<compile_context>
chip_gen: v6e
topology: v6e:2x2x1
jax: 0.10.0
libtpu: 0.0.40
codegen_flags: <defaults>
</compile_context>

<pallas_src>
import jax
import jax.numpy as jnp
from jax.experimental import pallas as pl
from jax.experimental.pallas import tpu as pltpu

_PACK = 128   # lane-dense packed-output width (one full vreg lane row)
_TILE_B = 256 # batch tile (M >= 256 keeps the v6e/v7x MXU rows dense)


def _vae_kernel(x_ref, c_ref, eps_ref,
                ew0x_ref, wc_ref, ew1_ref, wmuv_ref,
                dw0z_ref, dw1_ref, dwo_ref,
                packed_ref):
    f32, bf16 = jnp.float32, jnp.bfloat16
    TB, x_dim = x_ref.shape
    latent = eps_ref.shape[1]
    hidden = ew1_ref.shape[0]

    # Fused condition projection: [enc_w0_c | dec_w0_c] -> one [c_dim, 2H] matmul.
    c_proj = jnp.dot(c_ref[...].astype(bf16), wc_ref[...],
                     preferred_element_type=f32)
    c_enc = c_proj[:, :hidden]
    c_dec = c_proj[:, hidden:]

    # ---------------- encoder MLP ----------------
    # concat(x, c) @ We0  ==  x @ We0[:x_dim] + c @ We0[x_dim:]  (weight pre-split)
    h = jnp.dot(x_ref[...].astype(bf16), ew0x_ref[...],
                preferred_element_type=f32) + c_enc
    h = jnp.maximum(h, 0.0)
    # TODO(synk): nn.Dropout(0.5) treated as eval-mode identity (train-mode RNG
    #             is not reproducible against torch anyway).
    h = jnp.dot(h.astype(bf16), ew1_ref[...], preferred_element_type=f32)
    h = jnp.maximum(h, 0.0)

    # Fused head: single [hidden, 2*latent] matmul -> head = [mu | log_var].
    head = jnp.dot(h.astype(bf16), wmuv_ref[...], preferred_element_type=f32)
    mu = head[:, :latent]
    lv = head[:, latent:]

    # ---------------- reparameterization (f32 on the VPU/EUP) ----------------
    z = eps_ref[...] * jnp.exp(0.5 * lv) + mu

    # ---------------- decoder MLP ----------------
    # concat(z, c) @ Wd0  ==  z @ Wd0[:L, :] + c @ Wd0[L:, :]  (weight pre-split)
    d = jnp.dot(z.astype(bf16), dw0z_ref[...], preferred_element_type=f32) + c_dec
    d = jnp.maximum(d, 0.0)
    d = jnp.dot(d.astype(bf16), dw1_ref[...], preferred_element_type=f32)
    d = jnp.maximum(d, 0.0)
    recon = jnp.dot(d.astype(bf16), dwo_ref[...], preferred_element_type=f32)

    # ---------------- single lane-dense packed store -------------------------
    # Layout: [recon (x_dim) | mu|lv (2L, already contiguous in `head`) | z (L)
    #          | zero pad] -> 128 lanes, one unmasked dense store.
    pad = jnp.zeros((TB, _PACK - (x_dim + 3 * latent)), f32)
    packed_ref[...] = jnp.concatenate([recon, head, z, pad], axis=-1)


def vae_forward(x, c, eps, params, tile_b=_TILE_B):
    """Fused CVAE forward.  Batch tiled over a 1-D grid; weights stay
    VMEM-resident across tiles (index_map returns the same block each step).
    Kernel emits one packed [TB, 128] slab per tile; sliced here."""
    B, x_dim = x.shape
    c_dim = c.shape[1]
    latent = eps.shape[1]
    assert x_dim + 3 * latent <= _PACK, "packed output layout overflow"

    # Pad batch to a multiple of the tile; padded rows are discarded below.
    n_tiles = -(-B // tile_b)
    Bp = n_tiles * tile_b
    if Bp != B:
        p = Bp - B
        x = jnp.pad(x, ((0, p), (0, 0)))
        c = jnp.pad(c, ((0, p), (0, 0)))
        eps = jnp.pad(eps, ((0, p), (0, 0)))

    def row_spec(d):
        return pl.BlockSpec((tile_b, d), lambda i: (i, 0))

    def w_spec(w):
        # Same block every grid step -> weight DMA'd once, stays VMEM-resident.
        return pl.BlockSpec(w.shape, lambda i: (0, 0))

    packed = pl.pallas_call(
        _vae_kernel,
        out_shape=jax.ShapeDtypeStruct((Bp, _PACK), jnp.float32),
        grid=(n_tiles,),
        in_specs=[row_spec(x_dim), row_spec(c_dim), row_spec(latent),
                  w_spec(params["enc_w0_x"]), w_spec(params["w_c"]),
                  w_spec(params["enc_w1"]), w_spec(params["w_muv"]),
                  w_spec(params["dec_w0_z"]), w_spec(params["dec_w1"]),
                  w_spec(params["dec_wo"])],
        out_specs=row_spec(_PACK),
        compiler_params=pltpu.CompilerParams(
            dimension_semantics=("parallel",),   # v7x: two TCs split the batch
            vmem_limit_bytes=16 << 20),
    )(x, c, eps,
      params["enc_w0_x"], params["w_c"], params["enc_w1"], params["w_muv"],
      params["dec_w0_z"], params["dec_w1"], params["dec_wo"])

    packed = packed[:B]
    recon_x = packed[:, :x_dim]
    means   = packed[:, x_dim:x_dim + latent]
    log_var = packed[:, x_dim + latent:x_dim + 2 * latent]
    z       = packed[:, x_dim + 2 * latent:x_dim + 3 * latent]
    return recon_x, means, log_var, z


def _init_linear(key, fan_in, fan_out, dtype=jnp.bfloat16):
    # torch.nn.Linear default init: U(-1/sqrt(fan_in), 1/sqrt(fan_in));
    # stored [in, out] so the kernel computes x @ W.  Stored bf16 (native MXU
    # dtype; halves the weight-DMA floor of this HBM-bound kernel).
    bound = 1.0 / jnp.sqrt(jnp.float32(fan_in))
    w = jax.random.uniform(key, (fan_in, fan_out), jnp.float32, -bound, bound)
    return w.astype(dtype)


def init_vae_params(key, x_dim, latent_size, c_dim, hidden=512):
    ks = jax.random.split(key, 7)
    enc_in = x_dim + c_dim
    dec_in = latent_size + c_dim
    enc_w0 = _init_linear(ks[0], enc_in, hidden)
    dec_w0 = _init_linear(ks[4], dec_in, hidden)
    w_mu = _init_linear(ks[2], hidden, latent_size)
    w_lv = _init_linear(ks[3], hidden, latent_size)
    return {
        # encoder L0 pre-split along the input (concat) axis
        "enc_w0_x": enc_w0[:x_dim, :],
        "enc_w1":   _init_linear(ks[1], hidden, hidden),
        # fused mu | log_var head: [hidden, 2*latent]
        "w_muv":    jnp.concatenate([w_mu, w_lv], axis=-1),
        # decoder L0 pre-split along the input (concat) axis
        "dec_w0_z": dec_w0[:latent_size, :],
        "dec_w1":   _init_linear(ks[5], hidden, hidden),
        "dec_wo":   _init_linear(ks[6], hidden, x_dim),
        # fused condition projection: [enc_w0_c | dec_w0_c] -> [c_dim, 2*hidden]
        "w_c":      jnp.concatenate([enc_w0[x_dim:, :], dec_w0[latent_size:, :]],
                                    axis=-1),
    }


def _reference_forward(x, c, eps, p):
    """Pure-JAX reference (same math & bf16/f32 mixed precision, unfused)."""
    f32, bf16 = jnp.float32, jnp.bfloat16
    latent = eps.shape[1]
    hidden = p["enc_w1"].shape[0]

    def mm(a, w):
        return jnp.dot(a.astype(bf16), w, preferred_element_type=f32)

    c_proj = mm(c, p["w_c"])
    h = jnp.maximum(mm(x, p["enc_w0_x"]) + c_proj[:, :hidden], 0.0)
    h = jnp.maximum(mm(h, p["enc_w1"]), 0.0)
    head = mm(h, p["w_muv"])
    mu, lv = head[:, :latent], head[:, latent:]
    z = eps * jnp.exp(0.5 * lv) + mu
    d = jnp.maximum(mm(z, p["dec_w0_z"]) + c_proj[:, hidden:], 0.0)
    d = jnp.maximum(mm(d, p["dec_w1"]), 0.0)
    recon = mm(d, p["dec_wo"])
    return recon, mu, lv, z


if __name__ == "__main__":
    # Small shapes consistent with the module's forward (conditional CVAE).
    # B = 384 exercises both the batch grid (2 tiles of 256) and the pad path.
    B, X_DIM, LATENT, C_DIM = 384, 32, 8, 8

    key = jax.random.PRNGKey(0)
    k_param, k_x, k_c, k_eps = jax.random.split(key, 4)

    params = init_vae_params(k_param, X_DIM, LATENT, C_DIM)
    x = jax.random.normal(k_x, (B, X_DIM), jnp.float32)
    c = jax.random.normal(k_c, (B, C_DIM), jnp.float32)
    eps = jax.random.normal(k_eps, (B, LATENT), jnp.float32)  # torch.randn([B, latent])

    recon_x, means, log_var, z = jax.block_until_ready(
        vae_forward(x, c, eps, params))

    # sanity check against plain-JAX reference (same bf16 weights / f32 accum)
    ref = _reference_forward(x, c, eps, params)
    for got, want in zip((recon_x, means, log_var, z), ref):
        assert got.shape == want.shape and got.dtype == want.dtype
        assert jnp.allclose(got, want, atol=1e-2, rtol=1e-2)

    print("KERNEL_OK")
</pallas_src>

<mosaic_0001>
module attributes {stable_mosaic.version = 11 : i64} {
  func.func @_vae_kernel(%arg0: i32, %arg1: memref<256x32xf32, #tpu.memory_space<vmem>>, %arg2: memref<256x8xf32, #tpu.memory_space<vmem>>, %arg3: memref<256x8xf32, #tpu.memory_space<vmem>>, %arg4: memref<32x512xbf16, #tpu.memory_space<vmem>>, %arg5: memref<8x1024xbf16, #tpu.memory_space<vmem>>, %arg6: memref<512x512xbf16, #tpu.memory_space<vmem>>, %arg7: memref<512x16xbf16, #tpu.memory_space<vmem>>, %arg8: memref<8x512xbf16, #tpu.memory_space<vmem>>, %arg9: memref<512x512xbf16, #tpu.memory_space<vmem>>, %arg10: memref<512x32xbf16, #tpu.memory_space<vmem>>, %arg11: memref<256x128xf32, #tpu.memory_space<vmem>>) attributes {dimension_semantics = [#tpu.dimension_semantics<parallel>], iteration_bounds = array<i64: 2>, scalar_prefetch = 0 : i64, scratch_operands = 0 : i64, tpu.core_type = #tpu.core_type<tc>, window_params = [{transform_indices = @transform_0, window_bounds = array<i64: 256, 32>}, {transform_indices = @transform_1, window_bounds = array<i64: 256, 8>}, {transform_indices = @transform_2, window_bounds = array<i64: 256, 8>}, {pipeline_mode = #tpu.pipeline_mode<synchronous>, transform_indices = @transform_3, window_bounds = array<i64: 32, 512>}, {pipeline_mode = #tpu.pipeline_mode<synchronous>, transform_indices = @transform_4, window_bounds = array<i64: 8, 1024>}, {pipeline_mode = #tpu.pipeline_mode<synchronous>, transform_indices = @transform_5, window_bounds = array<i64: 512, 512>}, {pipeline_mode = #tpu.pipeline_mode<synchronous>, transform_indices = @transform_6, window_bounds = array<i64: 512, 16>}, {pipeline_mode = #tpu.pipeline_mode<synchronous>, transform_indices = @transform_7, window_bounds = array<i64: 8, 512>}, {pipeline_mode = #tpu.pipeline_mode<synchronous>, transform_indices = @transform_8, window_bounds = array<i64: 512, 512>}, {pipeline_mode = #tpu.pipeline_mode<synchronous>, transform_indices = @transform_9, window_bounds = array<i64: 512, 32>}, {transform_indices = @transform_10, window_bounds = array<i64: 256, 128>}]} {
    %c0 = arith.constant 0 : index
    %c0_0 = arith.constant 0 : index
    %0 = vector.load %arg2[%c0, %c0_0] : memref<256x8xf32, #tpu.memory_space<vmem>>, vector<256x8xf32>
    %1 = arith.truncf %0 : vector<256x8xf32> to vector<256x8xbf16>
    %c0_1 = arith.constant 0 : index
    %c0_2 = arith.constant 0 : index
    %2 = vector.load %arg5[%c0_1, %c0_2] : memref<8x1024xbf16, #tpu.memory_space<vmem>>, vector<8x1024xbf16>
    %cst = arith.constant dense<0.000000e+00> : vector<256x1024xf32>
    %3 = tpu.matmul %1, %2, %cst {dimension_numbers = #tpu.dot_dimension_numbers<[1], [0], [0], [1], [0, 0, 1, 1], [], []>} : vector<256x8xbf16>, vector<8x1024xbf16>, vector<256x1024xf32> -> vector<256x1024xf32>
    %4 = vector.extract_strided_slice %3 {offsets = [0, 0], sizes = [256, 512], strides = [1, 1]} : vector<256x1024xf32> to vector<256x512xf32>
    %5 = vector.extract_strided_slice %3 {offsets = [0, 512], sizes = [256, 512], strides = [1, 1]} : vector<256x1024xf32> to vector<256x512xf32>
    %c0_3 = arith.constant 0 : index
    %c0_4 = arith.constant 0 : index
    %6 = vector.load %arg1[%c0_3, %c0_4] : memref<256x32xf32, #tpu.memory_space<vmem>>, vector<256x32xf32>
    %7 = arith.truncf %6 : vector<256x32xf32> to vector<256x32xbf16>
    %c0_5 = arith.constant 0 : index
    %c0_6 = arith.constant 0 : index
    %8 = vector.load %arg4[%c0_5, %c0_6] : memref<32x512xbf16, #tpu.memory_space<vmem>>, vector<32x512xbf16>
    %cst_7 = arith.constant dense<0.000000e+00> : vector<256x512xf32>
    %9 = tpu.matmul %7, %8, %cst_7 {dimension_numbers = #tpu.dot_dimension_numbers<[1], [0], [0], [1], [0, 0, 1, 1], [], []>} : vector<256x32xbf16>, vector<32x512xbf16>, vector<256x512xf32> -> vector<256x512xf32>
    %10 = arith.addf %9, %4 : vector<256x512xf32>
    %cst_8 = arith.constant 0.000000e+00 : f32
    %11 = vector.broadcast %cst_8 : f32 to vector<256x512xf32>
    %12 = arith.maximumf %10, %11 : vector<256x512xf32>
    %13 = arith.truncf %12 : vector<256x512xf32> to vector<256x512xbf16>
    %c0_9 = arith.constant 0 : index
    %c0_10 = arith.constant 0 : index
    %14 = vector.load %arg6[%c0_9, %c0_10] : memref<512x512xbf16, #tpu.memory_space<vmem>>, vector<512x512xbf16>
    %cst_11 = arith.constant dense<0.000000e+00> : vector<256x512xf32>
    %15 = tpu.matmul %13, %14, %cst_11 {dimension_numbers = #tpu.dot_dimension_numbers<[1], [0], [0], [1], [0, 0, 1, 1], [], []>} : vector<256x512xbf16>, vector<512x512xbf16>, vector<256x512xf32> -> vector<256x512xf32>
    %cst_12 = arith.constant 0.000000e+00 : f32
    %16 = vector.broadcast %cst_12 : f32 to vector<256x512xf32>
    %17 = arith.maximumf %15, %16 : vector<256x512xf32>
    %18 = arith.truncf %17 : vector<256x512xf32> to vector<256x512xbf16>
    %c0_13 = arith.constant 0 : index
    %c0_14 = arith.constant 0 : index
    %19 = vector.load %arg7[%c0_13, %c0_14] : memref<512x16xbf16, #tpu.memory_space<vmem>>, vector<512x16xbf16>
    %cst_15 = arith.constant dense<0.000000e+00> : vector<256x16xf32>
    %20 = tpu.matmul %18, %19, %cst_15 {dimension_numbers = #tpu.dot_dimension_numbers<[1], [0], [0], [1], [0, 0, 1, 1], [], []>} : vector<256x512xbf16>, vector<512x16xbf16>, vector<256x16xf32> -> vector<256x16xf32>
    %21 = vector.extract_strided_slice %20 {offsets = [0, 0], sizes = [256, 8], strides = [1, 1]} : vector<256x16xf32> to vector<256x8xf32>
    %22 = vector.extract_strided_slice %20 {offsets = [0, 8], sizes = [256, 8], strides = [1, 1]} : vector<256x16xf32> to vector<256x8xf32>
    %c0_16 = arith.constant 0 : index
    %c0_17 = arith.constant 0 : index
    %23 = vector.load %arg3[%c0_16, %c0_17] : memref<256x8xf32, #tpu.memory_space<vmem>>, vector<256x8xf32>
    %cst_18 = arith.constant 5.000000e-01 : f32
    %24 = vector.broadcast %cst_18 : f32 to vector<256x8xf32>
    %25 = arith.mulf %24, %22 : vector<256x8xf32>
    %26 = math.exp %25 : vector<256x8xf32>
    %27 = arith.mulf %23, %26 : vector<256x8xf32>
    %28 = arith.addf %27, %21 : vector<256x8xf32>
    %29 = arith.truncf %28 : vector<256x8xf32> to vector<256x8xbf16>
    %c0_19 = arith.constant 0 : index
    %c0_20 = arith.constant 0 : index
    %30 = vector.load %arg8[%c0_19, %c0_20] : memref<8x512xbf16, #tpu.memory_space<vmem>>, vector<8x512xbf16>
    %cst_21 = arith.constant dense<0.000000e+00> : vector<256x512xf32>
    %31 = tpu.matmul %29, %30, %cst_21 {dimension_numbers = #tpu.dot_dimension_numbers<[1], [0], [0], [1], [0, 0, 1, 1], [], []>} : vector<256x8xbf16>, vector<8x512xbf16>, vector<256x512xf32> -> vector<256x512xf32>
    %32 = arith.addf %31, %5 : vector<256x512xf32>
    %cst_22 = arith.constant 0.000000e+00 : f32
    %33 = vector.broadcast %cst_22 : f32 to vector<256x512xf32>
    %34 = arith.maximumf %32, %33 : vector<256x512xf32>
    %35 = arith.truncf %34 : vector<256x512xf32> to vector<256x512xbf16>
    %c0_23 = arith.constant 0 : index
    %c0_24 = arith.constant 0 : index
    %36 = vector.load %arg9[%c0_23, %c0_24] : memref<512x512xbf16, #tpu.memory_space<vmem>>, vector<512x512xbf16>
    %cst_25 = arith.constant dense<0.000000e+00> : vector<256x512xf32>
    %37 = tpu.matmul %35, %36, %cst_25 {dimension_numbers = #tpu.dot_dimension_numbers<[1], [0], [0], [1], [0, 0, 1, 1], [], []>} : vector<256x512xbf16>, vector<512x512xbf16>, vector<256x512xf32> -> vector<256x512xf32>
    %cst_26 = arith.constant 0.000000e+00 : f32
    %38 = vector.broadcast %cst_26 : f32 to vector<256x512xf32>
    %39 = arith.maximumf %37, %38 : vector<256x512xf32>
    %40 = arith.truncf %39 : vector<256x512xf32> to vector<256x512xbf16>
    %c0_27 = arith.constant 0 : index
    %c0_28 = arith.constant 0 : index
    %41 = vector.load %arg10[%c0_27, %c0_28] : memref<512x32xbf16, #tpu.memory_space<vmem>>, vector<512x32xbf16>
    %cst_29 = arith.constant dense<0.000000e+00> : vector<256x32xf32>
    %42 = tpu.matmul %40, %41, %cst_29 {dimension_numbers = #tpu.dot_dimension_numbers<[1], [0], [0], [1], [0, 0, 1, 1], [], []>} : vector<256x512xbf16>, vector<512x32xbf16>, vector<256x32xf32> -> vector<256x32xf32>
    %cst_30 = arith.constant 0.000000e+00 : f32
    %43 = vector.broadcast %cst_30 : f32 to vector<256x72xf32>
    %44 = tpu.concatenate %42, %20, %28, %43 in 1 : vector<256x32xf32>, vector<256x16xf32>, vector<256x8xf32>, vector<256x72xf32> -> vector<256x128xf32>
    %c0_31 = arith.constant 0 : index
    %c0_32 = arith.constant 0 : index
    %45 = vector.load %arg11[%c0_31, %c0_32] : memref<256x128xf32, #tpu.memory_space<vmem>>, vector<256x128xf32>
    tpu.vector_store %arg11[%c0_31, %c0_32], %44 {strides = array<i32>} : memref<256x128xf32, #tpu.memory_space<vmem>>, vector<256x128xf32>,
    return
  }
  func.func @transform_0(%arg0: i32) -> (i32, i32) {
    %c0_i32 = arith.constant 0 : i32
    %c0_i32_0 = arith.constant 0 : i32
    return %arg0, %c0_i32 : i32, i32
  }
  func.func @transform_1(%arg0: i32) -> (i32, i32) {
    %c0_i32 = arith.constant 0 : i32
    %c0_i32_0 = arith.constant 0 : i32
    return %arg0, %c0_i32 : i32, i32
  }
  func.func @transform_2(%arg0: i32) -> (i32, i32) {
    %c0_i32 = arith.constant 0 : i32
    %c0_i32_0 = arith.constant 0 : i32
    return %arg0, %c0_i32 : i32, i32
  }
  func.func @transform_3(%arg0: i32) -> (i32, i32) {
    %c0_i32 = arith.constant 0 : i32
    %c0_i32_0 = arith.constant 0 : i32
    %c0_i32_1 = arith.constant 0 : i32
    return %c0_i32, %c0_i32_0 : i32, i32
  }
  func.func @transform_4(%arg0: i32) -> (i32, i32) {
    %c0_i32 = arith.constant 0 : i32
    %c0_i32_0 = arith.constant 0 : i32
    %c0_i32_1 = arith.constant 0 : i32
    return %c0_i32, %c0_i32_0 : i32, i32
  }
  func.func @transform_5(%arg0: i32) -> (i32, i32) {
    %c0_i32 = arith.constant 0 : i32
    %c0_i32_0 = arith.constant 0 : i32
    %c0_i32_1 = arith.constant 0 : i32
    return %c0_i32, %c0_i32_0 : i32, i32
  }
  func.func @transform_6(%arg0: i32) -> (i32, i32) {
    %c0_i32 = arith.constant 0 : i32
    %c0_i32_0 = arith.constant 0 : i32
    %c0_i32_1 = arith.constant 0 : i32
    return %c0_i32, %c0_i32_0 : i32, i32
  }
  func.func @transform_7(%arg0: i32) -> (i32, i32) {
    %c0_i32 = arith.constant 0 : i32
    %c0_i32_0 = arith.constant 0 : i32
    %c0_i32_1 = arith.constant 0 : i32
    return %c0_i32, %c0_i32_0 : i32, i32
  }
  func.func @transform_8(%arg0: i32) -> (i32, i32) {
    %c0_i32 = arith.constant 0 : i32
    %c0_i32_0 = arith.constant 0 : i32
    %c0_i32_1 = arith.constant 0 : i32
    return %c0_i32, %c0_i32_0 : i32, i32
  }
  func.func @transform_9(%arg0: i32) -> (i32, i32) {
    %c0_i32 = arith.constant 0 : i32
    %c0_i32_0 = arith.constant 0 : i32
    %c0_i32_1 = arith.constant 0 : i32
    return %c0_i32, %c0_i32_0 : i32, i32
  }
  func.func @transform_10(%arg0: i32) -> (i32, i32) {
    %c0_i32 = arith.constant 0 : i32
    %c0_i32_0 = arith.constant 0 : i32
    return %arg0, %c0_i32 : i32, i32
  }
}

</mosaic_0001>

<bundles_post_ra>
// kernel: tpu_custom_call.1
= control target key start
LH: loop header
LB: loop body
LE: loop exit
PB: predicated region body
PF: predicated region fallthrough
CT: control target
= control target key end

     0   :  { %s14355_s0 = inlined_call_operand.vmem [shape: f32[512,32], index: 0, kind: input, shape index: {}]   ;;  %s14356_s1 = inlined_call_operand.vmem [shape: f32[512,8], index: 1, kind: input, shape index: {}]   ;;  %s14357_s2 = inlined_call_operand.vmem [shape: f32[512,8], index: 2, kind: input, shape index: {}]   ;;  %s14358_s3 = inlined_call_operand.vmem [shape: bf16[32,512], index: 3, kind: input, shape index: {}]   ;;  %s14359_s4 = inlined_call_operand.vmem [shape: bf16[8,1024], index: 4, kind: input, shape index: {}]   ;;  %s14360_s5 = inlined_call_operand.vmem [shape: bf16[512,512], index: 5, kind: input, shape index: {}]   ;;  %s14361_s6 = inlined_call_operand.vmem [shape: bf16[512,16], index: 6, kind: input, shape index: {}]   ;;  %s14362_s7 = inlined_call_operand.hbm [shape: bf16[8,512], index: 7, kind: input, shape index: {}]   ;;  %s14363_s8 = inlined_call_operand.vmem [shape: bf16[512,512], index: 8, kind: input, shape index: {}]   ;;  %s14364_s9 = inlined_call_operand.vmem [shape: bf16[512,32], index: 9, kind: input, shape index: {}]   ;;  %s14365_s10 = inlined_call_operand.hbm [shape: f32[512,128], index: 10, kind: output, shape index: {}]  }
   0x1   :  { %14409 = sst [smem:[#allocation219_spill]] %s14356_s1 }
   0x2   :  { %14410 = sst [smem:[#allocation220_spill]] %s14359_s4 }
   0x3   :  { %15 = vsyncpa [#allocation3], 0 }
   0x4   :  { %16 = vsyncpa [#allocation4], 0 }
   0x5   :  { %18 = vsyncpa [#allocation4 + $0x1], 0  ;;  %s9852_s13 = smov 0   ;;  %s9854_s14 = smov 0  }
   0x6   :  { %s9856_s15 = smov 0   ;;  %s9858_s16 = smov 0  }
   0x7 LB: > { %s9873_s17 = sadd.s32 4294967295, %s9787_s16   ;;  %s8164_s18 = sadd.s32 4294967294, %s9787_s16   ;;  %s9787_s16 = sphi %s9858_s16, %s14968_s16   ;;  %s9783_s15 = sphi %s9856_s15, %s14967_s15   ;;  %s9779_s14 = sphi %s9854_s14, %s14966_s14   ;;  %s9775_s13 = sphi %s9852_s13, %s14965_s13  }
   0x8   : > { %s9877_s19 = sadd.s32 1, %s9787_s16   ;;  %s256_s20 = sadd.s32 1, %s9783_s15 }
   0x9   : > { %s253_s21 = ssub.s32 %s9787_s16, %s9877_s19  ;;  %p266_p0 = scmp.ne.s32.totalorder %s9783_s15, %s9779_s14 }
   0xa   : > { %p254_p1 = scmp.eq.s32.totalorder %s253_s21, 0  ;;  %p267_p2 = scmp.eq.s32.totalorder %s9873_s17, 1 }
   0xb   : > { %p272_p3 = scmp.ne.s32.totalorder %s9779_s14, %s9775_s13  ;;  %p273_p4 = scmp.eq.s32.totalorder %s8164_s18, 1 }
   0xc   : > { %s9888_s22 = scalar_select %p254_p1, %s9783_s15, %s256_s20  }
   0xd   : > { %p9890_p5 = por %p267_p2, %p266_p0  ;;  %p9894_p6 = por %p273_p4, %p272_p3 }
   0xe   : > { %p8165_p7 = scmp.ge.s32.totalorder %s9787_s16, 1  ;;  %p280_p8 = scmp.lt.s32.totalorder %s9787_s16, 3 }
   0xf   : > { %s14412_s24 = scalar_select %p9894_p6, 1, 0 }
  0x10   : > { %p9119_p9 = scmp.eq.s32.totalorder %s9873_s17, 0  ;;  %p9901_p10 = pnand %p8165_p7, %p280_p8 }
  0x11   : > { %s9789_s26 = smov [#allocation2]  }
  0x12   : > { %s305_s27 = sshll.u32 %s9789_s26, 4  ;;  %p9111_p11 = pneg %p9901_p10  ;;  %s306_s27 = int_to_ptr.vmem [resolvable:$true] %s305_s27 }
  0x13   : > { %s9708_s28 = scalar_lea.vmem %s306_s27, 256  ;;  %p9716_p3 = scmp.lt.s32.totalorder %s306_s27, %s306_s27 }
  0x14   : > { %p9112_p12 = pnand %p9119_p9, %p9111_p11  ;;  %p9709_p0 = scmp.ne.s32.totalorder %s306_s27, %s9708_s28 }
  0x15   : > { %p9717_p4 = scmp.lt.s32.totalorder %s9708_s28, %s9708_s28 }
  0x16   : > { %p9699_p13 = pneg %p9112_p12 }
  0x17   : > { %p9718_p6 = por %p9717_p4, %p9716_p3 }
  0x18   : > { %p9711_p1 = pnand %p9709_p0, %p9699_p13 }
  0x1a   : > { %p9712_p2 = pneg %p9711_p1 }
  0x1c   : > { %p9719_p7 = pnand %p9718_p6, %p9712_p2 }
  0x1e   : > { %9722 = shalt.err (!%p9719_p7)
}
  0x1f   : > { %9114 = dma.hbm_to_vmem [thread:$0]  (!%p9112_p12), %s14362_s7, 256, %s306_s27, [#allocation3]  }
  0x20   : > { %351 = sbr.rel (%p9901_p10) target bundleno = 2070 (0x816), region = 60 }
  0x25   : > { %9766 = dma.done.wait (%p9119_p9), [#allocation3], 256  }
  0x26   : > { %9768 = vsyncadd (%p9119_p9), [#allocation3], 4294967040  ;;  %s8171_s11 = sshll.u32 %s9873_s17, 5  ;;  %v14366_v0 = vmov 0   ;;  %s14414_s1 = sld [smem:[#allocation219_spill]]  ;;  %vm540_vm0 = vcmask 1043456  }
  0x27   : > { %597 = vmatprep.mubr.bf16.mxu0 %v14366_v0  ;;  %790 = vmatprep.mubr.bf16.mxu1 %v14366_v0  ;;  %p400_p6 = scmp.lt.s32.totalorder %s8171_s11, 63  ;;  %s14415_s4 = sld [smem:[#allocation220_spill]]  ;;  %vm491_vm1 = vcmask 64512   ;;  %v9171_v23 = vld [vmem:[%s14358_s3 + $0x24] ss:$16 sps:$4 sm:$0xff]   ;;  %vm1433_vm2 = vcmask 261120  }
  0x28   : > { %v9174_v26 = vld [vmem:[%s14358_s3 + $0x2c] ss:$16 sps:$4 sm:$0xff]   ;;  %s9791_s26 = smov 120   ;;  %s9792_s25 = smov 32   ;;  %vm7954_vm3 = vcmask 392192   ;;  %vm7987_vm4 = vcmask 457728  }
  0x29   : > { %s14970_s11 = smov (!%p400_p6, %s8171_s11), 63  ;;  %s9793_s30 = smov 48  }
  0x2a   : > { %s9921_s12 = sshll.u32 %s14970_s11, 3  ;;  %s8656_s27 = sshll.u32 %s9873_s17, 12 }
  0x2b   : > { %s10341_s11 = scalar_lea.vmem %s14355_s0, %s9921_s12  ;;  %s12358_s29 = scalar_lea.vmem %s14357_s2, %s9921_s12 }
  0x2c   : > { %s9927_s21 = scalar_lea.vmem %s14414_s1, %s9921_s12  ;;  %s396_s12 = sand.u32 1, %s9779_s14  }
  0x2d   : > { %v467_v1 = vld [vmem:[%s14415_s4] sm:$0xff]  ;;  %v468_v2 = vld [vmem:[%s14415_s4 + $0x8] sm:$0xff]  ;;  %v469_v9 = vld [vmem:[%s14415_s4 + $0x10] sm:$0xff]  ;;  %s8170_s18 = sshll.u32 %s396_s12, 8  ;;  %s14315_s17 = scalar_lea.sflag [#allocation4], %s396_s12 }
  0x2e   : > { %v419_v3 = vld [vmem:[%s9927_s21] sm:$0xff]  ;;  %v8178_v4 = vcombine.high %v467_v1, %v467_v1  ;;  %v8180_v5 = vcombine.high %v468_v2, %v468_v2  ;;  %v8177_v6 = vcombine.low %v467_v1, %v467_v1  ;;  %v8179_v7 = vcombine.low %v468_v2, %v468_v2  ;;  %v420_v8 = vld [vmem:[%s9927_s21 + $0x8] sm:$0xff]  ;;  %v470_v10 = vld [vmem:[%s14415_s4 + $0x18] sm:$0xff]  ;;  %s14055_s20 = scalar_lea.vmem [#allocation5], %s8170_s18 }
  0x2f   : > { %v8182_v11 = vcombine.high %v469_v9, %v469_v9  ;;  %v8184_v12 = vcombine.high %v470_v10, %v470_v10  ;;  %v8181_v13 = vcombine.low %v469_v9, %v469_v9  ;;  %v9947_v16 = vpack.c.bf16 %v420_v8, %v419_v3  ;;  %v421_v20 = vld [vmem:[%s9927_s21 + $0x10] sm:$0xff]  ;;  %v422_v21 = vld [vmem:[%s9927_s21 + $0x18] sm:$0xff]  ;;  %v423_v24 = vld [vmem:[%s9927_s21 + $0x20] sm:$0xff]  ;;  %s8066_s1 = sshll.u32 %s14055_s20, 4  ;;  %s14308_s1 = int_to_ptr.vmem [resolvable:$true] %s8066_s1 }
  0x30   : > { %8185 = vmatprep.subr.msk.bf16.mxu0 %vm540_vm0, %v8178_v4  ;;  %8202 = vmatprep.subr.msk.bf16.mxu1 %vm540_vm0, %v8180_v5  ;;  %v542_v14 = vsel %vm540_vm0, %v8177_v6, 0  ;;  %v548_v15 = vsel %vm540_vm0, %v8179_v7, 0  ;;  %v8183_v17 = vcombine.low %v470_v10, %v470_v10  ;;  %v9961_v22 = vpack.c.bf16 %v422_v21, %v421_v20  ;;  %v424_v25 = vld [vmem:[%s9927_s21 + $0x28] sm:$0xff]  ;;  %v425_v28 = vld [vmem:[%s9927_s21 + $0x30] sm:$0xff]  ;;  %v426_v29 = vld [vmem:[%s9927_s21 + $0x38] sm:$0xff] }
  0x31   : > { %580 = vmatpush1.bf16.msra.mxu0 %v542_v14  ;;  %773 = vmatpush1.bf16.msra.mxu1 %v548_v15  ;;  %v554_v18 = vsel %vm540_vm0, %v8181_v13, 0  ;;  %v9977_v27 = vpack.c.bf16 %v424_v25, %v423_v24  ;;  %v9987_v30 = vpack.c.bf16 %v426_v29, %v425_v28  ;;  %v427_v31 = vld [vmem:[%s9927_s21 + $0x40] sm:$0xff]  ;;  %v428_v32 = vld [vmem:[%s9927_s21 + $0x48] sm:$0xff]  ;;  %v429_v34 = vld [vmem:[%s9927_s21 + $0x50] sm:$0xff] }
  0x32   : > { %8219 = vmatprep.subr.msk.bf16.mxu0 %vm540_vm0, %v8182_v11  ;;  %8236 = vmatprep.subr.msk.bf16.mxu1 %vm540_vm0, %v8184_v12  ;;  %v560_v19 = vsel %vm540_vm0, %v8183_v17, 0  ;;  %v9997_v33 = vpack.c.bf16 %v428_v32, %v427_v31  ;;  %v430_v35 = vld [vmem:[%s9927_s21 + $0x58] sm:$0xff]  ;;  %v431_v37 = vld [vmem:[%s9927_s21 + $0x60] sm:$0xff]  ;;  %v432_v38 = vld [vmem:[%s9927_s21 + $0x68] sm:$0xff] }
  0x33   : > { %v10007_v36 = vpack.c.bf16 %v430_v35, %v429_v34  ;;  %v10017_v39 = vpack.c.bf16 %v432_v38, %v431_v37  ;;  %v433_v40 = vld [vmem:[%s9927_s21 + $0x70] sm:$0xff]  ;;  %v434_v41 = vld [vmem:[%s9927_s21 + $0x78] sm:$0xff]  ;;  %v435_v43 = vld [vmem:[%s9927_s21 + $0x80] sm:$0xff] }
  0x34   : > { %8186 = vmatmul.mubr.msk.bf16.vlgmr.msra.gmra.mxu0 %vm491_vm1, %v9947_v16  ;;  %8203 = vmatmul.mubr.msk.bf16.vlgmr.msra.gmra.mxu1 %vm491_vm1, %v9947_v16  ;;  %v10027_v42 = vpack.c.bf16 %v434_v41, %v433_v40  ;;  %v436_v44 = vld [vmem:[%s9927_s21 + $0x88] sm:$0xff]  ;;  %v437_v46 = vld [vmem:[%s9927_s21 + $0x90] sm:$0xff]  ;;  %v438_v47 = vld [vmem:[%s9927_s21 + $0x98] sm:$0xff] }
  0x35   : > { %966 = vmatpush1.bf16.msra.mxu0 %v554_v18  ;;  %1159 = vmatpush1.bf16.msra.mxu1 %v560_v19  ;;  %v10037_v45 = vpack.c.bf16 %v436_v44, %v435_v43  ;;  %v10047_v48 = vpack.c.bf16 %v438_v47, %v437_v46  ;;  %v439_v49 = vld [vmem:[%s9927_s21 + $0xa0] sm:$0xff]  ;;  %v440_v50 = vld [vmem:[%s9927_s21 + $0xa8] sm:$0xff]  ;;  %v441_v52 = vld [vmem:[%s9927_s21 + $0xb0] sm:$0xff] }
  0x36   : > { %607 = vmatprep.mubr.bf16.mxu0 %v14366_v0  ;;  %800 = vmatprep.mubr.bf16.mxu1 %v14366_v0  ;;  %v10057_v51 = vpack.c.bf16 %v440_v50, %v439_v49  ;;  %v442_v53 = vld [vmem:[%s9927_s21 + $0xb8] sm:$0xff]  ;;  %v443_v55 = vld [vmem:[%s9927_s21 + $0xc0] sm:$0xff]  ;;  %v444_v56 = vld [vmem:[%s9927_s21 + $0xc8] sm:$0xff] }
  0x37   : > { %1494 = vmatprep.subr.bf16.mxu0 %v9171_v23  ;;  %1687 = vmatprep.subr.bf16.mxu1 %v9174_v26  ;;  %v10067_v54 = vpack.c.bf16 %v442_v53, %v441_v52  ;;  %v10077_v57 = vpack.c.bf16 %v444_v56, %v443_v55  ;;  %v445_v58 = vld [vmem:[%s9927_s21 + $0xd0] sm:$0xff]  ;;  %v446_v59 = vld [vmem:[%s9927_s21 + $0xd8] sm:$0xff]  ;;  %v447_v61 = vld [vmem:[%s9927_s21 + $0xe0] sm:$0xff] }
  0x38   : > { %v10087_v60 = vpack.c.bf16 %v446_v59, %v445_v58  ;;  %v448_v62 = vld [vmem:[%s9927_s21 + $0xe8] sm:$0xff]  ;;  %v449_v1 = vld [vmem:[%s9927_s21 + $0xf0] sm:$0xff]  ;;  %v450_v2 = vld [vmem:[%s9927_s21 + $0xf8] sm:$0xff] }
  0x39   : > { %v10097_v63 = vpack.c.bf16 %v448_v62, %v447_v61  ;;  %v10107_v3 = vpack.c.bf16 %v450_v2, %v449_v1  ;;  %v9169_v4 = vld [vmem:[%s14358_s3 + $0x20] ss:$16 sps:$4 sm:$0xff]   ;;  %v9172_v5 = vld [vmem:[%s14358_s3 + $0x28] ss:$16 sps:$4 sm:$0xff]   ;;  %v9177_v6 = vld [vmem:[%s14358_s3 + $0x4] ss:$16 sps:$4 sm:$0xff]  }
  0x3a   : > { %v9175_v7 = vld [vmem:[%s14358_s3] ss:$16 sps:$4 sm:$0xff]   ;;  %v9178_v8 = vld [vmem:[%s14358_s3 + $0x8] ss:$16 sps:$4 sm:$0xff]   ;;  %v9180_v9 = vld [vmem:[%s14358_s3 + $0xc] ss:$16 sps:$4 sm:$0xff]  }
  0x3b   : > { %v9183_v26 = vld [vmem:[%s14360_s5 + $0xe4] ss:$16 sps:$4 sm:$0xff]  }
  0x3c   : > { %8187 = vmatmul.mubr.msk.bf16.gmra.mxu0 %vm491_vm1, %v9961_v22  ;;  %8204 = vmatmul.mubr.msk.bf16.gmra.mxu1 %vm491_vm1, %v9961_v22 }
  0x3d   : > { %617 = vmatprep.mubr.bf16.mxu0 %v14366_v0  ;;  %810 = vmatprep.mubr.bf16.mxu1 %v14366_v0 }
  0x44   : > { %8188 = vmatmul.mubr.msk.bf16.gmra.mxu0 %vm491_vm1, %v9977_v27  ;;  %8205 = vmatmul.mubr.msk.bf16.gmra.mxu1 %vm491_vm1, %v9977_v27 }
  0x45   : > { %627 = vmatprep.mubr.bf16.mxu0 %v14366_v0  ;;  %820 = vmatprep.mubr.bf16.mxu1 %v14366_v0 }
  0x4c   : > { %8189 = vmatmul.mubr.msk.bf16.gmra.mxu0 %vm491_vm1, %v9987_v30  ;;  %8206 = vmatmul.mubr.msk.bf16.gmra.mxu1 %vm491_vm1, %v9987_v30 }
  0x4d   : > { %637 = vmatprep.mubr.bf16.mxu0 %v14366_v0  ;;  %830 = vmatprep.mubr.bf16.mxu1 %v14366_v0 }
  0x54   : > { %8190 = vmatmul.mubr.msk.bf16.gmra.mxu0 %vm491_vm1, %v9997_v33  ;;  %8207 = vmatmul.mubr.msk.bf16.gmra.mxu1 %vm491_vm1, %v9997_v33 }
  0x55   : > { %647 = vmatprep.mubr.bf16.mxu0 %v14366_v0  ;;  %840 = vmatprep.mubr.bf16.mxu1 %v14366_v0 }
  0x5c   : > { %8191 = vmatmul.mubr.msk.bf16.gmra.mxu0 %vm491_vm1, %v10007_v36  ;;  %8208 = vmatmul.mubr.msk.bf16.gmra.mxu1 %vm491_vm1, %v10007_v36 }
  0x5d   : > { %657 = vmatprep.mubr.bf16.mxu0 %v14366_v0  ;;  %850 = vmatprep.mubr.bf16.mxu1 %v14366_v0 }
  0x64   : > { %8192 = vmatmul.mubr.msk.bf16.gmra.mxu0 %vm491_vm1, %v10017_v39  ;;  %8209 = vmatmul.mubr.msk.bf16.gmra.mxu1 %vm491_vm1, %v10017_v39 }
  0x65   : > { %667 = vmatprep.mubr.bf16.mxu0 %v14366_v0  ;;  %860 = vmatprep.mubr.bf16.mxu1 %v14366_v0 }
  0x6c   : > { %8193 = vmatmul.mubr.msk.bf16.gmra.mxu0 %vm491_vm1, %v10027_v42  ;;  %8210 = vmatmul.mubr.msk.bf16.gmra.mxu1 %vm491_vm1, %v10027_v42 }
  0x6d   : > { %677 = vmatprep.mubr.bf16.mxu0 %v14366_v0  ;;  %870 = vmatprep.mubr.bf16.mxu1 %v14366_v0 }
  0x74   : > { %8194 = vmatmul.mubr.msk.bf16.gmra.mxu0 %vm491_vm1, %v10037_v45  ;;  %8211 = vmatmul.mubr.msk.bf16.gmra.mxu1 %vm491_vm1, %v10037_v45 }
  0x75   : > { %687 = vmatprep.mubr.bf16.mxu0 %v14366_v0  ;;  %880 = vmatprep.mubr.bf16.mxu1 %v14366_v0 }
  0x7c   : > { %8195 = vmatmul.mubr.msk.bf16.gmra.mxu0 %vm491_vm1, %v10047_v48  ;;  %8212 = vmatmul.mubr.msk.bf16.gmra.mxu1 %vm491_vm1, %v10047_v48 }
  0x7d   : > { %697 = vmatprep.mubr.bf16.mxu0 %v14366_v0  ;;  %890 = vmatprep.mubr.bf16.mxu1 %v14366_v0 }
  0x84   : > { %8196 = vmatmul.mubr.msk.bf16.gmra.mxu0 %vm491_vm1, %v10057_v51  ;;  %8213 = vmatmul.mubr.msk.bf16.gmra.mxu1 %vm491_vm1, %v10057_v51 }
  0x85   : > { %707 = vmatprep.mubr.bf16.mxu0 %v14366_v0  ;;  %900 = vmatprep.mubr.bf16.mxu1 %v14366_v0 }
  0x8c   : > { %8197 = vmatmul.mubr.msk.bf16.gmra.mxu0 %vm491_vm1, %v10067_v54  ;;  %8214 = vmatmul.mubr.msk.bf16.gmra.mxu1 %vm491_vm1, %v10067_v54 }
  0x8d   : > { %717 = vmatprep.mubr.bf16.mxu0 %v14366_v0  ;;  %910 = vmatprep.mubr.bf16.mxu1 %v14366_v0 }
  0x94   : > { %8198 = vmatmul.mubr.msk.bf16.gmra.mxu0 %vm491_vm1, %v10077_v57  ;;  %8215 = vmatmul.mubr.msk.bf16.gmra.mxu1 %vm491_vm1, %v10077_v57 }
  0x95   : > { %727 = vmatprep.mubr.bf16.mxu0 %v14366_v0  ;;  %920 = vmatprep.mubr.bf16.mxu1 %v14366_v0 }
  0x9c   : > { %8199 = vmatmul.mubr.msk.bf16.gmra.mxu0 %vm491_vm1, %v10087_v60  ;;  %8216 = vmatmul.mubr.msk.bf16.gmra.mxu1 %vm491_vm1, %v10087_v60 }
  0x9d   : > { %737 = vmatprep.mubr.bf16.mxu0 %v14366_v0  ;;  %930 = vmatprep.mubr.bf16.mxu1 %v14366_v0 }
  0xa4   : > { %8200 = vmatmul.mubr.msk.bf16.gmra.mxu0 %vm491_vm1, %v10097_v63  ;;  %8217 = vmatmul.mubr.msk.bf16.gmra.mxu1 %vm491_vm1, %v10097_v63 }
  0xa5   : > { %747 = vmatprep.mubr.bf16.mxu0 %v14366_v0  ;;  %940 = vmatprep.mubr.bf16.mxu1 %v14366_v0 }
  0xac   : > { %8201 = vmatmul.mubr.msk.bf16.gmra.mxu0 %vm491_vm1, %v10107_v3  ;;  %8218 = vmatmul.mubr.msk.bf16.gmra.mxu1 %vm491_vm1, %v10107_v3 }
  0xad   : > { %983 = vmatprep.mubr.bf16.mxu0 %v14366_v0  ;;  %1176 = vmatprep.mubr.bf16.mxu1 %v14366_v0 }
  0xb4   : > { %8220 = vmatmul.mubr.msk.bf16.vlgmr.msra.gmra.mxu0 %vm491_vm1, %v9947_v16  ;;  %8237 = vmatmul.mubr.msk.bf16.vlgmr.msra.gmra.mxu1 %vm491_vm1, %v9947_v16 }
  0xb5   : > { %1495 = vmatpush1.bf16.msra.mxu0 %v9169_v4  ;;  %1688 = vmatpush1.bf16.msra.mxu1 %v9172_v5 }
  0xb6   : > { %993 = vmatprep.mubr.bf16.mxu0 %v14366_v0  ;;  %1186 = vmatprep.mubr.bf16.mxu1 %v14366_v0 }
  0xb7   : > { %1496 = vmatprep.subr.bf16.mxu0 %v9177_v6  ;;  %1689 = vmatprep.subr.bf16.mxu1 %v9180_v9  ;;  %v1338_v9 = vld [vmem:[%s10341_s11 + $0x8] sm:$0xff] }
  0xb9   : > { %1497 = vmatpush1.bf16.msra.mxu0 %v9175_v7  ;;  %1690 = vmatpush1.bf16.msra.mxu1 %v9178_v8  ;;  %v1337_v8 = vld [vmem:[%s10341_s11] sm:$0xff] }
  0xba   : > { %2828 = vmatprep.subr.bf16.mxu0 %v9183_v26 }
  0xbc   : > { %8221 = vmatmul.mubr.msk.bf16.gmra.mxu0 %vm491_vm1, %v9961_v22  ;;  %8238 = vmatmul.mubr.msk.bf16.gmra.mxu1 %vm491_vm1, %v9961_v22 }
  0xbd   : > { %1003 = vmatprep.mubr.bf16.mxu0 %v14366_v0  ;;  %1196 = vmatprep.mubr.bf16.mxu1 %v14366_v0 }
  0xc4   : > { %8222 = vmatmul.mubr.msk.bf16.gmra.mxu0 %vm491_vm1, %v9977_v27  ;;  %8239 = vmatmul.mubr.msk.bf16.gmra.mxu1 %vm491_vm1, %v9977_v27  ;;  %v9186_v27 = vld [vmem:[%s14360_s5 + $0x2e4] ss:$16 sps:$4 sm:$0xff]  }
  0xc5   : > { %1013 = vmatprep.mubr.bf16.mxu0 %v14366_v0  ;;  %1206 = vmatprep.mubr.bf16.mxu1 %v14366_v0 }
  0xc6   : > { %3021 = vmatprep.subr.bf16.mxu1 %v9186_v27 }
  0xcc   : > { %8223 = vmatmul.mubr.msk.bf16.gmra.mxu0 %vm491_vm1, %v9987_v30  ;;  %8240 = vmatmul.mubr.msk.bf16.gmra.mxu1 %vm491_vm1, %v9987_v30 }
  0xcd   : > { %1023 = vmatprep.mubr.bf16.mxu0 %v14366_v0  ;;  %1216 = vmatprep.mubr.bf16.mxu1 %v14366_v0 }
  0xd4   : > { %8224 = vmatmul.mubr.msk.bf16.gmra.mxu0 %vm491_vm1, %v9997_v33  ;;  %8241 = vmatmul.mubr.msk.bf16.gmra.mxu1 %vm491_vm1, %v9997_v33 }
  0xd5   : > { %1033 = vmatprep.mubr.bf16.mxu0 %v14366_v0  ;;  %1226 = vmatprep.mubr.bf16.mxu1 %v14366_v0 }
  0xdc   : > { %8225 = vmatmul.mubr.msk.bf16.gmra.mxu0 %vm491_vm1, %v10007_v36  ;;  %8242 = vmatmul.mubr.msk.bf16.gmra.mxu1 %vm491_vm1, %v10007_v36 }
  0xdd   : > { %1043 = vmatprep.mubr.bf16.mxu0 %v14366_v0  ;;  %1236 = vmatprep.mubr.bf16.mxu1 %v14366_v0 }
  0xe4   : > { %8226 = vmatmul.mubr.msk.bf16.gmra.mxu0 %vm491_vm1, %v10017_v39  ;;  %8243 = vmatmul.mubr.msk.bf16.gmra.mxu1 %vm491_vm1, %v10017_v39 }
  0xe5   : > { %1053 = vmatprep.mubr.bf16.mxu0 %v14366_v0  ;;  %1246 = vmatprep.mubr.bf16.mxu1 %v14366_v0 }
  0xec   : > { %8227 = vmatmul.mubr.msk.bf16.gmra.mxu0 %vm491_vm1, %v10027_v42  ;;  %8244 = vmatmul.mubr.msk.bf16.gmra.mxu1 %vm491_vm1, %v10027_v42 }
  0xed   : > { %1063 = vmatprep.mubr.bf16.mxu0 %v14366_v0  ;;  %1256 = vmatprep.mubr.bf16.mxu1 %v14366_v0 }
  0xf4   : > { %v10181_v10 = vpop.f32.mrf.mxu0  ;;  %v10183_v11 = vpop.f32.mrf.mxu1  ;;  %8228 = vmatmul.mubr.msk.bf16.gmra.mxu0 %vm491_vm1, %v10037_v45  ;;  %8245 = vmatmul.mubr.msk.bf16.gmra.mxu1 %vm491_vm1, %v10037_v45 }
  0xf5   : > { %1073 = vmatprep.mubr.bf16.mxu0 %v14366_v0  ;;  %1266 = vmatprep.mubr.bf16.mxu1 %v14366_v0 }
  0xf6   : > { %v10191_v12 = vpop.f32.mrf.mxu0  ;;  %v10193_v13 = vpop.f32.mrf.mxu1 }
  0xf8   : > { %v10195_v14 = vpop.f32.mrf.mxu0  ;;  %v10197_v15 = vpop.f32.mrf.mxu1 }
  0xfa   : > { %v10199_v16 = vpop.f32.mrf.mxu0  ;;  %v10201_v17 = vpop.f32.mrf.mxu1 }
  0xfc   : > { %v10203_v18 = vpop.f32.mrf.mxu0  ;;  %v10205_v19 = vpop.f32.mrf.mxu1  ;;  %8229 = vmatmul.mubr.msk.bf16.gmra.mxu0 %vm491_vm1, %v10047_v48  ;;  %8246 = vmatmul.mubr.msk.bf16.gmra.mxu1 %vm491_vm1, %v10047_v48 }
  0xfd   : > { %1083 = vmatprep.mubr.bf16.mxu0 %v14366_v0  ;;  %1276 = vmatprep.mubr.bf16.mxu1 %v14366_v0 }
  0xfe   : > { %v10213_v20 = vpop.f32.mrf.mxu0  ;;  %v10215_v21 = vpop.f32.mrf.mxu1 }
 0x100   : > { %v10217_v22 = vpop.f32.mrf.mxu0  ;;  %v10219_v23 = vpop.f32.mrf.mxu1 }
 0x102   : > { %v10221_v24 = vpop.f32.mrf.mxu0  ;;  %v10223_v25 = vpop.f32.mrf.mxu1 }
 0x104   : > { %v10231_v28 = vpop.f32.mrf.mxu0  ;;  %v10233_v29 = vpop.f32.mrf.mxu1  ;;  %8230 = vmatmul.mubr.msk.bf16.gmra.mxu0 %vm491_vm1, %v10057_v51  ;;  %8247 = vmatmul.mubr.msk.bf16.gmra.mxu1 %vm491_vm1, %v10057_v51 }
 0x105   : > { %1093 = vmatprep.mubr.bf16.mxu0 %v14366_v0  ;;  %1286 = vmatprep.mubr.bf16.mxu1 %v14366_v0 }
 0x106   : > { %v10241_v30 = vpop.f32.mrf.mxu0  ;;  %v10243_v31 = vpop.f32.mrf.mxu1 }
 0x108   : > { %v10245_v32 = vpop.f32.mrf.mxu0  ;;  %v10247_v33 = vpop.f32.mrf.mxu1 }
 0x10a   : > { %v10249_v34 = vpop.f32.mrf.mxu0  ;;  %v10251_v35 = vpop.f32.mrf.mxu1 }
 0x10c   : > { %v10253_v36 = vpop.f32.mrf.mxu0  ;;  %v10255_v37 = vpop.f32.mrf.mxu1  ;;  %8231 = vmatmul.mubr.msk.bf16.gmra.mxu0 %vm491_vm1, %v10067_v54  ;;  %8248 = vmatmul.mubr.msk.bf16.gmra.mxu1 %vm491_vm1, %v10067_v54 }
 0x10d   : > { %1103 = vmatprep.mubr.bf16.mxu0 %v14366_v0  ;;  %1296 = vmatprep.mubr.bf16.mxu1 %v14366_v0 }
 0x10e   : > { %v10263_v38 = vpop.f32.mrf.mxu0  ;;  %v10265_v39 = vpop.f32.mrf.mxu1 }
 0x110   : > { %v10267_v40 = vpop.f32.mrf.mxu0  ;;  %v10269_v41 = vpop.f32.mrf.mxu1 }
 0x112   : > { %v10271_v42 = vpop.f32.mrf.mxu0  ;;  %v10273_v43 = vpop.f32.mrf.mxu1 }
 0x114   : > { %v10275_v44 = vpop.f32.mrf.mxu0  ;;  %v10277_v45 = vpop.f32.mrf.mxu1  ;;  %8232 = vmatmul.mubr.msk.bf16.gmra.mxu0 %vm491_vm1, %v10077_v57  ;;  %8249 = vmatmul.mubr.msk.bf16.gmra.mxu1 %vm491_vm1, %v10077_v57 }
 0x115   : > { %1113 = vmatprep.mubr.bf16.mxu0 %v14366_v0  ;;  %1306 = vmatprep.mubr.bf16.mxu1 %v14366_v0 }
 0x116   : > { %v10285_v46 = vpop.f32.mrf.mxu0  ;;  %v10287_v47 = vpop.f32.mrf.mxu1 }
 0x118   : > { %v10289_v48 = vpop.f32.mrf.mxu0  ;;  %v10291_v49 = vpop.f32.mrf.mxu1 }
 0x11a   : > { %v10293_v50 = vpop.f32.mrf.mxu0  ;;  %v10295_v51 = vpop.f32.mrf.mxu1 }
 0x11c   : > { %v10297_v52 = vpop.f32.mrf.mxu0  ;;  %v10299_v53 = vpop.f32.mrf.mxu1  ;;  %8233 = vmatmul.mubr.msk.bf16.gmra.mxu0 %vm491_vm1, %v10087_v60  ;;  %8250 = vmatmul.mubr.msk.bf16.gmra.mxu1 %vm491_vm1, %v10087_v60 }
 0x11d   : > { %14416 = vst [vmem:[#allocation8_spill] sm:$0xff] %v10299_v53  ;;  %1123 = vmatprep.mubr.bf16.mxu0 %v14366_v0  ;;  %1316 = vmatprep.mubr.bf16.mxu1 %v14366_v0 }
 0x11e   : > { %v10307_v54 = vpop.f32.mrf.mxu0  ;;  %v10309_v55 = vpop.f32.mrf.mxu1 }
 0x120   : > { %v10311_v56 = vpop.f32.mrf.mxu0  ;;  %v10313_v57 = vpop.f32.mrf.mxu1 }
 0x122   : > { %v10315_v58 = vpop.f32.mrf.mxu0  ;;  %v10317_v59 = vpop.f32.mrf.mxu1 }
 0x123   : > { %14417 = vst [vmem:[#allocation9_spill] sm:$0xff] %v10315_v58  ;;  %14418 = vst [vmem:[#allocation10_spill] sm:$0xff] %v10317_v59 }
 0x124   : > { %v10319_v61 = vpop.f32.mrf.mxu0  ;;  %v10321_v60 = vpop.f32.mrf.mxu1  ;;  %8234 = vmatmul.mubr.msk.bf16.gmra.mxu0 %vm491_vm1, %v10097_v63  ;;  %8251 = vmatmul.mubr.msk.bf16.gmra.mxu1 %vm491_vm1, %v10097_v63 }
 0x125   : > { %14419 = vst [vmem:[#allocation11_spill] sm:$0xff] %v10319_v61  ;;  %14420 = vst [vmem:[#allocation12_spill] sm:$0xff] %v10321_v60  ;;  %1133 = vmatprep.mubr.bf16.mxu0 %v14366_v0  ;;  %1326 = vmatprep.mubr.bf16.mxu1 %v14366_v0 }
 0x126   : > { %v10329_v62 = vpop.f32.mrf.mxu0  ;;  %v10331_v1 = vpop.f32.mrf.mxu1 }
 0x127   : > { %14421 = vst [vmem:[#allocation13_spill] sm:$0xff] %v10329_v62  ;;  %14422 = vst [vmem:[#allocation14_spill] sm:$0xff] %v10331_v1 }
 0x128   : > { %v10333_v2 = vpop.f32.mrf.mxu0  ;;  %v10335_v4 = vpop.f32.mrf.mxu1 }
 0x129   : > { %14423 = vst [vmem:[#allocation15_spill] sm:$0xff] %v10333_v2  ;;  %14424 = vst [vmem:[#allocation16_spill] sm:$0xff] %v10335_v4 }
 0x12a   : > { %v10343_v63 = vpop.f32.mrf.mxu0  ;;  %v10345_v5 = vpop.f32.mrf.mxu1 }
 0x12b   : > { %14425 = vst [vmem:[#allocation17_spill] sm:$0xff] %v10343_v63  ;;  %14426 = vst [vmem:[#allocation18_spill] sm:$0xff] %v10345_v5 }
 0x12c   : > { %v10347_v6 = vpop.f32.mrf.mxu0  ;;  %v10349_v7 = vpop.f32.mrf.mxu1  ;;  %8235 = vmatmul.mubr.msk.bf16.gmra.mxu0 %vm491_vm1, %v10107_v3  ;;  %8252 = vmatmul.mubr.msk.bf16.gmra.mxu1 %vm491_vm1, %v10107_v3 }
 0x12d   : > { %14427 = vst [vmem:[#allocation19_spill] sm:$0xff] %v10347_v6  ;;  %14428 = vst [vmem:[#allocation20_spill] sm:$0xff] %v10349_v7  ;;  %1514 = vmatprep.mubr.bf16.mxu0 %v14366_v0  ;;  %1707 = vmatprep.mubr.bf16.mxu1 %v14366_v0  ;;  %v1369_v6 = vpack.c.bf16 %v1338_v9, %v1337_v8  ;;  %v9181_v0 = vld [vmem:[%s14360_s5 + $0xe0] ss:$16 sps:$4 sm:$0xff]   ;;  %v9192_v8 = vld [vmem:[%s14360_s5 + $0x2c4] ss:$16 sps:$4 sm:$0xff]  }
 0x12e   : > { %v10359_v26 = vpop.f32.mrf.mxu0  ;;  %v10361_v27 = vpop.f32.mrf.mxu1 }
 0x12f   : > { %14429 = vst [vmem:[#allocation21_spill] sm:$0xff] %v10359_v26  ;;  %14430 = vst [vmem:[#allocation22_spill] sm:$0xff] %v10361_v27  ;;  %v9184_v27 = vld [vmem:[%s14360_s5 + $0x2e0] ss:$16 sps:$4 sm:$0xff]   ;;  %v1340_v26 = vld [vmem:[%s10341_s11 + $0x18] sm:$0xff] }
 0x130   : > { %v10363_v5 = vpop.f32.mrf.mxu0  ;;  %v10365_v7 = vpop.f32.mrf.mxu1 }
 0x131   : > { %14431 = vst [vmem:[#allocation23_spill] sm:$0xff] %v10363_v5  ;;  %14432 = vst [vmem:[#allocation24_spill] sm:$0xff] %v10365_v7  ;;  %v9189_v5 = vld [vmem:[%s14360_s5 + $0xc4] ss:$16 sps:$4 sm:$0xff]  }
 0x132   : > { %v10367_v63 = vpop.f32.mrf.mxu0  ;;  %v10369_v3 = vpop.f32.mrf.mxu1  ;;  %v1339_v7 = vld [vmem:[%s10341_s11 + $0x10] sm:$0xff] }
 0x133   : > { %14433 = vst [vmem:[#allocation25_spill] sm:$0xff] %v10367_v63  ;;  %14434 = vst [vmem:[#allocation26_spill] sm:$0xff] %v10369_v3  ;;  %v14437_v3 = vmov 0  }
 0x134   : > { %v10383_v9 = vpop.f32.mrf.mxu0  ;;  %v10385_v63 = vpop.f32.mrf.mxu1  ;;  %8261 = vmatmul.mubr.msk.bf16.vlgmr.msra.gmra.mxu0 %vm1433_vm2, %v1369_v6  ;;  %8277 = vmatmul.mubr.msk.bf16.vlgmr.msra.gmra.mxu1 %vm1433_vm2, %v1369_v6  ;;  %v9190_v6 = vld [vmem:[%s14360_s5 + $0x2c0] ss:$16 sps:$4 sm:$0xff]  }
 0x135   : > { %14435 = vst [vmem:[#allocation27_spill] sm:$0xff] %v10383_v9  ;;  %14436 = vst [vmem:[#allocation28_spill] sm:$0xff] %v10385_v63  ;;  %1524 = vmatprep.mubr.bf16.mxu0 %v14437_v3  ;;  %1717 = vmatprep.mubr.bf16.mxu1 %v14437_v3  ;;  %v9187_v63 = vld [vmem:[%s14360_s5 + $0xc0] ss:$16 sps:$4 sm:$0xff]   ;;  %v9195_v9 = vld [vmem:[%s14360_s5 + $0xa4] ss:$16 sps:$4 sm:$0xff]  }
 0x136   : > { %v10393_v60 = vpop.f32.mrf.mxu0  ;;  %v10395_v61 = vpop.f32.mrf.mxu1  ;;  %2829 = vmatpush1.bf16.msra.mxu0 %v9181_v0  ;;  %3022 = vmatpush1.bf16.msra.mxu1 %v9184_v27 }
 0x137   : > { %14438 = vst [vmem:[#allocation29_spill] sm:$0xff] %v10393_v60  ;;  %14439 = vst [vmem:[#allocation30_spill] sm:$0xff] %v10395_v61  ;;  %2830 = vmatprep.subr.bf16.mxu0 %v9189_v5  ;;  %3023 = vmatprep.subr.bf16.mxu1 %v9192_v8  ;;  %v9198_v61 = vld [vmem:[%s14360_s5 + $0x2a4] ss:$16 sps:$4 sm:$0xff]   ;;  %v1370_v60 = vpack.c.bf16 %v1340_v26, %v1339_v7  ;;  %v9193_v5 = vld [vmem:[%s14360_s5 + $0xa0] ss:$16 sps:$4 sm:$0xff]  }
 0x138   : > { %v10409_v0 = vpop.f32.mrf.mxu0  ;;  %v10411_v27 = vpop.f32.mrf.mxu1  ;;  %v9196_v8 = vld [vmem:[%s14360_s5 + $0x2a0] ss:$16 sps:$4 sm:$0xff]   ;;  %v9201_v7 = vld [vmem:[%s14360_s5 + $0x84] ss:$16 sps:$4 sm:$0xff]  }
 0x139   : > { %14440 = vst [vmem:[#allocation31_spill] sm:$0xff] %v10409_v0  ;;  %14441 = vst [vmem:[#allocation32_spill] sm:$0xff] %v10411_v27  ;;  %v9204_v26 = vld [vmem:[%s14360_s5 + $0x284] ss:$16 sps:$4 sm:$0xff]  }
 0x13a   : > { %v10413_v4 = vpop.f32.mrf.mxu0  ;;  %v10415_v2 = vpop.f32.mrf.mxu1  ;;  %2831 = vmatpush1.bf16.msra.mxu0 %v9187_v63  ;;  %3024 = vmatpush1.bf16.msra.mxu1 %v9190_v6 }
 0x13b   : > { %14442 = vst [vmem:[#allocation33_spill] sm:$0xff] %v10413_v4  ;;  %14443 = vst [vmem:[#allocation34_spill] sm:$0xff] %v10415_v2  ;;  %2832 = vmatprep.subr.bf16.mxu0 %v9195_v9  ;;  %3025 = vmatprep.subr.bf16.mxu1 %v9198_v61  ;;  %v1341_v61 = vld [vmem:[%s10341_s11 + $0x20] sm:$0xff]  ;;  %v1342_v9 = vld [vmem:[%s10341_s11 + $0x28] sm:$0xff] }
 0x13c   : > { %v10429_v63 = vpop.f32.mrf.mxu0  ;;  %v10431_v6 = vpop.f32.mrf.mxu1  ;;  %8262 = vmatmul.mubr.msk.bf16.gmra.mxu0 %vm1433_vm2, %v1370_v60  ;;  %8278 = vmatmul.mubr.msk.bf16.gmra.mxu1 %vm1433_vm2, %v1370_v60  ;;  %v9202_v60 = vld [vmem:[%s14360_s5 + $0x280] ss:$16 sps:$4 sm:$0xff]  }
 0x13d   : > { %14444 = vst [vmem:[#allocation35_spill] sm:$0xff] %v10429_v63  ;;  %14445 = vst [vmem:[#allocation36_spill] sm:$0xff] %v10431_v6  ;;  %1534 = vmatprep.mubr.bf16.mxu0 %v14437_v3  ;;  %1727 = vmatprep.mubr.bf16.mxu1 %v14437_v3  ;;  %v9199_v6 = vld [vmem:[%s14360_s5 + $0x80] ss:$16 sps:$4 sm:$0xff]   ;;  %v9207_v63 = vld [vmem:[%s14360_s5 + $0x64] ss:$16 sps:$4 sm:$0xff]  }
 0x13e   : > { %v10439_v2 = vpop.f32.mrf.mxu0  ;;  %v10441_v4 = vpop.f32.mrf.mxu1  ;;  %2833 = vmatpush1.bf16.msra.mxu0 %v9193_v5  ;;  %3026 = vmatpush1.bf16.msra.mxu1 %v9196_v8 }
 0x13f   : > { %14446 = vst [vmem:[#allocation37_spill] sm:$0xff] %v10439_v2  ;;  %14447 = vst [vmem:[#allocation38_spill] sm:$0xff] %v10441_v4  ;;  %2834 = vmatprep.subr.bf16.mxu0 %v9201_v7  ;;  %3027 = vmatprep.subr.bf16.mxu1 %v9204_v26  ;;  %v9210_v4 = vld [vmem:[%s14360_s5 + $0x264] ss:$16 sps:$4 sm:$0xff]   ;;  %v1371_v2 = vpack.c.bf16 %v1342_v9, %v1341_v61  ;;  %v9205_v7 = vld [vmem:[%s14360_s5 + $0x60] ss:$16 sps:$4 sm:$0xff]  }
 0x140   : > { %v10455_v5 = vpop.f32.mrf.mxu0  ;;  %v10457_v8 = vpop.f32.mrf.mxu1  ;;  %v9208_v26 = vld [vmem:[%s14360_s5 + $0x260] ss:$16 sps:$4 sm:$0xff]   ;;  %v9213_v61 = vld [vmem:[%s14360_s5 + $0x44] ss:$16 sps:$4 sm:$0xff]  }
 0x141   : > { %14448 = vst [vmem:[#allocation39_spill] sm:$0xff] %v10455_v5  ;;  %14449 = vst [vmem:[#allocation40_spill] sm:$0xff] %v10457_v8  ;;  %v9216_v9 = vld [vmem:[%s14360_s5 + $0x244] ss:$16 sps:$4 sm:$0xff]  }
 0x142   : > { %v10459_v27 = vpop.f32.mrf.mxu0  ;;  %v10461_v0 = vpop.f32.mrf.mxu1  ;;  %2835 = vmatpush1.bf16.msra.mxu0 %v9199_v6  ;;  %3028 = vmatpush1.bf16.msra.mxu1 %v9202_v60 }
 0x143   : > { %14450 = vst [vmem:[#allocation41_spill] sm:$0xff] %v10459_v27  ;;  %14451 = vst [vmem:[#allocation42_spill] sm:$0xff] %v10461_v0  ;;  %2836 = vmatprep.subr.bf16.mxu0 %v9207_v63  ;;  %3029 = vmatprep.subr.bf16.mxu1 %v9210_v4  ;;  %v1343_v4 = vld [vmem:[%s10341_s11 + $0x30] sm:$0xff]  ;;  %v1344_v63 = vld [vmem:[%s10341_s11 + $0x38] sm:$0xff] }
 0x144   : > { %v10475_v6 = vpop.f32.mrf.mxu0  ;;  %v10477_v60 = vpop.f32.mrf.mxu1  ;;  %8263 = vmatmul.mubr.msk.bf16.gmra.mxu0 %vm1433_vm2, %v1371_v2  ;;  %8279 = vmatmul.mubr.msk.bf16.gmra.mxu1 %vm1433_vm2, %v1371_v2  ;;  %v9214_v2 = vld [vmem:[%s14360_s5 + $0x240] ss:$16 sps:$4 sm:$0xff]  }
 0x145   : > { %14452 = vst [vmem:[#allocation43_spill] sm:$0xff] %v10475_v6  ;;  %14453 = vst [vmem:[#allocation44_spill] sm:$0xff] %v10477_v60  ;;  %1544 = vmatprep.mubr.bf16.mxu0 %v14437_v3  ;;  %1737 = vmatprep.mubr.bf16.mxu1 %v14437_v3  ;;  %v9211_v60 = vld [vmem:[%s14360_s5 + $0x40] ss:$16 sps:$4 sm:$0xff]   ;;  %v9219_v6 = vld [vmem:[%s14360_s5 + $0x24] ss:$16 sps:$4 sm:$0xff]  }
 0x146   : > { %v10485_v0 = vpop.f32.mrf.mxu0  ;;  %v10487_v27 = vpop.f32.mrf.mxu1  ;;  %2837 = vmatpush1.bf16.msra.mxu0 %v9205_v7  ;;  %3030 = vmatpush1.bf16.msra.mxu1 %v9208_v26 }
 0x147   : > { %14454 = vst [vmem:[#allocation45_spill] sm:$0xff] %v10485_v0  ;;  %14455 = vst [vmem:[#allocation46_spill] sm:$0xff] %v10487_v27  ;;  %2838 = vmatprep.subr.bf16.mxu0 %v9213_v61  ;;  %3031 = vmatprep.subr.bf16.mxu1 %v9216_v9  ;;  %v9222_v27 = vld [vmem:[%s14360_s5 + $0x224] ss:$16 sps:$4 sm:$0xff]   ;;  %v1372_v0 = vpack.c.bf16 %v1344_v63, %v1343_v4  ;;  %v9217_v61 = vld [vmem:[%s14360_s5 + $0x20] ss:$16 sps:$4 sm:$0xff]  }
 0x148   : > { %v10501_v7 = vpop.f32.mrf.mxu0  ;;  %v10503_v26 = vpop.f32.mrf.mxu1  ;;  %v9220_v9 = vld [vmem:[%s14360_s5 + $0x220] ss:$16 sps:$4 sm:$0xff]   ;;  %v9225_v4 = vld [vmem:[%s14360_s5 + $0x4] ss:$16 sps:$4 sm:$0xff]  }
 0x149   : > { %14456 = vst [vmem:[#allocation47_spill] sm:$0xff] %v10501_v7  ;;  %14457 = vst [vmem:[#allocation48_spill] sm:$0xff] %v10503_v26  ;;  %v9228_v63 = vld [vmem:[%s14360_s5 + $0x204] ss:$16 sps:$4 sm:$0xff]  }
 0x14a   : > { %v10505_v8 = vpop.f32.mrf.mxu0  ;;  %v10507_v5 = vpop.f32.mrf.mxu1  ;;  %2839 = vmatpush1.bf16.msra.mxu0 %v9211_v60  ;;  %3032 = vmatpush1.bf16.msra.mxu1 %v9214_v2 }
 0x14b   : > { %14458 = vst [vmem:[#allocation49_spill] sm:$0xff] %v10505_v8  ;;  %14459 = vst [vmem:[#allocation50_spill] sm:$0xff] %v10507_v5  ;;  %2840 = vmatprep.subr.bf16.mxu0 %v9219_v6  ;;  %3033 = vmatprep.subr.bf16.mxu1 %v9222_v27  ;;  %v1345_v27 = vld [vmem:[%s10341_s11 + $0x40] sm:$0xff]  ;;  %v1346_v6 = vld [vmem:[%s10341_s11 + $0x48] sm:$0xff] }
 0x14c   : > { %v10521_v60 = vpop.f32.mrf.mxu0  ;;  %v10523_v2 = vpop.f32.mrf.mxu1  ;;  %8264 = vmatmul.mubr.msk.bf16.gmra.mxu0 %vm1433_vm2, %v1372_v0  ;;  %8280 = vmatmul.mubr.msk.bf16.gmra.mxu1 %vm1433_vm2, %v1372_v0  ;;  %v9226_v0 = vld [vmem:[%s14360_s5 + $0x200] ss:$16 sps:$4 sm:$0xff]  }
 0x14d   : > { %14460 = vst [vmem:[#allocation51_spill] sm:$0xff] %v10521_v60  ;;  %14461 = vst [vmem:[#allocation52_spill] sm:$0xff] %v10523_v2  ;;  %1554 = vmatprep.mubr.bf16.mxu0 %v14437_v3  ;;  %1747 = vmatprep.mubr.bf16.mxu1 %v14437_v3  ;;  %v9223_v2 = vld [vmem:[%s14360_s5] ss:$16 sps:$4 sm:$0xff]   ;;  %v9231_v60 = vld [vmem:[%s14360_s5 + $0x1e4] ss:$16 sps:$4 sm:$0xff]  }
 0x14e   : > { %v10531_v5 = vpop.f32.mrf.mxu0  ;;  %v10533_v8 = vpop.f32.mrf.mxu1  ;;  %2841 = vmatpush1.bf16.msra.mxu0 %v9217_v61  ;;  %3034 = vmatpush1.bf16.msra.mxu1 %v9220_v9 }
 0x14f   : > { %14462 = vst [vmem:[#allocation53_spill] sm:$0xff] %v10531_v5  ;;  %14463 = vst [vmem:[#allocation54_spill] sm:$0xff] %v10533_v8  ;;  %2842 = vmatprep.subr.bf16.mxu0 %v9225_v4  ;;  %3035 = vmatprep.subr.bf16.mxu1 %v9228_v63  ;;  %v9234_v8 = vld [vmem:[%s14360_s5 + $0x3e4] ss:$16 sps:$4 sm:$0xff]   ;;  %v1373_v5 = vpack.c.bf16 %v1346_v6, %v1345_v27  ;;  %v9229_v4 = vld [vmem:[%s14360_s5 + $0x1e0] ss:$16 sps:$4 sm:$0xff]  }
 0x150   : > { %v10547_v61 = vpop.f32.mrf.mxu0  ;;  %v10549_v9 = vpop.f32.mrf.mxu1  ;;  %v9232_v63 = vld [vmem:[%s14360_s5 + $0x3e0] ss:$16 sps:$4 sm:$0xff]   ;;  %v9237_v27 = vld [vmem:[%s14360_s5 + $0x1c4] ss:$16 sps:$4 sm:$0xff]  }
 0x151   : > { %14464 = vst [vmem:[#allocation55_spill] sm:$0xff] %v10547_v61  ;;  %14465 = vst [vmem:[#allocation56_spill] sm:$0xff] %v10549_v9  ;;  %v9240_v6 = vld [vmem:[%s14360_s5 + $0x3c4] ss:$16 sps:$4 sm:$0xff]  }
 0x152   : > { %v10551_v26 = vpop.f32.mrf.mxu0  ;;  %v10553_v7 = vpop.f32.mrf.mxu1  ;;  %2843 = vmatpush1.bf16.msra.mxu0 %v9223_v2  ;;  %3036 = vmatpush1.bf16.msra.mxu1 %v9226_v0 }
 0x153   : > { %14466 = vst [vmem:[#allocation57_spill] sm:$0xff] %v10551_v26  ;;  %14467 = vst [vmem:[#allocation58_spill] sm:$0xff] %v10553_v7  ;;  %2844 = vmatprep.subr.bf16.mxu0 %v9231_v60  ;;  %3037 = vmatprep.subr.bf16.mxu1 %v9234_v8  ;;  %v1347_v8 = vld [vmem:[%s10341_s11 + $0x50] sm:$0xff]  ;;  %v1348_v60 = vld [vmem:[%s10341_s11 + $0x58] sm:$0xff] }
 0x154   : > { %v10567_v2 = vpop.f32.mrf.mxu0  ;;  %v10569_v0 = vpop.f32.mrf.mxu1  ;;  %8265 = vmatmul.mubr.msk.bf16.gmra.mxu0 %vm1433_vm2, %v1373_v5  ;;  %8281 = vmatmul.mubr.msk.bf16.gmra.mxu1 %vm1433_vm2, %v1373_v5  ;;  %v9238_v5 = vld [vmem:[%s14360_s5 + $0x3c0] ss:$16 sps:$4 sm:$0xff]  }
 0x155   : > { %14468 = vst [vmem:[#allocation59_spill] sm:$0xff] %v10567_v2  ;;  %14469 = vst [vmem:[#allocation60_spill] sm:$0xff] %v10569_v0  ;;  %1564 = vmatprep.mubr.bf16.mxu0 %v14437_v3  ;;  %1757 = vmatprep.mubr.bf16.mxu1 %v14437_v3  ;;  %v9235_v0 = vld [vmem:[%s14360_s5 + $0x1c0] ss:$16 sps:$4 sm:$0xff]   ;;  %v9243_v2 = vld [vmem:[%s14360_s5 + $0x1a4] ss:$16 sps:$4 sm:$0xff]  }
 0x156   : > { %v10577_v7 = vpop.f32.mrf.mxu0  ;;  %v10579_v26 = vpop.f32.mrf.mxu1  ;;  %2845 = vmatpush2.bf16.msra.mxu0 %v9229_v4  ;;  %3038 = vmatpush2.bf16.msra.mxu1 %v9232_v63 }
 0x157   : > { %14470 = vst [vmem:[#allocation61_spill] sm:$0xff] %v10577_v7  ;;  %14471 = vst [vmem:[#allocation62_spill] sm:$0xff] %v10579_v26  ;;  %2846 = vmatprep.subr.bf16.mxu0 %v9237_v27  ;;  %3039 = vmatprep.subr.bf16.mxu1 %v9240_v6  ;;  %v9246_v26 = vld [vmem:[%s14360_s5 + $0x3a4] ss:$16 sps:$4 sm:$0xff]   ;;  %v1374_v7 = vpack.c.bf16 %v1348_v60, %v1347_v8  ;;  %v9241_v27 = vld [vmem:[%s14360_s5 + $0x1a0] ss:$16 sps:$4 sm:$0xff]  }
 0x158   : > { %v10593_v4 = vpop.f32.mrf.mxu0  ;;  %v10595_v63 = vpop.f32.mrf.mxu1  ;;  %v9244_v6 = vld [vmem:[%s14360_s5 + $0x3a0] ss:$16 sps:$4 sm:$0xff]   ;;  %v9249_v8 = vld [vmem:[%s14360_s5 + $0x184] ss:$16 sps:$4 sm:$0xff]  }
 0x159   : > { %14472 = vst [vmem:[#allocation63_spill] sm:$0xff] %v10593_v4  ;;  %14473 = vst [vmem:[#allocation64_spill] sm:$0xff] %v10595_v63  ;;  %v9252_v60 = vld [vmem:[%s14360_s5 + $0x384] ss:$16 sps:$4 sm:$0xff]  }
 0x15a   : > { %v10597_v9 = vpop.f32.mrf.mxu0  ;;  %v10599_v61 = vpop.f32.mrf.mxu1  ;;  %2847 = vmatpush2.bf16.msra.mxu0 %v9235_v0  ;;  %3040 = vmatpush2.bf16.msra.mxu1 %v9238_v5 }
 0x15b   : > { %14474 = vst [vmem:[#allocation65_spill] sm:$0xff] %v10597_v9  ;;  %14475 = vst [vmem:[#allocation66_spill] sm:$0xff] %v10599_v61  ;;  %2848 = vmatprep.subr.bf16.mxu0 %v9243_v2  ;;  %3041 = vmatprep.subr.bf16.mxu1 %v9246_v26  ;;  %v1349_v26 = vld [vmem:[%s10341_s11 + $0x60] sm:$0xff]  ;;  %v1350_v2 = vld [vmem:[%s10341_s11 + $0x68] sm:$0xff] }
 0x15c   : > { %v10613_v0 = vpop.f32.mrf.mxu0  ;;  %v10615_v5 = vpop.f32.mrf.mxu1  ;;  %8266 = vmatmul.mubr.msk.bf16.gmra.mxu0 %vm1433_vm2, %v1374_v7  ;;  %8282 = vmatmul.mubr.msk.bf16.gmra.mxu1 %vm1433_vm2, %v1374_v7  ;;  %v9250_v7 = vld [vmem:[%s14360_s5 + $0x380] ss:$16 sps:$4 sm:$0xff]  }
 0x15d   : > { %14476 = vst [vmem:[#allocation67_spill] sm:$0xff] %v10613_v0  ;;  %14477 = vst [vmem:[#allocation68_spill] sm:$0xff] %v10615_v5  ;;  %1574 = vmatprep.mubr.bf16.mxu0 %v14437_v3  ;;  %1767 = vmatprep.mubr.bf16.mxu1 %v14437_v3  ;;  %v9247_v5 = vld [vmem:[%s14360_s5 + $0x180] ss:$16 sps:$4 sm:$0xff]  }
 0x15e   : > { %v10623_v61 = vpop.f32.mrf.mxu0  ;;  %v10625_v9 = vpop.f32.mrf.mxu1  ;;  %2849 = vmatpush2.bf16.msra.mxu0 %v9241_v27  ;;  %3042 = vmatpush2.bf16.msra.mxu1 %v9244_v6  ;;  %v9255_v6 = vld [vmem:[%s14360_s5 + $0x164] ss:$16 sps:$4 sm:$0xff]  }
 0x15f   : > { %14478 = vst [vmem:[#allocation69_spill] sm:$0xff] %v10623_v61  ;;  %14479 = vst [vmem:[#allocation70_spill] sm:$0xff] %v10625_v9  ;;  %2850 = vmatprep.subr.bf16.mxu0 %v9249_v8  ;;  %3043 = vmatprep.subr.bf16.mxu1 %v9252_v60  ;;  %v1375_v61 = vpack.c.bf16 %v1350_v2, %v1349_v26  ;;  %v9253_v8 = vld [vmem:[%s14360_s5 + $0x160] ss:$16 sps:$4 sm:$0xff]   ;;  %v9258_v26 = vld [vmem:[%s14360_s5 + $0x364] ss:$16 sps:$4 sm:$0xff]  }
 0x160   : > { %v10633_v0 = vpop.f32.mrf.mxu0  ;;  %v10635_v63 = vpop.f32.mrf.mxu1  ;;  %v9256_v60 = vld [vmem:[%s14360_s5 + $0x360] ss:$16 sps:$4 sm:$0xff]  }
 0x161   : > { %14480 = vst [vmem:[#allocation71_spill] sm:$0xff] %v10633_v0  ;;  %14481 = vst [vmem:[#allocation72_spill] sm:$0xff] %v10635_v63 }
 0x162   : > { %v10637_v9 = vpop.f32.mrf.mxu0  ;;  %v10639_v27 = vpop.f32.mrf.mxu1  ;;  %2851 = vmatpush2.bf16.msra.mxu0 %v9247_v5  ;;  %3044 = vmatpush2.bf16.msra.mxu1 %v9250_v7  ;;  %v1351_v7 = vld [vmem:[%s10341_s11 + $0x70] sm:$0xff] }
 0x163   : > { %14482 = vst [vmem:[#allocation73_spill] sm:$0xff] %v10637_v9  ;;  %14483 = vst [vmem:[#allocation74_spill] sm:$0xff] %v10639_v27  ;;  %v1352_v27 = vld [vmem:[%s10341_s11 + $0x78] sm:$0xff]  ;;  %2852 = vmatprep.subr.bf16.mxu0 %v9255_v6  ;;  %3045 = vmatprep.subr.bf16.mxu1 %v9258_v26  ;;  %v9259_v6 = vld [vmem:[%s14360_s5 + $0x140] ss:$16 sps:$4 sm:$0xff]  }
 0x164   : > { %v10653_v2 = vpop.f32.mrf.mxu0  ;;  %v10655_v5 = vpop.f32.mrf.mxu1  ;;  %8267 = vmatmul.mubr.msk.bf16.gmra.mxu0 %vm1433_vm2, %v1375_v61  ;;  %8283 = vmatmul.mubr.msk.bf16.gmra.mxu1 %vm1433_vm2, %v1375_v61  ;;  %v1376_v61 = vpack.c.bf16 %v1352_v27, %v1351_v7  ;;  %v9264_v27 = vld [vmem:[%s14360_s5 + $0x344] ss:$16 sps:$4 sm:$0xff]  }
 0x165   : > { %14484 = vst [vmem:[#allocation75_spill] sm:$0xff] %v10653_v2  ;;  %14485 = vst [vmem:[#allocation76_spill] sm:$0xff] %v10655_v5  ;;  %1584 = vmatprep.mubr.bf16.mxu0 %v14437_v3  ;;  %1777 = vmatprep.mubr.bf16.mxu1 %v14437_v3  ;;  %v1353_v7 = vld [vmem:[%s10341_s11 + $0x80] sm:$0xff] }
 0x166   : > { %v10663_v9 = vpop.f32.mrf.mxu0  ;;  %v10665_v63 = vpop.f32.mrf.mxu1  ;;  %2853 = vmatpush2.bf16.msra.mxu0 %v9253_v8  ;;  %3046 = vmatpush2.bf16.msra.mxu1 %v9256_v60  ;;  %v9262_v8 = vld [vmem:[%s14360_s5 + $0x340] ss:$16 sps:$4 sm:$0xff]  }
 0x167   : > { %14486 = vst [vmem:[#allocation77_spill] sm:$0xff] %v10663_v9  ;;  %14487 = vst [vmem:[#allocation78_spill] sm:$0xff] %v10665_v63  ;;  %v9261_v9 = vld [vmem:[%s14360_s5 + $0x144] ss:$16 sps:$4 sm:$0xff]   ;;  %3047 = vmatprep.subr.bf16.mxu1 %v9264_v27 }
 0x168   : > { %v10667_v5 = vpop.f32.mrf.mxu0  ;;  %v10669_v2 = vpop.f32.mrf.mxu1  ;;  %2854 = vmatprep.subr.bf16.mxu0 %v9261_v9  ;;  %v9265_v9 = vld [vmem:[%s14360_s5 + $0x120] ss:$16 sps:$4 sm:$0xff]  }
 0x169   : > { %14488 = vst [vmem:[#allocation79_spill] sm:$0xff] %v10667_v5  ;;  %14489 = vst [vmem:[#allocation80_spill] sm:$0xff] %v10669_v2 }
 0x16a   : > { %v10671_v0 = vpop.f32.mrf.mxu0  ;;  %v10673_v4 = vpop.f32.mrf.mxu1  ;;  %2855 = vmatpush2.bf16.msra.mxu0 %v9259_v6  ;;  %3048 = vmatpush2.bf16.msra.mxu1 %v9262_v8  ;;  %v9268_v6 = vld [vmem:[%s14360_s5 + $0x320] ss:$16 sps:$4 sm:$0xff]  }
 0x16b   : > { %14490 = vst [vmem:[#allocation81_spill] sm:$0xff] %v10671_v0  ;;  %14491 = vst [vmem:[#allocation82_spill] sm:$0xff] %v10673_v4  ;;  %v1354_v4 = vld [vmem:[%s10341_s11 + $0x88] sm:$0xff] }
 0x16c   : > { %v10687_v60 = vpop.f32.mrf.mxu0  ;;  %v10689_v26 = vpop.f32.mrf.mxu1  ;;  %8268 = vmatmul.mubr.msk.bf16.gmra.mxu0 %vm1433_vm2, %v1376_v61  ;;  %8284 = vmatmul.mubr.msk.bf16.gmra.mxu1 %vm1433_vm2, %v1376_v61  ;;  %v1377_v61 = vpack.c.bf16 %v1354_v4, %v1353_v7  ;;  %v9270_v4 = vld [vmem:[%s14360_s5 + $0x324] ss:$16 sps:$4 sm:$0xff]  }
 0x16d   : > { %14492 = vst [vmem:[#allocation83_spill] sm:$0xff] %v10687_v60  ;;  %14493 = vst [vmem:[#allocation84_spill] sm:$0xff] %v10689_v26  ;;  %1594 = vmatprep.mubr.bf16.mxu0 %v14437_v3  ;;  %1787 = vmatprep.mubr.bf16.mxu1 %v14437_v3  ;;  %v1355_v7 = vld [vmem:[%s10341_s11 + $0x90] sm:$0xff] }
 0x16e   : > { %v10697_v0 = vpop.f32.mrf.mxu0  ;;  %v10699_v2 = vpop.f32.mrf.mxu1  ;;  %3049 = vmatprep.subr.bf16.mxu1 %v9270_v4  ;;  %v9271_v4 = vld [vmem:[%s14360_s5 + $0x100] ss:$16 sps:$4 sm:$0xff]  }
 0x16f   : > { %14494 = vst [vmem:[#allocation85_spill] sm:$0xff] %v10697_v0  ;;  %14495 = vst [vmem:[#allocation86_spill] sm:$0xff] %v10699_v2  ;;  %v9267_v0 = vld [vmem:[%s14360_s5 + $0x124] ss:$16 sps:$4 sm:$0xff]   ;;  %3050 = vmatpush2.bf16.msra.mxu1 %v9268_v6  ;;  %v1358_v6 = vld [vmem:[%s10341_s11 + $0xa8] sm:$0xff] }
 0x170   : > { %v10701_v26 = vpop.f32.mrf.mxu0  ;;  %v10703_v60 = vpop.f32.mrf.mxu1  ;;  %2856 = vmatprep.subr.bf16.mxu0 %v9267_v0  ;;  %v1357_v0 = vld [vmem:[%s10341_s11 + $0xa0] sm:$0xff] }
 0x171   : > { %14496 = vst [vmem:[#allocation87_spill] sm:$0xff] %v10701_v26  ;;  %14497 = vst [vmem:[#allocation88_spill] sm:$0xff] %v10703_v60  ;;  %2857 = vmatpush2.bf16.msra.mxu0 %v9265_v9  ;;  %v9273_v9 = vld [vmem:[%s14360_s5 + $0x104] ss:$16 sps:$4 sm:$0xff]  }
 0x172   : > { %v10705_v5 = vpop.f32.mrf.mxu0  ;;  %v10707_v63 = vpop.f32.mrf.mxu1  ;;  %2858 = vmatprep.subr.bf16.mxu0 %v9273_v9  ;;  %v1359_v9 = vld [vmem:[%s10341_s11 + $0xb0] sm:$0xff] }
 0x173   : > { %14498 = vst [vmem:[#allocation89_spill] sm:$0xff] %v10705_v5  ;;  %14499 = vst [vmem:[#allocation90_spill] sm:$0xff] %v10707_v63  ;;  %v1356_v63 = vld [vmem:[%s10341_s11 + $0x98] sm:$0xff] }
 0x174   : > { %v10721_v8 = vpop.f32.mrf.mxu0  ;;  %v10723_v27 = vpop.f32.mrf.mxu1  ;;  %8269 = vmatmul.mubr.msk.bf16.gmra.mxu0 %vm1433_vm2, %v1377_v61  ;;  %8285 = vmatmul.mubr.msk.bf16.gmra.mxu1 %vm1433_vm2, %v1377_v61  ;;  %v1378_v61 = vpack.c.bf16 %v1356_v63, %v1355_v7  ;;  %v9276_v63 = vld [vmem:[%s14360_s5 + $0x304] ss:$16 sps:$4 sm:$0xff]   ;;  %v9274_v7 = vld [vmem:[%s14360_s5 + $0x300] ss:$16 sps:$4 sm:$0xff]  }
 0x175   : > { %14500 = vst [vmem:[#allocation91_spill] sm:$0xff] %v10721_v8  ;;  %14501 = vst [vmem:[#allocation92_spill] sm:$0xff] %v10723_v27  ;;  %1604 = vmatprep.mubr.bf16.mxu0 %v14437_v3  ;;  %1797 = vmatprep.mubr.bf16.mxu1 %v14437_v3 }
 0x176   : > { %v10731_v5 = vpop.f32.mrf.mxu0  ;;  %v10733_v60 = vpop.f32.mrf.mxu1  ;;  %3051 = vmatprep.subr.bf16.mxu1 %v9276_v63  ;;  %2859 = vmatpush2.bf16.msra.mxu0 %v9271_v4  ;;  %v1360_v63 = vld [vmem:[%s10341_s11 + $0xb8] sm:$0xff] }
 0x177   : > { %14502 = vst [vmem:[#allocation93_spill] sm:$0xff] %v10731_v5  ;;  %14503 = vst [vmem:[#allocation94_spill] sm:$0xff] %v10733_v60  ;;  %3052 = vmatpush2.bf16.msra.mxu1 %v9274_v7 }
 0x178   : > { %v10735_v27 = vpop.f32.mrf.mxu0  ;;  %v10737_v8 = vpop.f32.mrf.mxu1 }
 0x179   : > { %14504 = vst [vmem:[#allocation95_spill] sm:$0xff] %v10735_v27  ;;  %14505 = vst [vmem:[#allocation96_spill] sm:$0xff] %v10737_v8 }
 0x17a   : > { %v10739_v26 = vpop.f32.mrf.mxu0  ;;  %v10741_v2 = vpop.f32.mrf.mxu1 }
 0x17b   : > { %14506 = vst [vmem:[#allocation97_spill] sm:$0xff] %v10739_v26  ;;  %14507 = vst [vmem:[#allocation98_spill] sm:$0xff] %v10741_v2  ;;  %v1379_v26 = vpack.c.bf16 %v1358_v6, %v1357_v0  ;;  %v9279_v0 = vld [vmem:[%s14360_s5 + $0xec] ss:$16 sps:$4 sm:$0xff]  }
 0x17c   : > { %v10743_v1 = vpop.f32.mrf.mxu0  ;;  %v10745_v62 = vpop.f32.mrf.mxu1  ;;  %8270 = vmatmul.mubr.msk.bf16.gmra.mxu0 %vm1433_vm2, %v1378_v61  ;;  %8286 = vmatmul.mubr.msk.bf16.gmra.mxu1 %vm1433_vm2, %v1378_v61 }
 0x17d   : > { %14508 = vst [vmem:[#allocation99_spill] sm:$0xff] %v10743_v1  ;;  %14509 = vst [vmem:[#allocation100_spill] sm:$0xff] %v10745_v62  ;;  %1614 = vmatprep.mubr.bf16.mxu0 %v14437_v3  ;;  %1807 = vmatprep.mubr.bf16.mxu1 %v14437_v3 }
 0x17e   : > { %v10765_v61 = vpop.f32.mrf.mxu0  ;;  %v10767_v62 = vpop.f32.mrf.mxu1  ;;  %3214 = vmatprep.subr.bf16.mxu0 %v9279_v0  ;;  %v1361_v0 = vld [vmem:[%s10341_s11 + $0xc0] sm:$0xff] }
 0x17f   : > { %14510 = vst [vmem:[#allocation101_spill] sm:$0xff] %v10765_v61  ;;  %14511 = vst [vmem:[#allocation102_spill] sm:$0xff] %v10767_v62 }
 0x180   : > { %v10769_v1 = vpop.f32.mrf.mxu0  ;;  %v10771_v2 = vpop.f32.mrf.mxu1 }
 0x181   : > { %14512 = vst [vmem:[#allocation103_spill] sm:$0xff] %v10769_v1  ;;  %14513 = vst [vmem:[#allocation104_spill] sm:$0xff] %v10771_v2 }
 0x182   : > { %v10773_v8 = vpop.f32.mrf.mxu0  ;;  %v10775_v27 = vpop.f32.mrf.mxu1 }
 0x183   : > { %14514 = vst [vmem:[#allocation105_spill] sm:$0xff] %v10773_v8  ;;  %14515 = vst [vmem:[#allocation106_spill] sm:$0xff] %v10775_v27 }
 0x184   : > { %v10777_v60 = vpop.f32.mrf.mxu0  ;;  %v10779_v61 = vpop.f32.mrf.mxu1  ;;  %8271 = vmatmul.mubr.msk.bf16.gmra.mxu0 %vm1433_vm2, %v1379_v26  ;;  %8287 = vmatmul.mubr.msk.bf16.gmra.mxu1 %vm1433_vm2, %v1379_v26  ;;  %v9282_v26 = vld [vmem:[%s14360_s5 + $0x2ec] ss:$16 sps:$4 sm:$0xff]  }
 0x185   : > { %14516 = vst [vmem:[#allocation107_spill] sm:$0xff] %v10777_v60  ;;  %14517 = vst [vmem:[#allocation108_spill] sm:$0xff] %v10779_v61  ;;  %1624 = vmatprep.mubr.bf16.mxu0 %v14437_v3  ;;  %1817 = vmatprep.mubr.bf16.mxu1 %v14437_v3  ;;  %v1380_v60 = vpack.c.bf16 %v1360_v63, %v1359_v9  ;;  %v1362_v9 = vld [vmem:[%s10341_s11 + $0xc8] sm:$0xff] }
 0x186   : > { %v10790_v6 = vpop.f32.mrf.mxu0  ;;  %v10792_v4 = vpop.f32.mrf.mxu1  ;;  %3407 = vmatprep.subr.bf16.mxu1 %v9282_v26 }
 0x187   : > { %14518 = vst [vmem:[#allocation109_spill] sm:$0xff] %v10790_v6  ;;  %14519 = vst [vmem:[#allocation110_spill] sm:$0xff] %v10792_v4 }
 0x188   : > { %v10797_v7 = vpop.f32.mrf.mxu0  ;;  %v10799_v61 = vpop.f32.mrf.mxu1 }
 0x189   : > { %14520 = vst [vmem:[#allocation111_spill] sm:$0xff] %v10797_v7  ;;  %14521 = vst [vmem:[#allocation112_spill] sm:$0xff] %v10799_v61 }
 0x18a   : > { %v10801_v27 = vpop.f32.mrf.mxu0  ;;  %v10803_v8 = vpop.f32.mrf.mxu1 }
 0x18b   : > { %14522 = vst [vmem:[#allocation113_spill] sm:$0xff] %v10801_v27  ;;  %14523 = vst [vmem:[#allocation114_spill] sm:$0xff] %v10803_v8 }
 0x18c   : > { %v10805_v6 = vpop.f32.mrf.mxu0  ;;  %v10807_v2 = vpop.f32.mrf.mxu1  ;;  %8272 = vmatmul.mubr.msk.bf16.gmra.mxu0 %vm1433_vm2, %v1380_v60  ;;  %8288 = vmatmul.mubr.msk.bf16.gmra.mxu1 %vm1433_vm2, %v1380_v60 }
 0x18d   : > { %14524 = vst [vmem:[#allocation115_spill] sm:$0xff] %v10805_v6  ;;  %14525 = vst [vmem:[#allocation116_spill] sm:$0xff] %v10807_v2  ;;  %1634 = vmatprep.mubr.bf16.mxu0 %v14437_v3  ;;  %1827 = vmatprep.mubr.bf16.mxu1 %v14437_v3  ;;  %v1381_v2 = vpack.c.bf16 %v1362_v9, %v1361_v0  ;;  %v1364_v0 = vld [vmem:[%s10341_s11 + $0xd8] sm:$0xff] }
 0x18e   : > { %v10815_v63 = vpop.f32.mrf.mxu0  ;;  %v10817_v26 = vpop.f32.mrf.mxu1 }
 0x18f   : > { %14526 = vst [vmem:[#allocation117_spill] sm:$0xff] %v10815_v63  ;;  %14527 = vst [vmem:[#allocation118_spill] sm:$0xff] %v10817_v26 }
 0x190   : > { %v10819_v8 = vpop.f32.mrf.mxu0  ;;  %v10821_v6 = vpop.f32.mrf.mxu1 }
 0x191   : > { %14528 = vst [vmem:[#allocation119_spill] sm:$0xff] %v10819_v8  ;;  %14529 = vst [vmem:[#allocation120_spill] sm:$0xff] %v10821_v6  ;;  %v1363_v8 = vld [vmem:[%s10341_s11 + $0xd0] sm:$0xff] }
 0x192   : > { %v10823_v27 = vpop.f32.mrf.mxu0  ;;  %v10825_v60 = vpop.f32.mrf.mxu1 }
 0x193   : > { %14530 = vst [vmem:[#allocation121_spill] sm:$0xff] %v10823_v27  ;;  %14531 = vst [vmem:[#allocation122_spill] sm:$0xff] %v10825_v60 }
 0x194   : > { %v10827_v61 = vpop.f32.mrf.mxu0  ;;  %v10829_v7 = vpop.f32.mrf.mxu1  ;;  %8273 = vmatmul.mubr.msk.bf16.gmra.mxu0 %vm1433_vm2, %v1381_v2  ;;  %8289 = vmatmul.mubr.msk.bf16.gmra.mxu1 %vm1433_vm2, %v1381_v2 }
 0x195   : > { %14532 = vst [vmem:[#allocation123_spill] sm:$0xff] %v10827_v61  ;;  %14533 = vst [vmem:[#allocation124_spill] sm:$0xff] %v10829_v7  ;;  %1644 = vmatprep.mubr.bf16.mxu0 %v14437_v3  ;;  %1837 = vmatprep.mubr.bf16.mxu1 %v14437_v3  ;;  %v1382_v7 = vpack.c.bf16 %v1364_v0, %v1363_v8  ;;  %v1366_v8 = vld [vmem:[%s10341_s11 + $0xe8] sm:$0xff] }
 0x196   : > { %v10837_v9 = vpop.f32.mrf.mxu0  ;;  %v10839_v27 = vpop.f32.mrf.mxu1 }
 0x197   : > { %14534 = vst [vmem:[#allocation125_spill] sm:$0xff] %v10837_v9  ;;  %14535 = vst [vmem:[#allocation126_spill] sm:$0xff] %v10839_v27 }
 0x198   : > { %v10841_v60 = vpop.f32.mrf.mxu0  ;;  %v10843_v61 = vpop.f32.mrf.mxu1 }
 0x199   : > { %14536 = vst [vmem:[#allocation127_spill] sm:$0xff] %v10841_v60  ;;  %14537 = vst [vmem:[#allocation128_spill] sm:$0xff] %v10843_v61  ;;  %v1365_v60 = vld [vmem:[%s10341_s11 + $0xe0] sm:$0xff] }
 0x19a   : > { %v10845_v6 = vpop.f32.mrf.mxu0  ;;  %v10847_v2 = vpop.f32.mrf.mxu1 }
 0x19b   : > { %14538 = vst [vmem:[#allocation129_spill] sm:$0xff] %v10845_v6  ;;  %14539 = vst [vmem:[#allocation130_spill] sm:$0xff] %v10847_v2 }
 0x19c   : > { %v10849_v26 = vpop.f32.mrf.mxu0  ;;  %v10851_v63 = vpop.f32.mrf.mxu1  ;;  %8274 = vmatmul.mubr.msk.bf16.gmra.mxu0 %vm1433_vm2, %v1382_v7  ;;  %8290 = vmatmul.mubr.msk.bf16.gmra.mxu1 %vm1433_vm2, %v1382_v7 }
 0x19d   : > { %14540 = vst [vmem:[#allocation131_spill] sm:$0xff] %v10849_v26  ;;  %14541 = vst [vmem:[#allocation132_spill] sm:$0xff] %v10851_v63  ;;  %1654 = vmatprep.mubr.bf16.mxu0 %v14437_v3  ;;  %1847 = vmatprep.mubr.bf16.mxu1 %v14437_v3  ;;  %v1383_v63 = vpack.c.bf16 %v1366_v8, %v1365_v60 }
 0x19e   : > { %v10859_v0 = vpop.f32.mrf.mxu0  ;;  %v10861_v6 = vpop.f32.mrf.mxu1 }
 0x19f   : > { %14542 = vst [vmem:[#allocation133_spill] sm:$0xff] %v10859_v0  ;;  %14543 = vst [vmem:[#allocation134_spill] sm:$0xff] %v10861_v6  ;;  %v1368_v6 = vld [vmem:[%s10341_s11 + $0xf8] sm:$0xff] }
 0x1a0   : > { %v10863_v2 = vpop.f32.mrf.mxu0  ;;  %v10865_v26 = vpop.f32.mrf.mxu1 }
 0x1a1   : > { %14544 = vst [vmem:[#allocation135_spill] sm:$0xff] %v10863_v2  ;;  %14545 = vst [vmem:[#allocation136_spill] sm:$0xff] %v10865_v26  ;;  %v1367_v2 = vld [vmem:[%s10341_s11 + $0xf0] sm:$0xff]  ;;  %s9794_s11 = smov [#allocation5]  }
 0x1a2   : > { %v10867_v61 = vpop.f32.mrf.mxu0  ;;  %v10869_v7 = vpop.f32.mrf.mxu1 }
 0x1a3   : > { %14546 = vst [vmem:[#allocation137_spill] sm:$0xff] %v10867_v61  ;;  %14547 = vst [vmem:[#allocation138_spill] sm:$0xff] %v10869_v7 }
 0x1a4   : > { %v10871_v27 = vpop.f32.mrf.mxu0  ;;  %v10873_v9 = vpop.f32.mrf.mxu1  ;;  %8275 = vmatmul.mubr.msk.bf16.gmra.mxu0 %vm1433_vm2, %v1383_v63  ;;  %8291 = vmatmul.mubr.msk.bf16.gmra.mxu1 %vm1433_vm2, %v1383_v63 }
 0x1a5   : > { %14548 = vst [vmem:[#allocation139_spill] sm:$0xff] %v10871_v27  ;;  %14549 = vst [vmem:[#allocation140_spill] sm:$0xff] %v10873_v9  ;;  %1664 = vmatprep.mubr.bf16.mxu0 %v14437_v3  ;;  %1857 = vmatprep.mubr.bf16.mxu1 %v14437_v3  ;;  %v1384_v27 = vpack.c.bf16 %v1368_v6, %v1367_v2 }
 0x1a6   : > { %v10881_v26 = vpop.f32.mrf.mxu0  ;;  %v10883_v60 = vpop.f32.mrf.mxu1 }
 0x1a7   : > { %14550 = vst [vmem:[#allocation141_spill] sm:$0xff] %v10881_v26  ;;  %14551 = vst [vmem:[#allocation142_spill] sm:$0xff] %v10883_v60 }
 0x1a8   : > { %v10885_v8 = vpop.f32.mrf.mxu0  ;;  %v10887_v7 = vpop.f32.mrf.mxu1 }
 0x1a9   : > { %14552 = vst [vmem:[#allocation143_spill] sm:$0xff] %v10885_v8  ;;  %14553 = vst [vmem:[#allocation144_spill] sm:$0xff] %v10887_v7 }
 0x1aa   : > { %v10889_v9 = vpop.f32.mrf.mxu0  ;;  %v10891_v61 = vpop.f32.mrf.mxu1 }
 0x1ab   : > { %14554 = vst [vmem:[#allocation145_spill] sm:$0xff] %v10889_v9  ;;  %14555 = vst [vmem:[#allocation146_spill] sm:$0xff] %v10891_v61 }
 0x1ac   : > { %v10893_v63 = vpop.f32.mrf.mxu0  ;;  %v10895_v0 = vpop.f32.mrf.mxu1  ;;  %8276 = vmatmul.mubr.msk.bf16.gmra.mxu0 %vm1433_vm2, %v1384_v27  ;;  %8292 = vmatmul.mubr.msk.bf16.gmra.mxu1 %vm1433_vm2, %v1384_v27 }
 0x1ad   : > { %14556 = vst [vmem:[#allocation147_spill] sm:$0xff] %v10893_v63  ;;  %14557 = vst [vmem:[#allocation148_spill] sm:$0xff] %v10895_v0 }
 0x1ae   : > { %v10899_v26 = vpop.f32.mrf.mxu0  ;;  %v10901_v60 = vpop.f32.mrf.mxu1 }
 0x1af   : > { %14558 = vst [vmem:[#allocation149_spill] sm:$0xff] %v10899_v26  ;;  %14559 = vst [vmem:[#allocation150_spill] sm:$0xff] %v10901_v60 }
 0x1b0   : > { %v10903_v8 = vpop.f32.mrf.mxu0  ;;  %v10905_v7 = vpop.f32.mrf.mxu1 }
 0x1b1   : > { %14560 = vst [vmem:[#allocation151_spill] sm:$0xff] %v10903_v8  ;;  %14561 = vst [vmem:[#allocation152_spill] sm:$0xff] %v10905_v7 }
 0x1b2   : > { %v10907_v6 = vpop.f32.mrf.mxu0  ;;  %v10909_v2 = vpop.f32.mrf.mxu1 }
 0x1b3   : > { %14562 = vst [vmem:[#allocation153_spill] sm:$0xff] %v10907_v6  ;;  %14563 = vst [vmem:[#allocation154_spill] sm:$0xff] %v10909_v2 }
 0x1b4   : > { %v10911_v61 = vpop.f32.mrf.mxu0  ;;  %v10913_v63 = vpop.f32.mrf.mxu1 }
 0x1b5   : > { %14564 = vst [vmem:[#allocation155_spill] sm:$0xff] %v10911_v61  ;;  %14565 = vst [vmem:[#allocation156_spill] sm:$0xff] %v10913_v63 }
 0x1b6   : > { %v10915_v0 = vpop.f32.mrf.mxu0  ;;  %v10917_v9 = vpop.f32.mrf.mxu1 }
 0x1b7   : > { %14566 = vst [vmem:[#allocation157_spill] sm:$0xff] %v10915_v0  ;;  %14567 = vst [vmem:[#allocation158_spill] sm:$0xff] %v10917_v9 }
 0x1b8   : > { %v10919_v27 = vpop.f32.mrf.mxu0  ;;  %v10921_v26 = vpop.f32.mrf.mxu1 }
 0x1b9   : > { %14568 = vst [vmem:[#allocation159_spill] sm:$0xff] %v10919_v27  ;;  %14569 = vst [vmem:[#allocation160_spill] sm:$0xff] %v10921_v26 }
 0x1ba   : > { %v10923_v60 = vpop.f32.mrf.mxu0  ;;  %v10925_v8 = vpop.f32.mrf.mxu1 }
 0x1bb   : > { %14570 = vst [vmem:[#allocation161_spill] sm:$0xff] %v10923_v60  ;;  %14571 = vst [vmem:[#allocation162_spill] sm:$0xff] %v10925_v8 }
 0x1bc   : > { %v10927_v7 = vpop.f32.mrf.mxu0  ;;  %v10929_v6 = vpop.f32.mrf.mxu1 }
 0x1bd   : > { %14572 = vst [vmem:[#allocation163_spill] sm:$0xff] %v10927_v7  ;;  %14573 = vst [vmem:[#allocation164_spill] sm:$0xff] %v10929_v6 }
 0x1be   : > { %v10931_v2 = vpop.f32.mrf.mxu0  ;;  %v10933_v61 = vpop.f32.mrf.mxu1 }
 0x1bf   : > { %14574 = vst [vmem:[#allocation165_spill] sm:$0xff] %v10931_v2  ;;  %14575 = vst [vmem:[#allocation166_spill] sm:$0xff] %v10933_v61 }
 0x1c0   : > { %v10935_v63 = vpop.f32.mrf.mxu0  ;;  %v10937_v0 = vpop.f32.mrf.mxu1 }
 0x1c1   : > { %14576 = vst [vmem:[#allocation167_spill] sm:$0xff] %v10935_v63  ;;  %14577 = vst [vmem:[#allocation168_spill] sm:$0xff] %v10937_v0 }
 0x1c2   : > { %v10939_v9 = vpop.f32.mrf.mxu0  ;;  %v10941_v27 = vpop.f32.mrf.mxu1 }
 0x1c3   : > { %14578 = vst [vmem:[#allocation169_spill] sm:$0xff] %v10939_v9  ;;  %14579 = vst [vmem:[#allocation170_spill] sm:$0xff] %v10941_v27 }
 0x1c4   : > { %v10943_v26 = vpop.f32.mrf.mxu0  ;;  %v10945_v60 = vpop.f32.mrf.mxu1 }
 0x1c5   : > { %14580 = vst [vmem:[#allocation171_spill] sm:$0xff] %v10943_v26  ;;  %14581 = vst [vmem:[#allocation172_spill] sm:$0xff] %v10945_v60 }
 0x1c6   : > { %v10947_v8 = vpop.f32.mrf.mxu0  ;;  %v10949_v7 = vpop.f32.mrf.mxu1 }
 0x1c7   : > { %14582 = vst [vmem:[#allocation173_spill] sm:$0xff] %v10947_v8  ;;  %14583 = vst [vmem:[#allocation174_spill] sm:$0xff] %v10949_v7 }
 0x1c8   : > { %v10951_v6 = vpop.f32.mrf.mxu0  ;;  %v10953_v2 = vpop.f32.mrf.mxu1 }
 0x1c9   : > { %14584 = vst [vmem:[#allocation175_spill] sm:$0xff] %v10951_v6  ;;  %14585 = vst [vmem:[#allocation176_spill] sm:$0xff] %v10953_v2 }
 0x1ca   : > { %v10955_v61 = vpop.f32.mrf.mxu0  ;;  %v10957_v63 = vpop.f32.mrf.mxu1 }
 0x1cb   : > { %14586 = vst [vmem:[#allocation177_spill] sm:$0xff] %v10955_v61  ;;  %14587 = vst [vmem:[#allocation178_spill] sm:$0xff] %v10957_v63 }
 0x1cc   : > { %v10959_v0 = vpop.f32.mrf.mxu0  ;;  %v10961_v9 = vpop.f32.mrf.mxu1 }
 0x1cd   : > { %14588 = vst [vmem:[#allocation179_spill] sm:$0xff] %v10959_v0  ;;  %14589 = vst [vmem:[#allocation180_spill] sm:$0xff] %v10961_v9 }
 0x1ce   : > { %v10963_v27 = vpop.f32.mrf.mxu0  ;;  %v10965_v26 = vpop.f32.mrf.mxu1 }
 0x1cf   : > { %14590 = vst [vmem:[#allocation181_spill] sm:$0xff] %v10963_v27  ;;  %14591 = vst [vmem:[#allocation182_spill] sm:$0xff] %v10965_v26 }
 0x1d0   : > { %v10967_v60 = vpop.f32.mrf.mxu0  ;;  %v10969_v8 = vpop.f32.mrf.mxu1 }
 0x1d1   : > { %14592 = vst [vmem:[#allocation183_spill] sm:$0xff] %v10967_v60  ;;  %14593 = vst [vmem:[#allocation184_spill] sm:$0xff] %v10969_v8 }
 0x1d2   : > { %v10971_v7 = vpop.f32.mrf.mxu0  ;;  %v10973_v6 = vpop.f32.mrf.mxu1 }
 0x1d3   : > { %14594 = vst [vmem:[#allocation185_spill] sm:$0xff] %v10971_v7  ;;  %14595 = vst [vmem:[#allocation186_spill] sm:$0xff] %v10973_v6 }
 0x1d4   : > { %v10975_v2 = vpop.f32.mrf.mxu0  ;;  %v10977_v61 = vpop.f32.mrf.mxu1 }
 0x1d5   : > { %14596 = vst [vmem:[#allocation187_spill] sm:$0xff] %v10975_v2  ;;  %14597 = vst [vmem:[#allocation188_spill] sm:$0xff] %v10977_v61 }
 0x1d6   : > { %v10979_v63 = vpop.f32.mrf.mxu0  ;;  %v10981_v0 = vpop.f32.mrf.mxu1 }
 0x1d7   : > { %14598 = vst [vmem:[#allocation189_spill] sm:$0xff] %v10979_v63  ;;  %14599 = vst [vmem:[#allocation190_spill] sm:$0xff] %v10981_v0 }
 0x1d8   : > { %v10983_v9 = vpop.f32.mrf.mxu0  ;;  %v10985_v27 = vpop.f32.mrf.mxu1 }
 0x1d9   : > { %14600 = vst [vmem:[#allocation191_spill] sm:$0xff] %v10983_v9  ;;  %14601 = vst [vmem:[#allocation192_spill] sm:$0xff] %v10985_v27 }
 0x1da   : > { %v10987_v26 = vpop.f32.mrf.mxu0  ;;  %v10989_v60 = vpop.f32.mrf.mxu1 }
 0x1db   : > { %14602 = vst [vmem:[#allocation193_spill] sm:$0xff] %v10987_v26  ;;  %14603 = vst [vmem:[#allocation194_spill] sm:$0xff] %v10989_v60 }
 0x1dc   : > { %v10991_v8 = vpop.f32.mrf.mxu0  ;;  %v10993_v7 = vpop.f32.mrf.mxu1 }
 0x1dd   : > { %14604 = vst [vmem:[#allocation195_spill] sm:$0xff] %v10991_v8  ;;  %14605 = vst [vmem:[#allocation196_spill] sm:$0xff] %v10993_v7 }
 0x1de   : > { %v10995_v6 = vpop.f32.mrf.mxu0  ;;  %v10997_v2 = vpop.f32.mrf.mxu1 }
 0x1df   : > { %14606 = vst [vmem:[#allocation197_spill] sm:$0xff] %v10995_v6  ;;  %14607 = vst [vmem:[#allocation198_spill] sm:$0xff] %v10997_v2 }
 0x1e0   : > { %v10999_v61 = vpop.f32.mrf.mxu0  ;;  %v11001_v63 = vpop.f32.mrf.mxu1 }
 0x1e1   : > { %14608 = vst [vmem:[#allocation199_spill] sm:$0xff] %v10999_v61  ;;  %14609 = vst [vmem:[#allocation200_spill] sm:$0xff] %v11001_v63 }
 0x1e2   : > { %v11003_v0 = vpop.f32.mrf.mxu0  ;;  %v11005_v9 = vpop.f32.mrf.mxu1 }
 0x1e3   : > { %14610 = vst [vmem:[#allocation201_spill] sm:$0xff] %v11003_v0  ;;  %14611 = vst [vmem:[#allocation202_spill] sm:$0xff] %v11005_v9 }
 0x1e4   : > { %v11007_v27 = vpop.f32.mrf.mxu0  ;;  %v11009_v26 = vpop.f32.mrf.mxu1 }
 0x1e5   : > { %14612 = vst [vmem:[#allocation203_spill] sm:$0xff] %v11007_v27  ;;  %14613 = vst [vmem:[#allocation204_spill] sm:$0xff] %v11009_v26 }
 0x1e6   : > { %v11011_v60 = vpop.f32.mrf.mxu0  ;;  %v11013_v8 = vpop.f32.mrf.mxu1 }
 0x1e7   : > { %14614 = vst [vmem:[#allocation205_spill] sm:$0xff] %v11011_v60  ;;  %14615 = vst [vmem:[#allocation206_spill] sm:$0xff] %v11013_v8 }
 0x1e8   : > { %v11015_v7 = vpop.f32.mrf.mxu0  ;;  %v11017_v6 = vpop.f32.mrf.mxu1 }
 0x1e9   : > { %14616 = vst [vmem:[#allocation207_spill] sm:$0xff] %v11015_v7  ;;  %14617 = vst [vmem:[#allocation208_spill] sm:$0xff] %v11017_v6 }
 0x1ea   : > { %v11019_v2 = vpop.f32.mrf.mxu0  ;;  %v11021_v61 = vpop.f32.mrf.mxu1 }
 0x1eb   : > { %14618 = vst [vmem:[#allocation209_spill] sm:$0xff] %v11019_v2  ;;  %14619 = vst [vmem:[#allocation210_spill] sm:$0xff] %v11021_v61 }
 0x1ec   : > { %v11023_v63 = vpop.f32.mrf.mxu0  ;;  %v11025_v0 = vpop.f32.mrf.mxu1 }
 0x1ed   : > { %14620 = vst [vmem:[#allocation211_spill] sm:$0xff] %v11023_v63  ;;  %14621 = vst [vmem:[#allocation212_spill] sm:$0xff] %v11025_v0 }
 0x1ee   : > { %v11027_v9 = vpop.f32.mrf.mxu0  ;;  %v11029_v27 = vpop.f32.mrf.mxu1 }
 0x1ef   : > { %14622 = vst [vmem:[#allocation213_spill] sm:$0xff] %v11027_v9  ;;  %14623 = vst [vmem:[#allocation214_spill] sm:$0xff] %v11029_v27 }
 0x1f0   : > { %v11031_v26 = vpop.f32.mrf.mxu0  ;;  %v11033_v60 = vpop.f32.mrf.mxu1 }
 0x1f1   : > { %14624 = vst [vmem:[#allocation215_spill] sm:$0xff] %v11031_v26  ;;  %14625 = vst [vmem:[#allocation216_spill] sm:$0xff] %v11033_v60 }
 0x1f2   : > { %v11035_v8 = vpop.f32.mrf.mxu0  ;;  %v11037_v7 = vpop.f32.mrf.mxu1 }
 0x1f3   : > { %14626 = vst [vmem:[#allocation217_spill] sm:$0xff] %v11035_v8  ;;  %14627 = vst [vmem:[#allocation218_spill] sm:$0xff] %v11037_v7 }
 0x1f4   : > { %v1516_v6 = vpop.f32.mrf.mxu0  ;;  %v1709_v2 = vpop.f32.mrf.mxu1 }
 0x1f5   : > { %v1517_v60 = vadd.f32 %v1516_v6, %v10181_v10  ;;  %v1710_v8 = vadd.f32 %v1709_v2, %v10183_v11 }
 0x1f6   : > { %v1518_v4 = vpop.f32.mrf.mxu0  ;;  %v1711_v61 = vpop.f32.mrf.mxu1 }
 0x1f7   : > { %v1519_v0 = vadd.f32 %v1518_v4, %v10191_v12  ;;  %v1712_v9 = vadd.f32 %v1711_v61, %v10193_v13 }
 0x1f8   : > { %v1520_v1 = vpop.f32.mrf.mxu0  ;;  %v1713_v63 = vpop.f32.mrf.mxu1 }
 0x1f9   : > { %v1521_v27 = vadd.f32 %v1520_v1, %v10195_v14  ;;  %v1714_v26 = vadd.f32 %v1713_v63, %v10197_v15  ;;  %v1869_v4 = vmax.f32 %v1519_v0, 0.0  ;;  %v1871_v13 = vmax.f32 %v1712_v9, 0.0  ;;  %v9285_v0 = vld [vmem:[%s14360_s5 + $0xcc] ss:$16 sps:$4 sm:$0xff]  }
 0x1fa   : > { %v1522_v62 = vpop.f32.mrf.mxu0  ;;  %v1715_v7 = vpop.f32.mrf.mxu1  ;;  %v1868_v1 = vmax.f32 %v1517_v60, 0.0  ;;  %v1870_v15 = vmax.f32 %v1710_v8, 0.0 }
 0x1fb   : > { %v1523_v5 = vadd.f32 %v1522_v62, %v10199_v16  ;;  %v1716_v3 = vadd.f32 %v1715_v7, %v10201_v17  ;;  %v1872_v59 = vmax.f32 %v1521_v27, 0.0  ;;  %v1874_v58 = vmax.f32 %v1714_v26, 0.0  ;;  %v9277_v16 = vld [vmem:[%s14360_s5 + $0xe8] ss:$16 sps:$4 sm:$0xff]   ;;  %v9288_v7 = vld [vmem:[%s14360_s5 + $0x2cc] ss:$16 sps:$4 sm:$0xff]  }
 0x1fc   : > { %v1526_v53 = vpop.f32.mrf.mxu0  ;;  %v1719_v12 = vpop.f32.mrf.mxu1  ;;  %v9280_v17 = vld [vmem:[%s14360_s5 + $0x2e8] ss:$16 sps:$4 sm:$0xff]  }
 0x1fd   : > { %v1873_v61 = vmax.f32 %v1523_v5, 0.0  ;;  %v1875_v14 = vmax.f32 %v1716_v3, 0.0  ;;  %v11057_v62 = vpack.c.bf16 %v1872_v59, %v1868_v1  ;;  %v11059_v5 = vpack.c.bf16 %v1874_v58, %v1870_v15 }
 0x1fe   : > { %v1528_v63 = vpop.f32.mrf.mxu0  ;;  %v1721_v10 = vpop.f32.mrf.mxu1  ;;  %v1720_v58 = vadd.f32 %v1719_v12, %v10205_v19  ;;  %v9286_v12 = vld [vmem:[%s14360_s5 + $0x2c8] ss:$16 sps:$4 sm:$0xff]  }
 0x1ff   : > { %v11047_v6 = vpack.c.bf16 %v1873_v61, %v1869_v4  ;;  %v11049_v11 = vpack.c.bf16 %v1875_v14, %v1871_v13  ;;  %v1529_v3 = vadd.f32 %v1528_v63, %v10213_v20  ;;  %v1722_v60 = vadd.f32 %v1721_v10, %v10215_v21 }
 0x200   : > { %v1530_v26 = vpop.f32.mrf.mxu0  ;;  %v1723_v9 = vpop.f32.mrf.mxu1  ;;  %v1527_v20 = vadd.f32 %v1526_v53, %v10203_v18  ;;  %v1878_v15 = vmax.f32 %v1720_v58, 0.0 }
 0x201   : > { %v1531_v8 = vadd.f32 %v1530_v26, %v10217_v22  ;;  %v1724_v59 = vadd.f32 %v1723_v9, %v10219_v23  ;;  %2860 = vmatprep.mubr.bf16.mxu0 %v11047_v6  ;;  %3053 = vmatprep.mubr.bf16.mxu1 %v11049_v11  ;;  %v9283_v23 = vld [vmem:[%s14360_s5 + $0xc8] ss:$16 sps:$4 sm:$0xff]   ;;  %v1879_v13 = vmax.f32 %v1722_v60, 0.0 }
 0x202   : > { %v1532_v2 = vpop.f32.mrf.mxu0  ;;  %v1725_v27 = vpop.f32.mrf.mxu1  ;;  %2861 = vmatmul.mubr.bf16.vlgmr.msra.gmra.mxu0 %v11057_v62  ;;  %3054 = vmatmul.mubr.bf16.vlgmr.msra.gmra.mxu1 %v11059_v5  ;;  %v1876_v1 = vmax.f32 %v1527_v20, 0.0  ;;  %v9289_v26 = vld [vmem:[%s14360_s5 + $0xa8] ss:$16 sps:$4 sm:$0xff]   ;;  %v9297_v20 = vld [vmem:[%s14360_s5 + $0x8c] ss:$16 sps:$4 sm:$0xff]  }
 0x203   : > { %v1533_v21 = vadd.f32 %v1532_v2, %v10221_v24  ;;  %v1726_v22 = vadd.f32 %v1725_v27, %v10223_v25  ;;  %3215 = vmatpush1.bf16.msra.mxu0 %v9277_v16  ;;  %3408 = vmatpush1.bf16.msra.mxu1 %v9280_v17  ;;  %v1880_v4 = vmax.f32 %v1531_v8, 0.0  ;;  %v1882_v18 = vmax.f32 %v1724_v59, 0.0  ;;  %v9291_v24 = vld [vmem:[%s14360_s5 + $0xac] ss:$16 sps:$4 sm:$0xff]   ;;  %v9292_v59 = vld [vmem:[%s14360_s5 + $0x2a8] ss:$16 sps:$4 sm:$0xff]  }
 0x204   : > { %v1536_v53 = vpop.f32.mrf.mxu0  ;;  %v1729_v19 = vpop.f32.mrf.mxu1  ;;  %3216 = vmatprep.subr.bf16.mxu0 %v9285_v0  ;;  %3409 = vmatprep.subr.bf16.mxu1 %v9288_v7  ;;  %v1877_v25 = vmax.f32 %v1529_v3, 0.0  ;;  %v9294_v3 = vld [vmem:[%s14360_s5 + $0x2ac] ss:$16 sps:$4 sm:$0xff]  }
 0x205   : > { %v1881_v61 = vmax.f32 %v1533_v21, 0.0  ;;  %v1883_v14 = vmax.f32 %v1726_v22, 0.0  ;;  %v11098_v9 = vpack.c.bf16 %v1880_v4, %v1876_v1  ;;  %v11100_v0 = vpack.c.bf16 %v1882_v18, %v1878_v15 }
 0x206   : > { %v1538_v63 = vpop.f32.mrf.mxu0  ;;  %v1731_v10 = vpop.f32.mrf.mxu1  ;;  %v1537_v21 = vadd.f32 %v1536_v53, %v10231_v28  ;;  %v1730_v22 = vadd.f32 %v1729_v19, %v10233_v29  ;;  %v9298_v19 = vld [vmem:[%s14360_s5 + $0x288] ss:$16 sps:$4 sm:$0xff]  }
 0x207   : > { %v11088_v16 = vpack.c.bf16 %v1881_v61, %v1877_v25  ;;  %v11090_v17 = vpack.c.bf16 %v1883_v14, %v1879_v13  ;;  %3217 = vmatpush1.bf16.msra.mxu0 %v9283_v23  ;;  %v1539_v7 = vadd.f32 %v1538_v63, %v10241_v30  ;;  %3410 = vmatpush1.bf16.msra.mxu1 %v9286_v12  ;;  %v9300_v30 = vld [vmem:[%s14360_s5 + $0x28c] ss:$16 sps:$4 sm:$0xff]  }
 0x208   : > { %v1540_v60 = vpop.f32.mrf.mxu0  ;;  %v1733_v8 = vpop.f32.mrf.mxu1  ;;  %3218 = vmatprep.subr.bf16.mxu0 %v9291_v24  ;;  %v1732_v58 = vadd.f32 %v1731_v10, %v10243_v31  ;;  %3411 = vmatprep.subr.bf16.mxu1 %v9294_v3  ;;  %v1884_v13 = vmax.f32 %v1537_v21, 0.0  ;;  %v1886_v61 = vmax.f32 %v1730_v22, 0.0  ;;  %v9301_v10 = vld [vmem:[%s14360_s5 + $0x68] ss:$16 sps:$4 sm:$0xff]  }
 0x209   : > { %v1541_v2 = vadd.f32 %v1540_v60, %v10245_v32  ;;  %v1734_v27 = vadd.f32 %v1733_v8, %v10247_v33  ;;  %2870 = vmatprep.mubr.bf16.mxu0 %v11088_v16  ;;  %3063 = vmatprep.mubr.bf16.mxu1 %v11090_v17  ;;  %v9295_v33 = vld [vmem:[%s14360_s5 + $0x88] ss:$16 sps:$4 sm:$0xff]  }
 0x20a   : > { %v1542_v23 = vpop.f32.mrf.mxu0  ;;  %v1735_v4 = vpop.f32.mrf.mxu1  ;;  %2871 = vmatmul.mubr.bf16.gmra.mxu0 %v11098_v9  ;;  %3064 = vmatmul.mubr.bf16.gmra.mxu1 %v11100_v0  ;;  %v1887_v12 = vmax.f32 %v1732_v58, 0.0  ;;  %v9309_v58 = vld [vmem:[%s14360_s5 + $0x4c] ss:$16 sps:$4 sm:$0xff]  }
 0x20b   : > { %v1543_v31 = vadd.f32 %v1542_v23, %v10249_v34  ;;  %v1736_v32 = vadd.f32 %v1735_v4, %v10251_v35  ;;  %3219 = vmatpush1.bf16.msra.mxu0 %v9289_v26  ;;  %v1888_v18 = vmax.f32 %v1541_v2, 0.0  ;;  %v1890_v28 = vmax.f32 %v1734_v27, 0.0  ;;  %3412 = vmatpush1.bf16.msra.mxu1 %v9292_v59  ;;  %v9303_v34 = vld [vmem:[%s14360_s5 + $0x6c] ss:$16 sps:$4 sm:$0xff]  }
 0x20c   : > { %v1546_v53 = vpop.f32.mrf.mxu0  ;;  %v1739_v29 = vpop.f32.mrf.mxu1  ;;  %3220 = vmatprep.subr.bf16.mxu0 %v9297_v20  ;;  %v1885_v35 = vmax.f32 %v1539_v7, 0.0  ;;  %3413 = vmatprep.subr.bf16.mxu1 %v9300_v30  ;;  %v9306_v26 = vld [vmem:[%s14360_s5 + $0x26c] ss:$16 sps:$4 sm:$0xff]   ;;  %v9304_v20 = vld [vmem:[%s14360_s5 + $0x268] ss:$16 sps:$4 sm:$0xff]  }
 0x20d   : > { %v1889_v24 = vmax.f32 %v1543_v31, 0.0  ;;  %v1891_v25 = vmax.f32 %v1736_v32, 0.0  ;;  %v11142_v3 = vpack.c.bf16 %v1888_v18, %v1884_v13  ;;  %v11144_v7 = vpack.c.bf16 %v1890_v28, %v1886_v61  ;;  %v9318_v13 = vld [vmem:[%s14360_s5 + $0x22c] ss:$16 sps:$4 sm:$0xff]  }
 0x20e   : > { %v1548_v14 = vpop.f32.mrf.mxu0  ;;  %v1741_v1 = vpop.f32.mrf.mxu1  ;;  %v1547_v21 = vadd.f32 %v1546_v53, %v10253_v36  ;;  %v1740_v22 = vadd.f32 %v1739_v29, %v10255_v37 }
 0x20f   : > { %v11132_v15 = vpack.c.bf16 %v1889_v24, %v1885_v35  ;;  %v11134_v63 = vpack.c.bf16 %v1891_v25, %v1887_v12  ;;  %3221 = vmatpush1.bf16.msra.mxu0 %v9295_v33  ;;  %v1549_v60 = vadd.f32 %v1548_v14, %v10263_v38  ;;  %3414 = vmatpush1.bf16.msra.mxu1 %v9298_v19  ;;  %v9312_v38 = vld [vmem:[%s14360_s5 + $0x24c] ss:$16 sps:$4 sm:$0xff]   ;;  %v9310_v33 = vld [vmem:[%s14360_s5 + $0x248] ss:$16 sps:$4 sm:$0xff]  }
 0x210   : > { %v1550_v8 = vpop.f32.mrf.mxu0  ;;  %v1743_v59 = vpop.f32.mrf.mxu1  ;;  %3222 = vmatprep.subr.bf16.mxu0 %v9303_v34  ;;  %v1742_v2 = vadd.f32 %v1741_v1, %v10265_v39  ;;  %3415 = vmatprep.subr.bf16.mxu1 %v9306_v26  ;;  %v1892_v29 = vmax.f32 %v1547_v21, 0.0  ;;  %v1894_v19 = vmax.f32 %v1740_v22, 0.0  ;;  %v9313_v25 = vld [vmem:[%s14360_s5 + $0x28] ss:$16 sps:$4 sm:$0xff]  }
 0x211   : > { %v1551_v27 = vadd.f32 %v1550_v8, %v10267_v40  ;;  %v1744_v30 = vadd.f32 %v1743_v59, %v10269_v41  ;;  %2880 = vmatprep.mubr.bf16.mxu0 %v11132_v15  ;;  %3073 = vmatprep.mubr.bf16.mxu1 %v11134_v63  ;;  %v9307_v41 = vld [vmem:[%s14360_s5 + $0x48] ss:$16 sps:$4 sm:$0xff]   ;;  %v9321_v8 = vld [vmem:[%s14360_s5 + $0xc] ss:$16 sps:$4 sm:$0xff]  }
 0x212   : > { %v1552_v23 = vpop.f32.mrf.mxu0  ;;  %v1745_v4 = vpop.f32.mrf.mxu1  ;;  %2881 = vmatmul.mubr.bf16.gmra.mxu0 %v11142_v3  ;;  %3074 = vmatmul.mubr.bf16.gmra.mxu1 %v11144_v7  ;;  %v1895_v18 = vmax.f32 %v1742_v2, 0.0 }
 0x213   : > { %v1553_v39 = vadd.f32 %v1552_v23, %v10271_v42  ;;  %v1746_v40 = vadd.f32 %v1745_v4, %v10273_v43  ;;  %3223 = vmatpush1.bf16.msra.mxu0 %v9301_v10  ;;  %v1896_v31 = vmax.f32 %v1551_v27, 0.0  ;;  %v1898_v36 = vmax.f32 %v1744_v30, 0.0  ;;  %3416 = vmatpush1.bf16.msra.mxu1 %v9304_v20  ;;  %v9315_v42 = vld [vmem:[%s14360_s5 + $0x2c] ss:$16 sps:$4 sm:$0xff]   ;;  %v9322_v23 = vld [vmem:[%s14360_s5 + $0x208] ss:$16 sps:$4 sm:$0xff]  }
 0x214   : > { %v1556_v32 = vpop.f32.mrf.mxu0  ;;  %v1749_v37 = vpop.f32.mrf.mxu1  ;;  %3224 = vmatprep.subr.bf16.mxu0 %v9309_v58  ;;  %v1893_v43 = vmax.f32 %v1549_v60, 0.0  ;;  %3417 = vmatprep.subr.bf16.mxu1 %v9312_v38  ;;  %v9316_v60 = vld [vmem:[%s14360_s5 + $0x228] ss:$16 sps:$4 sm:$0xff]  }
 0x215   : > { %v1897_v28 = vmax.f32 %v1553_v39, 0.0  ;;  %v1899_v53 = vmax.f32 %v1746_v40, 0.0  ;;  %v11186_v61 = vpack.c.bf16 %v1896_v31, %v1892_v29  ;;  %v11188_v14 = vpack.c.bf16 %v1898_v36, %v1894_v19 }
 0x216   : > { %v1558_v34 = vpop.f32.mrf.mxu0  ;;  %v1751_v35 = vpop.f32.mrf.mxu1  ;;  %v1557_v2 = vadd.f32 %v1556_v32, %v10275_v44  ;;  %v1750_v27 = vadd.f32 %v1749_v37, %v10277_v45 }
 0x217   : > { %v11176_v12 = vpack.c.bf16 %v1897_v28, %v1893_v43  ;;  %v11178_v24 = vpack.c.bf16 %v1899_v53, %v1895_v18  ;;  %3225 = vmatpush1.bf16.msra.mxu0 %v9307_v41  ;;  %v1559_v1 = vadd.f32 %v1558_v34, %v10285_v46  ;;  %3418 = vmatpush1.bf16.msra.mxu1 %v9310_v33  ;;  %v9324_v46 = vld [vmem:[%s14360_s5 + $0x20c] ss:$16 sps:$4 sm:$0xff]   ;;  %v9328_v34 = vld [vmem:[%s14360_s5 + $0x3e8] ss:$16 sps:$4 sm:$0xff]  }
 0x218   : > { %v1560_v10 = vpop.f32.mrf.mxu0  ;;  %v1753_v26 = vpop.f32.mrf.mxu1  ;;  %3226 = vmatprep.subr.bf16.mxu0 %v9315_v42  ;;  %v1752_v59 = vadd.f32 %v1751_v35, %v10287_v47  ;;  %3419 = vmatprep.subr.bf16.mxu1 %v9318_v13  ;;  %v1900_v41 = vmax.f32 %v1557_v2, 0.0  ;;  %v1902_v31 = vmax.f32 %v1750_v27, 0.0  ;;  %v9325_v42 = vld [vmem:[%s14360_s5 + $0x1e8] ss:$16 sps:$4 sm:$0xff]   ;;  %v9330_v43 = vld [vmem:[%s14360_s5 + $0x3ec] ss:$16 sps:$4 sm:$0xff]  }
 0x219   : > { %v1561_v20 = vadd.f32 %v1560_v10, %v10289_v48  ;;  %v1754_v58 = vadd.f32 %v1753_v26, %v10291_v49  ;;  %2890 = vmatprep.mubr.bf16.mxu0 %v11176_v12  ;;  %3083 = vmatprep.mubr.bf16.mxu1 %v11178_v24  ;;  %v9319_v49 = vld [vmem:[%s14360_s5 + $0x8] ss:$16 sps:$4 sm:$0xff]   ;;  %v9333_v35 = vld [vmem:[%s14360_s5 + $0x1cc] ss:$16 sps:$4 sm:$0xff]   ;;  %v14628_v26 = vld [vmem:[#allocation8_spill] sm:$0xff] }
 0x21a   : > { %v1562_v30 = vpop.f32.mrf.mxu0  ;;  %v1755_v38 = vpop.f32.mrf.mxu1  ;;  %2891 = vmatmul.mubr.bf16.gmra.mxu0 %v11186_v61  ;;  %3084 = vmatmul.mubr.bf16.gmra.mxu1 %v11188_v14  ;;  %v1903_v4 = vmax.f32 %v1752_v59, 0.0 }
 0x21b   : > { %v1563_v47 = vadd.f32 %v1562_v30, %v10293_v50  ;;  %v1756_v48 = vadd.f32 %v1755_v38, %v10295_v51  ;;  %3227 = vmatpush1.bf16.msra.mxu0 %v9313_v25  ;;  %v1904_v21 = vmax.f32 %v1561_v20, 0.0  ;;  %v1906_v44 = vmax.f32 %v1754_v58, 0.0  ;;  %3420 = vmatpush1.bf16.msra.mxu1 %v9316_v60  ;;  %v9327_v50 = vld [vmem:[%s14360_s5 + $0x1ec] ss:$16 sps:$4 sm:$0xff]   ;;  %v9331_v58 = vld [vmem:[%s14360_s5 + $0x1c8] ss:$16 sps:$4 sm:$0xff]  }
 0x21c   : > { %v1566_v22 = vpop.f32.mrf.mxu0  ;;  %v1759_v45 = vpop.f32.mrf.mxu1  ;;  %3228 = vmatprep.subr.bf16.mxu0 %v9321_v8  ;;  %v1901_v51 = vmax.f32 %v1559_v1, 0.0  ;;  %3421 = vmatprep.subr.bf16.mxu1 %v9324_v46  ;;  %v9334_v30 = vld [vmem:[%s14360_s5 + $0x3c8] ss:$16 sps:$4 sm:$0xff]   ;;  %v9339_v38 = vld [vmem:[%s14360_s5 + $0x1ac] ss:$16 sps:$4 sm:$0xff]  }
 0x21d   : > { %v1905_v39 = vmax.f32 %v1563_v47, 0.0  ;;  %v1907_v40 = vmax.f32 %v1756_v48, 0.0  ;;  %v11230_v18 = vpack.c.bf16 %v1904_v21, %v1900_v41  ;;  %v11232_v28 = vpack.c.bf16 %v1906_v44, %v1902_v31  ;;  %v14631_v31 = vld [vmem:[#allocation13_spill] sm:$0xff] }
 0x21e   : > { %v1568_v36 = vpop.f32.mrf.mxu0  ;;  %v1761_v32 = vpop.f32.mrf.mxu1  ;;  %v1567_v10 = vadd.f32 %v1566_v22, %v10297_v52  ;;  %v1760_v60 = vadd.f32 %v1759_v45, %v14628_v26  ;;  %v14636_v26 = vld [vmem:[#allocation12_spill] sm:$0xff] }
 0x21f   : > { %v11220_v37 = vpack.c.bf16 %v1905_v39, %v1901_v51  ;;  %v11222_v33 = vpack.c.bf16 %v1907_v40, %v1903_v4  ;;  %3229 = vmatpush1.bf16.msra.mxu0 %v9319_v49  ;;  %v1569_v53 = vadd.f32 %v1568_v36, %v10307_v54  ;;  %3422 = vmatpush1.bf16.msra.mxu1 %v9322_v23  ;;  %v9336_v54 = vld [vmem:[%s14360_s5 + $0x3cc] ss:$16 sps:$4 sm:$0xff]   ;;  %v9337_v4 = vld [vmem:[%s14360_s5 + $0x1a8] ss:$16 sps:$4 sm:$0xff]  }
 0x220   : > { %v1570_v29 = vpop.f32.mrf.mxu0  ;;  %v1763_v19 = vpop.f32.mrf.mxu1  ;;  %3230 = vmatprep.subr.bf16.mxu0 %v9327_v50  ;;  %v1762_v25 = vadd.f32 %v1761_v32, %v10309_v55  ;;  %v14629_v55 = vld [vmem:[#allocation9_spill] sm:$0xff]  ;;  %3423 = vmatprep.subr.bf16.mxu1 %v9330_v43  ;;  %v1908_v44 = vmax.f32 %v1567_v10, 0.0  ;;  %v1910_v22 = vmax.f32 %v1760_v60, 0.0 }
 0x221   : > { %v1571_v13 = vadd.f32 %v1570_v29, %v10311_v56  ;;  %v1764_v1 = vadd.f32 %v1763_v19, %v10313_v57  ;;  %2900 = vmatprep.mubr.bf16.mxu0 %v11220_v37  ;;  %3093 = vmatprep.mubr.bf16.mxu1 %v11222_v33  ;;  %v14630_v57 = vld [vmem:[#allocation10_spill] sm:$0xff]  ;;  %v1909_v47 = vmax.f32 %v1569_v53, 0.0  ;;  %v9342_v39 = vld [vmem:[%s14360_s5 + $0x3ac] ss:$16 sps:$4 sm:$0xff]   ;;  %v9340_v43 = vld [vmem:[%s14360_s5 + $0x3a8] ss:$16 sps:$4 sm:$0xff]  }
 0x222   : > { %v1572_v8 = vpop.f32.mrf.mxu0  ;;  %v1765_v59 = vpop.f32.mrf.mxu1  ;;  %2901 = vmatmul.mubr.bf16.gmra.mxu0 %v11230_v18  ;;  %3094 = vmatmul.mubr.bf16.gmra.mxu1 %v11232_v28  ;;  %v1911_v48 = vmax.f32 %v1762_v25, 0.0  ;;  %v9345_v53 = vld [vmem:[%s14360_s5 + $0x18c] ss:$16 sps:$4 sm:$0xff]   ;;  %v14632_v29 = vld [vmem:[#allocation14_spill] sm:$0xff]  ;;  %v14634_v25 = vld [vmem:[#allocation16_spill] sm:$0xff] }
 0x223   : > { %v1573_v56 = vadd.f32 %v1572_v8, %v14629_v55  ;;  %v1766_v20 = vadd.f32 %v1765_v59, %v14630_v57  ;;  %3231 = vmatpush2.bf16.msra.mxu0 %v9325_v42  ;;  %v1912_v46 = vmax.f32 %v1571_v13, 0.0  ;;  %v1914_v52 = vmax.f32 %v1764_v1, 0.0  ;;  %3424 = vmatpush2.bf16.msra.mxu1 %v9328_v34  ;;  %v14633_v34 = vld [vmem:[#allocation15_spill] sm:$0xff]  ;;  %v14637_v55 = vld [vmem:[#allocation17_spill] sm:$0xff]  ;;  %v14638_v57 = vld [vmem:[#allocation18_spill] sm:$0xff] }
 0x224   : > { %v1576_v2 = vpop.f32.mrf.mxu0  ;;  %v1769_v27 = vpop.f32.mrf.mxu1  ;;  %3232 = vmatprep.subr.bf16.mxu0 %v9333_v35  ;;  %3425 = vmatprep.subr.bf16.mxu1 %v9336_v54  ;;  %v9348_v1 = vld [vmem:[%s14360_s5 + $0x38c] ss:$16 sps:$4 sm:$0xff]  }
 0x225   : > { %v1913_v49 = vmax.f32 %v1573_v56, 0.0  ;;  %v1915_v21 = vmax.f32 %v1766_v20, 0.0  ;;  %v11274_v40 = vpack.c.bf16 %v1912_v46, %v1908_v44  ;;  %v11276_v41 = vpack.c.bf16 %v1914_v52, %v1910_v22  ;;  %v14635_v54 = vld [vmem:[#allocation11_spill] sm:$0xff] }
 0x226   : > { %v1578_v45 = vpop.f32.mrf.mxu0  ;;  %v1771_v23 = vpop.f32.mrf.mxu1  ;;  %v1577_v10 = vadd.f32 %v1576_v2, %v14635_v54  ;;  %v1770_v60 = vadd.f32 %v1769_v27, %v14636_v26 }
 0x227   : > { %v11264_v50 = vpack.c.bf16 %v1913_v49, %v1909_v47  ;;  %v11266_v51 = vpack.c.bf16 %v1915_v21, %v1911_v48  ;;  %3233 = vmatpush2.bf16.msra.mxu0 %v9331_v58  ;;  %v1579_v36 = vadd.f32 %v1578_v45, %v14631_v31  ;;  %3426 = vmatpush2.bf16.msra.mxu1 %v9334_v30  ;;  %v9343_v58 = vld [vmem:[%s14360_s5 + $0x188] ss:$16 sps:$4 sm:$0xff]  }
 0x228   : > { %v1580_v32 = vpop.f32.mrf.mxu0  ;;  %v1773_v42 = vpop.f32.mrf.mxu1  ;;  %3234 = vmatprep.subr.bf16.mxu0 %v9339_v38  ;;  %v1772_v19 = vadd.f32 %v1771_v23, %v14632_v29  ;;  %3427 = vmatprep.subr.bf16.mxu1 %v9342_v39  ;;  %v9346_v30 = vld [vmem:[%s14360_s5 + $0x388] ss:$16 sps:$4 sm:$0xff]   ;;  %v9351_v38 = vld [vmem:[%s14360_s5 + $0x16c] ss:$16 sps:$4 sm:$0xff]   ;;  %v1916_v44 = vmax.f32 %v1577_v10, 0.0  ;;  %v1918_v22 = vmax.f32 %v1770_v60, 0.0 }
 0x229   : > { %v1581_v35 = vadd.f32 %v1580_v32, %v14633_v34  ;;  %v1774_v13 = vadd.f32 %v1773_v42, %v14634_v25  ;;  %2910 = vmatprep.mubr.bf16.mxu0 %v11264_v50  ;;  %3103 = vmatprep.mubr.bf16.mxu1 %v11266_v51  ;;  %v1917_v47 = vmax.f32 %v1579_v36, 0.0  ;;  %v9349_v31 = vld [vmem:[%s14360_s5 + $0x168] ss:$16 sps:$4 sm:$0xff]   ;;  %v9354_v36 = vld [vmem:[%s14360_s5 + $0x36c] ss:$16 sps:$4 sm:$0xff]   ;;  %v14640_v25 = vld [vmem:[#allocation22_spill] sm:$0xff] }
 0x22a   : > { %v1582_v8 = vpop.f32.mrf.mxu0  ;;  %v1775_v59 = vpop.f32.mrf.mxu1  ;;  %2911 = vmatmul.mubr.bf16.gmra.mxu0 %v11274_v40  ;;  %3104 = vmatmul.mubr.bf16.gmra.mxu1 %v11276_v41  ;;  %v1919_v48 = vmax.f32 %v1772_v19, 0.0  ;;  %v9352_v34 = vld [vmem:[%s14360_s5 + $0x368] ss:$16 sps:$4 sm:$0xff]   ;;  %v14642_v10 = vld [vmem:[#allocation24_spill] sm:$0xff]  ;;  %v9360_v60 = vld [vmem:[%s14360_s5 + $0x34c] ss:$16 sps:$4 sm:$0xff]  }
 0x22b   : > { %v1583_v56 = vadd.f32 %v1582_v8, %v14637_v55  ;;  %v1776_v20 = vadd.f32 %v1775_v59, %v14638_v57  ;;  %3235 = vmatpush2.bf16.msra.mxu0 %v9337_v4  ;;  %v1920_v46 = vmax.f32 %v1581_v35, 0.0  ;;  %v1922_v52 = vmax.f32 %v1774_v13, 0.0  ;;  %3428 = vmatpush2.bf16.msra.mxu1 %v9340_v43  ;;  %v14639_v43 = vld [vmem:[#allocation21_spill] sm:$0xff]  ;;  %v14643_v8 = vld [vmem:[#allocation19_spill] sm:$0xff]  ;;  %v14644_v55 = vld [vmem:[#allocation20_spill] sm:$0xff] }
 0x22c   : > { %v1586_v2 = vpop.f32.mrf.mxu0  ;;  %v1779_v27 = vpop.f32.mrf.mxu1  ;;  %3236 = vmatprep.subr.bf16.mxu0 %v9345_v53  ;;  %3429 = vmatprep.subr.bf16.mxu1 %v9348_v1  ;;  %v9357_v35 = vld [vmem:[%s14360_s5 + $0x14c] ss:$16 sps:$4 sm:$0xff]  }
 0x22d   : > { %v1921_v49 = vmax.f32 %v1583_v56, 0.0  ;;  %v1923_v21 = vmax.f32 %v1776_v20, 0.0  ;;  %v11318_v32 = vpack.c.bf16 %v1920_v46, %v1916_v44  ;;  %v11320_v42 = vpack.c.bf16 %v1922_v52, %v1918_v22  ;;  %v14641_v1 = vld [vmem:[#allocation23_spill] sm:$0xff]  ;;  %v14646_v52 = vld [vmem:[#allocation26_spill] sm:$0xff] }
 0x22e   : > { %v1588_v45 = vpop.f32.mrf.mxu0  ;;  %v1781_v23 = vpop.f32.mrf.mxu1  ;;  %v1587_v59 = vadd.f32 %v1586_v2, %v14643_v8  ;;  %v1780_v56 = vadd.f32 %v1779_v27, %v14644_v55  ;;  %v9369_v8 = vld [vmem:[%s14360_s5 + $0x10c] ss:$16 sps:$4 sm:$0xff]  }
 0x22f   : > { %v11308_v4 = vpack.c.bf16 %v1921_v49, %v1917_v47  ;;  %v11310_v39 = vpack.c.bf16 %v1923_v21, %v1919_v48  ;;  %3237 = vmatpush2.bf16.msra.mxu0 %v9343_v58  ;;  %v1589_v53 = vadd.f32 %v1588_v45, %v14639_v43  ;;  %3430 = vmatpush2.bf16.msra.mxu1 %v9346_v30  ;;  %v14645_v58 = vld [vmem:[#allocation25_spill] sm:$0xff] }
 0x230   : > { %v1590_v29 = vpop.f32.mrf.mxu0  ;;  %v1783_v19 = vpop.f32.mrf.mxu1  ;;  %3238 = vmatprep.subr.bf16.mxu0 %v9351_v38  ;;  %v1782_v13 = vadd.f32 %v1781_v23, %v14640_v25  ;;  %3431 = vmatprep.subr.bf16.mxu1 %v9354_v36  ;;  %v9355_v38 = vld [vmem:[%s14360_s5 + $0x148] ss:$16 sps:$4 sm:$0xff]   ;;  %v9363_v21 = vld [vmem:[%s14360_s5 + $0x12c] ss:$16 sps:$4 sm:$0xff]   ;;  %v1926_v36 = vmax.f32 %v1780_v56, 0.0 }
 0x231   : > { %v1591_v54 = vadd.f32 %v1590_v29, %v14641_v1  ;;  %v1784_v26 = vadd.f32 %v1783_v19, %v14642_v10  ;;  %2920 = vmatprep.mubr.bf16.mxu0 %v11308_v4  ;;  %3113 = vmatprep.mubr.bf16.mxu1 %v11310_v39  ;;  %v9358_v49 = vld [vmem:[%s14360_s5 + $0x348] ss:$16 sps:$4 sm:$0xff]   ;;  %v1925_v44 = vmax.f32 %v1589_v53, 0.0  ;;  %v9366_v53 = vld [vmem:[%s14360_s5 + $0x32c] ss:$16 sps:$4 sm:$0xff]  }
 0x232   : > { %v1592_v57 = vpop.f32.mrf.mxu0  ;;  %v1785_v20 = vpop.f32.mrf.mxu1  ;;  %2921 = vmatmul.mubr.bf16.gmra.mxu0 %v11318_v32  ;;  %3114 = vmatmul.mubr.bf16.gmra.mxu1 %v11320_v42  ;;  %v1927_v22 = vmax.f32 %v1782_v13, 0.0  ;;  %v14647_v1 = vld [vmem:[#allocation29_spill] sm:$0xff]  ;;  %v14649_v56 = vld [vmem:[#allocation31_spill] sm:$0xff] }
 0x233   : > { %v1593_v46 = vadd.f32 %v1592_v57, %v14645_v58  ;;  %v1786_v30 = vadd.f32 %v1785_v20, %v14646_v52  ;;  %3239 = vmatpush2.bf16.msra.mxu0 %v9349_v31  ;;  %v1928_v47 = vmax.f32 %v1591_v54, 0.0  ;;  %v1930_v2 = vmax.f32 %v1784_v26, 0.0  ;;  %3432 = vmatpush2.bf16.msra.mxu1 %v9352_v34  ;;  %v14650_v20 = vld [vmem:[#allocation32_spill] sm:$0xff]  ;;  %v14651_v52 = vld [vmem:[#allocation27_spill] sm:$0xff] }
 0x234   : > { %v1596_v48 = vpop.f32.mrf.mxu0  ;;  %v1789_v27 = vpop.f32.mrf.mxu1  ;;  %3240 = vmatprep.subr.bf16.mxu0 %v9357_v35  ;;  %3433 = vmatprep.subr.bf16.mxu1 %v9360_v60  ;;  %v1924_v31 = vmax.f32 %v1587_v59, 0.0  ;;  %v9361_v35 = vld [vmem:[%s14360_s5 + $0x128] ss:$16 sps:$4 sm:$0xff]   ;;  %v14648_v59 = vld [vmem:[#allocation30_spill] sm:$0xff] }
 0x235   : > { %v1929_v45 = vmax.f32 %v1593_v46, 0.0  ;;  %v1931_v23 = vmax.f32 %v1786_v30, 0.0  ;;  %v11364_v13 = vpack.c.bf16 %v1930_v2, %v1926_v36  ;;  %v9364_v60 = vld [vmem:[%s14360_s5 + $0x328] ss:$16 sps:$4 sm:$0xff]   ;;  %v9372_v46 = vld [vmem:[%s14360_s5 + $0x30c] ss:$16 sps:$4 sm:$0xff]   ;;  %v1597_v30 = vadd.f32 %v1596_v48, %v14651_v52 }
 0x236   : > { %v1598_v43 = vpop.f32.mrf.mxu0  ;;  %v1791_v29 = vpop.f32.mrf.mxu1  ;;  %v11362_v25 = vpack.c.bf16 %v1928_v47, %v1924_v31 }
 0x237   : > { %v11352_v19 = vpack.c.bf16 %v1929_v45, %v1925_v44  ;;  %v11354_v34 = vpack.c.bf16 %v1931_v23, %v1927_v22  ;;  %3241 = vmatpush2.bf16.msra.mxu0 %v9355_v38  ;;  %v1599_v54 = vadd.f32 %v1598_v43, %v14647_v1  ;;  %3434 = vmatpush2.bf16.msra.mxu1 %v9358_v49  ;;  %v14652_v38 = vld [vmem:[#allocation28_spill] sm:$0xff]  ;;  %v14654_v22 = vld [vmem:[#allocation34_spill] sm:$0xff]  ;;  %v9367_v23 = vld [vmem:[%s14360_s5 + $0x108] ss:$16 sps:$4 sm:$0xff]  }
 0x238   : > { %v1600_v10 = vpop.f32.mrf.mxu0  ;;  %v1793_v26 = vpop.f32.mrf.mxu1  ;;  %3242 = vmatprep.subr.bf16.mxu0 %v9363_v21  ;;  %v1792_v55 = vadd.f32 %v1791_v29, %v14648_v59  ;;  %v1790_v47 = vadd.f32 %v1789_v27, %v14652_v38  ;;  %v14653_v21 = vld [vmem:[#allocation33_spill] sm:$0xff]  ;;  %3435 = vmatprep.subr.bf16.mxu1 %v9366_v53  ;;  %v14656_v38 = vld [vmem:[#allocation38_spill] sm:$0xff] }
 0x239   : > { %v1601_v57 = vadd.f32 %v1600_v10, %v14649_v56  ;;  %v1794_v58 = vadd.f32 %v1793_v26, %v14650_v20  ;;  %2930 = vmatprep.mubr.bf16.mxu0 %v11352_v19  ;;  %3123 = vmatprep.mubr.bf16.mxu1 %v11354_v34  ;;  %v9370_v43 = vld [vmem:[%s14360_s5 + $0x308] ss:$16 sps:$4 sm:$0xff]   ;;  %v1933_v29 = vmax.f32 %v1599_v54, 0.0 }
 0x23a   : > { %v1602_v2 = vpop.f32.mrf.mxu0  ;;  %v1795_v49 = vpop.f32.mrf.mxu1  ;;  %2931 = vmatmul.mubr.bf16.gmra.mxu0 %v11362_v25  ;;  %3124 = vmatmul.mubr.bf16.gmra.mxu1 %v11364_v13  ;;  %v1935_v1 = vmax.f32 %v1792_v55, 0.0  ;;  %v1934_v53 = vmax.f32 %v1790_v47, 0.0 }
 0x23b   : > { %v1603_v44 = vadd.f32 %v1602_v2, %v14653_v21  ;;  %v1796_v45 = vadd.f32 %v1795_v49, %v14654_v22  ;;  %3243 = vmatpush2.bf16.msra.mxu0 %v9361_v35  ;;  %v1936_v31 = vmax.f32 %v1601_v57, 0.0  ;;  %v1938_v48 = vmax.f32 %v1794_v58, 0.0  ;;  %3436 = vmatpush2.bf16.msra.mxu1 %v9364_v60  ;;  %v14655_v58 = vld [vmem:[#allocation37_spill] sm:$0xff]  ;;  %v14658_v2 = vld [vmem:[#allocation40_spill] sm:$0xff]  ;;  %v14659_v21 = vld [vmem:[#allocation35_spill] sm:$0xff] }
 0x23c   : > { %v1606_v36 = vpop.f32.mrf.mxu0  ;;  %v1799_v27 = vpop.f32.mrf.mxu1  ;;  %3244 = vmatprep.subr.bf16.mxu0 %v9369_v8  ;;  %3437 = vmatprep.subr.bf16.mxu1 %v9372_v46  ;;  %v1932_v35 = vmax.f32 %v1597_v30, 0.0  ;;  %v14657_v30 = vld [vmem:[#allocation39_spill] sm:$0xff]  ;;  %v14660_v22 = vld [vmem:[#allocation36_spill] sm:$0xff] }
 0x23d   : > { %v1937_v10 = vmax.f32 %v1603_v44, 0.0  ;;  %v1939_v26 = vmax.f32 %v1796_v45, 0.0  ;;  %v11399_v8 = vpack.c.bf16 %v1938_v48, %v1934_v53  ;;  %v1607_v44 = vadd.f32 %v1606_v36, %v14659_v21  ;;  %v14661_v48 = vld [vmem:[#allocation41_spill] sm:$0xff] }
 0x23e   : > { %v1608_v59 = vpop.f32.mrf.mxu0  ;;  %v1801_v56 = vpop.f32.mrf.mxu1  ;;  %v11397_v60 = vpack.c.bf16 %v1936_v31, %v1932_v35  ;;  %v1800_v45 = vadd.f32 %v1799_v27, %v14660_v22 }
 0x23f   : > { %v11393_v20 = vpack.c.bf16 %v1937_v10, %v1933_v29  ;;  %v11395_v57 = vpack.c.bf16 %v1939_v26, %v1935_v1  ;;  %3245 = vmatpush2.bf16.msra.mxu0 %v9367_v23  ;;  %v1609_v52 = vadd.f32 %v1608_v59, %v14655_v58  ;;  %3438 = vmatpush2.bf16.msra.mxu1 %v9370_v43  ;;  %v14662_v29 = vld [vmem:[#allocation42_spill] sm:$0xff] }
 0x240   : > { %v1610_v54 = vpop.f32.mrf.mxu0  ;;  %v1803_v55 = vpop.f32.mrf.mxu1  ;;  %v1802_v46 = vadd.f32 %v1801_v56, %v14656_v38  ;;  %v1942_v27 = vmax.f32 %v1800_v45, 0.0 }
 0x241   : > { %v1611_v47 = vadd.f32 %v1610_v54, %v14657_v30  ;;  %v1804_v49 = vadd.f32 %v1803_v55, %v14658_v2  ;;  %2940 = vmatprep.mubr.bf16.mxu0 %v11393_v20  ;;  %3133 = vmatprep.mubr.bf16.mxu1 %v11395_v57  ;;  %v1941_v59 = vmax.f32 %v1609_v52, 0.0  ;;  %v1940_v54 = vmax.f32 %v1607_v44, 0.0  ;;  %v14667_v52 = vld [vmem:[#allocation46_spill] sm:$0xff]  ;;  %v14669_v44 = vld [vmem:[#allocation48_spill] sm:$0xff] }
 0x242   : > { %v1612_v23 = vpop.f32.mrf.mxu0  ;;  %v1805_v31 = vpop.f32.mrf.mxu1  ;;  %2941 = vmatmul.mubr.bf16.gmra.mxu0 %v11397_v60  ;;  %3134 = vmatmul.mubr.bf16.gmra.mxu1 %v11399_v8  ;;  %v1943_v56 = vmax.f32 %v1802_v46, 0.0 }
 0x243   : > { %v1613_v43 = vadd.f32 %v1612_v23, %v14661_v48  ;;  %v1806_v1 = vadd.f32 %v1805_v31, %v14662_v29  ;;  %v1944_v10 = vmax.f32 %v1611_v47, 0.0  ;;  %v1946_v26 = vmax.f32 %v1804_v49, 0.0  ;;  %v14666_v47 = vld [vmem:[#allocation45_spill] sm:$0xff]  ;;  %v14668_v48 = vld [vmem:[#allocation47_spill] sm:$0xff] }
 0x244   : > { %v1616_v35 = vpop.f32.mrf.mxu0  ;;  %v1809_v53 = vpop.f32.mrf.mxu1  ;;  %v14670_v29 = vld [vmem:[#allocation43_spill] sm:$0xff] }
 0x245   : > { %v1945_v58 = vmax.f32 %v1613_v43, 0.0  ;;  %v1947_v36 = vmax.f32 %v1806_v1, 0.0  ;;  %v11417_v21 = vpack.c.bf16 %v1944_v10, %v1940_v54  ;;  %v11419_v22 = vpack.c.bf16 %v1946_v26, %v1942_v27  ;;  %v14671_v10 = vld [vmem:[#allocation44_spill] sm:$0xff]  ;;  %v14673_v54 = vld [vmem:[#allocation50_spill] sm:$0xff] }
 0x246   : > { %v1618_v55 = vpop.f32.mrf.mxu0  ;;  %v1811_v38 = vpop.f32.mrf.mxu1  ;;  %v1617_v1 = vadd.f32 %v1616_v35, %v14670_v29 }
 0x247   : > { %v11413_v30 = vpack.c.bf16 %v1945_v58, %v1941_v59  ;;  %v11415_v2 = vpack.c.bf16 %v1947_v36, %v1943_v56  ;;  %14664 = vst [vmem:[#allocation9_spill] sm:$0xff] %v11417_v21  ;;  %14665 = vst [vmem:[#allocation10_spill] sm:$0xff] %v11419_v22  ;;  %v1619_v49 = vadd.f32 %v1618_v55, %v14666_v47  ;;  %v14672_v58 = vld [vmem:[#allocation49_spill] sm:$0xff] }
 0x248   : > { %v1620_v23 = vpop.f32.mrf.mxu0  ;;  %v1813_v31 = vpop.f32.mrf.mxu1  ;;  %v1812_v46 = vadd.f32 %v1811_v38, %v14667_v52  ;;  %v1810_v59 = vadd.f32 %v1809_v53, %v14671_v10 }
 0x249   : > { %14663 = vst [vmem:[#allocation8_spill] sm:$0xff] %v11415_v2  ;;  %v1621_v43 = vadd.f32 %v1620_v23, %v14668_v48  ;;  %v1814_v45 = vadd.f32 %v1813_v31, %v14669_v44  ;;  %2950 = vmatprep.mubr.bf16.mxu0 %v11413_v30  ;;  %3143 = vmatprep.mubr.bf16.mxu1 %v11415_v2  ;;  %v1949_v31 = vmax.f32 %v1619_v49, 0.0  ;;  %v1948_v44 = vmax.f32 %v1617_v1, 0.0  ;;  %v14679_v49 = vld [vmem:[#allocation54_spill] sm:$0xff]  ;;  %v14681_v1 = vld [vmem:[#allocation56_spill] sm:$0xff] }
 0x24a   : > { %v1622_v26 = vpop.f32.mrf.mxu0  ;;  %v1815_v56 = vpop.f32.mrf.mxu1  ;;  %2951 = vmatmul.mubr.bf16.gmra.mxu0 %v11417_v21  ;;  %3144 = vmatmul.mubr.bf16.gmra.mxu1 %v11419_v22  ;;  %v1951_v52 = vmax.f32 %v1812_v46, 0.0  ;;  %v1950_v53 = vmax.f32 %v1810_v59, 0.0 }
 0x24b   : > { %v1623_v36 = vadd.f32 %v1622_v26, %v14672_v58  ;;  %v1816_v27 = vadd.f32 %v1815_v56, %v14673_v54  ;;  %v1952_v55 = vmax.f32 %v1621_v43, 0.0  ;;  %v1954_v38 = vmax.f32 %v1814_v45, 0.0  ;;  %v14678_v43 = vld [vmem:[#allocation53_spill] sm:$0xff] }
 0x24c   : > { %v1626_v47 = vpop.f32.mrf.mxu0  ;;  %v1819_v23 = vpop.f32.mrf.mxu1 }
 0x24d   : > { %v1953_v48 = vmax.f32 %v1623_v36, 0.0  ;;  %v1955_v35 = vmax.f32 %v1816_v27, 0.0  ;;  %v11437_v22 = vpack.c.bf16 %v1952_v55, %v1948_v44  ;;  %v11439_v26 = vpack.c.bf16 %v1954_v38, %v1950_v53  ;;  %v14680_v36 = vld [vmem:[#allocation55_spill] sm:$0xff]  ;;  %v14683_v55 = vld [vmem:[#allocation52_spill] sm:$0xff]  ;;  %v14685_v53 = vld [vmem:[#allocation58_spill] sm:$0xff] }
 0x24e   : > { %v1628_v29 = vpop.f32.mrf.mxu0  ;;  %v1821_v10 = vpop.f32.mrf.mxu1  ;;  %v14682_v27 = vld [vmem:[#allocation51_spill] sm:$0xff] }
 0x24f   : > { %v11433_v2 = vpack.c.bf16 %v1953_v48, %v1949_v31  ;;  %v11435_v21 = vpack.c.bf16 %v1955_v35, %v1951_v52  ;;  %14676 = vst [vmem:[#allocation15_spill] sm:$0xff] %v11437_v22  ;;  %14677 = vst [vmem:[#allocation16_spill] sm:$0xff] %v11439_v26  ;;  %v1629_v45 = vadd.f32 %v1628_v29, %v14678_v43  ;;  %v14684_v35 = vld [vmem:[#allocation57_spill] sm:$0xff] }
 0x250   : > { %v1630_v56 = vpop.f32.mrf.mxu0  ;;  %v1823_v58 = vpop.f32.mrf.mxu1  ;;  %v1822_v46 = vadd.f32 %v1821_v10, %v14679_v49  ;;  %v1627_v31 = vadd.f32 %v1626_v47, %v14682_v27  ;;  %v1820_v52 = vadd.f32 %v1819_v23, %v14683_v55  ;;  %v9373_v10 = vld [vmem:[%s14361_s6 + $0x78] sm:$0xff]  }
 0x251   : > { %14674 = vst [vmem:[#allocation13_spill] sm:$0xff] %v11433_v2  ;;  %14675 = vst [vmem:[#allocation14_spill] sm:$0xff] %v11435_v21  ;;  %v1631_v54 = vadd.f32 %v1630_v56, %v14680_v36  ;;  %v1824_v59 = vadd.f32 %v1823_v58, %v14681_v1  ;;  %2960 = vmatprep.mubr.bf16.mxu0 %v11433_v2  ;;  %3153 = vmatprep.mubr.bf16.mxu1 %v11435_v21  ;;  %v9374_v47 = vld [vmem:[%s14361_s6 + $0xf8] sm:$0xff]   ;;  %v1957_v49 = vmax.f32 %v1629_v45, 0.0 }
 0x252   : > { %v1632_v38 = vpop.f32.mrf.mxu0  ;;  %v1825_v48 = vpop.f32.mrf.mxu1  ;;  %2961 = vmatmul.mubr.bf16.gmra.mxu0 %v11437_v22  ;;  %3154 = vmatmul.mubr.bf16.gmra.mxu1 %v11439_v26  ;;  %v1959_v36 = vmax.f32 %v1822_v46, 0.0  ;;  %v1956_v55 = vmax.f32 %v1627_v31, 0.0  ;;  %v14693_v31 = vld [vmem:[#allocation64_spill] sm:$0xff] }
 0x253   : > { %v1633_v44 = vadd.f32 %v1632_v38, %v14684_v35  ;;  %v1826_v29 = vadd.f32 %v1825_v48, %v14685_v53  ;;  %v1960_v43 = vmax.f32 %v1631_v54, 0.0  ;;  %v1962_v23 = vmax.f32 %v1824_v59, 0.0  ;;  %8657 = vmatprep.subr.bf16.mxu0 %v9373_v10  ;;  %8769 = vmatprep.subr.bf16.mxu1 %v9374_v47  ;;  %v14690_v59 = vld [vmem:[#allocation61_spill] sm:$0xff]  ;;  %v14692_v10 = vld [vmem:[#allocation63_spill] sm:$0xff] }
 0x254   : > { %v1636_v56 = vpop.f32.mrf.mxu0  ;;  %v1829_v58 = vpop.f32.mrf.mxu1  ;;  %v1958_v38 = vmax.f32 %v1820_v52, 0.0 }
 0x255   : > { %v1961_v1 = vmax.f32 %v1633_v44, 0.0  ;;  %v1963_v27 = vmax.f32 %v1826_v29, 0.0  ;;  %v11463_v22 = vpack.c.bf16 %v1960_v43, %v1956_v55  ;;  %v14691_v44 = vld [vmem:[#allocation62_spill] sm:$0xff]  ;;  %v14695_v43 = vld [vmem:[#allocation60_spill] sm:$0xff]  ;;  %v14696_v55 = vld [vmem:[#allocation65_spill] sm:$0xff] }
 0x256   : > { %v1638_v48 = vpop.f32.mrf.mxu0  ;;  %v1831_v35 = vpop.f32.mrf.mxu1  ;;  %v11465_v54 = vpack.c.bf16 %v1962_v23, %v1958_v38 }
 0x257   : > { %v11459_v53 = vpack.c.bf16 %v1961_v1, %v1957_v49  ;;  %v11461_v26 = vpack.c.bf16 %v1963_v27, %v1959_v36  ;;  %14688 = vst [vmem:[#allocation17_spill] sm:$0xff] %v11463_v22  ;;  %v1639_v21 = vadd.f32 %v1638_v48, %v14690_v59  ;;  %v1832_v29 = vadd.f32 %v1831_v35, %v14691_v44  ;;  %v14694_v49 = vld [vmem:[#allocation59_spill] sm:$0xff]  ;;  %v14697_v48 = vld [vmem:[#allocation66_spill] sm:$0xff] }
 0x258   : > { %14689 = vst [vmem:[#allocation18_spill] sm:$0xff] %v11465_v54  ;;  %v1640_v45 = vpop.f32.mrf.mxu0  ;;  %v1833_v46 = vpop.f32.mrf.mxu1  ;;  %v1637_v36 = vadd.f32 %v1636_v56, %v14694_v49  ;;  %v1830_v1 = vadd.f32 %v1829_v58, %v14695_v43 }
 0x259   : > { %14686 = vst [vmem:[#allocation11_spill] sm:$0xff] %v11459_v53  ;;  %14687 = vst [vmem:[#allocation12_spill] sm:$0xff] %v11461_v26  ;;  %v1641_v47 = vadd.f32 %v1640_v45, %v14692_v10  ;;  %v1834_v52 = vadd.f32 %v1833_v46, %v14693_v31  ;;  %2970 = vmatprep.mubr.bf16.mxu0 %v11459_v53  ;;  %3163 = vmatprep.mubr.bf16.mxu1 %v11461_v26  ;;  %v1965_v10 = vmax.f32 %v1639_v21, 0.0  ;;  %v14703_v21 = vld [vmem:[#allocation70_spill] sm:$0xff] }
 0x25a   : > { %v1642_v23 = vpop.f32.mrf.mxu0  ;;  %v1835_v27 = vpop.f32.mrf.mxu1  ;;  %2971 = vmatmul.mubr.bf16.gmra.mxu0 %v11463_v22  ;;  %3164 = vmatmul.mubr.bf16.gmra.mxu1 %v11465_v54  ;;  %v1967_v31 = vmax.f32 %v1832_v29, 0.0  ;;  %v1964_v49 = vmax.f32 %v1637_v36, 0.0  ;;  %v1966_v58 = vmax.f32 %v1830_v1, 0.0  ;;  %v14705_v36 = vld [vmem:[#allocation72_spill] sm:$0xff] }
 0x25b   : > { %v1643_v38 = vadd.f32 %v1642_v23, %v14696_v55  ;;  %v1836_v35 = vadd.f32 %v1835_v27, %v14697_v48  ;;  %v1968_v59 = vmax.f32 %v1641_v47, 0.0  ;;  %v1970_v45 = vmax.f32 %v1834_v52, 0.0  ;;  %v14702_v47 = vld [vmem:[#allocation69_spill] sm:$0xff] }
 0x25c   : > { %v1646_v46 = vpop.f32.mrf.mxu0  ;;  %v1839_v44 = vpop.f32.mrf.mxu1 }
 0x25d   : > { %v1969_v26 = vmax.f32 %v1643_v38, 0.0  ;;  %v1971_v56 = vmax.f32 %v1836_v35, 0.0  ;;  %v11483_v54 = vpack.c.bf16 %v1968_v59, %v1964_v49  ;;  %v11485_v23 = vpack.c.bf16 %v1970_v45, %v1966_v58  ;;  %v14704_v38 = vld [vmem:[#allocation71_spill] sm:$0xff]  ;;  %v14707_v59 = vld [vmem:[#allocation68_spill] sm:$0xff]  ;;  %v14709_v49 = vld [vmem:[#allocation74_spill] sm:$0xff] }
 0x25e   : > { %v1648_v43 = vpop.f32.mrf.mxu0  ;;  %v1841_v53 = vpop.f32.mrf.mxu1 }
 0x25f   : > { %v11479_v2 = vpack.c.bf16 %v1969_v26, %v1965_v10  ;;  %v11481_v22 = vpack.c.bf16 %v1971_v56, %v1967_v31  ;;  %14700 = vst [vmem:[#allocation23_spill] sm:$0xff] %v11483_v54  ;;  %14701 = vst [vmem:[#allocation24_spill] sm:$0xff] %v11485_v23  ;;  %v1649_v52 = vadd.f32 %v1648_v43, %v14702_v47  ;;  %v14706_v26 = vld [vmem:[#allocation67_spill] sm:$0xff]  ;;  %v14708_v56 = vld [vmem:[#allocation73_spill] sm:$0xff] }
 0x260   : > { %v1650_v27 = vpop.f32.mrf.mxu0  ;;  %v1843_v55 = vpop.f32.mrf.mxu1  ;;  %v1842_v29 = vadd.f32 %v1841_v53, %v14703_v21  ;;  %v1647_v35 = vadd.f32 %v1646_v46, %v14706_v26  ;;  %v1840_v10 = vadd.f32 %v1839_v44, %v14707_v59 }
 0x261   : > { %14698 = vst [vmem:[#allocation21_spill] sm:$0xff] %v11479_v2  ;;  %14699 = vst [vmem:[#allocation22_spill] sm:$0xff] %v11481_v22  ;;  %v1651_v48 = vadd.f32 %v1650_v27, %v14704_v38  ;;  %v1844_v1 = vadd.f32 %v1843_v55, %v14705_v36  ;;  %2980 = vmatprep.mubr.bf16.mxu0 %v11479_v2  ;;  %3173 = vmatprep.mubr.bf16.mxu1 %v11481_v22  ;;  %v1973_v21 = vmax.f32 %v1649_v52, 0.0  ;;  %v14715_v52 = vld [vmem:[#allocation78_spill] sm:$0xff] }
 0x262   : > { %v1652_v45 = vpop.f32.mrf.mxu0  ;;  %v1845_v31 = vpop.f32.mrf.mxu1  ;;  %2981 = vmatmul.mubr.bf16.gmra.mxu0 %v11483_v54  ;;  %3174 = vmatmul.mubr.bf16.gmra.mxu1 %v11485_v23  ;;  %v1975_v38 = vmax.f32 %v1842_v29, 0.0  ;;  %v1972_v26 = vmax.f32 %v1647_v35, 0.0  ;;  %v1974_v44 = vmax.f32 %v1840_v10, 0.0  ;;  %v14717_v35 = vld [vmem:[#allocation80_spill] sm:$0xff] }
 0x263   : > { %v1653_v53 = vadd.f32 %v1652_v45, %v14708_v56  ;;  %v1846_v58 = vadd.f32 %v1845_v31, %v14709_v49  ;;  %v1976_v43 = vmax.f32 %v1651_v48, 0.0  ;;  %v1978_v47 = vmax.f32 %v1844_v1, 0.0  ;;  %v14714_v48 = vld [vmem:[#allocation77_spill] sm:$0xff] }
 0x264   : > { %v1656_v27 = vpop.f32.mrf.mxu0  ;;  %v1849_v55 = vpop.f32.mrf.mxu1 }
 0x265   : > { %v1977_v36 = vmax.f32 %v1653_v53, 0.0  ;;  %v1979_v46 = vmax.f32 %v1846_v58, 0.0  ;;  %v11503_v23 = vpack.c.bf16 %v1976_v43, %v1972_v26  ;;  %v11505_v45 = vpack.c.bf16 %v1978_v47, %v1974_v44  ;;  %v14716_v53 = vld [vmem:[#allocation79_spill] sm:$0xff]  ;;  %v14719_v43 = vld [vmem:[#allocation76_spill] sm:$0xff]  ;;  %v14721_v26 = vld [vmem:[#allocation82_spill] sm:$0xff] }
 0x266   : > { %v1658_v59 = vpop.f32.mrf.mxu0  ;;  %v1851_v22 = vpop.f32.mrf.mxu1  ;;  %v14718_v58 = vld [vmem:[#allocation75_spill] sm:$0xff] }
 0x267   : > { %v11499_v2 = vpack.c.bf16 %v1977_v36, %v1973_v21  ;;  %v11501_v54 = vpack.c.bf16 %v1979_v46, %v1975_v38  ;;  %14712 = vst [vmem:[#allocation25_spill] sm:$0xff] %v11503_v23  ;;  %14713 = vst [vmem:[#allocation26_spill] sm:$0xff] %v11505_v45  ;;  %v1659_v1 = vadd.f32 %v1658_v59, %v14714_v48  ;;  %v14720_v46 = vld [vmem:[#allocation81_spill] sm:$0xff] }
 0x268   : > { %v1660_v31 = vpop.f32.mrf.mxu0  ;;  %v1853_v56 = vpop.f32.mrf.mxu1  ;;  %v1852_v29 = vadd.f32 %v1851_v22, %v14715_v52  ;;  %v1657_v21 = vadd.f32 %v1656_v27, %v14718_v58  ;;  %v1850_v38 = vadd.f32 %v1849_v55, %v14719_v43 }
 0x269   : > { %14710 = vst [vmem:[#allocation19_spill] sm:$0xff] %v11499_v2  ;;  %14711 = vst [vmem:[#allocation20_spill] sm:$0xff] %v11501_v54  ;;  %v1661_v49 = vadd.f32 %v1660_v31, %v14716_v53  ;;  %v1854_v10 = vadd.f32 %v1853_v56, %v14717_v35  ;;  %2990 = vmatprep.mubr.bf16.mxu0 %v11499_v2  ;;  %3183 = vmatprep.mubr.bf16.mxu1 %v11501_v54  ;;  %v1981_v52 = vmax.f32 %v1659_v1, 0.0  ;;  %v14724_v1 = vld [vmem:[#allocation86_spill] sm:$0xff] }
 0x26a   : > { %v1662_v47 = vpop.f32.mrf.mxu0  ;;  %v1855_v36 = vpop.f32.mrf.mxu1  ;;  %2991 = vmatmul.mubr.bf16.gmra.mxu0 %v11503_v23  ;;  %3184 = vmatmul.mubr.bf16.gmra.mxu1 %v11505_v45  ;;  %v1983_v53 = vmax.f32 %v1852_v29, 0.0  ;;  %v1980_v58 = vmax.f32 %v1657_v21, 0.0  ;;  %v1982_v55 = vmax.f32 %v1850_v38, 0.0  ;;  %v14726_v21 = vld [vmem:[#allocation88_spill] sm:$0xff] }
 0x26b   : > { %v1663_v22 = vadd.f32 %v1662_v47, %v14720_v46  ;;  %v1856_v44 = vadd.f32 %v1855_v36, %v14721_v26  ;;  %v1984_v59 = vmax.f32 %v1661_v49, 0.0  ;;  %v1986_v48 = vmax.f32 %v1854_v10, 0.0  ;;  %v14723_v49 = vld [vmem:[#allocation85_spill] sm:$0xff] }
 0x26c   : > { %v1666_v31 = vpop.f32.mrf.mxu0  ;;  %v1859_v56 = vpop.f32.mrf.mxu1 }
 0x26d   : > { %v1985_v35 = vmax.f32 %v1663_v22, 0.0  ;;  %v1987_v27 = vmax.f32 %v1856_v44, 0.0  ;;  %v11523_v45 = vpack.c.bf16 %v1984_v59, %v1980_v58  ;;  %v11525_v47 = vpack.c.bf16 %v1986_v48, %v1982_v55  ;;  %v14725_v22 = vld [vmem:[#allocation87_spill] sm:$0xff]  ;;  %v14728_v59 = vld [vmem:[#allocation84_spill] sm:$0xff]  ;;  %v14730_v58 = vld [vmem:[#allocation90_spill] sm:$0xff] }
 0x26e   : > { %v1668_v43 = vpop.f32.mrf.mxu0  ;;  %v1861_v54 = vpop.f32.mrf.mxu1  ;;  %v14727_v44 = vld [vmem:[#allocation83_spill] sm:$0xff] }
 0x26f   : > { %v11519_v2 = vpack.c.bf16 %v1985_v35, %v1981_v52  ;;  %v11521_v23 = vpack.c.bf16 %v1987_v27, %v1983_v53  ;;  %14722 = vst [vmem:[#allocation29_spill] sm:$0xff] %v11523_v45  ;;  %v1669_v10 = vadd.f32 %v1668_v43, %v14723_v49  ;;  %v1862_v29 = vadd.f32 %v1861_v54, %v14724_v1  ;;  %v14729_v27 = vld [vmem:[#allocation89_spill] sm:$0xff] }
 0x270   : > { %v1670_v36 = vpop.f32.mrf.mxu0  ;;  %v1863_v46 = vpop.f32.mrf.mxu1  ;;  %v1667_v52 = vadd.f32 %v1666_v31, %v14727_v44  ;;  %v1860_v53 = vadd.f32 %v1859_v56, %v14728_v59 }
 0x271   : > { %v1671_v26 = vadd.f32 %v1670_v36, %v14725_v22  ;;  %v1864_v38 = vadd.f32 %v1863_v46, %v14726_v21  ;;  %3000 = vmatprep.mubr.bf16.mxu0 %v11519_v2  ;;  %3193 = vmatprep.mubr.bf16.mxu1 %v11521_v23  ;;  %v1989_v36 = vmax.f32 %v1669_v10, 0.0  ;;  %v1991_v46 = vmax.f32 %v1862_v29, 0.0  ;;  %v9375_v10 = vld [vmem:[%s14361_s6 + $0x38] sm:$0xff]  }
 0x272   : > { %v1672_v48 = vpop.f32.mrf.mxu0  ;;  %v1865_v35 = vpop.f32.mrf.mxu1  ;;  %3001 = vmatmul.mubr.bf16.gmra.mxu0 %v11523_v45  ;;  %3194 = vmatmul.mubr.bf16.gmra.mxu1 %v11525_v47  ;;  %v1988_v21 = vmax.f32 %v1667_v52, 0.0  ;;  %v1990_v31 = vmax.f32 %v1860_v53, 0.0  ;;  %v9376_v29 = vld [vmem:[%s14361_s6 + $0xb8] sm:$0xff]   ;;  %v9383_v52 = vld [vmem:[%s14361_s6 + $0x60] sm:$0xff]  }
 0x273   : > { %v1673_v54 = vadd.f32 %v1672_v48, %v14729_v27  ;;  %v1866_v55 = vadd.f32 %v1865_v35, %v14730_v58  ;;  %v1992_v43 = vmax.f32 %v1671_v26, 0.0  ;;  %v1994_v49 = vmax.f32 %v1864_v38, 0.0  ;;  %v9377_v26 = vld [vmem:[%s14361_s6 + $0x70] sm:$0xff]   ;;  %v9395_v53 = vld [vmem:[%s14361_s6 + $0xe0] sm:$0xff]   ;;  %v9398_v27 = vld [vmem:[%s14361_s6 + $0x98] sm:$0xff]  }
 0x274   : > { %v9378_v38 = vld [vmem:[%s14361_s6 + $0xf0] sm:$0xff]   ;;  %v9384_v48 = vld [vmem:[%s14361_s6 + $0x20] sm:$0xff]  }
 0x275   : > { %v1993_v1 = vmax.f32 %v1673_v54, 0.0  ;;  %v1995_v22 = vmax.f32 %v1866_v55, 0.0  ;;  %v11543_v59 = vpack.c.bf16 %v1992_v43, %v1988_v21  ;;  %v11545_v45 = vpack.c.bf16 %v1994_v49, %v1990_v31  ;;  %v9396_v35 = vld [vmem:[%s14361_s6 + $0xa0] sm:$0xff]   ;;  %v9390_v54 = vld [vmem:[%s14361_s6 + $0x10] sm:$0xff]   ;;  %v14738_v21 = vld [vmem:[#allocation11_spill] sm:$0xff] }
 0x276   : > { %v14739_v31 = vld [vmem:[#allocation12_spill] sm:$0xff] }
 0x277   : > { %v11539_v44 = vpack.c.bf16 %v1993_v1, %v1989_v36  ;;  %v11541_v56 = vpack.c.bf16 %v1995_v22, %v1991_v46  ;;  %v14736_v1 = vld [vmem:[#allocation15_spill] sm:$0xff]  ;;  %v14737_v22 = vld [vmem:[#allocation16_spill] sm:$0xff] }
 0x279   : > { %3010 = vmatprep.mubr.bf16.mxu0 %v11539_v44  ;;  %3203 = vmatprep.mubr.bf16.mxu1 %v11541_v56 }
 0x27a   : > { %3011 = vmatmul.mubr.bf16.gmra.mxu0 %v11543_v59  ;;  %3204 = vmatmul.mubr.bf16.gmra.mxu1 %v11545_v45 }
 0x27b   : > { %3246 = vmatprep.mubr.bf16.mxu0 %v11047_v6  ;;  %3439 = vmatprep.mubr.bf16.mxu1 %v11049_v11  ;;  %v9379_v6 = vld [vmem:[%s14361_s6 + $0x30] sm:$0xff]  }
 0x27c   : > { %v9380_v11 = vld [vmem:[%s14361_s6 + $0xb0] sm:$0xff]  }
 0x282   : > { %3247 = vmatmul.mubr.bf16.vlgmr.msra.gmra.mxu0 %v11057_v62  ;;  %3440 = vmatmul.mubr.bf16.vlgmr.msra.gmra.mxu1 %v11059_v5  ;;  %v9381_v62 = vld [vmem:[%s14361_s6 + $0x68] sm:$0xff]  }
 0x283   : > { %3256 = vmatprep.mubr.bf16.mxu0 %v11088_v16  ;;  %3449 = vmatprep.mubr.bf16.mxu1 %v11090_v17  ;;  %v9385_v5 = vld [vmem:[%s14361_s6 + $0xe8] sm:$0xff]  }
 0x284   : > { %8658 = vmatpush3.bf16.msra.mxu0 %v9375_v10  ;;  %8770 = vmatpush3.bf16.msra.mxu1 %v9376_v29  ;;  %v9382_v16 = vld [vmem:[%s14361_s6 + $0x28] sm:$0xff]  }
 0x285   : > { %8659 = vmatprep.subr.bf16.mxu0 %v9377_v26  ;;  %8771 = vmatprep.subr.bf16.mxu1 %v9378_v38  ;;  %v9386_v17 = vld [vmem:[%s14361_s6 + $0xa8] sm:$0xff]  }
 0x288   : > { %8660 = vmatpush3.bf16.msra.mxu0 %v9379_v6  ;;  %8772 = vmatpush3.bf16.msra.mxu1 %v9380_v11 }
 0x289   : > { %8661 = vmatprep.subr.bf16.mxu0 %v9381_v62  ;;  %8773 = vmatprep.subr.bf16.mxu1 %v9385_v5 }
 0x28a   : > { %3257 = vmatmul.mubr.bf16.gmra.mxu0 %v11098_v9  ;;  %3450 = vmatmul.mubr.bf16.gmra.mxu1 %v11100_v0  ;;  %v9387_v9 = vld [vmem:[%s14361_s6 + $0x58] sm:$0xff]  }
 0x28b   : > { %3266 = vmatprep.mubr.bf16.mxu0 %v11132_v15  ;;  %3459 = vmatprep.mubr.bf16.mxu1 %v11134_v63  ;;  %v9388_v0 = vld [vmem:[%s14361_s6 + $0x18] sm:$0xff]   ;;  %v9389_v15 = vld [vmem:[%s14361_s6 + $0x50] sm:$0xff]  }
 0x28c   : > { %8662 = vmatpush3.bf16.msra.mxu0 %v9382_v16  ;;  %8774 = vmatpush3.bf16.msra.mxu1 %v9386_v17  ;;  %v9397_v63 = vld [vmem:[%s14361_s6 + $0xd8] sm:$0xff]   ;;  %v14741_v17 = vld [vmem:[#allocation18_spill] sm:$0xff] }
 0x28d   : > { %8663 = vmatprep.subr.bf16.mxu0 %v9383_v52  ;;  %8775 = vmatprep.subr.bf16.mxu1 %v9395_v53  ;;  %v14740_v16 = vld [vmem:[#allocation17_spill] sm:$0xff]  ;;  %v14743_v53 = vld [vmem:[#allocation22_spill] sm:$0xff] }
 0x28e   : > { %v14742_v52 = vld [vmem:[#allocation21_spill] sm:$0xff] }
 0x290   : > { %8664 = vmatpush3.bf16.msra.mxu0 %v9384_v48  ;;  %8776 = vmatpush3.bf16.msra.mxu1 %v9396_v35 }
 0x291   : > { %8665 = vmatprep.subr.bf16.mxu0 %v9387_v9  ;;  %8777 = vmatprep.subr.bf16.mxu1 %v9397_v63 }
 0x292   : > { %3267 = vmatmul.mubr.bf16.gmra.mxu0 %v11142_v3  ;;  %3460 = vmatmul.mubr.bf16.gmra.mxu1 %v11144_v7  ;;  %v9391_v3 = vld [vmem:[%s14361_s6 + $0x48] sm:$0xff]  }
 0x293   : > { %3276 = vmatprep.mubr.bf16.mxu0 %v11176_v12  ;;  %3469 = vmatprep.mubr.bf16.mxu1 %v11178_v24  ;;  %v9392_v7 = vld [vmem:[%s14361_s6 + $0x8] sm:$0xff]   ;;  %v9393_v12 = vld [vmem:[%s14361_s6 + $0x40] sm:$0xff]  }
 0x294   : > { %8666 = vmatpush3.bf16.msra.mxu0 %v9388_v0  ;;  %8778 = vmatpush3.bf16.msra.mxu1 %v9398_v27  ;;  %v9394_v24 = vld [vmem:[%s14361_s6] sm:$0xff]  }
 0x295   : > { %8667 = vmatprep.subr.bf16.mxu0 %v9389_v15 }
 0x298   : > { %8668 = vmatpush3.bf16.msra.mxu0 %v9390_v54 }
 0x299   : > { %8669 = vmatprep.subr.bf16.mxu0 %v9391_v3  ;;  %v14744_v3 = vld [vmem:[#allocation23_spill] sm:$0xff] }
 0x29a   : > { %3277 = vmatmul.mubr.bf16.gmra.mxu0 %v11186_v61  ;;  %3470 = vmatmul.mubr.bf16.gmra.mxu1 %v11188_v14  ;;  %v9399_v61 = vld [vmem:[%s14361_s6 + $0xd0] sm:$0xff]  }
 0x29b   : > { %3286 = vmatprep.mubr.bf16.mxu0 %v11220_v37  ;;  %3479 = vmatprep.mubr.bf16.mxu1 %v11222_v33  ;;  %v9400_v14 = vld [vmem:[%s14361_s6 + $0x90] sm:$0xff]   ;;  %v9401_v37 = vld [vmem:[%s14361_s6 + $0xc8] sm:$0xff]  }
 0x29c   : > { %8670 = vmatpush3.bf16.msra.mxu0 %v9392_v7  ;;  %8779 = vmatprep.subr.bf16.mxu1 %v9399_v61  ;;  %v9402_v33 = vld [vmem:[%s14361_s6 + $0x88] sm:$0xff]   ;;  %v14745_v7 = vld [vmem:[#allocation24_spill] sm:$0xff] }
 0x29d   : > { %8671 = vmatprep.subr.bf16.mxu0 %v9393_v12  ;;  %8780 = vmatpush3.bf16.msra.mxu1 %v9400_v14  ;;  %v14746_v12 = vld [vmem:[#allocation19_spill] sm:$0xff] }
 0x29e   : > { %8781 = vmatprep.subr.bf16.mxu1 %v9401_v37 }
 0x2a0   : > { %8672 = vmatpush3.bf16.msra.mxu0 %v9394_v24  ;;  %v14747_v24 = vld [vmem:[#allocation20_spill] sm:$0xff] }
 0x2a1   : > { %8782 = vmatpush3.bf16.msra.mxu1 %v9402_v33 }
 0x2a2   : > { %3287 = vmatmul.mubr.bf16.gmra.mxu0 %v11230_v18  ;;  %3480 = vmatmul.mubr.bf16.gmra.mxu1 %v11232_v28 }
 0x2a3   : > { %3296 = vmatprep.mubr.bf16.mxu0 %v11264_v50  ;;  %3489 = vmatprep.mubr.bf16.mxu1 %v11266_v51  ;;  %v14731_v50 = vld [vmem:[#allocation8_spill] sm:$0xff]  ;;  %v9403_v51 = vld [vmem:[%s14361_s6 + $0xc0] sm:$0xff]  }
 0x2a4   : > { %8783 = vmatprep.subr.bf16.mxu1 %v9403_v51 }
 0x2aa   : > { %3297 = vmatmul.mubr.bf16.gmra.mxu0 %v11274_v40  ;;  %3490 = vmatmul.mubr.bf16.gmra.mxu1 %v11276_v41  ;;  %v9404_v40 = vld [vmem:[%s14361_s6 + $0x80] sm:$0xff]  }
 0x2ab   : > { %3306 = vmatprep.mubr.bf16.mxu0 %v11308_v4  ;;  %3499 = vmatprep.mubr.bf16.mxu1 %v11310_v39 }
 0x2ac   : > { %8784 = vmatpush3.bf16.msra.mxu1 %v9404_v40 }
 0x2b2   : > { %3307 = vmatmul.mubr.bf16.gmra.mxu0 %v11318_v32  ;;  %3500 = vmatmul.mubr.bf16.gmra.mxu1 %v11320_v42 }
 0x2b3   : > { %3316 = vmatprep.mubr.bf16.mxu0 %v11352_v19  ;;  %3509 = vmatprep.mubr.bf16.mxu1 %v11354_v34 }
 0x2ba   : > { %3317 = vmatmul.mubr.bf16.gmra.mxu0 %v11362_v25  ;;  %3510 = vmatmul.mubr.bf16.gmra.mxu1 %v11364_v13  ;;  %v14732_v13 = vld [vmem:[#allocation9_spill] sm:$0xff] }
 0x2bb   : > { %3326 = vmatprep.mubr.bf16.mxu0 %v11393_v20  ;;  %3519 = vmatprep.mubr.bf16.mxu1 %v11395_v57  ;;  %v14733_v20 = vld [vmem:[#allocation10_spill] sm:$0xff]  ;;  %v14734_v57 = vld [vmem:[#allocation13_spill] sm:$0xff] }
 0x2c2   : > { %v11669_v18 = vpop.f32.mrf.mxu0  ;;  %v11671_v28 = vpop.f32.mrf.mxu1  ;;  %3327 = vmatmul.mubr.bf16.gmra.mxu0 %v11397_v60  ;;  %3520 = vmatmul.mubr.bf16.gmra.mxu1 %v11399_v8  ;;  %v14735_v60 = vld [vmem:[#allocation14_spill] sm:$0xff] }
 0x2c3   : > { %3336 = vmatprep.mubr.bf16.mxu0 %v11413_v30  ;;  %3529 = vmatprep.mubr.bf16.mxu1 %v14731_v50 }
 0x2c4   : > { %v11683_v41 = vpop.f32.mrf.mxu0  ;;  %v11685_v4 = vpop.f32.mrf.mxu1 }
 0x2c6   : > { %v11687_v39 = vpop.f32.mrf.mxu0  ;;  %v11689_v32 = vpop.f32.mrf.mxu1 }
 0x2c8   : > { %v2868_v42 = vpop.f32.mrf.mxu0  ;;  %v3061_v19 = vpop.f32.mrf.mxu1 }
 0x2ca   : > { %v11691_v34 = vpop.f32.mrf.mxu0  ;;  %v11693_v25 = vpop.f32.mrf.mxu1  ;;  %3337 = vmatmul.mubr.bf16.gmra.mxu0 %v14732_v13  ;;  %3530 = vmatmul.mubr.bf16.gmra.mxu1 %v14733_v20  ;;  %v14748_v20 = vld [vmem:[#allocation25_spill] sm:$0xff] }
 0x2cb   : > { %3346 = vmatprep.mubr.bf16.mxu0 %v14734_v57  ;;  %3539 = vmatprep.mubr.bf16.mxu1 %v14735_v60  ;;  %v14749_v57 = vld [vmem:[#allocation26_spill] sm:$0xff] }
 0x2cc   : > { %v11699_v8 = vpop.f32.mrf.mxu0  ;;  %v11701_v30 = vpop.f32.mrf.mxu1 }
 0x2ce   : > { %v11703_v58 = vpop.f32.mrf.mxu0  ;;  %v11705_v55 = vpop.f32.mrf.mxu1 }
 0x2d0   : > { %v11707_v43 = vpop.f32.mrf.mxu0  ;;  %v11709_v49 = vpop.f32.mrf.mxu1 }
 0x2d2   : > { %v11711_v36 = vpop.f32.mrf.mxu0  ;;  %v11713_v46 = vpop.f32.mrf.mxu1  ;;  %3347 = vmatmul.mubr.bf16.gmra.mxu0 %v14736_v1  ;;  %3540 = vmatmul.mubr.bf16.gmra.mxu1 %v14737_v22 }
 0x2d3   : > { %3356 = vmatprep.mubr.bf16.mxu0 %v14738_v21  ;;  %3549 = vmatprep.mubr.bf16.mxu1 %v14739_v31 }
 0x2d4   : > { %v11719_v10 = vpop.f32.mrf.mxu0  ;;  %v11721_v29 = vpop.f32.mrf.mxu1 }
 0x2d6   : > { %v11723_v26 = vpop.f32.mrf.mxu0  ;;  %v11725_v38 = vpop.f32.mrf.mxu1 }
 0x2d8   : > { %v11727_v6 = vpop.f32.mrf.mxu0  ;;  %v11729_v11 = vpop.f32.mrf.mxu1 }
 0x2da   : > { %v11731_v62 = vpop.f32.mrf.mxu0  ;;  %v11733_v5 = vpop.f32.mrf.mxu1  ;;  %3357 = vmatmul.mubr.bf16.gmra.mxu0 %v14740_v16  ;;  %3550 = vmatmul.mubr.bf16.gmra.mxu1 %v14741_v17  ;;  %v3062_v17 = vadd.f32 %v3061_v19, %v2868_v42 }
 0x2db   : > { %3366 = vmatprep.mubr.bf16.mxu0 %v14742_v52  ;;  %3559 = vmatprep.mubr.bf16.mxu1 %v14743_v53 }
 0x2dc   : > { %v11739_v48 = vpop.f32.mrf.mxu0  ;;  %v11741_v35 = vpop.f32.mrf.mxu1  ;;  %v3605_v42 = vmax.f32 %v3062_v17, 0.0 }
 0x2de   : > { %v11743_v9 = vpop.f32.mrf.mxu0  ;;  %v11745_v0 = vpop.f32.mrf.mxu1 }
 0x2e0   : > { %v11747_v15 = vpop.f32.mrf.mxu0  ;;  %v11749_v63 = vpop.f32.mrf.mxu1 }
 0x2e2   : > { %v11751_v27 = vpop.f32.mrf.mxu0  ;;  %v11753_v54 = vpop.f32.mrf.mxu1  ;;  %3367 = vmatmul.mubr.bf16.gmra.mxu0 %v14744_v3  ;;  %3560 = vmatmul.mubr.bf16.gmra.mxu1 %v14745_v7 }
 0x2e3   : > { %3376 = vmatprep.mubr.bf16.mxu0 %v14746_v12  ;;  %3569 = vmatprep.mubr.bf16.mxu1 %v14747_v24 }
 0x2e4   : > { %v11759_v61 = vpop.f32.mrf.mxu0  ;;  %v11761_v14 = vpop.f32.mrf.mxu1 }
 0x2e6   : > { %v11763_v37 = vpop.f32.mrf.mxu0  ;;  %v11765_v33 = vpop.f32.mrf.mxu1 }
 0x2e8   : > { %v11767_v50 = vpop.f32.mrf.mxu0  ;;  %v11769_v51 = vpop.f32.mrf.mxu1 }
 0x2ea   : > { %v11771_v40 = vpop.f32.mrf.mxu0  ;;  %v11773_v13 = vpop.f32.mrf.mxu1  ;;  %3377 = vmatmul.mubr.bf16.gmra.mxu0 %v14748_v20  ;;  %3570 = vmatmul.mubr.bf16.gmra.mxu1 %v14749_v57 }
 0x2eb   : > { %3386 = vmatprep.mubr.bf16.mxu0 %v11519_v2  ;;  %3579 = vmatprep.mubr.bf16.mxu1 %v11521_v23  ;;  %v14750_v2 = vld [vmem:[#allocation29_spill] sm:$0xff]  ;;  %v3058_v23 = vadd.f32 %v11685_v4, %v11683_v41  ;;  %v3056_v4 = vadd.f32 %v11671_v28, %v11669_v18 }
 0x2ec   : > { %v11779_v60 = vpop.f32.mrf.mxu0  ;;  %v11781_v1 = vpop.f32.mrf.mxu1 }
 0x2ed   : > { %v3601_v24 = vmax.f32 %v3058_v23, 0.0  ;;  %v3600_v23 = vmax.f32 %v3056_v4, 0.0 }
 0x2ee   : > { %v11783_v22 = vpop.f32.mrf.mxu0  ;;  %v11785_v21 = vpop.f32.mrf.mxu1 }
 0x2f0   : > { %v11787_v31 = vpop.f32.mrf.mxu0  ;;  %v11789_v16 = vpop.f32.mrf.mxu1 }
 0x2f2   : > { %v11791_v52 = vpop.f32.mrf.mxu0  ;;  %v11793_v53 = vpop.f32.mrf.mxu1  ;;  %3387 = vmatmul.mubr.bf16.gmra.mxu0 %v14750_v2  ;;  %3580 = vmatmul.mubr.bf16.gmra.mxu1 %v11525_v47  ;;  %v3060_v47 = vadd.f32 %v11689_v32, %v11687_v39  ;;  %v3068_v39 = vadd.f32 %v11701_v30, %v11699_v8  ;;  %v3082_v30 = vadd.f32 %v11729_v11, %v11727_v6 }
 0x2f3   : > { %3396 = vmatprep.mubr.bf16.mxu0 %v11539_v44  ;;  %3589 = vmatprep.mubr.bf16.mxu1 %v11541_v56  ;;  %v3072_v44 = vadd.f32 %v11709_v49, %v11707_v43  ;;  %v3729_v56 = vpack.c.bf16 %v3605_v42, %v3601_v24 }
 0x2f4   : > { %v11801_v3 = vpop.f32.mrf.mxu0  ;;  %v11803_v7 = vpop.f32.mrf.mxu1  ;;  %v3604_v32 = vmax.f32 %v3060_v47, 0.0  ;;  %v3609_v42 = vmax.f32 %v3068_v39, 0.0  ;;  %v3078_v39 = vadd.f32 %v11721_v29, %v11719_v10  ;;  %v3092_v29 = vadd.f32 %v11749_v63, %v11747_v15 }
 0x2f5   : > { %v3613_v49 = vmax.f32 %v3072_v44, 0.0  ;;  %v3066_v44 = vadd.f32 %v11693_v25, %v11691_v34 }
 0x2f6   : > { %v11805_v19 = vpop.f32.mrf.mxu0  ;;  %v11807_v12 = vpop.f32.mrf.mxu1  ;;  %v3728_v24 = vpack.c.bf16 %v3604_v32, %v3600_v23  ;;  %v3621_v23 = vmax.f32 %v3082_v30, 0.0  ;;  %v3617_v34 = vmax.f32 %v3078_v39, 0.0  ;;  %v3076_v30 = vadd.f32 %v11713_v46, %v11711_v36 }
 0x2f7   : > { %v3733_v47 = vpack.c.bf16 %v3613_v49, %v3609_v42  ;;  %v3608_v6 = vmax.f32 %v3066_v44, 0.0  ;;  %v3080_v42 = vadd.f32 %v11725_v38, %v11723_v26  ;;  %v3088_v39 = vadd.f32 %v11741_v35, %v11739_v48 }
 0x2f8   : > { %v11811_v20 = vpop.f32.mrf.mxu0  ;;  %v11813_v41 = vpop.f32.mrf.mxu1  ;;  %v3616_v15 = vmax.f32 %v3076_v30, 0.0  ;;  %v3102_v35 = vadd.f32 %v11769_v51, %v11767_v50 }
 0x2f9   : > { %v3620_v26 = vmax.f32 %v3080_v42, 0.0  ;;  %v3625_v36 = vmax.f32 %v3088_v39, 0.0  ;;  %v3098_v39 = vadd.f32 %v11761_v14, %v11759_v61  ;;  %v3112_v14 = vadd.f32 %v11789_v16, %v11787_v31 }
 0x2fa   : > { %v11819_v57 = vpop.f32.mrf.mxu0  ;;  %v11821_v17 = vpop.f32.mrf.mxu1  ;;  %3397 = vmatmul.mubr.bf16.gmra.mxu0 %v11543_v59  ;;  %3590 = vmatmul.mubr.bf16.gmra.mxu1 %v11545_v45  ;;  %v3070_v45 = vadd.f32 %v11705_v55, %v11703_v58 }
 0x2fb   : > { %4080 = vmatprep.mubr.bf16.mxu0 %v3729_v56  ;;  %v3736_v46 = vpack.c.bf16 %v3620_v26, %v3616_v15  ;;  %v3637_v15 = vmax.f32 %v3102_v35, 0.0  ;;  %v3096_v35 = vadd.f32 %v11753_v54, %v11751_v27 }
 0x2fc   : > { %v11827_v2 = vpop.f32.mrf.mxu0  ;;  %v11829_v43 = vpop.f32.mrf.mxu1  ;;  %v3612_v58 = vmax.f32 %v3070_v45, 0.0  ;;  %v3737_v45 = vpack.c.bf16 %v3621_v23, %v3617_v34  ;;  %v3090_v34 = vadd.f32 %v11745_v0, %v11743_v9 }
 0x2fd   : > { %v3632_v31 = vmax.f32 %v3096_v35, 0.0 }
 0x2fe   : > { %v11831_v18 = vpop.f32.mrf.mxu0  ;;  %v11833_v28 = vpop.f32.mrf.mxu1  ;;  %v3732_v25 = vpack.c.bf16 %v3612_v58, %v3608_v6  ;;  %v3629_v6 = vmax.f32 %v3092_v29, 0.0  ;;  %v3086_v29 = vadd.f32 %v11733_v5, %v11731_v62  ;;  %v3628_v9 = vmax.f32 %v3090_v34, 0.0 }
 0x2ff   : > { %v3633_v62 = vmax.f32 %v3098_v39, 0.0  ;;  %v3108_v39 = vadd.f32 %v11781_v1, %v11779_v60  ;;  %v3122_v1 = vadd.f32 %v11813_v41, %v11811_v20 }
 0x300   : > { %v11837_v59 = vpop.f32.mrf.mxu0  ;;  %v11839_v8 = vpop.f32.mrf.mxu1  ;;  %v3741_v42 = vpack.c.bf16 %v3629_v6, %v3625_v36  ;;  %v3624_v50 = vmax.f32 %v3086_v29, 0.0  ;;  %v3100_v36 = vadd.f32 %v11765_v33, %v11763_v37 }
 0x301   : > { %v3745_v34 = vpack.c.bf16 %v3637_v15, %v3633_v62  ;;  %v3641_v27 = vmax.f32 %v3108_v39, 0.0  ;;  %v3110_v62 = vadd.f32 %v11785_v21, %v11783_v22  ;;  %v3118_v39 = vadd.f32 %v11803_v7, %v11801_v3 }
 0x302   : > { %v11845_v56 = vpop.f32.mrf.mxu0  ;;  %v11847_v4 = vpop.f32.mrf.mxu1  ;;  %4081 = vmatmul.mubr.bf16.vlgmr.msra.gmra.mxu0 %v3728_v24  ;;  %v3740_v5 = vpack.c.bf16 %v3628_v9, %v3624_v50  ;;  %v3636_v37 = vmax.f32 %v3100_v36, 0.0  ;;  %v3645_v50 = vmax.f32 %v3112_v14, 0.0  ;;  %v3106_v14 = vadd.f32 %v11773_v13, %v11771_v40 }
 0x303   : > { %4088 = vmatprep.mubr.bf16.mxu0 %v3733_v47  ;;  %v3644_v22 = vmax.f32 %v3110_v62, 0.0  ;;  %v3649_v40 = vmax.f32 %v3118_v39, 0.0  ;;  %v3132_v7 = vadd.f32 %v11839_v8, %v11837_v59  ;;  %v3128_v39 = vadd.f32 %v11829_v43, %v11827_v2 }
 0x304   : > { %v11851_v55 = vpop.f32.mrf.mxu0  ;;  %v11853_v32 = vpop.f32.mrf.mxu1  ;;  %v3744_v54 = vpack.c.bf16 %v3636_v37, %v3632_v31  ;;  %v3749_v36 = vpack.c.bf16 %v3645_v50, %v3641_v27  ;;  %v3653_v31 = vmax.f32 %v3122_v1, 0.0  ;;  %v3640_v20 = vmax.f32 %v3106_v14, 0.0 }
 0x305   : > { %v3120_v27 = vadd.f32 %v11807_v12, %v11805_v19  ;;  %v3116_v1 = vadd.f32 %v11793_v53, %v11791_v52  ;;  %v3657_v52 = vmax.f32 %v3128_v39, 0.0  ;;  %v3138_v39 = vadd.f32 %v11853_v32, %v11851_v55 }
 0x306   : > { %v11855_v11 = vpop.f32.mrf.mxu0  ;;  %v11857_v49 = vpop.f32.mrf.mxu1  ;;  %v3748_v13 = vpack.c.bf16 %v3644_v22, %v3640_v20  ;;  %v3753_v62 = vpack.c.bf16 %v3653_v31, %v3649_v40  ;;  %v3661_v20 = vmax.f32 %v3132_v7, 0.0  ;;  %v3130_v40 = vadd.f32 %v11833_v28, %v11831_v18 }
 0x307   : > { %v3652_v19 = vmax.f32 %v3120_v27, 0.0  ;;  %v3648_v59 = vmax.f32 %v3116_v1, 0.0  ;;  %v3126_v7 = vadd.f32 %v11821_v17, %v11819_v57  ;;  %v3665_v57 = vmax.f32 %v3138_v39, 0.0 }
 0x308   : > { %v11861_v24 = vpop.f32.mrf.mxu0  ;;  %v11863_v10 = vpop.f32.mrf.mxu1  ;;  %v3757_v27 = vpack.c.bf16 %v3661_v20, %v3657_v52  ;;  %v3660_v18 = vmax.f32 %v3130_v40, 0.0  ;;  %v3140_v52 = vadd.f32 %v11857_v49, %v11855_v11 }
 0x309   : > { %v3752_v53 = vpack.c.bf16 %v3652_v19, %v3648_v59  ;;  %v3142_v43 = vadd.f32 %v11863_v10, %v11861_v24  ;;  %v3656_v24 = vmax.f32 %v3126_v7, 0.0 }
 0x30a   : > { %v11869_v47 = vpop.f32.mrf.mxu0  ;;  %v11871_v44 = vpop.f32.mrf.mxu1  ;;  %4089 = vmatmul.mubr.bf16.gmra.mxu0 %v3732_v25  ;;  %v3668_v11 = vmax.f32 %v3140_v52, 0.0 }
 0x30b   : > { %4096 = vmatprep.mubr.bf16.mxu0 %v3737_v45  ;;  %v3669_v59 = vmax.f32 %v3142_v43, 0.0  ;;  %v3756_v17 = vpack.c.bf16 %v3660_v18, %v3656_v24  ;;  %v3136_v43 = vadd.f32 %v11847_v4, %v11845_v56 }
 0x30c   : > { %v11875_v38 = vpop.f32.mrf.mxu0  ;;  %v11877_v58 = vpop.f32.mrf.mxu1 }
 0x30d   : > { %v3761_v40 = vpack.c.bf16 %v3669_v59, %v3665_v57  ;;  %v3148_v39 = vadd.f32 %v11877_v58, %v11875_v38 }
 0x30e   : > { %v11879_v63 = vpop.f32.mrf.mxu0  ;;  %v11881_v23 = vpop.f32.mrf.mxu1 }
 0x30f   : > { %v3673_v56 = vmax.f32 %v3148_v39, 0.0  ;;  %v3150_v57 = vadd.f32 %v11881_v23, %v11879_v63 }
 0x310   : > { %v11885_v25 = vpop.f32.mrf.mxu0  ;;  %v11887_v48 = vpop.f32.mrf.mxu1 }
 0x311   : > { %v3152_v32 = vadd.f32 %v11887_v48, %v11885_v25  ;;  %v3664_v25 = vmax.f32 %v3136_v43, 0.0 }
 0x312   : > { %v11893_v45 = vpop.f32.mrf.mxu0  ;;  %v11895_v30 = vpop.f32.mrf.mxu1  ;;  %4097 = vmatmul.mubr.bf16.gmra.mxu0 %v3736_v46 }
 0x313   : > { %4104 = vmatprep.mubr.bf16.mxu0 %v3741_v42  ;;  %v3677_v24 = vmax.f32 %v3152_v32, 0.0  ;;  %v3760_v4 = vpack.c.bf16 %v3668_v11, %v3664_v25  ;;  %v3146_v32 = vadd.f32 %v11871_v44, %v11869_v47  ;;  %v3676_v11 = vmax.f32 %v3150_v57, 0.0 }
 0x314   : > { %v11899_v0 = vpop.f32.mrf.mxu0  ;;  %v11901_v26 = vpop.f32.mrf.mxu1 }
 0x315   : > { %v3765_v52 = vpack.c.bf16 %v3677_v24, %v3673_v56  ;;  %v3158_v39 = vadd.f32 %v11901_v26, %v11899_v0 }
 0x316   : > { %v11903_v51 = vpop.f32.mrf.mxu0  ;;  %v11905_v6 = vpop.f32.mrf.mxu1 }
 0x317   : > { %v3160_v47 = vadd.f32 %v11905_v6, %v11903_v51 }
 0x318   : > { %v11909_v46 = vpop.f32.mrf.mxu0  ;;  %v11911_v61 = vpop.f32.mrf.mxu1 }
 0x319   : > { %v3162_v58 = vadd.f32 %v11911_v61, %v11909_v46  ;;  %v3684_v6 = vmax.f32 %v3160_v47, 0.0 }
 0x31a   : > { %v11917_v42 = vpop.f32.mrf.mxu0  ;;  %v11919_v29 = vpop.f32.mrf.mxu1  ;;  %4105 = vmatmul.mubr.bf16.gmra.mxu0 %v3740_v5 }
 0x31b   : > { %4112 = vmatprep.mubr.bf16.mxu0 %v3745_v34  ;;  %v3685_v25 = vmax.f32 %v3162_v58, 0.0  ;;  %v3156_v58 = vadd.f32 %v11895_v30, %v11893_v45 }
 0x31c   : > { %v11923_v33 = vpop.f32.mrf.mxu0  ;;  %v11925_v9 = vpop.f32.mrf.mxu1 }
 0x31e   : > { %v11927_v16 = vpop.f32.mrf.mxu0  ;;  %v11929_v15 = vpop.f32.mrf.mxu1 }
 0x320   : > { %v11933_v5 = vpop.f32.mrf.mxu0  ;;  %v11935_v60 = vpop.f32.mrf.mxu1 }
 0x321   : > { %v3172_v0 = vadd.f32 %v11935_v60, %v11933_v5 }
 0x322   : > { %v11941_v34 = vpop.f32.mrf.mxu0  ;;  %v11943_v35 = vpop.f32.mrf.mxu1  ;;  %4113 = vmatmul.mubr.bf16.gmra.mxu0 %v3744_v54 }
 0x323   : > { %4120 = vmatprep.mubr.bf16.mxu0 %v3749_v36  ;;  %v3693_v5 = vmax.f32 %v3172_v0, 0.0 }
 0x324   : > { %v11947_v21 = vpop.f32.mrf.mxu0  ;;  %v11949_v37 = vpop.f32.mrf.mxu1 }
 0x326   : > { %v11951_v41 = vpop.f32.mrf.mxu0  ;;  %v11953_v50 = vpop.f32.mrf.mxu1 }
 0x328   : > { %v11957_v54 = vpop.f32.mrf.mxu0  ;;  %v11959_v3 = vpop.f32.mrf.mxu1 }
 0x329   : > { %v3182_v47 = vadd.f32 %v11959_v3, %v11957_v54 }
 0x32a   : > { %v11965_v36 = vpop.f32.mrf.mxu0  ;;  %v11967_v14 = vpop.f32.mrf.mxu1  ;;  %4121 = vmatmul.mubr.bf16.gmra.mxu0 %v3748_v13 }
 0x32b   : > { %4128 = vmatprep.mubr.bf16.mxu0 %v3753_v62  ;;  %v3701_v54 = vmax.f32 %v3182_v47, 0.0 }
 0x32c   : > { %v11971_v12 = vpop.f32.mrf.mxu0  ;;  %v11973_v22 = vpop.f32.mrf.mxu1 }
 0x32e   : > { %v11975_v8 = vpop.f32.mrf.mxu0  ;;  %v11977_v31 = vpop.f32.mrf.mxu1 }
 0x330   : > { %v11981_v13 = vpop.f32.mrf.mxu0  ;;  %v11983_v2 = vpop.f32.mrf.mxu1 }
 0x332   : > { %v11989_v62 = vpop.f32.mrf.mxu0  ;;  %v11991_v1 = vpop.f32.mrf.mxu1  ;;  %4129 = vmatmul.mubr.bf16.gmra.mxu0 %v3752_v53 }
 0x333   : > { %4136 = vmatprep.mubr.bf16.mxu0 %v3757_v27 }
 0x334   : > { %v11995_v28 = vpop.f32.mrf.mxu0  ;;  %v11997_v19 = vpop.f32.mrf.mxu1 }
 0x336   : > { %v11999_v10 = vpop.f32.mrf.mxu0  ;;  %v12001_v20 = vpop.f32.mrf.mxu1 }
 0x338   : > { %v12005_v53 = vpop.f32.mrf.mxu0  ;;  %v12007_v55 = vpop.f32.mrf.mxu1 }
 0x33a   : > { %v12013_v27 = vpop.f32.mrf.mxu0  ;;  %v12015_v7 = vpop.f32.mrf.mxu1  ;;  %4137 = vmatmul.mubr.bf16.gmra.mxu0 %v3756_v17 }
 0x33b   : > { %14751 = vst [vmem:[#allocation30_spill] sm:$0xff] %v12013_v27  ;;  %14752 = vst [vmem:[#allocation31_spill] sm:$0xff] %v12015_v7  ;;  %4144 = vmatprep.mubr.bf16.mxu0 %v3761_v40  ;;  %v3672_v7 = vmax.f32 %v3146_v32, 0.0 }
 0x33c   : > { %v12019_v49 = vpop.f32.mrf.mxu0  ;;  %v12021_v18 = vpop.f32.mrf.mxu1 }
 0x33d   : > { %v3764_v24 = vpack.c.bf16 %v3676_v11, %v3672_v7 }
 0x33e   : > { %v12023_v48 = vpop.f32.mrf.mxu0  ;;  %v12025_v59 = vpop.f32.mrf.mxu1 }
 0x33f   : > { %14753 = vst [vmem:[#allocation32_spill] sm:$0xff] %v12023_v48  ;;  %14754 = vst [vmem:[#allocation27_spill] sm:$0xff] %v12025_v59  ;;  %v3681_v48 = vmax.f32 %v3158_v39, 0.0 }
 0x340   : > { %v12029_v17 = vpop.f32.mrf.mxu0  ;;  %v12031_v38 = vpop.f32.mrf.mxu1 }
 0x341   : > { %v3769_v57 = vpack.c.bf16 %v3685_v25, %v3681_v48  ;;  %v3680_v48 = vmax.f32 %v3156_v58, 0.0  ;;  %v3178_v58 = vadd.f32 %v11949_v37, %v11947_v21  ;;  %v3180_v21 = vadd.f32 %v11953_v50, %v11951_v41 }
 0x342   : > { %v3248_v40 = vpop.f32.mrf.mxu0  ;;  %v3441_v43 = vpop.f32.mrf.mxu1  ;;  %4145 = vmatmul.mubr.bf16.gmra.mxu0 %v3760_v4 }
 0x343   : > { %4152 = vmatprep.mubr.bf16.mxu0 %v3765_v52  ;;  %v3442_v44 = vadd.f32 %v3441_v43, %v3248_v40 }
 0x344   : > { %v3250_v63 = vpop.f32.mrf.mxu0  ;;  %v3443_v23 = vpop.f32.mrf.mxu1 }
 0x345   : > { %v3444_v46 = vadd.f32 %v3443_v23, %v3250_v63 }
 0x346   : > { %v3252_v27 = vpop.f32.mrf.mxu0  ;;  %v3445_v59 = vpop.f32.mrf.mxu1 }
 0x347   : > { %v3446_v61 = vadd.f32 %v3445_v59, %v3252_v27  ;;  %v3168_v27 = vadd.f32 %v11925_v9, %v11923_v33  ;;  %v3603_v7 = vmax.f32 %v3444_v46, 0.0  ;;  %v3602_v59 = vmax.f32 %v3442_v44, 0.0 }
 0x348   : > { %v3254_v56 = vpop.f32.mrf.mxu0  ;;  %v3447_v4 = vpop.f32.mrf.mxu1  ;;  %v3170_v33 = vadd.f32 %v11929_v15, %v11927_v16 }
 0x349   : > { %v3448_v26 = vadd.f32 %v3447_v4, %v3254_v56  ;;  %v3606_v52 = vmax.f32 %v3446_v61, 0.0  ;;  %v3689_v30 = vmax.f32 %v3168_v27, 0.0  ;;  %v3768_v61 = vpack.c.bf16 %v3684_v6, %v3680_v48 }
 0x34a   : > { %v3258_v32 = vpop.f32.mrf.mxu0  ;;  %v3451_v39 = vpop.f32.mrf.mxu1  ;;  %4153 = vmatmul.mubr.bf16.gmra.mxu0 %v3764_v24  ;;  %v3166_v4 = vadd.f32 %v11919_v29, %v11917_v42  ;;  %v3697_v29 = vmax.f32 %v3178_v58, 0.0  ;;  %v3192_v48 = vadd.f32 %v11983_v2, %v11981_v13 }
 0x34b   : > { %v3607_v51 = vmax.f32 %v3448_v26, 0.0  ;;  %4160 = vmatprep.mubr.bf16.mxu0 %v3769_v57  ;;  %v3730_v11 = vpack.c.bf16 %v3606_v52, %v3602_v59  ;;  %v3452_v9 = vadd.f32 %v3451_v39, %v3258_v32  ;;  %v3773_v56 = vpack.c.bf16 %v3693_v5, %v3689_v30 }
 0x34c   : > { %v3260_v40 = vpop.f32.mrf.mxu0  ;;  %v3453_v43 = vpop.f32.mrf.mxu1  ;;  %v3692_v52 = vmax.f32 %v3170_v33, 0.0  ;;  %v3700_v33 = vmax.f32 %v3180_v21, 0.0  ;;  %v3709_v13 = vmax.f32 %v3192_v48, 0.0  ;;  %v3212_v48 = vadd.f32 %v12031_v38, %v12029_v17 }
 0x34d   : > { %v3731_v60 = vpack.c.bf16 %v3607_v51, %v3603_v7  ;;  %v3454_v23 = vadd.f32 %v3453_v43, %v3260_v40  ;;  %v3610_v32 = vmax.f32 %v3452_v9, 0.0  ;;  %v3688_v7 = vmax.f32 %v3166_v4, 0.0 }
 0x34e   : > { %v3262_v63 = vpop.f32.mrf.mxu0  ;;  %v3455_v45 = vpop.f32.mrf.mxu1  ;;  %v3725_v17 = vmax.f32 %v3212_v48, 0.0 }
 0x34f   : > { %v3456_v25 = vadd.f32 %v3455_v45, %v3262_v63  ;;  %4241 = vmatprep.mubr.bf16.mxu1 %v3731_v60  ;;  %v3611_v16 = vmax.f32 %v3454_v23, 0.0  ;;  %v3772_v43 = vpack.c.bf16 %v3692_v52, %v3688_v7  ;;  %v3777_v63 = vpack.c.bf16 %v3701_v54, %v3697_v29 }
 0x350   : > { %v3264_v46 = vpop.f32.mrf.mxu0  ;;  %v3457_v24 = vpop.f32.mrf.mxu1  ;;  %4242 = vmatmul.mubr.bf16.vlgmr.msra.gmra.mxu1 %v3730_v11  ;;  %v3176_v45 = vadd.f32 %v11943_v35, %v11941_v34 }
 0x351   : > { %v3458_v44 = vadd.f32 %v3457_v24, %v3264_v46  ;;  %v3614_v0 = vmax.f32 %v3456_v25, 0.0 }
 0x352   : > { %v3268_v26 = vpop.f32.mrf.mxu0  ;;  %v3461_v57 = vpop.f32.mrf.mxu1  ;;  %4161 = vmatmul.mubr.bf16.gmra.mxu0 %v3768_v61  ;;  %v3188_v61 = vadd.f32 %v11973_v22, %v11971_v12  ;;  %v3696_v47 = vmax.f32 %v3176_v45, 0.0  ;;  %v3190_v12 = vadd.f32 %v11977_v31, %v11975_v8  ;;  %v3196_v45 = vadd.f32 %v11991_v1, %v11989_v62 }
 0x353   : > { %v3615_v15 = vmax.f32 %v3458_v44, 0.0  ;;  %4168 = vmatprep.mubr.bf16.mxu0 %v3773_v56  ;;  %v3734_v51 = vpack.c.bf16 %v3614_v0, %v3610_v32  ;;  %v3462_v37 = vadd.f32 %v3461_v57, %v3268_v26  ;;  %v3186_v32 = vadd.f32 %v11967_v14, %v11965_v36 }
 0x354   : > { %v3270_v39 = vpop.f32.mrf.mxu0  ;;  %v3463_v27 = vpop.f32.mrf.mxu1  ;;  %v3705_v35 = vmax.f32 %v3188_v61, 0.0  ;;  %v3776_v26 = vpack.c.bf16 %v3700_v33, %v3696_v47  ;;  %v3708_v7 = vmax.f32 %v3190_v12, 0.0  ;;  %v3208_v61 = vadd.f32 %v12021_v18, %v12019_v49  ;;  %v14756_v49 = vld [vmem:[#allocation27_spill] sm:$0xff]  ;;  %v14757_v12 = vld [vmem:[#allocation30_spill] sm:$0xff] }
 0x355   : > { %v3735_v3 = vpack.c.bf16 %v3615_v15, %v3611_v16  ;;  %v3464_v59 = vadd.f32 %v3463_v27, %v3270_v39  ;;  %v3618_v9 = vmax.f32 %v3462_v37, 0.0  ;;  %v3202_v16 = vadd.f32 %v12007_v55, %v12005_v53 }
 0x356   : > { %v3272_v6 = vpop.f32.mrf.mxu0  ;;  %v3465_v42 = vpop.f32.mrf.mxu1  ;;  %v3781_v52 = vpack.c.bf16 %v3709_v13, %v3705_v35  ;;  %v3704_v29 = vmax.f32 %v3186_v32, 0.0  ;;  %v3721_v1 = vmax.f32 %v3208_v61, 0.0 }
 0x357   : > { %v3466_v40 = vadd.f32 %v3465_v42, %v3272_v6  ;;  %4249 = vmatprep.mubr.bf16.mxu1 %v3735_v3  ;;  %v3619_v41 = vmax.f32 %v3464_v59, 0.0  ;;  %v3198_v3 = vadd.f32 %v11997_v19, %v11995_v28  ;;  %v3717_v53 = vmax.f32 %v3202_v16, 0.0 }
 0x358   : > { %v3274_v5 = vpop.f32.mrf.mxu0  ;;  %v3467_v60 = vpop.f32.mrf.mxu1  ;;  %4250 = vmatmul.mubr.bf16.gmra.mxu1 %v3734_v51  ;;  %v3780_v37 = vpack.c.bf16 %v3708_v7, %v3704_v29  ;;  %v3200_v28 = vadd.f32 %v12001_v20, %v11999_v10 }
 0x359   : > { %v3468_v11 = vadd.f32 %v3467_v60, %v3274_v5  ;;  %v3622_v30 = vmax.f32 %v3466_v40, 0.0  ;;  %v3713_v14 = vmax.f32 %v3198_v3, 0.0 }
 0x35a   : > { %v3278_v23 = vpop.f32.mrf.mxu0  ;;  %v3471_v25 = vpop.f32.mrf.mxu1  ;;  %4169 = vmatmul.mubr.bf16.gmra.mxu0 %v3772_v43 }
 0x35b   : > { %v3623_v50 = vmax.f32 %v3468_v11, 0.0  ;;  %4176 = vmatprep.mubr.bf16.mxu0 %v3777_v63  ;;  %v3738_v44 = vpack.c.bf16 %v3622_v30, %v3618_v9  ;;  %v3472_v22 = vadd.f32 %v3471_v25, %v3278_v23  ;;  %v3785_v63 = vpack.c.bf16 %v3717_v53, %v3713_v14 }
 0x35c   : > { %v3280_v46 = vpop.f32.mrf.mxu0  ;;  %v3473_v24 = vpop.f32.mrf.mxu1 }
 0x35d   : > { %v3739_v2 = vpack.c.bf16 %v3623_v50, %v3619_v41  ;;  %v3474_v4 = vadd.f32 %v3473_v24, %v3280_v46  ;;  %v3626_v51 = vmax.f32 %v3472_v22, 0.0  ;;  %v3716_v41 = vmax.f32 %v3200_v28, 0.0  ;;  %v14758_v22 = vld [vmem:[#allocation31_spill] sm:$0xff] }
 0x35e   : > { %v3282_v56 = vpop.f32.mrf.mxu0  ;;  %v3475_v34 = vpop.f32.mrf.mxu1  ;;  %v3712_v46 = vmax.f32 %v3196_v45, 0.0 }
 0x35f   : > { %v3476_v0 = vadd.f32 %v3475_v34, %v3282_v56  ;;  %4257 = vmatprep.mubr.bf16.mxu1 %v3739_v2  ;;  %v3627_v8 = vmax.f32 %v3474_v4, 0.0  ;;  %v14755_v56 = vld [vmem:[#allocation32_spill] sm:$0xff] }
 0x360   : > { %v3284_v57 = vpop.f32.mrf.mxu0  ;;  %v3477_v58 = vpop.f32.mrf.mxu1  ;;  %4258 = vmatmul.mubr.bf16.gmra.mxu1 %v3738_v44  ;;  %v3784_v44 = vpack.c.bf16 %v3716_v41, %v3712_v46  ;;  %v3210_v18 = vadd.f32 %v14756_v49, %v14755_v56 }
 0x361   : > { %v3478_v15 = vadd.f32 %v3477_v58, %v3284_v57  ;;  %v3630_v39 = vmax.f32 %v3476_v0, 0.0  ;;  %v3206_v57 = vadd.f32 %v14758_v22, %v14757_v12 }
 0x362   : > { %v3288_v27 = vpop.f32.mrf.mxu0  ;;  %v3481_v54 = vpop.f32.mrf.mxu1  ;;  %4177 = vmatmul.mubr.bf16.gmra.mxu0 %v3776_v26  ;;  %v3789_v26 = vpack.c.bf16 %v3725_v17, %v3721_v1 }
 0x363   : > { %v3631_v31 = vmax.f32 %v3478_v15, 0.0  ;;  %4184 = vmatprep.mubr.bf16.mxu0 %v3781_v52  ;;  %v3742_v59 = vpack.c.bf16 %v3630_v39, %v3626_v51  ;;  %v3482_v19 = vadd.f32 %v3481_v54, %v3288_v27  ;;  %v3724_v39 = vmax.f32 %v3210_v18, 0.0 }
 0x364   : > { %v3290_v6 = vpop.f32.mrf.mxu0  ;;  %v3483_v42 = vpop.f32.mrf.mxu1 }
 0x365   : > { %v3743_v55 = vpack.c.bf16 %v3631_v31, %v3627_v8  ;;  %v3484_v43 = vadd.f32 %v3483_v42, %v3290_v6  ;;  %v3634_v50 = vmax.f32 %v3482_v19, 0.0  ;;  %v3720_v31 = vmax.f32 %v3206_v57, 0.0 }
 0x366   : > { %v3292_v40 = vpop.f32.mrf.mxu0  ;;  %v3485_v36 = vpop.f32.mrf.mxu1  ;;  %v14759_v19 = vmov 0  }
 0x367   : > { %v3486_v21 = vadd.f32 %v3485_v36, %v3292_v40  ;;  %4265 = vmatprep.mubr.bf16.mxu1 %v3743_v55  ;;  %v3635_v10 = vmax.f32 %v3484_v43, 0.0  ;;  %v3788_v55 = vpack.c.bf16 %v3724_v39, %v3720_v31 }
 0x368   : > { %v3294_v5 = vpop.f32.mrf.mxu0  ;;  %v3487_v60 = vpop.f32.mrf.mxu1  ;;  %4266 = vmatmul.mubr.bf16.gmra.mxu1 %v3742_v59 }
 0x369   : > { %v3488_v11 = vadd.f32 %v3487_v60, %v3294_v5  ;;  %v3638_v30 = vmax.f32 %v3486_v21, 0.0 }
 0x36a   : > { %v3298_v23 = vpop.f32.mrf.mxu0  ;;  %v3491_v25 = vpop.f32.mrf.mxu1  ;;  %4185 = vmatmul.mubr.bf16.gmra.mxu0 %v3780_v37 }
 0x36b   : > { %v3639_v20 = vmax.f32 %v3488_v11, 0.0  ;;  %4192 = vmatprep.mubr.bf16.mxu0 %v3785_v63  ;;  %v3746_v24 = vpack.c.bf16 %v3638_v30, %v3634_v50  ;;  %v3492_v34 = vadd.f32 %v3491_v25, %v3298_v23 }
 0x36c   : > { %v3300_v33 = vpop.f32.mrf.mxu0  ;;  %v3493_v9 = vpop.f32.mrf.mxu1 }
 0x36d   : > { %v3747_v38 = vpack.c.bf16 %v3639_v20, %v3635_v10  ;;  %v3494_v2 = vadd.f32 %v3493_v9, %v3300_v33  ;;  %v3642_v27 = vmax.f32 %v3492_v34, 0.0 }
 0x36e   : > { %v3302_v13 = vpop.f32.mrf.mxu0  ;;  %v3495_v62 = vpop.f32.mrf.mxu1 }
 0x36f   : > { %v3496_v47 = vadd.f32 %v3495_v62, %v3302_v13  ;;  %4273 = vmatprep.mubr.bf16.mxu1 %v3747_v38  ;;  %v3643_v52 = vmax.f32 %v3494_v2, 0.0 }
 0x370   : > { %v3304_v35 = vpop.f32.mrf.mxu0  ;;  %v3497_v4 = vpop.f32.mrf.mxu1  ;;  %4274 = vmatmul.mubr.bf16.gmra.mxu1 %v3746_v24 }
 0x371   : > { %v3498_v0 = vadd.f32 %v3497_v4, %v3304_v35  ;;  %v3646_v58 = vmax.f32 %v3496_v47, 0.0 }
 0x372   : > { %v3308_v16 = vpop.f32.mrf.mxu0  ;;  %v3501_v15 = vpop.f32.mrf.mxu1  ;;  %4193 = vmatmul.mubr.bf16.gmra.mxu0 %v3784_v44 }
 0x373   : > { %v3647_v32 = vmax.f32 %v3498_v0, 0.0  ;;  %4200 = vmatprep.mubr.bf16.mxu0 %v3789_v26  ;;  %v3750_v7 = vpack.c.bf16 %v3646_v58, %v3642_v27  ;;  %v3502_v29 = vadd.f32 %v3501_v15, %v3308_v16 }
 0x374   : > { %v3310_v54 = vpop.f32.mrf.mxu0  ;;  %v3503_v3 = vpop.f32.mrf.mxu1 }
 0x375   : > { %v3751_v8 = vpack.c.bf16 %v3647_v32, %v3643_v52  ;;  %v3504_v42 = vadd.f32 %v3503_v3, %v3310_v54  ;;  %v3650_v5 = vmax.f32 %v3502_v29, 0.0 }
 0x376   : > { %v3312_v51 = vpop.f32.mrf.mxu0  ;;  %v3505_v6 = vpop.f32.mrf.mxu1 }
 0x377   : > { %v3506_v53 = vadd.f32 %v3505_v6, %v3312_v51  ;;  %4281 = vmatprep.mubr.bf16.mxu1 %v3751_v8  ;;  %v3651_v37 = vmax.f32 %v3504_v42, 0.0 }
 0x378   : > { %v3314_v59 = vpop.f32.mrf.mxu0  ;;  %v3507_v40 = vpop.f32.mrf.mxu1  ;;  %4282 = vmatmul.mubr.bf16.gmra.mxu1 %v3750_v7 }
 0x379   : > { %v3508_v36 = vadd.f32 %v3507_v40, %v3314_v59  ;;  %v3654_v14 = vmax.f32 %v3506_v53, 0.0 }
 0x37a   : > { %v3318_v43 = vpop.f32.mrf.mxu0  ;;  %v3511_v21 = vpop.f32.mrf.mxu1  ;;  %4201 = vmatmul.mubr.bf16.gmra.mxu0 %v3788_v55 }
 0x37b   : > { %v3655_v28 = vmax.f32 %v3508_v36, 0.0  ;;  %4810 = vmatprep.mubr.bf16.mxu0 %v14759_v19  ;;  %v3754_v63 = vpack.c.bf16 %v3654_v14, %v3650_v5  ;;  %v3512_v61 = vadd.f32 %v3511_v21, %v3318_v43 }
 0x37c   : > { %v3320_v60 = vpop.f32.mrf.mxu0  ;;  %v3513_v48 = vpop.f32.mrf.mxu1 }
 0x37d   : > { %v3755_v11 = vpack.c.bf16 %v3655_v28, %v3651_v37  ;;  %v3514_v23 = vadd.f32 %v3513_v48, %v3320_v60  ;;  %v3658_v46 = vmax.f32 %v3512_v61, 0.0 }
 0x37e   : > { %v3322_v45 = vpop.f32.mrf.mxu0  ;;  %v3515_v30 = vpop.f32.mrf.mxu1 }
 0x37f   : > { %v3516_v25 = vadd.f32 %v3515_v30, %v3322_v45  ;;  %4289 = vmatprep.mubr.bf16.mxu1 %v3755_v11  ;;  %v3659_v17 = vmax.f32 %v3514_v23, 0.0 }
 0x380   : > { %v3324_v10 = vpop.f32.mrf.mxu0  ;;  %v3517_v20 = vpop.f32.mrf.mxu1  ;;  %4290 = vmatmul.mubr.bf16.gmra.mxu1 %v3754_v63 }
 0x381   : > { %v3518_v41 = vadd.f32 %v3517_v20, %v3324_v10  ;;  %v3662_v50 = vmax.f32 %v3516_v25, 0.0 }
 0x382   : > { %v3328_v33 = vpop.f32.mrf.mxu0  ;;  %v3521_v9 = vpop.f32.mrf.mxu1 }
 0x383   : > { %v3663_v38 = vmax.f32 %v3518_v41, 0.0  ;;  %v3758_v1 = vpack.c.bf16 %v3662_v50, %v3658_v46  ;;  %v3522_v49 = vadd.f32 %v3521_v9, %v3328_v33 }
 0x384   : > { %v3330_v24 = vpop.f32.mrf.mxu0  ;;  %v3523_v13 = vpop.f32.mrf.mxu1 }
 0x385   : > { %v3759_v62 = vpack.c.bf16 %v3663_v38, %v3659_v17  ;;  %v3524_v44 = vadd.f32 %v3523_v13, %v3330_v24  ;;  %v3666_v57 = vmax.f32 %v3522_v49, 0.0 }
 0x386   : > { %v3332_v2 = vpop.f32.mrf.mxu0  ;;  %v3525_v47 = vpop.f32.mrf.mxu1 }
 0x387   : > { %v3526_v56 = vadd.f32 %v3525_v47, %v3332_v2  ;;  %4297 = vmatprep.mubr.bf16.mxu1 %v3759_v62  ;;  %v3667_v12 = vmax.f32 %v3524_v44, 0.0 }
 0x388   : > { %v3334_v18 = vpop.f32.mrf.mxu0  ;;  %v3527_v34 = vpop.f32.mrf.mxu1  ;;  %4298 = vmatmul.mubr.bf16.gmra.mxu1 %v3758_v1 }
 0x389   : > { %v3528_v35 = vadd.f32 %v3527_v34, %v3334_v18  ;;  %v3670_v4 = vmax.f32 %v3526_v56, 0.0 }
 0x38a   : > { %v3338_v0 = vpop.f32.mrf.mxu0  ;;  %v3531_v26 = vpop.f32.mrf.mxu1 }
 0x38b   : > { %v3671_v22 = vmax.f32 %v3528_v35, 0.0  ;;  %v3762_v52 = vpack.c.bf16 %v3670_v4, %v3666_v57  ;;  %v3532_v3 = vadd.f32 %v3531_v26, %v3338_v0 }
 0x38c   : > { %v3340_v58 = vpop.f32.mrf.mxu0  ;;  %v3533_v16 = vpop.f32.mrf.mxu1 }
 0x38d   : > { %v3763_v15 = vpack.c.bf16 %v3671_v22, %v3667_v12  ;;  %v3534_v27 = vadd.f32 %v3533_v16, %v3340_v58  ;;  %v3674_v29 = vmax.f32 %v3532_v3, 0.0 }
 0x38e   : > { %v3342_v32 = vpop.f32.mrf.mxu0  ;;  %v3535_v39 = vpop.f32.mrf.mxu1 }
 0x38f   : > { %v3536_v54 = vadd.f32 %v3535_v39, %v3342_v32  ;;  %4305 = vmatprep.mubr.bf16.mxu1 %v3763_v15  ;;  %v3675_v53 = vmax.f32 %v3534_v27, 0.0 }
 0x390   : > { %v3344_v8 = vpop.f32.mrf.mxu0  ;;  %v3537_v31 = vpop.f32.mrf.mxu1  ;;  %4306 = vmatmul.mubr.bf16.gmra.mxu1 %v3762_v52 }
 0x391   : > { %v3538_v7 = vadd.f32 %v3537_v31, %v3344_v8  ;;  %v3678_v51 = vmax.f32 %v3536_v54, 0.0 }
 0x392   : > { %v3348_v6 = vpop.f32.mrf.mxu0  ;;  %v3541_v42 = vpop.f32.mrf.mxu1 }
 0x393   : > { %v3679_v55 = vmax.f32 %v3538_v7, 0.0  ;;  %v3766_v14 = vpack.c.bf16 %v3678_v51, %v3674_v29  ;;  %v3542_v5 = vadd.f32 %v3541_v42, %v3348_v6 }
 0x394   : > { %v3350_v59 = vpop.f32.mrf.mxu0  ;;  %v3543_v40 = vpop.f32.mrf.mxu1 }
 0x395   : > { %v3767_v36 = vpack.c.bf16 %v3679_v55, %v3675_v53  ;;  %v3544_v37 = vadd.f32 %v3543_v40, %v3350_v59  ;;  %v3682_v61 = vmax.f32 %v3542_v5, 0.0  ;;  %v4706_v59 = vld [vmem:[#allocation2] sm:$0xff]  ;;  %v4707_v40 = vld [vmem:[#allocation2 + $0x8] sm:$0xff] }
 0x396   : > { %v3352_v43 = vpop.f32.mrf.mxu0  ;;  %v3545_v21 = vpop.f32.mrf.mxu1 }
 0x397   : > { %v3546_v28 = vadd.f32 %v3545_v21, %v3352_v43  ;;  %4313 = vmatprep.mubr.bf16.mxu1 %v3767_v36  ;;  %v3683_v23 = vmax.f32 %v3544_v37, 0.0  ;;  %v8454_v43 = vcombine.high %v4706_v59, %v4706_v59  ;;  %v8456_v21 = vcombine.high %v4707_v40, %v4707_v40 }
 0x398   : > { %v3354_v60 = vpop.f32.mrf.mxu0  ;;  %v3547_v48 = vpop.f32.mrf.mxu1  ;;  %4314 = vmatmul.mubr.bf16.gmra.mxu1 %v3766_v14  ;;  %v8453_v37 = vcombine.low %v4706_v59, %v4706_v59 }
 0x399   : > { %v3548_v11 = vadd.f32 %v3547_v48, %v3354_v60  ;;  %v3686_v63 = vmax.f32 %v3546_v28, 0.0  ;;  %v8455_v28 = vcombine.low %v4707_v40, %v4707_v40  ;;  %8457 = vmatprep.subr.msk.bf16.mxu0 %vm540_vm0, %v8454_v43  ;;  %8474 = vmatprep.subr.msk.bf16.mxu1 %vm540_vm0, %v8456_v21 }
 0x39a   : > { %v3358_v45 = vpop.f32.mrf.mxu0  ;;  %v3551_v30 = vpop.f32.mrf.mxu1 }
 0x39b   : > { %v3687_v25 = vmax.f32 %v3548_v11, 0.0  ;;  %v3770_v50 = vpack.c.bf16 %v3686_v63, %v3682_v61  ;;  %v3552_v46 = vadd.f32 %v3551_v30, %v3358_v45  ;;  %v4767_v63 = vsel %vm540_vm0, %v8453_v37, 0 }
 0x39c   : > { %v3360_v10 = vpop.f32.mrf.mxu0  ;;  %v3553_v20 = vpop.f32.mrf.mxu1  ;;  %v4773_v45 = vsel %vm540_vm0, %v8455_v28, 0  ;;  %4793 = vmatpush1.bf16.msra.mxu0 %v4767_v63 }
 0x39d   : > { %v3771_v41 = vpack.c.bf16 %v3687_v25, %v3683_v23  ;;  %v3554_v17 = vadd.f32 %v3553_v20, %v3360_v10  ;;  %v3690_v49 = vmax.f32 %v3552_v46, 0.0  ;;  %4986 = vmatpush1.bf16.msra.mxu1 %v4773_v45 }
 0x39e   : > { %v3362_v33 = vpop.f32.mrf.mxu0  ;;  %v3555_v9 = vpop.f32.mrf.mxu1 }
 0x39f   : > { %v3556_v38 = vadd.f32 %v3555_v9, %v3362_v33  ;;  %4321 = vmatprep.mubr.bf16.mxu1 %v3771_v41  ;;  %v3691_v44 = vmax.f32 %v3554_v17, 0.0 }
 0x3a0   : > { %v3364_v24 = vpop.f32.mrf.mxu0  ;;  %v3557_v13 = vpop.f32.mrf.mxu1  ;;  %4322 = vmatmul.mubr.bf16.gmra.mxu1 %v3770_v50 }
 0x3a1   : > { %v3558_v62 = vadd.f32 %v3557_v13, %v3364_v24  ;;  %v3694_v1 = vmax.f32 %v3556_v38, 0.0 }
 0x3a2   : > { %v3368_v2 = vpop.f32.mrf.mxu0  ;;  %v3561_v47 = vpop.f32.mrf.mxu1 }
 0x3a3   : > { %v3695_v56 = vmax.f32 %v3558_v62, 0.0  ;;  %v3774_v4 = vpack.c.bf16 %v3694_v1, %v3690_v49  ;;  %v3562_v57 = vadd.f32 %v3561_v47, %v3368_v2 }
 0x3a4   : > { %v3370_v18 = vpop.f32.mrf.mxu0  ;;  %v3563_v34 = vpop.f32.mrf.mxu1 }
 0x3a5   : > { %v3775_v35 = vpack.c.bf16 %v3695_v56, %v3691_v44  ;;  %v3564_v12 = vadd.f32 %v3563_v34, %v3370_v18  ;;  %v3698_v3 = vmax.f32 %v3562_v57, 0.0 }
 0x3a6   : > { %v3372_v0 = vpop.f32.mrf.mxu0  ;;  %v3565_v26 = vpop.f32.mrf.mxu1 }
 0x3a7   : > { %v3566_v22 = vadd.f32 %v3565_v26, %v3372_v0  ;;  %4329 = vmatprep.mubr.bf16.mxu1 %v3775_v35  ;;  %v3699_v27 = vmax.f32 %v3564_v12, 0.0 }
 0x3a8   : > { %v3374_v58 = vpop.f32.mrf.mxu0  ;;  %v3567_v16 = vpop.f32.mrf.mxu1  ;;  %4330 = vmatmul.mubr.bf16.gmra.mxu1 %v3774_v4 }
 0x3a9   : > { %v3568_v15 = vadd.f32 %v3567_v16, %v3374_v58  ;;  %v3702_v52 = vmax.f32 %v3566_v22, 0.0 }
 0x3aa   : > { %v3378_v32 = vpop.f32.mrf.mxu0  ;;  %v3571_v39 = vpop.f32.mrf.mxu1 }
 0x3ab   : > { %v3703_v54 = vmax.f32 %v3568_v15, 0.0  ;;  %v3778_v51 = vpack.c.bf16 %v3702_v52, %v3698_v3  ;;  %v3572_v53 = vadd.f32 %v3571_v39, %v3378_v32 }
 0x3ac   : > { %v3380_v8 = vpop.f32.mrf.mxu0  ;;  %v3573_v31 = vpop.f32.mrf.mxu1 }
 0x3ad   : > { %v3779_v7 = vpack.c.bf16 %v3703_v54, %v3699_v27  ;;  %v3574_v55 = vadd.f32 %v3573_v31, %v3380_v8  ;;  %v3706_v25 = vmax.f32 %v3572_v53, 0.0 }
 0x3ae   : > { %v3382_v6 = vpop.f32.mrf.mxu0  ;;  %v3575_v42 = vpop.f32.mrf.mxu1 }
 0x3af   : > { %v3576_v29 = vadd.f32 %v3575_v42, %v3382_v6  ;;  %4337 = vmatprep.mubr.bf16.mxu1 %v3779_v7  ;;  %v3707_v30 = vmax.f32 %v3574_v55, 0.0 }
 0x3b0   : > { %v3384_v36 = vpop.f32.mrf.mxu0  ;;  %v3577_v14 = vpop.f32.mrf.mxu1  ;;  %4338 = vmatmul.mubr.bf16.gmra.mxu1 %v3778_v51 }
 0x3b1   : > { %v3578_v5 = vadd.f32 %v3577_v14, %v3384_v36  ;;  %v3710_v60 = vmax.f32 %v3576_v29, 0.0 }
 0x3b2   : > { %v3388_v48 = vpop.f32.mrf.mxu0  ;;  %v3581_v11 = vpop.f32.mrf.mxu1 }
 0x3b3   : > { %v3711_v23 = vmax.f32 %v3578_v5, 0.0  ;;  %v3782_v41 = vpack.c.bf16 %v3710_v60, %v3706_v25  ;;  %v3582_v38 = vadd.f32 %v3581_v11, %v3388_v48 }
 0x3b4   : > { %v3390_v61 = vpop.f32.mrf.mxu0  ;;  %v3583_v10 = vpop.f32.mrf.mxu1 }
 0x3b5   : > { %v3783_v20 = vpack.c.bf16 %v3711_v23, %v3707_v30  ;;  %v3584_v9 = vadd.f32 %v3583_v10, %v3390_v61  ;;  %v3714_v56 = vmax.f32 %v3582_v38, 0.0 }
 0x3b6   : > { %v3392_v50 = vpop.f32.mrf.mxu0  ;;  %v3585_v33 = vpop.f32.mrf.mxu1 }
 0x3b7   : > { %v3586_v17 = vadd.f32 %v3585_v33, %v3392_v50  ;;  %4345 = vmatprep.mubr.bf16.mxu1 %v3783_v20  ;;  %v3715_v47 = vmax.f32 %v3584_v9, 0.0 }
 0x3b8   : > { %v3394_v46 = vpop.f32.mrf.mxu0  ;;  %v3587_v24 = vpop.f32.mrf.mxu1  ;;  %4346 = vmatmul.mubr.bf16.gmra.mxu1 %v3782_v41 }
 0x3b9   : > { %v3588_v13 = vadd.f32 %v3587_v24, %v3394_v46  ;;  %v3718_v62 = vmax.f32 %v3586_v17, 0.0 }
 0x3ba   : > { %v3398_v1 = vpop.f32.mrf.mxu0  ;;  %v3591_v2 = vpop.f32.mrf.mxu1 }
 0x3bb   : > { %v3719_v44 = vmax.f32 %v3588_v13, 0.0  ;;  %v3786_v35 = vpack.c.bf16 %v3718_v62, %v3714_v56  ;;  %v3592_v22 = vadd.f32 %v3591_v2, %v3398_v1 }
 0x3bc   : > { %v3400_v49 = vpop.f32.mrf.mxu0  ;;  %v3593_v18 = vpop.f32.mrf.mxu1 }
 0x3bd   : > { %v3787_v34 = vpack.c.bf16 %v3719_v44, %v3715_v47  ;;  %v3594_v26 = vadd.f32 %v3593_v18, %v3400_v49  ;;  %v3722_v27 = vmax.f32 %v3592_v22, 0.0 }
 0x3be   : > { %v3402_v4 = vpop.f32.mrf.mxu0  ;;  %v3595_v0 = vpop.f32.mrf.mxu1 }
 0x3bf   : > { %v3596_v12 = vadd.f32 %v3595_v0, %v3402_v4  ;;  %4353 = vmatprep.mubr.bf16.mxu1 %v3787_v34  ;;  %v3723_v32 = vmax.f32 %v3594_v26, 0.0 }
 0x3c0   : > { %v3404_v57 = vpop.f32.mrf.mxu0  ;;  %v3597_v58 = vpop.f32.mrf.mxu1  ;;  %4354 = vmatmul.mubr.bf16.gmra.mxu1 %v3786_v35 }
 0x3c1   : > { %v3598_v16 = vadd.f32 %v3597_v58, %v3404_v57  ;;  %v3726_v15 = vmax.f32 %v3596_v12, 0.0 }
 0x3c2   : > { %v8673_v52 = vpop.f32.mrf.mxu0 }
 0x3c3   : > { %v3727_v39 = vmax.f32 %v3598_v16, 0.0  ;;  %v3790_v8 = vpack.c.bf16 %v3726_v15, %v3722_v27 }
 0x3c4   : > { %v8674_v54 = vpop.f32.mrf.mxu0 }
 0x3c5   : > { %v3791_v3 = vpack.c.bf16 %v3727_v39, %v3723_v32  ;;  %v8675_v38 = vadd.f32 %v8674_v54, %v8673_v52 }
 0x3c6   : > { %v8676_v31 = vpop.f32.mrf.mxu0 }
 0x3c7   : > { %4361 = vmatprep.mubr.bf16.mxu1 %v3791_v3 }
 0x3c8   : > { %v8677_v7 = vpop.f32.mrf.mxu0  ;;  %4362 = vmatmul.mubr.bf16.gmra.mxu1 %v3790_v8 }
 0x3c9   : > { %5003 = vmatprep.mubr.bf16.mxu1 %v14759_v19  ;;  %v8678_v2 = vadd.f32 %v8677_v7, %v8676_v31 }
 0x3ca   : > { %v8679_v51 = vpop.f32.mrf.mxu0 }
 0x3cc   : > { %v8680_v6 = vpop.f32.mrf.mxu0 }
 0x3cd   : > { %v8681_v4 = vadd.f32 %v8680_v6, %v8679_v51 }
 0x3ce   : > { %v8682_v42 = vpop.f32.mrf.mxu0 }
 0x3d0   : > { %v8683_v53 = vpop.f32.mrf.mxu0 }
 0x3d1   : > { %v8684_v15 = vadd.f32 %v8683_v53, %v8682_v42 }
 0x3d2   : > { %v8685_v55 = vpop.f32.mrf.mxu0 }
 0x3d4   : > { %v8686_v29 = vpop.f32.mrf.mxu0 }
 0x3d5   : > { %v8687_v31 = vadd.f32 %v8686_v29, %v8685_v55 }
 0x3d6   : > { %v12089_v59 = vpop.f32.mrf.mxu0 }
 0x3d8   : > { %v12091_v40 = vpop.f32.mrf.mxu0 }
 0x3da   : > { %v12093_v36 = vpop.f32.mrf.mxu0 }
 0x3dc   : > { %v12095_v14 = vpop.f32.mrf.mxu0 }
 0x3de   : > { %v12097_v43 = vpop.f32.mrf.mxu0 }
 0x3e0   : > { %v12099_v21 = vpop.f32.mrf.mxu0 }
 0x3e2   : > { %v12101_v37 = vpop.f32.mrf.mxu0 }
 0x3e4   : > { %v12103_v28 = vpop.f32.mrf.mxu0 }
 0x3e6   : > { %v12105_v5 = vpop.f32.mrf.mxu0 }
 0x3e8   : > { %v12107_v60 = vpop.f32.mrf.mxu0 }
 0x3ea   : > { %v12109_v48 = vpop.f32.mrf.mxu0 }
 0x3ec   : > { %v12111_v11 = vpop.f32.mrf.mxu0 }
 0x3ee   : > { %v12113_v63 = vpop.f32.mrf.mxu0 }
 0x3f0   : > { %v12115_v45 = vpop.f32.mrf.mxu0 }
 0x3f2   : > { %v12117_v30 = vpop.f32.mrf.mxu0 }
 0x3f4   : > { %v12119_v23 = vpop.f32.mrf.mxu0 }
 0x3f6   : > { %v12121_v25 = vpop.f32.mrf.mxu0 }
 0x3f8   : > { %v12123_v61 = vpop.f32.mrf.mxu0 }
 0x3fa   : > { %v12125_v10 = vpop.f32.mrf.mxu0 }
 0x3fc   : > { %v12127_v20 = vpop.f32.mrf.mxu0 }
 0x3fe   : > { %v12129_v41 = vpop.f32.mrf.mxu0 }
 0x400   : > { %v12131_v50 = vpop.f32.mrf.mxu0 }
 0x402   : > { %v12133_v33 = vpop.f32.mrf.mxu0 }
 0x404   : > { %v12135_v24 = vpop.f32.mrf.mxu0 }
 0x406   : > { %v12140_v56 = vpop.f32.mrf.mxu0 }
 0x408   : > { %v12145_v12 = vpop.f32.mrf.mxu0 }
 0x40a   : > { %v12150_v39 = vpop.f32.mrf.mxu0 }
 0x40c   : > { %v12155_v6 = vpop.f32.mrf.mxu0 }
 0x40e   : > { %v12162_v55 = vpop.f32.mrf.mxu0 }
 0x410   : > { %v8785_v9 = vpop.f32.mrf.mxu1 }
 0x412   : > { %v8786_v17 = vpop.f32.mrf.mxu1 }
 0x413   : > { %v8787_v46 = vadd.f32 %v8786_v17, %v8785_v9 }
 0x414   : > { %v8788_v13 = vpop.f32.mrf.mxu1 }
 0x415   : > { %v12137_v62 = vadd.f32 %v8787_v46, %v8675_v38  ;;  %v8690_v38 = vadd.f32 %v12091_v40, %v12089_v59 }
 0x416   : > { %v8789_v1 = vpop.f32.mrf.mxu1 }
 0x417   : > { %v4402_v47 = vmul.f32 0.5, %v12137_v62  ;;  %v8790_v44 = vadd.f32 %v8789_v1, %v8788_v13 }
 0x418   : > { %v8791_v49 = vpop.f32.mrf.mxu1 }
 0x419   : > { %v4434_v18 = vmul.f32 1.442695, %v4402_v47  ;;  %v12142_v34 = vadd.f32 %v8790_v44, %v8678_v2 }
 0x41a   : > { %v8792_v35 = vpop.f32.mrf.mxu1 }
 0x41b   : > { %9633 = vpow2.f32 %v4434_v18  ;;  %v4403_v0 = vmul.f32 0.5, %v12142_v34  ;;  %v8793_v26 = vadd.f32 %v8792_v35, %v8791_v49  ;;  %v8693_v49 = vadd.f32 %v12095_v14, %v12093_v36  ;;  %v12170_v35 = vpop.f32.mrf.mxu0 }
 0x41c   : > { %v8794_v22 = vpop.f32.mrf.mxu1 }
 0x41d   : > { %v4436_v57 = vmul.f32 1.442695, %v4403_v0  ;;  %v12147_v58 = vadd.f32 %v8793_v26, %v8681_v4 }
 0x41e   : > { %v8795_v16 = vpop.f32.mrf.mxu1 }
 0x41f   : > { %9635 = vpow2.f32 %v4436_v57  ;;  %v4404_v52 = vmul.f32 0.5, %v12147_v58  ;;  %v8796_v32 = vadd.f32 %v8795_v16, %v8794_v22  ;;  %v8696_v57 = vadd.f32 %v12099_v21, %v12097_v43 }
 0x420   : > { %v8797_v27 = vpop.f32.mrf.mxu1 }
 0x421   : > { %v4438_v54 = vmul.f32 1.442695, %v4404_v52  ;;  %v12152_v3 = vadd.f32 %v8796_v32, %v8684_v15  ;;  %v12178_v15 = vpop.f32.mrf.mxu0 }
 0x422   : > { %v8798_v8 = vpop.f32.mrf.mxu1 }
 0x423   : > { %9637 = vpow2.f32 %v4438_v54  ;;  %v4405_v7 = vmul.f32 0.5, %v12152_v3  ;;  %v8799_v51 = vadd.f32 %v8798_v8, %v8797_v27  ;;  %v8699_v8 = vadd.f32 %v12103_v28, %v12101_v37 }
 0x424   : > { %v8800_v9 = vpop.f32.mrf.mxu1 }
 0x425   : > { %v4440_v42 = vmul.f32 1.442695, %v4405_v7  ;;  %v12157_v53 = vadd.f32 %v8799_v51, %v8687_v31  ;;  %v12186_v7 = vpop.f32.mrf.mxu0 }
 0x426   : > { %v8801_v17 = vpop.f32.mrf.mxu1 }
 0x427   : > { %9639 = vpow2.f32 %v4440_v42  ;;  %v4406_v46 = vmul.f32 0.5, %v12157_v53  ;;  %v8802_v13 = vadd.f32 %v8801_v17, %v8800_v9 }
 0x428   : > { %v9634_v1 = vpop.eup %9633  ;;  %v8803_v29 = vpop.f32.mrf.mxu1 }
 0x429   : > { %v4442_v2 = vmul.f32 1.442695, %v4406_v46  ;;  %v12164_v47 = vadd.f32 %v8802_v13, %v8690_v38  ;;  %4530 = vrot.lane.b32.xlu0 %v9634_v1, %s9791_s26  ;;  %v8702_v38 = vadd.f32 %v12107_v60, %v12105_v5  ;;  %v12194_v13 = vpop.f32.mrf.mxu0 }
 0x42a   : > { %v8804_v44 = vpop.f32.mrf.mxu1 }
 0x42b   : > { %9641 = vpow2.f32 %v4442_v2  ;;  %v4407_v59 = vmul.f32 0.5, %v12164_v47  ;;  %v8805_v40 = vadd.f32 %v8804_v44, %v8803_v29 }
 0x42c   : > { %v9636_v18 = vpop.eup %9635  ;;  %v8806_v4 = vpop.f32.mrf.mxu1 }
 0x42d   : > { %v4444_v0 = vmul.f32 1.442695, %v4407_v59  ;;  %v12172_v26 = vadd.f32 %v8805_v40, %v8693_v49  ;;  %4532 = vrot.lane.b32.xlu0 %v9636_v18, %s9791_s26  ;;  %v8705_v49 = vadd.f32 %v12111_v11, %v12109_v48  ;;  %v12202_v40 = vpop.f32.mrf.mxu0 }
 0x42e   : > { %v8807_v22 = vpop.f32.mrf.mxu1 }
 0x42f   : > { %9643 = vpow2.f32 %v4444_v0  ;;  %v4408_v36 = vmul.f32 0.5, %v12172_v26  ;;  %v8808_v14 = vadd.f32 %v8807_v22, %v8806_v4 }
 0x430   : > { %v9638_v16 = vpop.eup %9637  ;;  %v8809_v52 = vpop.f32.mrf.mxu1 }
 0x431   : > { %v4446_v32 = vmul.f32 1.442695, %v4408_v36  ;;  %v12180_v27 = vadd.f32 %v8808_v14, %v8696_v57  ;;  %4534 = vrot.lane.b32.xlu1 %v9638_v16, %s9791_s26  ;;  %v8708_v57 = vadd.f32 %v12115_v45, %v12113_v63  ;;  %v12210_v14 = vpop.f32.mrf.mxu0 }
 0x432   : > { %v8810_v54 = vpop.f32.mrf.mxu1 }
 0x433   : > { %9645 = vpow2.f32 %v4446_v32  ;;  %v4409_v43 = vmul.f32 0.5, %v12180_v27  ;;  %v8811_v21 = vadd.f32 %v8810_v54, %v8809_v52 }
 0x434   : > { %v9640_v31 = vpop.eup %9639  ;;  %v8812_v51 = vpop.f32.mrf.mxu1 }
 0x435   : > { %v4448_v9 = vmul.f32 1.442695, %v4409_v43  ;;  %v12188_v42 = vadd.f32 %v8811_v21, %v8699_v8  ;;  %4536 = vrot.lane.b32.xlu1 %v9640_v31, %s9791_s26  ;;  %v8711_v8 = vadd.f32 %v12119_v23, %v12117_v30  ;;  %v12218_v21 = vpop.f32.mrf.mxu0 }
 0x436   : > { %v8813_v17 = vpop.f32.mrf.mxu1 }
 0x437   : > { %9647 = vpow2.f32 %v4448_v9  ;;  %v4410_v37 = vmul.f32 0.5, %v12188_v42  ;;  %v8814_v28 = vadd.f32 %v8813_v17, %v8812_v51 }
 0x438   : > { %v9642_v46 = vpop.eup %9641  ;;  %v8815_v1 = vpop.f32.mrf.mxu1 }
 0x439   : > { %v4450_v29 = vmul.f32 1.442695, %v4410_v37  ;;  %v12196_v2 = vadd.f32 %v8814_v28, %v8702_v38  ;;  %4538 = vrot.lane.b32.xlu0 %v9642_v46, %s9791_s26  ;;  %v8714_v38 = vadd.f32 %v12123_v61, %v12121_v25  ;;  %v12226_v28 = vpop.f32.mrf.mxu0 }
 0x43a   : > { %v8816_v44 = vpop.f32.mrf.mxu1 }
 0x43b   : > { %9649 = vpow2.f32 %v4450_v29  ;;  %v4411_v5 = vmul.f32 0.5, %v12196_v2  ;;  %v8817_v60 = vadd.f32 %v8816_v44, %v8815_v1 }
 0x43c   : > { %v9644_v59 = vpop.eup %9643  ;;  %v8818_v18 = vpop.f32.mrf.mxu1 }
 0x43d   : > { %v4452_v4 = vmul.f32 1.442695, %v4411_v5  ;;  %v12204_v0 = vadd.f32 %v8817_v60, %v8705_v49  ;;  %4540 = vrot.lane.b32.xlu1 %v9644_v59, %s9791_s26  ;;  %v8717_v49 = vadd.f32 %v12127_v20, %v12125_v10  ;;  %v12234_v60 = vpop.f32.mrf.mxu0 }
 0x43e   : > { %v8819_v22 = vpop.f32.mrf.mxu1 }
 0x43f   : > { %9651 = vpow2.f32 %v4452_v4  ;;  %v4412_v48 = vmul.f32 0.5, %v12204_v0  ;;  %v8820_v11 = vadd.f32 %v8819_v22, %v8818_v18 }
 0x440   : > { %v9646_v36 = vpop.eup %9645  ;;  %v8821_v16 = vpop.f32.mrf.mxu1 }
 0x441   : > { %v4454_v52 = vmul.f32 1.442695, %v4412_v48  ;;  %v12212_v32 = vadd.f32 %v8820_v11, %v8708_v57  ;;  %4542 = vrot.lane.b32.xlu0 %v9646_v36, %s9791_s26  ;;  %v8720_v57 = vadd.f32 %v12131_v50, %v12129_v41  ;;  %v12242_v11 = vpop.f32.mrf.mxu0 }
 0x442   : > { %v8822_v54 = vpop.f32.mrf.mxu1 }
 0x443   : > { %9653 = vpow2.f32 %v4454_v52  ;;  %v4413_v63 = vmul.f32 0.5, %v12212_v32  ;;  %v8823_v45 = vadd.f32 %v8822_v54, %v8821_v16 }
 0x444   : > { %v9648_v43 = vpop.eup %9647  ;;  %v8824_v31 = vpop.f32.mrf.mxu1 }
 0x445   : > { %v4456_v51 = vmul.f32 1.442695, %v4413_v63  ;;  %v12220_v9 = vadd.f32 %v8823_v45, %v8711_v8  ;;  %4544 = vrot.lane.b32.xlu1 %v9648_v43, %s9791_s26  ;;  %v8723_v8 = vadd.f32 %v12135_v24, %v12133_v33  ;;  %v12250_v45 = vpop.f32.mrf.mxu0 }
 0x446   : > { %v8825_v17 = vpop.f32.mrf.mxu1 }
 0x447   : > { %9655 = vpow2.f32 %v4456_v51  ;;  %v4414_v30 = vmul.f32 0.5, %v12220_v9  ;;  %v8826_v23 = vadd.f32 %v8825_v17, %v8824_v31 }
 0x448   : > { %v9650_v37 = vpop.eup %9649  ;;  %v8827_v46 = vpop.f32.mrf.mxu1 }
 0x449   : > { %v4458_v1 = vmul.f32 1.442695, %v4414_v30  ;;  %v12228_v29 = vadd.f32 %v8826_v23, %v8714_v38  ;;  %4546 = vrot.lane.b32.xlu0 %v9650_v37, %s9791_s26  ;;  %v8726_v38 = vadd.f32 %v12145_v12, %v12140_v56  ;;  %v12258_v23 = vpop.f32.mrf.mxu0 }
 0x44a   : > { %v8828_v44 = vpop.f32.mrf.mxu1 }
 0x44b   : > { %9657 = vpow2.f32 %v4458_v1  ;;  %v4415_v25 = vmul.f32 0.5, %v12228_v29  ;;  %v8829_v61 = vadd.f32 %v8828_v44, %v8827_v46 }
 0x44c   : > { %v9652_v5 = vpop.eup %9651  ;;  %v8830_v59 = vpop.f32.mrf.mxu1 }
 0x44d   : > { %v4460_v18 = vmul.f32 1.442695, %v4415_v25  ;;  %v12236_v4 = vadd.f32 %v8829_v61, %v8717_v49  ;;  %4548 = vrot.lane.b32.xlu1 %v9652_v5, %s9791_s26  ;;  %v8729_v49 = vadd.f32 %v12155_v6, %v12150_v39  ;;  %v12266_v61 = vpop.f32.mrf.mxu0 }
 0x44e   : > { %v8831_v22 = vpop.f32.mrf.mxu1 }
 0x44f   : > { %9659 = vpow2.f32 %v4460_v18  ;;  %v4416_v10 = vmul.f32 0.5, %v12236_v4  ;;  %v8832_v20 = vadd.f32 %v8831_v22, %v8830_v59 }
 0x450   : > { %v9654_v48 = vpop.eup %9653  ;;  %v8833_v36 = vpop.f32.mrf.mxu1 }
 0x451   : > { %v4462_v16 = vmul.f32 1.442695, %v4416_v10  ;;  %v12244_v52 = vadd.f32 %v8832_v20, %v8720_v57  ;;  %4550 = vrot.lane.b32.xlu0 %v9654_v48, %s9791_s26  ;;  %v8732_v57 = vadd.f32 %v12170_v35, %v12162_v55  ;;  %v12274_v20 = vpop.f32.mrf.mxu0 }
 0x452   : > { %v8834_v54 = vpop.f32.mrf.mxu1 }
 0x453   : > { %9661 = vpow2.f32 %v4462_v16  ;;  %v4417_v41 = vmul.f32 0.5, %v12244_v52  ;;  %v8835_v50 = vadd.f32 %v8834_v54, %v8833_v36 }
 0x454   : > { %v9656_v63 = vpop.eup %9655  ;;  %v8836_v43 = vpop.f32.mrf.mxu1 }
 0x455   : > { %v4464_v31 = vmul.f32 1.442695, %v4417_v41  ;;  %v12252_v51 = vadd.f32 %v8835_v50, %v8723_v8  ;;  %4552 = vrot.lane.b32.xlu1 %v9656_v63, %s9791_s26  ;;  %v8735_v8 = vadd.f32 %v12186_v7, %v12178_v15  ;;  %v12282_v50 = vpop.f32.mrf.mxu0 }
 0x456   : > { %v8837_v17 = vpop.f32.mrf.mxu1 }
 0x457   : > { %9663 = vpow2.f32 %v4464_v31  ;;  %v4418_v33 = vmul.f32 0.5, %v12252_v51  ;;  %v8838_v24 = vadd.f32 %v8837_v17, %v8836_v43 }
 0x458   : > { %v9658_v30 = vpop.eup %9657  ;;  %v8839_v37 = vpop.f32.mrf.mxu1 }
 0x459   : > { %v4466_v46 = vmul.f32 1.442695, %v4418_v33  ;;  %v12260_v1 = vadd.f32 %v8838_v24, %v8726_v38  ;;  %4554 = vrot.lane.b32.xlu0 %v9658_v30, %s9791_s26  ;;  %v8738_v38 = vadd.f32 %v12202_v40, %v12194_v13  ;;  %v12290_v24 = vpop.f32.mrf.mxu0 }
 0x45a   : > { %v8840_v44 = vpop.f32.mrf.mxu1 }
 0x45b   : > { %9665 = vpow2.f32 %v4466_v46  ;;  %v4419_v56 = vmul.f32 0.5, %v12260_v1  ;;  %v8841_v12 = vadd.f32 %v8840_v44, %v8839_v37 }
 0x45c   : > { %v9660_v25 = vpop.eup %9659  ;;  %v8842_v5 = vpop.f32.mrf.mxu1 }
 0x45d   : > { %v4468_v59 = vmul.f32 1.442695, %v4419_v56  ;;  %v12268_v18 = vadd.f32 %v8841_v12, %v8729_v49  ;;  %4556 = vrot.lane.b32.xlu1 %v9660_v25, %s9791_s26  ;;  %v8741_v49 = vadd.f32 %v12218_v21, %v12210_v14  ;;  %v8755_v12 = vpop.f32.mrf.mxu0 }
 0x45e   : > { %v8843_v22 = vpop.f32.mrf.mxu1 }
 0x45f   : > { %9667 = vpow2.f32 %v4468_v59  ;;  %v4420_v39 = vmul.f32 0.5, %v12268_v18  ;;  %v8844_v6 = vadd.f32 %v8843_v22, %v8842_v5 }
 0x460   : > { %v9662_v10 = vpop.eup %9661  ;;  %v8845_v48 = vpop.f32.mrf.mxu1 }
 0x461   : > { %v4470_v36 = vmul.f32 1.442695, %v4420_v39  ;;  %v12276_v16 = vadd.f32 %v8844_v6, %v8732_v57  ;;  %4558 = vrot.lane.b32.xlu0 %v9662_v10, %s9791_s26  ;;  %v8744_v57 = vadd.f32 %v12234_v60, %v12226_v28  ;;  %v8757_v6 = vpop.f32.mrf.mxu0 }
 0x462   : > { %v8846_v54 = vpop.f32.mrf.mxu1 }
 0x463   : > { %9669 = vpow2.f32 %v4470_v36  ;;  %v4421_v55 = vmul.f32 0.5, %v12276_v16  ;;  %v8847_v35 = vadd.f32 %v8846_v54, %v8845_v48 }
 0x464   : > { %v9664_v41 = vpop.eup %9663  ;;  %v8848_v63 = vpop.f32.mrf.mxu1 }
 0x465   : > { %v4472_v43 = vmul.f32 1.442695, %v4421_v55  ;;  %v12284_v31 = vadd.f32 %v8847_v35, %v8735_v8  ;;  %4560 = vrot.lane.b32.xlu1 %v9664_v41, %s9791_s26  ;;  %v8747_v8 = vadd.f32 %v12250_v45, %v12242_v11  ;;  %v8758_v35 = vpop.f32.mrf.mxu0  ;;  %v8750_v11 = vadd.f32 %v12266_v61, %v12258_v23 }
 0x466   : > { %v8849_v17 = vpop.f32.mrf.mxu1  ;;  %v8753_v23 = vadd.f32 %v12282_v50, %v12274_v20 }
 0x467   : > { %9671 = vpow2.f32 %v4472_v43  ;;  %v4422_v15 = vmul.f32 0.5, %v12284_v31  ;;  %v8850_v7 = vadd.f32 %v8849_v17, %v8848_v63 }
 0x468   : > { %v9666_v33 = vpop.eup %9665  ;;  %v8851_v30 = vpop.f32.mrf.mxu1 }
 0x469   : > { %v4474_v37 = vmul.f32 1.442695, %v4422_v15  ;;  %v12292_v46 = vadd.f32 %v8850_v7, %v8738_v38  ;;  %4562 = vrot.lane.b32.xlu0 %v9666_v33, %s9791_s26  ;;  %v9411_v38 = vld [vmem:[%s14363_s8 + $0xe4] ss:$16 sps:$4 sm:$0xff]  }
 0x46a   : > { %v8852_v44 = vpop.f32.mrf.mxu1  ;;  %v9414_v7 = vld [vmem:[%s14363_s8 + $0x2e4] ss:$16 sps:$4 sm:$0xff]   ;;  %6124 = vmatprep.subr.bf16.mxu0 %v9411_v38 }
 0x46b   : > { %9673 = vpow2.f32 %v4474_v37  ;;  %v4423_v13 = vmul.f32 0.5, %v12292_v46  ;;  %v8853_v40 = vadd.f32 %v8852_v44, %v8851_v30  ;;  %v8760_v30 = vpop.f32.mrf.mxu0  ;;  %6317 = vmatprep.subr.bf16.mxu1 %v9414_v7 }
 0x46c   : > { %v9668_v56 = vpop.eup %9667  ;;  %v8854_v25 = vpop.f32.mrf.mxu1 }
 0x46d   : > { %v4476_v5 = vmul.f32 1.442695, %v4423_v13  ;;  %v12298_v59 = vadd.f32 %v8853_v40, %v8741_v49  ;;  %4564 = vrot.lane.b32.xlu1 %v9668_v56, %s9791_s26 }
 0x46e   : > { %v8855_v22 = vpop.f32.mrf.mxu1 }
 0x46f   : > { %9675 = vpow2.f32 %v4476_v5  ;;  %v4424_v39 = vmul.f32 0.5, %v12298_v59  ;;  %v8856_v14 = vadd.f32 %v8855_v22, %v8854_v25  ;;  %v8761_v25 = vpop.f32.mrf.mxu0 }
 0x470   : > { %v9670_v21 = vpop.eup %9669  ;;  %v8857_v10 = vpop.f32.mrf.mxu1 }
 0x471   : > { %v4478_v48 = vmul.f32 1.442695, %v4424_v39  ;;  %v12304_v36 = vadd.f32 %v8856_v14, %v8744_v57  ;;  %4566 = vrot.lane.b32.xlu0 %v9670_v21, %s9791_s26  ;;  %v8756_v14 = vadd.f32 %v8755_v12, %v12290_v24  ;;  %v8763_v50 = vpop.f32.mrf.mxu0 }
 0x472   : > { %v8858_v54 = vpop.f32.mrf.mxu1 }
 0x473   : > { %9677 = vpow2.f32 %v4478_v48  ;;  %v4425_v55 = vmul.f32 0.5, %v12304_v36  ;;  %v8859_v28 = vadd.f32 %v8858_v54, %v8857_v10  ;;  %v8764_v24 = vpop.f32.mrf.mxu0 }
 0x474   : > { %v9672_v60 = vpop.eup %9671  ;;  %v8860_v41 = vpop.f32.mrf.mxu1 }
 0x475   : > { %v4480_v63 = vmul.f32 1.442695, %v4425_v55  ;;  %v12310_v43 = vadd.f32 %v8859_v28, %v8747_v8  ;;  %4568 = vrot.lane.b32.xlu1 %v9672_v60, %s9791_s26  ;;  %v8759_v28 = vadd.f32 %v8758_v35, %v8757_v6  ;;  %v8766_v6 = vpop.f32.mrf.mxu0 }
 0x476   : > { %v8861_v17 = vpop.f32.mrf.mxu1 }
 0x477   : > { %9679 = vpow2.f32 %v4480_v63  ;;  %v4426_v45 = vmul.f32 0.5, %v12310_v43  ;;  %v8862_v15 = vadd.f32 %v8861_v17, %v8860_v41 }
 0x478   : > { %v9674_v33 = vpop.eup %9673  ;;  %v8863_v37 = vpop.f32.mrf.mxu1 }
 0x479   : > { %v4482_v44 = vmul.f32 1.442695, %v4426_v45  ;;  %v12322_v49 = vadd.f32 %v8862_v15, %v8750_v11  ;;  %4570 = vrot.lane.b32.xlu0 %v9674_v33, %s9791_s26  ;;  %v8762_v45 = vadd.f32 %v8761_v25, %v8760_v30  ;;  %v8767_v30 = vpop.f32.mrf.mxu0 }
 0x47a   : > { %v8864_v13 = vpop.f32.mrf.mxu1 }
 0x47b   : > { %9681 = vpow2.f32 %v4482_v44  ;;  %v4427_v61 = vmul.f32 0.5, %v12322_v49  ;;  %v8865_v40 = vadd.f32 %v8864_v13, %v8863_v37 }
 0x47c   : > { %v9676_v56 = vpop.eup %9675  ;;  %v8866_v5 = vpop.f32.mrf.mxu1 }
 0x47d   : > { %v4484_v22 = vmul.f32 1.442695, %v4427_v61  ;;  %v12328_v57 = vadd.f32 %v8865_v40, %v8753_v23  ;;  %4572 = vrot.lane.b32.xlu1 %v9676_v56, %s9791_s26  ;;  %v8765_v23 = vadd.f32 %v8764_v24, %v8763_v50 }
 0x47e   : > { %v8867_v39 = vpop.f32.mrf.mxu1 }
 0x47f   : > { %9683 = vpow2.f32 %v4484_v22  ;;  %v4428_v21 = vmul.f32 0.5, %v12328_v57  ;;  %v8868_v10 = vadd.f32 %v8867_v39, %v8866_v5 }
 0x480   : > { %v9678_v20 = vpop.eup %9677  ;;  %v8869_v48 = vpop.f32.mrf.mxu1 }
 0x481   : > { %v4486_v54 = vmul.f32 1.442695, %v4428_v21  ;;  %v12333_v8 = vadd.f32 %v8868_v10, %v8756_v14  ;;  %4574 = vrot.lane.b32.xlu0 %v9678_v20, %s9791_s26  ;;  %v8768_v14 = vadd.f32 %v8767_v30, %v8766_v6  ;;  %v4372_v6 = vld [vmem:[%s12358_s29 + $0x10] sm:$0xff] }
 0x482   : > { %v8870_v55 = vpop.f32.mrf.mxu1  ;;  %v9417_v30 = vld [vmem:[%s14363_s8 + $0xc4] ss:$16 sps:$4 sm:$0xff]  }
 0x483   : > { %9685 = vpow2.f32 %v4486_v54  ;;  %v4429_v60 = vmul.f32 0.5, %v12333_v8  ;;  %v8871_v41 = vadd.f32 %v8870_v55, %v8869_v48 }
 0x484   : > { %v9680_v63 = vpop.eup %9679  ;;  %v8872_v12 = vpop.f32.mrf.mxu1 }
 0x485   : > { %v4488_v17 = vmul.f32 1.442695, %v4429_v60  ;;  %v12337_v38 = vadd.f32 %v8871_v41, %v8759_v28  ;;  %4576 = vrot.lane.b32.xlu1 %v9680_v63, %s9791_s26  ;;  %v4370_v41 = vld [vmem:[%s12358_s29] sm:$0xff] }
 0x486   : > { %v8873_v11 = vpop.f32.mrf.mxu1 }
 0x487   : > { %9687 = vpow2.f32 %v4488_v17  ;;  %v4430_v15 = vmul.f32 0.5, %v12337_v38  ;;  %v8874_v7 = vadd.f32 %v8873_v11, %v8872_v12  ;;  %v4371_v12 = vld [vmem:[%s12358_s29 + $0x8] sm:$0xff] }
 0x488   : > { %v9682_v33 = vpop.eup %9681  ;;  %v8875_v35 = vpop.f32.mrf.mxu1 }
 0x489   : > { %v4490_v37 = vmul.f32 1.442695, %v4430_v15  ;;  %v12341_v44 = vadd.f32 %v8874_v7, %v8762_v45  ;;  %4578 = vrot.lane.b32.xlu0 %v9682_v33, %s9791_s26 }
 0x48a   : > { %v8876_v13 = vpop.f32.mrf.mxu1 }
 0x48b   : > { %9689 = vpow2.f32 %v4490_v37  ;;  %v4431_v61 = vmul.f32 0.5, %v12341_v44  ;;  %v8877_v40 = vadd.f32 %v8876_v13, %v8875_v35 }
 0x48c   : > { %v9684_v56 = vpop.eup %9683  ;;  %v8878_v25 = vpop.f32.mrf.mxu1 }
 0x48d   : > { %v4492_v5 = vmul.f32 1.442695, %v4431_v61  ;;  %v12345_v22 = vadd.f32 %v8877_v40, %v8765_v23  ;;  %4580 = vrot.lane.b32.xlu1 %v9684_v56, %s9791_s26  ;;  %v9409_v23 = vld [vmem:[%s14363_s8 + $0xe0] ss:$16 sps:$4 sm:$0xff]   ;;  %v4373_v40 = vld [vmem:[%s12358_s29 + $0x18] sm:$0xff] }
 0x48e   : > { %v8879_v39 = vpop.f32.mrf.mxu1  ;;  %v9412_v61 = vld [vmem:[%s14363_s8 + $0x2e0] ss:$16 sps:$4 sm:$0xff]  }
 0x48f   : > { %9691 = vpow2.f32 %v4492_v5  ;;  %v4432_v21 = vmul.f32 0.5, %v12345_v22  ;;  %v8880_v10 = vadd.f32 %v8879_v39, %v8878_v25  ;;  %v9420_v25 = vld [vmem:[%s14363_s8 + $0x2c4] ss:$16 sps:$4 sm:$0xff]   ;;  %v9415_v39 = vld [vmem:[%s14363_s8 + $0xc0] ss:$16 sps:$4 sm:$0xff]  }
 0x490   : > { %v9686_v20 = vpop.eup %9685 }
 0x491   : > { %v4494_v50 = vmul.f32 1.442695, %v4432_v21  ;;  %v12349_v48 = vadd.f32 %v8880_v10, %v8768_v14  ;;  %4582 = vrot.lane.b32.xlu0 %v9686_v20, %s9791_s26  ;;  %v9418_v14 = vld [vmem:[%s14363_s8 + $0x2c0] ss:$16 sps:$4 sm:$0xff]  }
 0x492   : > { %v4374_v20 = vld [vmem:[%s12358_s29 + $0x20] sm:$0xff] }
 0x493   : > { %9693 = vpow2.f32 %v4494_v50  ;;  %v4433_v54 = vmul.f32 0.5, %v12349_v48 }
 0x494   : > { %v9688_v55 = vpop.eup %9687 }
 0x495   : > { %v4496_v28 = vmul.f32 1.442695, %v4433_v54  ;;  %4584 = vrot.lane.b32.xlu1 %v9688_v55, %s9791_s26  ;;  %v4375_v55 = vld [vmem:[%s12358_s29 + $0x28] sm:$0xff] }
 0x497   : > { %9695 = vpow2.f32 %v4496_v28 }
 0x498   : > { %v9690_v60 = vpop.eup %9689 }
 0x499   : > { %4586 = vrot.lane.b32.xlu0 %v9690_v60, %s9791_s26  ;;  %v9421_v60 = vld [vmem:[%s14363_s8 + $0xa0] ss:$16 sps:$4 sm:$0xff]  }
 0x49b   : > { %v4531_v63 = vpop.permute.xlu0 %4530 }
 0x49c   : > { %v9692_v24 = vpop.eup %9691  ;;  %v4626_v17 = vmul.f32 %v4531_v63, %v4370_v41  ;;  %v9424_v41 = vld [vmem:[%s14363_s8 + $0x2a0] ss:$16 sps:$4 sm:$0xff]  }
 0x49d   : > { %4588 = vrot.lane.b32.xlu1 %v9692_v24, %s9791_s26  ;;  %v9432_v24 = vld [vmem:[%s14363_s8 + $0x284] ss:$16 sps:$4 sm:$0xff]  }
 0x49e   : > { %v12366_v7 = vadd.f32 %v4626_v17, %v12137_v62 }
 0x49f   : > { %v4533_v11 = vpop.permute.xlu0 %4532 }
 0x4a0   : > { %v9694_v45 = vpop.eup %9693  ;;  %v4627_v15 = vmul.f32 %v4533_v11, %v4371_v12 }
 0x4a1   : > { %4590 = vrot.lane.b32.xlu0 %v9694_v45, %s9791_s26  ;;  %v4376_v45 = vld [vmem:[%s12358_s29 + $0x30] sm:$0xff] }
 0x4a2   : > { %v12369_v33 = vadd.f32 %v4627_v15, %v12142_v34 }
 0x4a3   : > { %v4535_v35 = vpop.permute.xlu1 %4534 }
 0x4a4   : > { %v9696_v37 = vpop.eup %9695  ;;  %v4690_v13 = vpack.c.bf16 %v12369_v33, %v12366_v7  ;;  %v4628_v56 = vmul.f32 %v4535_v35, %v4372_v6  ;;  %v9427_v35 = vld [vmem:[%s14363_s8 + $0x80] ss:$16 sps:$4 sm:$0xff]  }
 0x4a5   : > { %4592 = vrot.lane.b32.xlu1 %v9696_v37, %s9791_s26  ;;  %7698 = vrot.lane.b32.xlu0 %v12137_v62, %s9792_s25  ;;  %s9727_s26 = sshll.u32 %s9794_s11, 4  ;;  %s9728_s26 = int_to_ptr.vmem [resolvable:$false] %s9727_s26 }
 0x4a6   : > { %8458 = vmatmul.mubr.msk.bf16.vlgmr.msra.gmra.mxu0 %vm491_vm1, %v4690_v13  ;;  %8475 = vmatmul.mubr.msk.bf16.vlgmr.msra.gmra.mxu1 %vm491_vm1, %v4690_v13  ;;  %v12405_v21 = vadd.f32 %v4628_v56, %v12147_v58  ;;  %v9435_v13 = vld [vmem:[%s14363_s8 + $0x64] ss:$16 sps:$4 sm:$0xff]   ;;  %v9433_v56 = vld [vmem:[%s14363_s8 + $0x60] ss:$16 sps:$4 sm:$0xff]   ;;  %s9729_s21 = scalar_lea.vmem %s9728_s26, 8192  ;;  %p9730_p11 = scmp.lt.s32.totalorder %s14308_s1, %s9728_s26 }
 0x4a7   : > { %v4537_v5 = vpop.permute.xlu1 %4536  ;;  %4820 = vmatprep.mubr.bf16.mxu0 %v14759_v19  ;;  %5013 = vmatprep.mubr.bf16.mxu1 %v14759_v19 }
 0x4a8   : > { %v4629_v62 = vmul.f32 %v4537_v5, %v4373_v40  ;;  %6125 = vmatpush1.bf16.msra.mxu0 %v9409_v23  ;;  %6318 = vmatpush1.bf16.msra.mxu1 %v9412_v61  ;;  %v9438_v23 = vld [vmem:[%s14363_s8 + $0x264] ss:$16 sps:$4 sm:$0xff]  }
 0x4a9   : > { %7700 = vrot.lane.b32.xlu1 %v12142_v34, %s9792_s25  ;;  %7702 = vrot.lane.b32.xlu0 %v12147_v58, %s9792_s25  ;;  %v9423_v34 = vld [vmem:[%s14363_s8 + $0xa4] ss:$16 sps:$4 sm:$0xff]  }
 0x4aa   : > { %v12408_v10 = vadd.f32 %v4629_v62, %v12152_v3  ;;  %6126 = vmatprep.subr.bf16.mxu0 %v9417_v30  ;;  %6319 = vmatprep.subr.bf16.mxu1 %v9420_v25  ;;  %v9426_v58 = vld [vmem:[%s14363_s8 + $0x2a4] ss:$16 sps:$4 sm:$0xff]   ;;  %v9436_v30 = vld [vmem:[%s14363_s8 + $0x260] ss:$16 sps:$4 sm:$0xff]  }
 0x4ab   : > { %v4539_v50 = vpop.permute.xlu0 %4538  ;;  %v4378_v62 = vld [vmem:[%s12358_s29 + $0x40] sm:$0xff] }
 0x4ac   : > { %v4691_v54 = vpack.c.bf16 %v12408_v10, %v12405_v21  ;;  %6127 = vmatpush1.bf16.msra.mxu0 %v9415_v39  ;;  %6320 = vmatpush1.bf16.msra.mxu1 %v9418_v14  ;;  %v4630_v28 = vmul.f32 %v4539_v50, %v4374_v20  ;;  %v9441_v20 = vld [vmem:[%s14363_s8 + $0x44] ss:$16 sps:$4 sm:$0xff]  }
 0x4ad   : > { %7704 = vrot.lane.b32.xlu1 %v12152_v3, %s9792_s25  ;;  %7706 = vrot.lane.b32.xlu0 %v12157_v53, %s9792_s25  ;;  %v9429_v3 = vld [vmem:[%s14363_s8 + $0x84] ss:$16 sps:$4 sm:$0xff]  }
 0x4ae   : > { %8459 = vmatmul.mubr.msk.bf16.gmra.mxu0 %vm491_vm1, %v4691_v54  ;;  %8476 = vmatmul.mubr.msk.bf16.gmra.mxu1 %vm491_vm1, %v4691_v54  ;;  %v12445_v17 = vadd.f32 %v4630_v28, %v12157_v53  ;;  %v9430_v53 = vld [vmem:[%s14363_s8 + $0x280] ss:$16 sps:$4 sm:$0xff]   ;;  %v9450_v28 = vld [vmem:[%s14363_s8 + $0x224] ss:$16 sps:$4 sm:$0xff]  }
 0x4af   : > { %v4541_v63 = vpop.permute.xlu1 %4540  ;;  %4830 = vmatprep.mubr.bf16.mxu0 %v14759_v19  ;;  %5023 = vmatprep.mubr.bf16.mxu1 %v14759_v19  ;;  %v9439_v54 = vld [vmem:[%s14363_s8 + $0x40] ss:$16 sps:$4 sm:$0xff]  }
 0x4b0   : > { %v4631_v12 = vmul.f32 %v4541_v63, %v4375_v55  ;;  %6128 = vmatprep.subr.bf16.mxu0 %v9423_v34  ;;  %6321 = vmatprep.subr.bf16.mxu1 %v9426_v58  ;;  %v9442_v34 = vld [vmem:[%s14363_s8 + $0x240] ss:$16 sps:$4 sm:$0xff]   ;;  %v9447_v55 = vld [vmem:[%s14363_s8 + $0x24] ss:$16 sps:$4 sm:$0xff]  }
 0x4b1   : > { %7708 = vrot.lane.b32.xlu1 %v12164_v47, %s9792_s25  ;;  %7710 = vrot.lane.b32.xlu0 %v12172_v26, %s9792_s25 }
 0x4b2   : > { %v12448_v11 = vadd.f32 %v4631_v12, %v12164_v47  ;;  %6129 = vmatpush1.bf16.msra.mxu0 %v9421_v60  ;;  %6322 = vmatpush1.bf16.msra.mxu1 %v9424_v41  ;;  %v4377_v47 = vld [vmem:[%s12358_s29 + $0x38] sm:$0xff] }
 0x4b3   : > { %v4543_v15 = vpop.permute.xlu0 %4542  ;;  %6130 = vmatprep.subr.bf16.mxu0 %v9429_v3  ;;  %6323 = vmatprep.subr.bf16.mxu1 %v9432_v24  ;;  %v4380_v3 = vld [vmem:[%s12358_s29 + $0x50] sm:$0xff] }
 0x4b4   : > { %v4692_v6 = vpack.c.bf16 %v12448_v11, %v12445_v17  ;;  %v4632_v37 = vmul.f32 %v4543_v15, %v4376_v45  ;;  %v9445_v45 = vld [vmem:[%s14363_s8 + $0x20] ss:$16 sps:$4 sm:$0xff]  }
 0x4b5   : > { %7712 = vrot.lane.b32.xlu1 %v12180_v27, %s9792_s25  ;;  %7714 = vrot.lane.b32.xlu0 %v12188_v42, %s9792_s25 }
 0x4b6   : > { %8460 = vmatmul.mubr.msk.bf16.gmra.mxu0 %vm491_vm1, %v4692_v6  ;;  %8477 = vmatmul.mubr.msk.bf16.gmra.mxu1 %vm491_vm1, %v4692_v6  ;;  %v12485_v25 = vadd.f32 %v4632_v37, %v12172_v26  ;;  %v9444_v26 = vld [vmem:[%s14363_s8 + $0x244] ss:$16 sps:$4 sm:$0xff]   ;;  %v9451_v37 = vld [vmem:[%s14363_s8] ss:$16 sps:$4 sm:$0xff]  }
 0x4b7   : > { %v4545_v61 = vpop.permute.xlu1 %4544  ;;  %4840 = vmatprep.mubr.bf16.mxu0 %v14759_v19  ;;  %5033 = vmatprep.mubr.bf16.mxu1 %v14759_v19  ;;  %v9453_v6 = vld [vmem:[%s14363_s8 + $0x4] ss:$16 sps:$4 sm:$0xff]  }
 0x4b8   : > { %v4633_v40 = vmul.f32 %v4545_v61, %v4377_v47  ;;  %6131 = vmatpush1.bf16.msra.mxu0 %v9427_v35  ;;  %6324 = vmatpush1.bf16.msra.mxu1 %v9430_v53  ;;  %v9456_v35 = vld [vmem:[%s14363_s8 + $0x204] ss:$16 sps:$4 sm:$0xff]  }
 0x4b9   : > { %7716 = vrot.lane.b32.xlu1 %v12196_v2, %s9792_s25  ;;  %7718 = vrot.lane.b32.xlu0 %v12204_v0, %s9792_s25 }
 0x4ba   : > { %v12488_v5 = vadd.f32 %v4633_v40, %v12180_v27  ;;  %6132 = vmatprep.subr.bf16.mxu0 %v9435_v13  ;;  %6325 = vmatprep.subr.bf16.mxu1 %v9438_v23  ;;  %v4379_v27 = vld [vmem:[%s12358_s29 + $0x48] sm:$0xff]  ;;  %v9454_v13 = vld [vmem:[%s14363_s8 + $0x200] ss:$16 sps:$4 sm:$0xff]  }
 0x4bb   : > { %v4547_v39 = vpop.permute.xlu0 %4546  ;;  %v4382_v40 = vld [vmem:[%s12358_s29 + $0x60] sm:$0xff] }
 0x4bc   : > { %v4693_v14 = vpack.c.bf16 %v12488_v5, %v12485_v25  ;;  %6133 = vmatpush1.bf16.msra.mxu0 %v9433_v56  ;;  %6326 = vmatpush1.bf16.msra.mxu1 %v9436_v30  ;;  %v4634_v50 = vmul.f32 %v4547_v39, %v4378_v62  ;;  %v9459_v62 = vld [vmem:[%s14363_s8 + $0x1e4] ss:$16 sps:$4 sm:$0xff]  }
 0x4bd   : > { %7720 = vrot.lane.b32.xlu1 %v12212_v32, %s9792_s25  ;;  %7722 = vrot.lane.b32.xlu0 %v12220_v9, %s9792_s25 }
 0x4be   : > { %8461 = vmatmul.mubr.msk.bf16.gmra.mxu0 %vm491_vm1, %v4693_v14  ;;  %8478 = vmatmul.mubr.msk.bf16.gmra.mxu1 %vm491_vm1, %v4693_v14  ;;  %v12525_v41 = vadd.f32 %v4634_v50, %v12188_v42  ;;  %v9448_v42 = vld [vmem:[%s14363_s8 + $0x220] ss:$16 sps:$4 sm:$0xff]   ;;  %v9468_v50 = vld [vmem:[%s14363_s8 + $0x3c4] ss:$16 sps:$4 sm:$0xff]  }
 0x4bf   : > { %v4549_v58 = vpop.permute.xlu1 %4548  ;;  %4850 = vmatprep.mubr.bf16.mxu0 %v14759_v19  ;;  %5043 = vmatprep.mubr.bf16.mxu1 %v14759_v19  ;;  %v9457_v14 = vld [vmem:[%s14363_s8 + $0x1e0] ss:$16 sps:$4 sm:$0xff]  }
 0x4c0   : > { %v4635_v60 = vmul.f32 %v4549_v58, %v4379_v27  ;;  %6134 = vmatprep.subr.bf16.mxu0 %v9441_v20  ;;  %6327 = vmatprep.subr.bf16.mxu1 %v9444_v26  ;;  %v9460_v20 = vld [vmem:[%s14363_s8 + $0x3e0] ss:$16 sps:$4 sm:$0xff]   ;;  %v9465_v27 = vld [vmem:[%s14363_s8 + $0x1c4] ss:$16 sps:$4 sm:$0xff]  }
 0x4c1   : > { %7724 = vrot.lane.b32.xlu1 %v12228_v29, %s9792_s25  ;;  %7726 = vrot.lane.b32.xlu0 %v12236_v4, %s9792_s25 }
 0x4c2   : > { %v12528_v63 = vadd.f32 %v4635_v60, %v12196_v2  ;;  %6135 = vmatpush1.bf16.msra.mxu0 %v9439_v54  ;;  %6328 = vmatpush1.bf16.msra.mxu1 %v9442_v34  ;;  %v4381_v2 = vld [vmem:[%s12358_s29 + $0x58] sm:$0xff] }
 0x4c3   : > { %v4551_v24 = vpop.permute.xlu0 %4550  ;;  %6136 = vmatprep.subr.bf16.mxu0 %v9447_v55  ;;  %6329 = vmatprep.subr.bf16.mxu1 %v9450_v28  ;;  %v4384_v55 = vld [vmem:[%s12358_s29 + $0x70] sm:$0xff] }
 0x4c4   : > { %v4694_v12 = vpack.c.bf16 %v12528_v63, %v12525_v41  ;;  %v4636_v15 = vmul.f32 %v4551_v24, %v4380_v3  ;;  %v9463_v3 = vld [vmem:[%s14363_s8 + $0x1c0] ss:$16 sps:$4 sm:$0xff]  }
 0x4c5   : > { %7728 = vrot.lane.b32.xlu1 %v12244_v52, %s9792_s25  ;;  %7730 = vrot.lane.b32.xlu0 %v12252_v51, %s9792_s25 }
 0x4c6   : > { %8462 = vmatmul.mubr.msk.bf16.gmra.mxu0 %vm491_vm1, %v4694_v12  ;;  %8479 = vmatmul.mubr.msk.bf16.gmra.mxu1 %vm491_vm1, %v4694_v12  ;;  %v12565_v23 = vadd.f32 %v4636_v15, %v12204_v0  ;;  %v9462_v0 = vld [vmem:[%s14363_s8 + $0x3e4] ss:$16 sps:$4 sm:$0xff]   ;;  %v9469_v15 = vld [vmem:[%s14363_s8 + $0x1a0] ss:$16 sps:$4 sm:$0xff]  }
 0x4c7   : > { %v4553_v53 = vpop.permute.xlu1 %4552  ;;  %4860 = vmatprep.mubr.bf16.mxu0 %v14759_v19  ;;  %5053 = vmatprep.mubr.bf16.mxu1 %v14759_v19  ;;  %v9471_v12 = vld [vmem:[%s14363_s8 + $0x1a4] ss:$16 sps:$4 sm:$0xff]  }
 0x4c8   : > { %v4637_v47 = vmul.f32 %v4553_v53, %v4381_v2  ;;  %6137 = vmatpush1.bf16.msra.mxu0 %v9445_v45  ;;  %6330 = vmatpush1.bf16.msra.mxu1 %v9448_v42  ;;  %v9474_v45 = vld [vmem:[%s14363_s8 + $0x3a4] ss:$16 sps:$4 sm:$0xff]  }
 0x4c9   : > { %7732 = vrot.lane.b32.xlu1 %v12260_v1, %s9792_s25  ;;  %7734 = vrot.lane.b32.xlu0 %v12268_v18, %s9792_s25 }
 0x4ca   : > { %v12568_v61 = vadd.f32 %v4637_v47, %v12212_v32  ;;  %6138 = vmatprep.subr.bf16.mxu0 %v9453_v6  ;;  %6331 = vmatprep.subr.bf16.mxu1 %v9456_v35  ;;  %v4383_v32 = vld [vmem:[%s12358_s29 + $0x68] sm:$0xff]  ;;  %v9472_v6 = vld [vmem:[%s14363_s8 + $0x3a0] ss:$16 sps:$4 sm:$0xff]  }
 0x4cb   : > { %v4555_v56 = vpop.permute.xlu0 %4554  ;;  %v4386_v47 = vld [vmem:[%s12358_s29 + $0x80] sm:$0xff] }
 0x4cc   : > { %v4695_v30 = vpack.c.bf16 %v12568_v61, %v12565_v23  ;;  %6139 = vmatpush1.bf16.msra.mxu0 %v9451_v37  ;;  %6332 = vmatpush1.bf16.msra.mxu1 %v9454_v13  ;;  %v4638_v39 = vmul.f32 %v4555_v56, %v4382_v40  ;;  %v9477_v40 = vld [vmem:[%s14363_s8 + $0x184] ss:$16 sps:$4 sm:$0xff]  }
 0x4cd   : > { %7736 = vrot.lane.b32.xlu1 %v12276_v16, %s9792_s25  ;;  %7738 = vrot.lane.b32.xlu0 %v12284_v31, %s9792_s25 }
 0x4ce   : > { %8463 = vmatmul.mubr.msk.bf16.gmra.mxu0 %vm491_vm1, %v4695_v30  ;;  %8480 = vmatmul.mubr.msk.bf16.gmra.mxu1 %vm491_vm1, %v4695_v30  ;;  %v12605_v34 = vadd.f32 %v4638_v39, %v12220_v9  ;;  %v9466_v9 = vld [vmem:[%s14363_s8 + $0x3c0] ss:$16 sps:$4 sm:$0xff]   ;;  %v9486_v39 = vld [vmem:[%s14363_s8 + $0x364] ss:$16 sps:$4 sm:$0xff]  }
 0x4cf   : > { %v4557_v26 = vpop.permute.xlu1 %4556  ;;  %4870 = vmatprep.mubr.bf16.mxu0 %v14759_v19  ;;  %5063 = vmatprep.mubr.bf16.mxu1 %v14759_v19  ;;  %v9475_v30 = vld [vmem:[%s14363_s8 + $0x180] ss:$16 sps:$4 sm:$0xff]  }
 0x4d0   : > { %v4639_v54 = vmul.f32 %v4557_v26, %v4383_v32  ;;  %6140 = vmatprep.subr.bf16.mxu0 %v9459_v62  ;;  %6333 = vmatprep.subr.bf16.mxu1 %v9462_v0  ;;  %v9478_v62 = vld [vmem:[%s14363_s8 + $0x380] ss:$16 sps:$4 sm:$0xff]   ;;  %v9483_v32 = vld [vmem:[%s14363_s8 + $0x164] ss:$16 sps:$4 sm:$0xff]  }
 0x4d1   : > { %7740 = vrot.lane.b32.xlu1 %v12292_v46, %s9792_s25  ;;  %7742 = vrot.lane.b32.xlu0 %v12298_v59, %s9792_s25 }
 0x4d2   : > { %v12608_v58 = vadd.f32 %v4639_v54, %v12228_v29  ;;  %6141 = vmatpush2.bf16.msra.mxu0 %v9457_v14  ;;  %6334 = vmatpush2.bf16.msra.mxu1 %v9460_v20  ;;  %v4385_v29 = vld [vmem:[%s12358_s29 + $0x78] sm:$0xff] }
 0x4d3   : > { %v4559_v28 = vpop.permute.xlu0 %4558  ;;  %6142 = vmatprep.subr.bf16.mxu0 %v9465_v27  ;;  %6335 = vmatprep.subr.bf16.mxu1 %v9468_v50  ;;  %v4388_v27 = vld [vmem:[%s12358_s29 + $0x90] sm:$0xff] }
 0x4d4   : > { %v4696_v60 = vpack.c.bf16 %v12608_v58, %v12605_v34  ;;  %v4640_v24 = vmul.f32 %v4559_v28, %v4384_v55  ;;  %v9481_v55 = vld [vmem:[%s14363_s8 + $0x160] ss:$16 sps:$4 sm:$0xff]  }
 0x4d5   : > { %7744 = vrot.lane.b32.xlu1 %v12304_v36, %s9792_s25  ;;  %7746 = vrot.lane.b32.xlu0 %v12310_v43, %s9792_s25 }
 0x4d6   : > { %8464 = vmatmul.mubr.msk.bf16.gmra.mxu0 %vm491_vm1, %v4696_v60  ;;  %8481 = vmatmul.mubr.msk.bf16.gmra.mxu1 %vm491_vm1, %v4696_v60  ;;  %v12645_v35 = vadd.f32 %v4640_v24, %v12236_v4  ;;  %v9480_v4 = vld [vmem:[%s14363_s8 + $0x384] ss:$16 sps:$4 sm:$0xff]   ;;  %v9490_v24 = vld [vmem:[%s14363_s8 + $0x340] ss:$16 sps:$4 sm:$0xff]  }
 0x4d7   : > { %v4561_v42 = vpop.permute.xlu1 %4560  ;;  %4880 = vmatprep.mubr.bf16.mxu0 %v14759_v19  ;;  %5073 = vmatprep.mubr.bf16.mxu1 %v14759_v19  ;;  %v9489_v60 = vld [vmem:[%s14363_s8 + $0x144] ss:$16 sps:$4 sm:$0xff]  }
 0x4d8   : > { %v4641_v2 = vmul.f32 %v4561_v42, %v4385_v29  ;;  %6143 = vmatpush2.bf16.msra.mxu0 %v9463_v3  ;;  %6336 = vmatpush2.bf16.msra.mxu1 %v9466_v9  ;;  %v9492_v3 = vld [vmem:[%s14363_s8 + $0x344] ss:$16 sps:$4 sm:$0xff]   ;;  %v9487_v29 = vld [vmem:[%s14363_s8 + $0x140] ss:$16 sps:$4 sm:$0xff]  }
 0x4d9   : > { %7748 = vrot.lane.b32.xlu1 %v12322_v49, %s9792_s25  ;;  %7750 = vrot.lane.b32.xlu0 %v12328_v57, %s9792_s25  ;;  %v4390_v42 = vld [vmem:[%s12358_s29 + $0xa0] sm:$0xff] }
 0x4da   : > { %v12648_v53 = vadd.f32 %v4641_v2, %v12244_v52  ;;  %6144 = vmatprep.subr.bf16.mxu0 %v9471_v12  ;;  %6337 = vmatprep.subr.bf16.mxu1 %v9474_v45  ;;  %v4387_v52 = vld [vmem:[%s12358_s29 + $0x88] sm:$0xff] }
 0x4db   : > { %v4563_v37 = vpop.permute.xlu0 %4562 }
 0x4dc   : > { %v4697_v13 = vpack.c.bf16 %v12648_v53, %v12645_v35  ;;  %6145 = vmatpush2.bf16.msra.mxu0 %v9469_v15  ;;  %6338 = vmatpush2.bf16.msra.mxu1 %v9472_v6  ;;  %v4642_v56 = vmul.f32 %v4563_v37, %v4386_v47  ;;  %v9493_v6 = vld [vmem:[%s14363_s8 + $0x120] ss:$16 sps:$4 sm:$0xff]  }
 0x4dd   : > { %7752 = vrot.lane.b32.xlu1 %v12333_v8, %s9792_s25  ;;  %7754 = vrot.lane.b32.xlu0 %v12337_v38, %s9792_s25  ;;  %v9496_v47 = vld [vmem:[%s14363_s8 + $0x320] ss:$16 sps:$4 sm:$0xff]  }
 0x4de   : > { %8465 = vmatmul.mubr.msk.bf16.gmra.mxu0 %vm491_vm1, %v4697_v13  ;;  %8482 = vmatmul.mubr.msk.bf16.gmra.mxu1 %vm491_vm1, %v4697_v13  ;;  %v12685_v20 = vadd.f32 %v4642_v56, %v12252_v51  ;;  %v9484_v51 = vld [vmem:[%s14363_s8 + $0x360] ss:$16 sps:$4 sm:$0xff]   ;;  %v9504_v13 = vld [vmem:[%s14363_s8 + $0x304] ss:$16 sps:$4 sm:$0xff]  }
 0x4df   : > { %v4565_v0 = vpop.permute.xlu1 %4564  ;;  %4890 = vmatprep.mubr.bf16.mxu0 %v14759_v19  ;;  %5083 = vmatprep.mubr.bf16.mxu1 %v14759_v19 }
 0x4e0   : > { %v4643_v14 = vmul.f32 %v4565_v0, %v4387_v52  ;;  %6146 = vmatprep.subr.bf16.mxu0 %v9477_v40  ;;  %6339 = vmatprep.subr.bf16.mxu1 %v9480_v4  ;;  %v4392_v52 = vld [vmem:[%s12358_s29 + $0xb0] sm:$0xff]  ;;  %v9507_v0 = vld [vmem:[%s14363_s8 + $0xec] ss:$16 sps:$4 sm:$0xff]  }
 0x4e1   : > { %7756 = vrot.lane.b32.xlu1 %v12341_v44, %s9792_s25  ;;  %7758 = vrot.lane.b32.xlu0 %v12345_v22, %s9792_s25 }
 0x4e2   : > { %v12688_v26 = vadd.f32 %v4643_v14, %v12260_v1  ;;  %6147 = vmatpush2.bf16.msra.mxu0 %v9475_v30  ;;  %6340 = vmatpush2.bf16.msra.mxu1 %v9478_v62  ;;  %v4389_v1 = vld [vmem:[%s12358_s29 + $0x98] sm:$0xff]  ;;  %v4394_v14 = vld [vmem:[%s12358_s29 + $0xc0] sm:$0xff] }
 0x4e3   : > { %v4567_v50 = vpop.permute.xlu0 %4566  ;;  %6148 = vmatprep.subr.bf16.mxu0 %v9483_v32  ;;  %6341 = vmatprep.subr.bf16.mxu1 %v9486_v39 }
 0x4e4   : > { %v4698_v54 = vpack.c.bf16 %v12688_v26, %v12685_v20  ;;  %v4644_v28 = vmul.f32 %v4567_v50, %v4388_v27 }
 0x4e5   : > { %7760 = vrot.lane.b32.xlu1 %v12349_v48, %s9792_s25  ;;  %7826 = vrot.lane.b32.xlu0 %v12366_v7, %s9793_s30 }
 0x4e6   : > { %8466 = vmatmul.mubr.msk.bf16.gmra.mxu0 %vm491_vm1, %v4698_v54  ;;  %8483 = vmatmul.mubr.msk.bf16.gmra.mxu1 %vm491_vm1, %v4698_v54  ;;  %v12725_v12 = vadd.f32 %v4644_v28, %v12268_v18  ;;  %v9498_v18 = vld [vmem:[%s14363_s8 + $0x324] ss:$16 sps:$4 sm:$0xff]  }
 0x4e7   : > { %v4569_v9 = vpop.permute.xlu1 %4568  ;;  %4900 = vmatprep.mubr.bf16.mxu0 %v14759_v19  ;;  %5093 = vmatprep.mubr.bf16.mxu1 %v14759_v19 }
 0x4e8   : > { %v4645_v7 = vmul.f32 %v4569_v9, %v4389_v1  ;;  %6149 = vmatpush2.bf16.msra.mxu0 %v9481_v55  ;;  %6342 = vmatpush2.bf16.msra.mxu1 %v9484_v51  ;;  %v4397_v1 = vld [vmem:[%s12358_s29 + $0xd8] sm:$0xff] }
 0x4e9   : > { %7828 = vrot.lane.b32.xlu1 %v12369_v33, %s9793_s30  ;;  %7830 = vrot.lane.b32.xlu0 %v12405_v21, %s9793_s30  ;;  %v9495_v33 = vld [vmem:[%s14363_s8 + $0x124] ss:$16 sps:$4 sm:$0xff]  }
 0x4ea   : > { %v12728_v45 = vadd.f32 %v4645_v7, %v12276_v16  ;;  %6150 = vmatprep.subr.bf16.mxu0 %v9489_v60  ;;  %6343 = vmatprep.subr.bf16.mxu1 %v9492_v3  ;;  %v4391_v16 = vld [vmem:[%s12358_s29 + $0xa8] sm:$0xff] }
 0x4eb   : > { %v4571_v2 = vpop.permute.xlu0 %4570  ;;  %v4399_v3 = vld [vmem:[%s12358_s29 + $0xe8] sm:$0xff] }
 0x4ec   : > { %v4699_v15 = vpack.c.bf16 %v12728_v45, %v12725_v12  ;;  %6151 = vmatpush2.bf16.msra.mxu0 %v9487_v29  ;;  %6344 = vmatpush2.bf16.msra.mxu1 %v9490_v24  ;;  %v4646_v21 = vmul.f32 %v4571_v2, %v4390_v42  ;;  %v4400_v29 = vld [vmem:[%s12358_s29 + $0xf0] sm:$0xff] }
 0x4ed   : > { %7832 = vrot.lane.b32.xlu1 %v12408_v10, %s9793_s30  ;;  %7834 = vrot.lane.b32.xlu0 %v12445_v17, %s9793_s30  ;;  %v9501_v10 = vld [vmem:[%s14363_s8 + $0x104] ss:$16 sps:$4 sm:$0xff]  }
 0x4ee   : > { %8467 = vmatmul.mubr.msk.bf16.gmra.mxu0 %vm491_vm1, %v4699_v15  ;;  %8484 = vmatmul.mubr.msk.bf16.gmra.mxu1 %vm491_vm1, %v4699_v15  ;;  %v12765_v40 = vadd.f32 %v4646_v21, %v12284_v31  ;;  %v9502_v31 = vld [vmem:[%s14363_s8 + $0x300] ss:$16 sps:$4 sm:$0xff]  }
 0x4ef   : > { %v4573_v37 = vpop.permute.xlu1 %4572  ;;  %4910 = vmatprep.mubr.bf16.mxu0 %v14759_v19  ;;  %5103 = vmatprep.mubr.bf16.mxu1 %v14759_v19 }
 0x4f0   : > { %v4647_v17 = vmul.f32 %v4573_v37, %v4391_v16  ;;  %6152 = vmatprep.subr.bf16.mxu0 %v9495_v33  ;;  %6345 = vmatprep.subr.bf16.mxu1 %v9498_v18  ;;  %v14761_v37 = vld [vmem:[#allocation94_spill] sm:$0xff] }
 0x4f1   : > { %7836 = vrot.lane.b32.xlu1 %v12448_v11, %s9793_s30  ;;  %7838 = vrot.lane.b32.xlu0 %v12485_v25, %s9793_s30  ;;  %v9499_v11 = vld [vmem:[%s14363_s8 + $0x100] ss:$16 sps:$4 sm:$0xff]  }
 0x4f2   : > { %v12768_v4 = vadd.f32 %v4647_v17, %v12292_v46  ;;  %6153 = vmatpush2.bf16.msra.mxu0 %v9493_v6  ;;  %6346 = vmatpush2.bf16.msra.mxu1 %v9496_v47  ;;  %v4393_v46 = vld [vmem:[%s12358_s29 + $0xb8] sm:$0xff]  ;;  %v14762_v17 = vld [vmem:[#allocation95_spill] sm:$0xff] }
 0x4f3   : > { %v4575_v56 = vpop.permute.xlu0 %4574  ;;  %6154 = vmatprep.subr.bf16.mxu0 %v9501_v10  ;;  %6347 = vmatprep.subr.bf16.mxu1 %v9504_v13  ;;  %v14760_v6 = vld [vmem:[#allocation93_spill] sm:$0xff] }
 0x4f4   : > { %v4700_v30 = vpack.c.bf16 %v12768_v4, %v12765_v40  ;;  %v4648_v25 = vmul.f32 %v4575_v56, %v4392_v52  ;;  %v14764_v52 = vld [vmem:[#allocation91_spill] sm:$0xff] }
 0x4f5   : > { %7840 = vrot.lane.b32.xlu1 %v12488_v5, %s9793_s30  ;;  %7842 = vrot.lane.b32.xlu0 %v12525_v41, %s9793_s30  ;;  %v9510_v41 = vld [vmem:[%s14363_s8 + $0x2ec] ss:$16 sps:$4 sm:$0xff]  }
 0x4f6   : > { %8468 = vmatmul.mubr.msk.bf16.gmra.mxu0 %vm491_vm1, %v4700_v30  ;;  %8485 = vmatmul.mubr.msk.bf16.gmra.mxu1 %vm491_vm1, %v4700_v30  ;;  %v4680_v32 = vadd.f32 %v4648_v25, %v12298_v59  ;;  %v14765_v30 = vld [vmem:[#allocation92_spill] sm:$0xff]  ;;  %v14766_v25 = vld [vmem:[#allocation97_spill] sm:$0xff] }
 0x4f7   : > { %v4577_v62 = vpop.permute.xlu1 %4576  ;;  %4920 = vmatprep.mubr.bf16.mxu0 %v14759_v19  ;;  %5113 = vmatprep.mubr.bf16.mxu1 %v14759_v19 }
 0x4f8   : > { %v4649_v5 = vmul.f32 %v4577_v62, %v4393_v46  ;;  %6155 = vmatpush2.bf16.msra.mxu0 %v9499_v11  ;;  %6348 = vmatpush2.bf16.msra.mxu1 %v9502_v31 }
 0x4f9   : > { %7844 = vrot.lane.b32.xlu1 %v12528_v63, %s9793_s30  ;;  %7846 = vrot.lane.b32.xlu0 %v12565_v23, %s9793_s30  ;;  %v4395_v63 = vld [vmem:[%s12358_s29 + $0xc8] sm:$0xff] }
 0x4fa   : > { %v4681_v39 = vadd.f32 %v4649_v5, %v12304_v36  ;;  %6510 = vmatprep.subr.bf16.mxu0 %v9507_v0  ;;  %6703 = vmatprep.subr.bf16.mxu1 %v9510_v41  ;;  %v14767_v0 = vld [vmem:[#allocation98_spill] sm:$0xff] }
 0x4fb   : > { %v4579_v27 = vpop.permute.xlu0 %4578 }
 0x4fc   : > { %v4701_v50 = vpack.c.bf16 %v4681_v39, %v4680_v32  ;;  %v4650_v54 = vmul.f32 %v4579_v27, %v4394_v14 }
 0x4fd   : > { %7848 = vrot.lane.b32.xlu1 %v12568_v61, %s9793_s30  ;;  %7850 = vrot.lane.b32.xlu0 %v12605_v34, %s9793_s30  ;;  %v4396_v34 = vld [vmem:[%s12358_s29 + $0xd0] sm:$0xff] }
 0x4fe   : > { %8469 = vmatmul.mubr.msk.bf16.gmra.mxu0 %vm491_vm1, %v4701_v50  ;;  %8486 = vmatmul.mubr.msk.bf16.gmra.mxu1 %vm491_vm1, %v4701_v50  ;;  %v4682_v23 = vadd.f32 %v4650_v54, %v12310_v43 }
 0x4ff   : > { %v4581_v59 = vpop.permute.xlu1 %4580  ;;  %4930 = vmatprep.mubr.bf16.mxu0 %v14759_v19  ;;  %5123 = vmatprep.mubr.bf16.mxu1 %v14759_v19 }
 0x500   : > { %v4651_v36 = vmul.f32 %v4581_v59, %v4395_v63 }
 0x501   : > { %7852 = vrot.lane.b32.xlu1 %v12608_v58, %s9793_s30  ;;  %7854 = vrot.lane.b32.xlu0 %v12645_v35, %s9793_s30 }
 0x502   : > { %v4683_v61 = vadd.f32 %v4651_v36, %v12322_v49 }
 0x503   : > { %v4583_v55 = vpop.permute.xlu0 %4582 }
 0x504   : > { %v4702_v51 = vpack.c.bf16 %v4683_v61, %v4682_v23  ;;  %v4652_v28 = vmul.f32 %v4583_v55, %v4396_v34 }
 0x505   : > { %7856 = vrot.lane.b32.xlu1 %v12648_v53, %s9793_s30  ;;  %7858 = vrot.lane.b32.xlu0 %v12685_v20, %s9793_s30  ;;  %v4398_v53 = vld [vmem:[%s12358_s29 + $0xe0] sm:$0xff] }
 0x506   : > { %8470 = vmatmul.mubr.msk.bf16.gmra.mxu0 %vm491_vm1, %v4702_v51  ;;  %8487 = vmatmul.mubr.msk.bf16.gmra.mxu1 %vm491_vm1, %v4702_v51  ;;  %v4684_v58 = vadd.f32 %v4652_v28, %v12328_v57  ;;  %v9505_v51 = vld [vmem:[%s14363_s8 + $0xe8] ss:$16 sps:$4 sm:$0xff]  }
 0x507   : > { %v4585_v43 = vpop.permute.xlu1 %4584  ;;  %4940 = vmatprep.mubr.bf16.mxu0 %v14759_v19  ;;  %5133 = vmatprep.mubr.bf16.mxu1 %v14759_v19 }
 0x508   : > { %v4653_v49 = vmul.f32 %v4585_v43, %v4397_v1  ;;  %v9508_v1 = vld [vmem:[%s14363_s8 + $0x2e8] ss:$16 sps:$4 sm:$0xff]  }
 0x509   : > { %7860 = vrot.lane.b32.xlu1 %v12688_v26, %s9793_s30  ;;  %7862 = vrot.lane.b32.xlu0 %v12725_v12, %s9793_s30 }
 0x50a   : > { %v4685_v35 = vadd.f32 %v4653_v49, %v12333_v8  ;;  %v14768_v49 = vld [vmem:[#allocation101_spill] sm:$0xff] }
 0x50b   : > { %v4587_v20 = vpop.permute.xlu0 %4586 }
 0x50c   : > { %v4703_v60 = vpack.c.bf16 %v4685_v35, %v4684_v58  ;;  %v4654_v9 = vmul.f32 %v4587_v20, %v4398_v53  ;;  %v9513_v20 = vld [vmem:[%s14363_s8 + $0xcc] ss:$16 sps:$4 sm:$0xff]  }
 0x50d   : > { %7864 = vrot.lane.b32.xlu1 %v12728_v45, %s9793_s30  ;;  %7866 = vrot.lane.b32.xlu0 %v12765_v40, %s9793_s30  ;;  %v4401_v45 = vld [vmem:[%s12358_s29 + $0xf8] sm:$0xff]  ;;  %v14763_v40 = vld [vmem:[#allocation96_spill] sm:$0xff]  ;;  %s14306_s29 = scalar_lea.hbm %s14365_s10, %s8656_s27 }
 0x50e   : > { %8471 = vmatmul.mubr.msk.bf16.gmra.mxu0 %vm491_vm1, %v4703_v60  ;;  %8488 = vmatmul.mubr.msk.bf16.gmra.mxu1 %vm491_vm1, %v4703_v60  ;;  %v4686_v26 = vadd.f32 %v4654_v9, %v12337_v38  ;;  %v9516_v60 = vld [vmem:[%s14363_s8 + $0x2cc] ss:$16 sps:$4 sm:$0xff]  }
 0x50f   : > { %v4589_v57 = vpop.permute.xlu1 %4588  ;;  %4950 = vmatprep.mubr.bf16.mxu0 %v14759_v19  ;;  %5143 = vmatprep.mubr.bf16.mxu1 %v14759_v19 }
 0x510   : > { %v4655_v8 = vmul.f32 %v4589_v57, %v4399_v3  ;;  %v14769_v3 = vld [vmem:[#allocation102_spill] sm:$0xff]  ;;  %v14770_v57 = vld [vmem:[#allocation103_spill] sm:$0xff] }
 0x511   : > { %7868 = vrot.lane.b32.xlu1 %v12768_v4, %s9793_s30  ;;  %7870 = vrot.lane.b32.xlu0 %v4680_v32, %s9793_s30 }
 0x512   : > { %v4687_v7 = vadd.f32 %v4655_v8, %v12341_v44 }
 0x513   : > { %v4591_v24 = vpop.permute.xlu0 %4590 }
 0x514   : > { %v4704_v12 = vpack.c.bf16 %v4687_v7, %v4686_v26  ;;  %v4656_v42 = vmul.f32 %v4591_v24, %v4400_v29  ;;  %v14772_v29 = vld [vmem:[#allocation99_spill] sm:$0xff] }
 0x515   : > { %7872 = vrot.lane.b32.xlu1 %v4681_v39, %s9793_s30  ;;  %7874 = vrot.lane.b32.xlu0 %v4682_v23, %s9793_s30 }
 0x516   : > { %8472 = vmatmul.mubr.msk.bf16.gmra.mxu0 %vm491_vm1, %v4704_v12  ;;  %8489 = vmatmul.mubr.msk.bf16.gmra.mxu1 %vm491_vm1, %v4704_v12  ;;  %v4688_v44 = vadd.f32 %v4656_v42, %v12345_v22  ;;  %v14773_v12 = vld [vmem:[#allocation100_spill] sm:$0xff] }
 0x517   : > { %v4593_v2 = vpop.permute.xlu1 %4592  ;;  %4960 = vmatprep.mubr.bf16.mxu0 %v14759_v19  ;;  %5153 = vmatprep.mubr.bf16.mxu1 %v14759_v19 }
 0x518   : > { %v4657_v38 = vmul.f32 %v4593_v2, %v4401_v45 }
 0x519   : > { %7876 = vrot.lane.b32.xlu1 %v4683_v61, %s9793_s30  ;;  %7878 = vrot.lane.b32.xlu0 %v4684_v58, %s9793_s30 }
 0x51a   : > { %v4689_v15 = vadd.f32 %v4657_v38, %v12349_v48  ;;  %v14774_v38 = vld [vmem:[#allocation105_spill] sm:$0xff] }
 0x51c   : > { %v4705_v33 = vpack.c.bf16 %v4689_v15, %v4688_v44 }
 0x51d   : > { %7880 = vrot.lane.b32.xlu1 %v4685_v35, %s9793_s30  ;;  %7882 = vrot.lane.b32.xlu0 %v4686_v26, %s9793_s30  ;;  %v14771_v26 = vld [vmem:[#allocation104_spill] sm:$0xff] }
 0x51e   : > { %8473 = vmatmul.mubr.msk.bf16.gmra.mxu0 %vm491_vm1, %v4705_v33  ;;  %8490 = vmatmul.mubr.msk.bf16.gmra.mxu1 %vm491_vm1, %v4705_v33 }
 0x521   : > { %7884 = vrot.lane.b32.xlu1 %v4687_v7, %s9793_s30  ;;  %7886 = vrot.lane.b32.xlu0 %v4688_v44, %s9793_s30 }
 0x525   : > { %7888 = vrot.lane.b32.xlu1 %v4689_v15, %s9793_s30  ;;  %v14775_v15 = vld [vmem:[#allocation106_spill] sm:$0xff]  ;;  %s9723_s30 = scalar_lea.vmem %s14308_s1, 4096 }
 0x526   : > { %p9724_p8 = scmp.ne.s32.totalorder %s14308_s1, %s9723_s30  ;;  %p9731_p12 = scmp.lt.s32.totalorder %s9729_s21, %s9723_s30 }
 0x528   : > { %p9725_p9 = pnand %p9724_p8, %p9890_p5  ;;  %p9732_p13 = por %p9731_p12, %p9730_p11 }
 0x52a   : > { %p9726_p10 = pneg %p9725_p9 }
 0x52c   : > { %p9733_p0 = pnand %p9732_p13, %p9726_p10 }
 0x566   : > { %v4812_v19 = vpop.f32.mrf.mxu0  ;;  %v5005_v18 = vpop.f32.mrf.mxu1 }
 0x567   : > { %v4813_v56 = vadd.f32 %v4812_v19, %v14764_v52  ;;  %v5006_v11 = vadd.f32 %v5005_v18, %v14765_v30  ;;  %v9511_v19 = vld [vmem:[%s14363_s8 + $0xc8] ss:$16 sps:$4 sm:$0xff]  }
 0x568   : > { %v4814_v22 = vpop.f32.mrf.mxu0  ;;  %v5007_v16 = vpop.f32.mrf.mxu1 }
 0x569   : > { %v4815_v47 = vadd.f32 %v4814_v22, %v14760_v6  ;;  %v5008_v10 = vadd.f32 %v5007_v16, %v14761_v37  ;;  %v5164_v59 = vmax.f32 %v4813_v56, 0.0  ;;  %v5166_v36 = vmax.f32 %v5006_v11, 0.0  ;;  %v9519_v6 = vld [vmem:[%s14363_s8 + $0xac] ss:$16 sps:$4 sm:$0xff]   ;;  %v9517_v11 = vld [vmem:[%s14363_s8 + $0xa8] ss:$16 sps:$4 sm:$0xff]  }
 0x56a   : > { %v4816_v48 = vpop.f32.mrf.mxu0  ;;  %v5009_v21 = vpop.f32.mrf.mxu1 }
 0x56b   : > { %v4817_v13 = vadd.f32 %v4816_v48, %v14762_v17  ;;  %v5010_v4 = vadd.f32 %v5009_v21, %v14763_v40  ;;  %v5165_v27 = vmax.f32 %v4815_v47, 0.0  ;;  %v5167_v50 = vmax.f32 %v5008_v10, 0.0  ;;  %v9514_v21 = vld [vmem:[%s14363_s8 + $0x2c8] ss:$16 sps:$4 sm:$0xff]  }
 0x56c   : > { %v4818_v31 = vpop.f32.mrf.mxu0  ;;  %v5011_v46 = vpop.f32.mrf.mxu1 }
 0x56d   : > { %v4819_v62 = vadd.f32 %v4818_v31, %v14766_v25  ;;  %v5012_v5 = vadd.f32 %v5011_v46, %v14767_v0  ;;  %v5168_v41 = vmax.f32 %v4817_v13, 0.0  ;;  %v5170_v32 = vmax.f32 %v5010_v4, 0.0  ;;  %v9522_v31 = vld [vmem:[%s14363_s8 + $0x2ac] ss:$16 sps:$4 sm:$0xff]  }
 0x56e   : > { %v4822_v39 = vpop.f32.mrf.mxu0  ;;  %v5015_v14 = vpop.f32.mrf.mxu1 }
 0x56f   : > { %v5169_v63 = vmax.f32 %v4819_v62, 0.0  ;;  %v5171_v54 = vmax.f32 %v5012_v5, 0.0  ;;  %v12884_v28 = vpack.c.bf16 %v5168_v41, %v5164_v59  ;;  %v12886_v43 = vpack.c.bf16 %v5170_v32, %v5166_v36  ;;  %v14776_v62 = vld [vmem:[#allocation109_spill] sm:$0xff] }
 0x570   : > { %v4824_v23 = vpop.f32.mrf.mxu0  ;;  %v5017_v61 = vpop.f32.mrf.mxu1  ;;  %v4823_v24 = vadd.f32 %v4822_v39, %v14772_v29  ;;  %v5016_v45 = vadd.f32 %v5015_v14, %v14773_v12  ;;  %v9520_v32 = vld [vmem:[%s14363_s8 + $0x2a8] ss:$16 sps:$4 sm:$0xff]   ;;  %v9525_v39 = vld [vmem:[%s14363_s8 + $0x8c] ss:$16 sps:$4 sm:$0xff]   ;;  %v14777_v14 = vld [vmem:[#allocation110_spill] sm:$0xff] }
 0x571   : > { %v12874_v34 = vpack.c.bf16 %v5169_v63, %v5165_v27  ;;  %v12876_v55 = vpack.c.bf16 %v5171_v54, %v5167_v50  ;;  %v4825_v58 = vadd.f32 %v4824_v23, %v14768_v49  ;;  %v5018_v9 = vadd.f32 %v5017_v61, %v14769_v3  ;;  %v14778_v50 = vld [vmem:[#allocation111_spill] sm:$0xff]  ;;  %v14779_v54 = vld [vmem:[#allocation112_spill] sm:$0xff] }
 0x572   : > { %v4826_v35 = vpop.f32.mrf.mxu0  ;;  %v5019_v53 = vpop.f32.mrf.mxu1  ;;  %v5172_v13 = vmax.f32 %v4823_v24, 0.0  ;;  %v5174_v40 = vmax.f32 %v5016_v45, 0.0  ;;  %v9528_v36 = vld [vmem:[%s14363_s8 + $0x28c] ss:$16 sps:$4 sm:$0xff]   ;;  %v9523_v3 = vld [vmem:[%s14363_s8 + $0x88] ss:$16 sps:$4 sm:$0xff]  }
 0x573   : > { %v4827_v8 = vadd.f32 %v4826_v35, %v14770_v57  ;;  %v5020_v7 = vadd.f32 %v5019_v53, %v14771_v26  ;;  %6156 = vmatprep.mubr.bf16.mxu0 %v12874_v34  ;;  %6349 = vmatprep.mubr.bf16.mxu1 %v12876_v55  ;;  %v5173_v47 = vmax.f32 %v4825_v58, 0.0  ;;  %v5175_v37 = vmax.f32 %v5018_v9, 0.0  ;;  %v14780_v23 = vld [vmem:[#allocation107_spill] sm:$0xff]  ;;  %v14782_v35 = vld [vmem:[#allocation113_spill] sm:$0xff] }
 0x574   : > { %v4828_v42 = vpop.f32.mrf.mxu0  ;;  %v5021_v2 = vpop.f32.mrf.mxu1  ;;  %6157 = vmatmul.mubr.bf16.vlgmr.msra.gmra.mxu0 %v12884_v28  ;;  %6350 = vmatmul.mubr.bf16.vlgmr.msra.gmra.mxu1 %v12886_v43  ;;  %v9531_v29 = vld [vmem:[%s14363_s8 + $0x6c] ss:$16 sps:$4 sm:$0xff]  }
 0x575   : > { %v4829_v44 = vadd.f32 %v4828_v42, %v14774_v38  ;;  %v5022_v33 = vadd.f32 %v5021_v2, %v14775_v15  ;;  %6511 = vmatpush1.bf16.msra.mxu0 %v9505_v51  ;;  %6704 = vmatpush1.bf16.msra.mxu1 %v9508_v1  ;;  %v5176_v18 = vmax.f32 %v4827_v8, 0.0  ;;  %v5178_v22 = vmax.f32 %v5020_v7, 0.0  ;;  %v14781_v51 = vld [vmem:[#allocation108_spill] sm:$0xff]  ;;  %v9526_v7 = vld [vmem:[%s14363_s8 + $0x288] ss:$16 sps:$4 sm:$0xff]  }
 0x576   : > { %v4832_v16 = vpop.f32.mrf.mxu0  ;;  %v5025_v48 = vpop.f32.mrf.mxu1  ;;  %6512 = vmatprep.subr.bf16.mxu0 %v9513_v20  ;;  %6705 = vmatprep.subr.bf16.mxu1 %v9516_v60  ;;  %v14783_v20 = vld [vmem:[#allocation114_spill] sm:$0xff] }
 0x577   : > { %v5177_v10 = vmax.f32 %v4829_v44, 0.0  ;;  %v5179_v17 = vmax.f32 %v5022_v33, 0.0  ;;  %v12925_v46 = vpack.c.bf16 %v5176_v18, %v5172_v13  ;;  %v12927_v25 = vpack.c.bf16 %v5178_v22, %v5174_v40  ;;  %v9529_v18 = vld [vmem:[%s14363_s8 + $0x68] ss:$16 sps:$4 sm:$0xff]   ;;  %v9534_v22 = vld [vmem:[%s14363_s8 + $0x26c] ss:$16 sps:$4 sm:$0xff]  }
 0x578   : > { %v4834_v4 = vpop.f32.mrf.mxu0  ;;  %v5027_v52 = vpop.f32.mrf.mxu1  ;;  %v4833_v61 = vadd.f32 %v4832_v16, %v14780_v23  ;;  %v5026_v1 = vadd.f32 %v5025_v48, %v14781_v51  ;;  %v14785_v13 = vld [vmem:[#allocation118_spill] sm:$0xff] }
 0x579   : > { %v12915_v56 = vpack.c.bf16 %v5177_v10, %v5173_v47  ;;  %v12917_v30 = vpack.c.bf16 %v5179_v17, %v5175_v37  ;;  %6513 = vmatpush1.bf16.msra.mxu0 %v9511_v19  ;;  %v4835_v0 = vadd.f32 %v4834_v4, %v14776_v62  ;;  %6706 = vmatpush1.bf16.msra.mxu1 %v9514_v21  ;;  %v14784_v21 = vld [vmem:[#allocation117_spill] sm:$0xff]  ;;  %v14786_v4 = vld [vmem:[#allocation119_spill] sm:$0xff] }
 0x57a   : > { %v4836_v5 = vpop.f32.mrf.mxu0  ;;  %v5029_v41 = vpop.f32.mrf.mxu1  ;;  %6514 = vmatprep.subr.bf16.mxu0 %v9519_v6  ;;  %v5028_v27 = vadd.f32 %v5027_v52, %v14777_v14  ;;  %6707 = vmatprep.subr.bf16.mxu1 %v9522_v31  ;;  %v5180_v2 = vmax.f32 %v4833_v61, 0.0  ;;  %v5182_v38 = vmax.f32 %v5026_v1, 0.0  ;;  %v9532_v10 = vld [vmem:[%s14363_s8 + $0x268] ss:$16 sps:$4 sm:$0xff]   ;;  %v9537_v17 = vld [vmem:[%s14363_s8 + $0x4c] ss:$16 sps:$4 sm:$0xff]  }
 0x57b   : > { %v4837_v63 = vadd.f32 %v4836_v5, %v14778_v50  ;;  %v5030_v59 = vadd.f32 %v5029_v41, %v14779_v54  ;;  %6166 = vmatprep.mubr.bf16.mxu0 %v12915_v56  ;;  %6359 = vmatprep.mubr.bf16.mxu1 %v12917_v30  ;;  %v5181_v24 = vmax.f32 %v4835_v0, 0.0  ;;  %v9540_v62 = vld [vmem:[%s14363_s8 + $0x24c] ss:$16 sps:$4 sm:$0xff]   ;;  %v14789_v41 = vld [vmem:[#allocation116_spill] sm:$0xff]  ;;  %v9538_v1 = vld [vmem:[%s14363_s8 + $0x248] ss:$16 sps:$4 sm:$0xff]  }
 0x57c   : > { %v4838_v49 = vpop.f32.mrf.mxu0  ;;  %v5031_v58 = vpop.f32.mrf.mxu1  ;;  %6167 = vmatmul.mubr.bf16.gmra.mxu0 %v12925_v46  ;;  %6360 = vmatmul.mubr.bf16.gmra.mxu1 %v12927_v25  ;;  %v5183_v12 = vmax.f32 %v5028_v27, 0.0  ;;  %v14788_v0 = vld [vmem:[#allocation115_spill] sm:$0xff]  ;;  %v14790_v27 = vld [vmem:[#allocation121_spill] sm:$0xff] }
 0x57d   : > { %v4839_v53 = vadd.f32 %v4838_v49, %v14782_v35  ;;  %v5032_v60 = vadd.f32 %v5031_v58, %v14783_v20  ;;  %6515 = vmatpush1.bf16.msra.mxu0 %v9517_v11  ;;  %v5184_v9 = vmax.f32 %v4837_v63, 0.0  ;;  %v5186_v57 = vmax.f32 %v5030_v59, 0.0  ;;  %6708 = vmatpush1.bf16.msra.mxu1 %v9520_v32  ;;  %v14787_v11 = vld [vmem:[#allocation120_spill] sm:$0xff]  ;;  %v14791_v63 = vld [vmem:[#allocation122_spill] sm:$0xff]  ;;  %v9535_v59 = vld [vmem:[%s14363_s8 + $0x48] ss:$16 sps:$4 sm:$0xff]  }
 0x57e   : > { %v4842_v8 = vpop.f32.mrf.mxu0  ;;  %v5035_v26 = vpop.f32.mrf.mxu1  ;;  %6516 = vmatprep.subr.bf16.mxu0 %v9525_v39  ;;  %6709 = vmatprep.subr.bf16.mxu1 %v9528_v36  ;;  %v9543_v49 = vld [vmem:[%s14363_s8 + $0x2c] ss:$16 sps:$4 sm:$0xff]  }
 0x57f   : > { %v5185_v45 = vmax.f32 %v4839_v53, 0.0  ;;  %v5187_v42 = vmax.f32 %v5032_v60, 0.0  ;;  %v12969_v16 = vpack.c.bf16 %v5184_v9, %v5180_v2  ;;  %v12971_v48 = vpack.c.bf16 %v5186_v57, %v5182_v38 }
 0x580   : > { %v4844_v44 = vpop.f32.mrf.mxu0  ;;  %v5037_v15 = vpop.f32.mrf.mxu1  ;;  %v4843_v5 = vadd.f32 %v4842_v8, %v14788_v0  ;;  %v5036_v32 = vadd.f32 %v5035_v26, %v14789_v41  ;;  %v14799_v0 = vld [vmem:[#allocation130_spill] sm:$0xff]  ;;  %v9547_v41 = vld [vmem:[%s14363_s8 + $0x8] ss:$16 sps:$4 sm:$0xff]  }
 0x581   : > { %v12959_v33 = vpack.c.bf16 %v5185_v45, %v5181_v24  ;;  %v12961_v19 = vpack.c.bf16 %v5187_v42, %v5183_v12  ;;  %6517 = vmatpush1.bf16.msra.mxu0 %v9523_v3  ;;  %v4845_v6 = vadd.f32 %v4844_v44, %v14784_v21  ;;  %6710 = vmatpush1.bf16.msra.mxu1 %v9526_v7  ;;  %v9541_v7 = vld [vmem:[%s14363_s8 + $0x28] ss:$16 sps:$4 sm:$0xff]  }
 0x582   : > { %v4846_v47 = vpop.f32.mrf.mxu0  ;;  %v5039_v37 = vpop.f32.mrf.mxu1  ;;  %6518 = vmatprep.subr.bf16.mxu0 %v9531_v29  ;;  %v5038_v40 = vadd.f32 %v5037_v15, %v14785_v13  ;;  %6711 = vmatprep.subr.bf16.mxu1 %v9534_v22  ;;  %v5188_v60 = vmax.f32 %v4843_v5, 0.0  ;;  %v5190_v3 = vmax.f32 %v5036_v32, 0.0  ;;  %v9546_v29 = vld [vmem:[%s14363_s8 + $0x22c] ss:$16 sps:$4 sm:$0xff]   ;;  %v9544_v44 = vld [vmem:[%s14363_s8 + $0x228] ss:$16 sps:$4 sm:$0xff]  }
 0x583   : > { %v4847_v52 = vadd.f32 %v4846_v47, %v14786_v4  ;;  %v5040_v31 = vadd.f32 %v5039_v37, %v14787_v11  ;;  %6176 = vmatprep.mubr.bf16.mxu0 %v12959_v33  ;;  %6369 = vmatprep.mubr.bf16.mxu1 %v12961_v19  ;;  %v5189_v58 = vmax.f32 %v4845_v6, 0.0  ;;  %v14792_v45 = vld [vmem:[#allocation125_spill] sm:$0xff]  ;;  %v14794_v21 = vld [vmem:[#allocation127_spill] sm:$0xff]  ;;  %v14795_v47 = vld [vmem:[#allocation128_spill] sm:$0xff] }
 0x584   : > { %v4848_v39 = vpop.f32.mrf.mxu0  ;;  %v5041_v14 = vpop.f32.mrf.mxu1  ;;  %6177 = vmatmul.mubr.bf16.gmra.mxu0 %v12969_v16  ;;  %6370 = vmatmul.mubr.bf16.gmra.mxu1 %v12971_v48  ;;  %v5191_v35 = vmax.f32 %v5038_v40, 0.0  ;;  %v9549_v15 = vld [vmem:[%s14363_s8 + $0xc] ss:$16 sps:$4 sm:$0xff]   ;;  %v14797_v40 = vld [vmem:[#allocation124_spill] sm:$0xff] }
 0x585   : > { %v4849_v50 = vadd.f32 %v4848_v39, %v14790_v27  ;;  %v5042_v54 = vadd.f32 %v5041_v14, %v14791_v63  ;;  %6519 = vmatpush1.bf16.msra.mxu0 %v9529_v18  ;;  %v5192_v36 = vmax.f32 %v4847_v52, 0.0  ;;  %v5194_v23 = vmax.f32 %v5040_v31, 0.0  ;;  %6712 = vmatpush1.bf16.msra.mxu1 %v9532_v10  ;;  %v14793_v18 = vld [vmem:[#allocation126_spill] sm:$0xff]  ;;  %v9552_v10 = vld [vmem:[%s14363_s8 + $0x20c] ss:$16 sps:$4 sm:$0xff]  }
 0x586   : > { %v4852_v61 = vpop.f32.mrf.mxu0  ;;  %v5045_v51 = vpop.f32.mrf.mxu1  ;;  %6520 = vmatprep.subr.bf16.mxu0 %v9537_v17  ;;  %6713 = vmatprep.subr.bf16.mxu1 %v9540_v62  ;;  %v14796_v17 = vld [vmem:[#allocation123_spill] sm:$0xff]  ;;  %v14798_v31 = vld [vmem:[#allocation129_spill] sm:$0xff] }
 0x587   : > { %v5193_v53 = vmax.f32 %v4849_v50, 0.0  ;;  %v5195_v20 = vmax.f32 %v5042_v54, 0.0  ;;  %v13013_v24 = vpack.c.bf16 %v5192_v36, %v5188_v60  ;;  %v13015_v12 = vpack.c.bf16 %v5194_v23, %v5190_v3  ;;  %v9550_v50 = vld [vmem:[%s14363_s8 + $0x208] ss:$16 sps:$4 sm:$0xff]   ;;  %v9555_v63 = vld [vmem:[%s14363_s8 + $0x1ec] ss:$16 sps:$4 sm:$0xff]  }
 0x588   : > { %v4854_v9 = vpop.f32.mrf.mxu0  ;;  %v5047_v57 = vpop.f32.mrf.mxu1  ;;  %v4853_v13 = vadd.f32 %v4852_v61, %v14796_v17  ;;  %v5046_v4 = vadd.f32 %v5045_v51, %v14797_v40  ;;  %v14806_v40 = vld [vmem:[#allocation137_spill] sm:$0xff] }
 0x589   : > { %v13003_v8 = vpack.c.bf16 %v5193_v53, %v5189_v58  ;;  %v13005_v26 = vpack.c.bf16 %v5195_v20, %v5191_v35  ;;  %6521 = vmatpush1.bf16.msra.mxu0 %v9535_v59  ;;  %v4855_v42 = vadd.f32 %v4854_v9, %v14792_v45  ;;  %6714 = vmatpush1.bf16.msra.mxu1 %v9538_v1  ;;  %v9553_v53 = vld [vmem:[%s14363_s8 + $0x1e8] ss:$16 sps:$4 sm:$0xff]   ;;  %v9558_v20 = vld [vmem:[%s14363_s8 + $0x3ec] ss:$16 sps:$4 sm:$0xff]  }
 0x58a   : > { %v4856_v2 = vpop.f32.mrf.mxu0  ;;  %v5049_v38 = vpop.f32.mrf.mxu1  ;;  %6522 = vmatprep.subr.bf16.mxu0 %v9543_v49  ;;  %v5048_v22 = vadd.f32 %v5047_v57, %v14793_v18  ;;  %6715 = vmatprep.subr.bf16.mxu1 %v9546_v29  ;;  %v5196_v61 = vmax.f32 %v4853_v13, 0.0  ;;  %v5198_v51 = vmax.f32 %v5046_v4, 0.0  ;;  %v14800_v9 = vld [vmem:[#allocation133_spill] sm:$0xff]  ;;  %v14803_v18 = vld [vmem:[#allocation136_spill] sm:$0xff] }
 0x58b   : > { %v4857_v6 = vadd.f32 %v4856_v2, %v14794_v21  ;;  %v5050_v37 = vadd.f32 %v5049_v38, %v14795_v47  ;;  %6186 = vmatprep.mubr.bf16.mxu0 %v13003_v8  ;;  %6379 = vmatprep.mubr.bf16.mxu1 %v13005_v26  ;;  %v5197_v54 = vmax.f32 %v4855_v42, 0.0  ;;  %v9556_v45 = vld [vmem:[%s14363_s8 + $0x3e8] ss:$16 sps:$4 sm:$0xff]   ;;  %v9561_v42 = vld [vmem:[%s14363_s8 + $0x1cc] ss:$16 sps:$4 sm:$0xff]   ;;  %v14801_v2 = vld [vmem:[#allocation134_spill] sm:$0xff] }
 0x58c   : > { %v4858_v52 = vpop.f32.mrf.mxu0  ;;  %v5051_v11 = vpop.f32.mrf.mxu1  ;;  %6187 = vmatmul.mubr.bf16.gmra.mxu0 %v13013_v24  ;;  %6380 = vmatmul.mubr.bf16.gmra.mxu1 %v13015_v12  ;;  %v5199_v59 = vmax.f32 %v5048_v22, 0.0  ;;  %v9564_v21 = vld [vmem:[%s14363_s8 + $0x3cc] ss:$16 sps:$4 sm:$0xff]  }
 0x58d   : > { %v4859_v62 = vadd.f32 %v4858_v52, %v14798_v31  ;;  %v5052_v5 = vadd.f32 %v5051_v11, %v14799_v0  ;;  %6523 = vmatpush1.bf16.msra.mxu0 %v9541_v7  ;;  %v5200_v32 = vmax.f32 %v4857_v6, 0.0  ;;  %v5202_v39 = vmax.f32 %v5050_v37, 0.0  ;;  %6716 = vmatpush1.bf16.msra.mxu1 %v9544_v44  ;;  %v14802_v44 = vld [vmem:[#allocation135_spill] sm:$0xff]  ;;  %v14805_v37 = vld [vmem:[#allocation132_spill] sm:$0xff]  ;;  %v14807_v52 = vld [vmem:[#allocation138_spill] sm:$0xff] }
 0x58e   : > { %v4862_v14 = vpop.f32.mrf.mxu0  ;;  %v5055_v27 = vpop.f32.mrf.mxu1  ;;  %6524 = vmatprep.subr.bf16.mxu0 %v9549_v15  ;;  %6717 = vmatprep.subr.bf16.mxu1 %v9552_v10  ;;  %v14804_v6 = vld [vmem:[#allocation131_spill] sm:$0xff] }
 0x58f   : > { %v5201_v36 = vmax.f32 %v4859_v62, 0.0  ;;  %v5203_v23 = vmax.f32 %v5052_v5, 0.0  ;;  %v13057_v60 = vpack.c.bf16 %v5200_v32, %v5196_v61  ;;  %v13059_v3 = vpack.c.bf16 %v5202_v39, %v5198_v51  ;;  %v9559_v31 = vld [vmem:[%s14363_s8 + $0x1c8] ss:$16 sps:$4 sm:$0xff]   ;;  %v9567_v39 = vld [vmem:[%s14363_s8 + $0x1ac] ss:$16 sps:$4 sm:$0xff]  }
 0x590   : > { %v4864_v1 = vpop.f32.mrf.mxu0  ;;  %v5057_v49 = vpop.f32.mrf.mxu1  ;;  %v4863_v47 = vadd.f32 %v4862_v14, %v14804_v6  ;;  %v5056_v10 = vadd.f32 %v5055_v27, %v14805_v37  ;;  %v9562_v32 = vld [vmem:[%s14363_s8 + $0x3c8] ss:$16 sps:$4 sm:$0xff]   ;;  %v14813_v37 = vld [vmem:[#allocation140_spill] sm:$0xff] }
 0x591   : > { %v13047_v58 = vpack.c.bf16 %v5201_v36, %v5197_v54  ;;  %v13049_v35 = vpack.c.bf16 %v5203_v23, %v5199_v59  ;;  %6525 = vmatpush1.bf16.msra.mxu0 %v9547_v41  ;;  %v4865_v57 = vadd.f32 %v4864_v1, %v14800_v9  ;;  %6718 = vmatpush1.bf16.msra.mxu1 %v9550_v50  ;;  %v9565_v1 = vld [vmem:[%s14363_s8 + $0x1a8] ss:$16 sps:$4 sm:$0xff]  }
 0x592   : > { %v4866_v7 = vpop.f32.mrf.mxu0  ;;  %v5059_v29 = vpop.f32.mrf.mxu1  ;;  %6526 = vmatprep.subr.bf16.mxu0 %v9555_v63  ;;  %v5058_v38 = vadd.f32 %v5057_v49, %v14801_v2  ;;  %6719 = vmatprep.subr.bf16.mxu1 %v9558_v20  ;;  %v5204_v54 = vmax.f32 %v4863_v47, 0.0  ;;  %v5206_v59 = vmax.f32 %v5056_v10, 0.0  ;;  %v9570_v49 = vld [vmem:[%s14363_s8 + $0x3ac] ss:$16 sps:$4 sm:$0xff]   ;;  %v14809_v2 = vld [vmem:[#allocation142_spill] sm:$0xff] }
 0x593   : > { %v4867_v15 = vadd.f32 %v4866_v7, %v14802_v44  ;;  %v5060_v22 = vadd.f32 %v5059_v29, %v14803_v18  ;;  %6196 = vmatprep.mubr.bf16.mxu0 %v13047_v58  ;;  %6389 = vmatprep.mubr.bf16.mxu1 %v13049_v35  ;;  %v5205_v14 = vmax.f32 %v4865_v57, 0.0  ;;  %v14808_v9 = vld [vmem:[#allocation141_spill] sm:$0xff]  ;;  %v14810_v44 = vld [vmem:[#allocation143_spill] sm:$0xff]  ;;  %v14811_v18 = vld [vmem:[#allocation144_spill] sm:$0xff] }
 0x594   : > { %v4868_v17 = vpop.f32.mrf.mxu0  ;;  %v5061_v13 = vpop.f32.mrf.mxu1  ;;  %6197 = vmatmul.mubr.bf16.gmra.mxu0 %v13057_v60  ;;  %6390 = vmatmul.mubr.bf16.gmra.mxu1 %v13059_v3  ;;  %v5207_v27 = vmax.f32 %v5058_v38, 0.0  ;;  %v14812_v6 = vld [vmem:[#allocation139_spill] sm:$0xff] }
 0x595   : > { %v4869_v4 = vadd.f32 %v4868_v17, %v14806_v40  ;;  %v5062_v11 = vadd.f32 %v5061_v13, %v14807_v52  ;;  %6527 = vmatpush2.bf16.msra.mxu0 %v9553_v53  ;;  %v5208_v62 = vmax.f32 %v4867_v15, 0.0  ;;  %v5210_v0 = vmax.f32 %v5060_v22, 0.0  ;;  %6720 = vmatpush2.bf16.msra.mxu1 %v9556_v45  ;;  %v9568_v45 = vld [vmem:[%s14363_s8 + $0x3a8] ss:$16 sps:$4 sm:$0xff]   ;;  %v14815_v52 = vld [vmem:[#allocation146_spill] sm:$0xff] }
 0x596   : > { %v4872_v5 = vpop.f32.mrf.mxu0  ;;  %v5065_v41 = vpop.f32.mrf.mxu1  ;;  %6528 = vmatprep.subr.bf16.mxu0 %v9561_v42  ;;  %6721 = vmatprep.subr.bf16.mxu1 %v9564_v21  ;;  %v9573_v42 = vld [vmem:[%s14363_s8 + $0x18c] ss:$16 sps:$4 sm:$0xff]  }
 0x597   : > { %v5209_v50 = vmax.f32 %v4869_v4, 0.0  ;;  %v5211_v63 = vmax.f32 %v5062_v11, 0.0  ;;  %v13101_v53 = vpack.c.bf16 %v5208_v62, %v5204_v54  ;;  %v13103_v20 = vpack.c.bf16 %v5210_v0, %v5206_v59  ;;  %v9576_v21 = vld [vmem:[%s14363_s8 + $0x38c] ss:$16 sps:$4 sm:$0xff]  }
 0x598   : > { %v4874_v36 = vpop.f32.mrf.mxu0  ;;  %v5067_v23 = vpop.f32.mrf.mxu1  ;;  %v4873_v47 = vadd.f32 %v4872_v5, %v14812_v6  ;;  %v5066_v10 = vadd.f32 %v5065_v41, %v14813_v37  ;;  %v14814_v40 = vld [vmem:[#allocation145_spill] sm:$0xff] }
 0x599   : > { %v13091_v61 = vpack.c.bf16 %v5209_v50, %v5205_v14  ;;  %v13093_v51 = vpack.c.bf16 %v5211_v63, %v5207_v27  ;;  %6529 = vmatpush2.bf16.msra.mxu0 %v9559_v31  ;;  %v4875_v57 = vadd.f32 %v4874_v36, %v14808_v9  ;;  %6722 = vmatpush2.bf16.msra.mxu1 %v9562_v32  ;;  %v9571_v31 = vld [vmem:[%s14363_s8 + $0x188] ss:$16 sps:$4 sm:$0xff]  }
 0x59a   : > { %v4876_v7 = vpop.f32.mrf.mxu0  ;;  %v5069_v29 = vpop.f32.mrf.mxu1  ;;  %6530 = vmatprep.subr.bf16.mxu0 %v9567_v39  ;;  %v5068_v38 = vadd.f32 %v5067_v23, %v14809_v2  ;;  %6723 = vmatprep.subr.bf16.mxu1 %v9570_v49  ;;  %v9574_v32 = vld [vmem:[%s14363_s8 + $0x388] ss:$16 sps:$4 sm:$0xff]   ;;  %v9579_v39 = vld [vmem:[%s14363_s8 + $0x16c] ss:$16 sps:$4 sm:$0xff]   ;;  %v5212_v54 = vmax.f32 %v4873_v47, 0.0  ;;  %v5214_v59 = vmax.f32 %v5066_v10, 0.0 }
 0x59b   : > { %v4877_v15 = vadd.f32 %v4876_v7, %v14810_v44  ;;  %v5070_v22 = vadd.f32 %v5069_v29, %v14811_v18  ;;  %6206 = vmatprep.mubr.bf16.mxu0 %v13091_v61  ;;  %6399 = vmatprep.mubr.bf16.mxu1 %v13093_v51  ;;  %v5213_v14 = vmax.f32 %v4875_v57, 0.0  ;;  %v9577_v9 = vld [vmem:[%s14363_s8 + $0x168] ss:$16 sps:$4 sm:$0xff]   ;;  %v9582_v57 = vld [vmem:[%s14363_s8 + $0x36c] ss:$16 sps:$4 sm:$0xff]   ;;  %v14817_v18 = vld [vmem:[#allocation150_spill] sm:$0xff] }
 0x59c   : > { %v4878_v17 = vpop.f32.mrf.mxu0  ;;  %v5071_v13 = vpop.f32.mrf.mxu1  ;;  %6207 = vmatmul.mubr.bf16.gmra.mxu0 %v13101_v53  ;;  %6400 = vmatmul.mubr.bf16.gmra.mxu1 %v13103_v20  ;;  %v5215_v27 = vmax.f32 %v5068_v38, 0.0  ;;  %v9580_v44 = vld [vmem:[%s14363_s8 + $0x368] ss:$16 sps:$4 sm:$0xff]   ;;  %v14819_v47 = vld [vmem:[#allocation152_spill] sm:$0xff]  ;;  %v9588_v10 = vld [vmem:[%s14363_s8 + $0x34c] ss:$16 sps:$4 sm:$0xff]  }
 0x59d   : > { %v4879_v4 = vadd.f32 %v4878_v17, %v14814_v40  ;;  %v5072_v11 = vadd.f32 %v5071_v13, %v14815_v52  ;;  %6531 = vmatpush2.bf16.msra.mxu0 %v9565_v1  ;;  %v5216_v62 = vmax.f32 %v4877_v15, 0.0  ;;  %v5218_v0 = vmax.f32 %v5070_v22, 0.0  ;;  %6724 = vmatpush2.bf16.msra.mxu1 %v9568_v45  ;;  %v14816_v45 = vld [vmem:[#allocation149_spill] sm:$0xff]  ;;  %v14820_v17 = vld [vmem:[#allocation147_spill] sm:$0xff]  ;;  %v14821_v40 = vld [vmem:[#allocation148_spill] sm:$0xff] }
 0x59e   : > { %v4882_v5 = vpop.f32.mrf.mxu0  ;;  %v5075_v41 = vpop.f32.mrf.mxu1  ;;  %6532 = vmatprep.subr.bf16.mxu0 %v9573_v42  ;;  %6725 = vmatprep.subr.bf16.mxu1 %v9576_v21  ;;  %v9585_v15 = vld [vmem:[%s14363_s8 + $0x14c] ss:$16 sps:$4 sm:$0xff]  }
 0x59f   : > { %v5217_v50 = vmax.f32 %v4879_v4, 0.0  ;;  %v5219_v63 = vmax.f32 %v5072_v11, 0.0  ;;  %v13145_v7 = vpack.c.bf16 %v5216_v62, %v5212_v54  ;;  %v13147_v29 = vpack.c.bf16 %v5218_v0, %v5214_v59  ;;  %v14818_v21 = vld [vmem:[#allocation151_spill] sm:$0xff]  ;;  %v14823_v0 = vld [vmem:[#allocation154_spill] sm:$0xff] }
 0x5a0   : > { %v4884_v36 = vpop.f32.mrf.mxu0  ;;  %v5077_v23 = vpop.f32.mrf.mxu1  ;;  %v4883_v13 = vadd.f32 %v4882_v5, %v14820_v17  ;;  %v5076_v4 = vadd.f32 %v5075_v41, %v14821_v40  ;;  %v9597_v17 = vld [vmem:[%s14363_s8 + $0x10c] ss:$16 sps:$4 sm:$0xff]  }
 0x5a1   : > { %v13135_v1 = vpack.c.bf16 %v5217_v50, %v5213_v14  ;;  %v13137_v49 = vpack.c.bf16 %v5219_v63, %v5215_v27  ;;  %6533 = vmatpush2.bf16.msra.mxu0 %v9571_v31  ;;  %v4885_v42 = vadd.f32 %v4884_v36, %v14816_v45  ;;  %6726 = vmatpush2.bf16.msra.mxu1 %v9574_v32  ;;  %v14822_v31 = vld [vmem:[#allocation153_spill] sm:$0xff] }
 0x5a2   : > { %v4886_v2 = vpop.f32.mrf.mxu0  ;;  %v5079_v38 = vpop.f32.mrf.mxu1  ;;  %6534 = vmatprep.subr.bf16.mxu0 %v9579_v39  ;;  %v5078_v22 = vadd.f32 %v5077_v23, %v14817_v18  ;;  %6727 = vmatprep.subr.bf16.mxu1 %v9582_v57  ;;  %v9583_v39 = vld [vmem:[%s14363_s8 + $0x148] ss:$16 sps:$4 sm:$0xff]   ;;  %v9591_v63 = vld [vmem:[%s14363_s8 + $0x12c] ss:$16 sps:$4 sm:$0xff]   ;;  %v5222_v57 = vmax.f32 %v5076_v4, 0.0 }
 0x5a3   : > { %v4887_v6 = vadd.f32 %v4886_v2, %v14818_v21  ;;  %v5080_v37 = vadd.f32 %v5079_v38, %v14819_v47  ;;  %6216 = vmatprep.mubr.bf16.mxu0 %v13135_v1  ;;  %6409 = vmatprep.mubr.bf16.mxu1 %v13137_v49  ;;  %v9586_v50 = vld [vmem:[%s14363_s8 + $0x348] ss:$16 sps:$4 sm:$0xff]   ;;  %v5221_v54 = vmax.f32 %v4885_v42, 0.0  ;;  %v9594_v42 = vld [vmem:[%s14363_s8 + $0x32c] ss:$16 sps:$4 sm:$0xff]  }
 0x5a4   : > { %v4888_v52 = vpop.f32.mrf.mxu0  ;;  %v5081_v11 = vpop.f32.mrf.mxu1  ;;  %6217 = vmatmul.mubr.bf16.gmra.mxu0 %v13145_v7  ;;  %6410 = vmatmul.mubr.bf16.gmra.mxu1 %v13147_v29  ;;  %v5223_v59 = vmax.f32 %v5078_v22, 0.0  ;;  %v14824_v21 = vld [vmem:[#allocation157_spill] sm:$0xff]  ;;  %v14826_v4 = vld [vmem:[#allocation159_spill] sm:$0xff] }
 0x5a5   : > { %v4889_v62 = vadd.f32 %v4888_v52, %v14822_v31  ;;  %v5082_v32 = vadd.f32 %v5081_v11, %v14823_v0  ;;  %6535 = vmatpush2.bf16.msra.mxu0 %v9577_v9  ;;  %v5224_v14 = vmax.f32 %v4887_v6, 0.0  ;;  %v5226_v5 = vmax.f32 %v5080_v37, 0.0  ;;  %6728 = vmatpush2.bf16.msra.mxu1 %v9580_v44  ;;  %v14827_v11 = vld [vmem:[#allocation160_spill] sm:$0xff]  ;;  %v14828_v0 = vld [vmem:[#allocation155_spill] sm:$0xff] }
 0x5a6   : > { %v4892_v27 = vpop.f32.mrf.mxu0  ;;  %v5085_v41 = vpop.f32.mrf.mxu1  ;;  %6536 = vmatprep.subr.bf16.mxu0 %v9585_v15  ;;  %6729 = vmatprep.subr.bf16.mxu1 %v9588_v10  ;;  %v5220_v9 = vmax.f32 %v4883_v13, 0.0  ;;  %v9589_v15 = vld [vmem:[%s14363_s8 + $0x128] ss:$16 sps:$4 sm:$0xff]   ;;  %v14825_v13 = vld [vmem:[#allocation158_spill] sm:$0xff] }
 0x5a7   : > { %v5225_v36 = vmax.f32 %v4889_v62, 0.0  ;;  %v5227_v23 = vmax.f32 %v5082_v32, 0.0  ;;  %v13191_v22 = vpack.c.bf16 %v5226_v5, %v5222_v57  ;;  %v9592_v10 = vld [vmem:[%s14363_s8 + $0x328] ss:$16 sps:$4 sm:$0xff]   ;;  %v9600_v62 = vld [vmem:[%s14363_s8 + $0x30c] ss:$16 sps:$4 sm:$0xff]   ;;  %v4893_v32 = vadd.f32 %v4892_v27, %v14828_v0 }
 0x5a8   : > { %v4894_v45 = vpop.f32.mrf.mxu0  ;;  %v5087_v2 = vpop.f32.mrf.mxu1  ;;  %v13189_v18 = vpack.c.bf16 %v5224_v14, %v5220_v9 }
 0x5a9   : > { %v13179_v38 = vpack.c.bf16 %v5225_v36, %v5221_v54  ;;  %v13181_v44 = vpack.c.bf16 %v5227_v23, %v5223_v59  ;;  %6537 = vmatpush2.bf16.msra.mxu0 %v9583_v39  ;;  %v4895_v6 = vadd.f32 %v4894_v45, %v14824_v21  ;;  %6730 = vmatpush2.bf16.msra.mxu1 %v9586_v50  ;;  %v14829_v39 = vld [vmem:[#allocation156_spill] sm:$0xff]  ;;  %v14831_v59 = vld [vmem:[#allocation162_spill] sm:$0xff]  ;;  %v9595_v23 = vld [vmem:[%s14363_s8 + $0x108] ss:$16 sps:$4 sm:$0xff]  }
 0x5aa   : > { %v4896_v47 = vpop.f32.mrf.mxu0  ;;  %v5089_v37 = vpop.f32.mrf.mxu1  ;;  %6538 = vmatprep.subr.bf16.mxu0 %v9591_v63  ;;  %v5088_v40 = vadd.f32 %v5087_v2, %v14825_v13  ;;  %v5086_v14 = vadd.f32 %v5085_v41, %v14829_v39  ;;  %v14830_v63 = vld [vmem:[#allocation161_spill] sm:$0xff]  ;;  %6731 = vmatprep.subr.bf16.mxu1 %v9594_v42  ;;  %v14833_v39 = vld [vmem:[#allocation166_spill] sm:$0xff] }
 0x5ab   : > { %v4897_v52 = vadd.f32 %v4896_v47, %v14826_v4  ;;  %v5090_v31 = vadd.f32 %v5089_v37, %v14827_v11  ;;  %6226 = vmatprep.mubr.bf16.mxu0 %v13179_v38  ;;  %6419 = vmatprep.mubr.bf16.mxu1 %v13181_v44  ;;  %v9598_v45 = vld [vmem:[%s14363_s8 + $0x308] ss:$16 sps:$4 sm:$0xff]   ;;  %v5229_v2 = vmax.f32 %v4895_v6, 0.0 }
 0x5ac   : > { %v4898_v5 = vpop.f32.mrf.mxu0  ;;  %v5091_v50 = vpop.f32.mrf.mxu1  ;;  %6227 = vmatmul.mubr.bf16.gmra.mxu0 %v13189_v18  ;;  %6420 = vmatmul.mubr.bf16.gmra.mxu1 %v13191_v22  ;;  %v5231_v21 = vmax.f32 %v5088_v40, 0.0  ;;  %v5230_v42 = vmax.f32 %v5086_v14, 0.0 }
 0x5ad   : > { %v4899_v54 = vadd.f32 %v4898_v5, %v14830_v63  ;;  %v5092_v36 = vadd.f32 %v5091_v50, %v14831_v59  ;;  %6539 = vmatpush2.bf16.msra.mxu0 %v9589_v15  ;;  %v5232_v9 = vmax.f32 %v4897_v52, 0.0  ;;  %v5234_v27 = vmax.f32 %v5090_v31, 0.0  ;;  %6732 = vmatpush2.bf16.msra.mxu1 %v9592_v10  ;;  %v14832_v31 = vld [vmem:[#allocation165_spill] sm:$0xff]  ;;  %v14835_v5 = vld [vmem:[#allocation168_spill] sm:$0xff]  ;;  %v14836_v63 = vld [vmem:[#allocation163_spill] sm:$0xff] }
 0x5ae   : > { %v4902_v57 = vpop.f32.mrf.mxu0  ;;  %v5095_v41 = vpop.f32.mrf.mxu1  ;;  %6540 = vmatprep.subr.bf16.mxu0 %v9597_v17  ;;  %6733 = vmatprep.subr.bf16.mxu1 %v9600_v62  ;;  %v5228_v15 = vmax.f32 %v4893_v32, 0.0  ;;  %v14834_v32 = vld [vmem:[#allocation167_spill] sm:$0xff]  ;;  %v14837_v59 = vld [vmem:[#allocation164_spill] sm:$0xff] }
 0x5af   : > { %v5233_v47 = vmax.f32 %v4899_v54, 0.0  ;;  %v5235_v37 = vmax.f32 %v5092_v36, 0.0  ;;  %v13226_v17 = vpack.c.bf16 %v5234_v27, %v5230_v42  ;;  %v4903_v54 = vadd.f32 %v4902_v57, %v14836_v63  ;;  %v14838_v27 = vld [vmem:[#allocation169_spill] sm:$0xff] }
 0x5b0   : > { %v4904_v13 = vpop.f32.mrf.mxu0  ;;  %v5097_v4 = vpop.f32.mrf.mxu1  ;;  %v13224_v10 = vpack.c.bf16 %v5232_v9, %v5228_v15  ;;  %v5096_v36 = vadd.f32 %v5095_v41, %v14837_v59 }
 0x5b1   : > { %v13220_v11 = vpack.c.bf16 %v5233_v47, %v5229_v2  ;;  %v13222_v52 = vpack.c.bf16 %v5235_v37, %v5231_v21  ;;  %6541 = vmatpush2.bf16.msra.mxu0 %v9595_v23  ;;  %v4905_v0 = vadd.f32 %v4904_v13, %v14832_v31  ;;  %6734 = vmatpush2.bf16.msra.mxu1 %v9598_v45  ;;  %v14839_v2 = vld [vmem:[#allocation170_spill] sm:$0xff] }
 0x5b2   : > { %v4906_v6 = vpop.f32.mrf.mxu0  ;;  %v5099_v40 = vpop.f32.mrf.mxu1  ;;  %v5098_v62 = vadd.f32 %v5097_v4, %v14833_v39  ;;  %v5238_v41 = vmax.f32 %v5096_v36, 0.0 }
 0x5b3   : > { %v4907_v14 = vadd.f32 %v4906_v6, %v14834_v32  ;;  %v5100_v50 = vadd.f32 %v5099_v40, %v14835_v5  ;;  %6236 = vmatprep.mubr.bf16.mxu0 %v13220_v11  ;;  %6429 = vmatprep.mubr.bf16.mxu1 %v13222_v52  ;;  %v5237_v13 = vmax.f32 %v4905_v0, 0.0  ;;  %v5236_v6 = vmax.f32 %v4903_v54, 0.0  ;;  %v14844_v0 = vld [vmem:[#allocation174_spill] sm:$0xff]  ;;  %v14846_v54 = vld [vmem:[#allocation176_spill] sm:$0xff] }
 0x5b4   : > { %v4908_v23 = vpop.f32.mrf.mxu0  ;;  %v5101_v9 = vpop.f32.mrf.mxu1  ;;  %6237 = vmatmul.mubr.bf16.gmra.mxu0 %v13224_v10  ;;  %6430 = vmatmul.mubr.bf16.gmra.mxu1 %v13226_v17  ;;  %v5239_v4 = vmax.f32 %v5098_v62, 0.0 }
 0x5b5   : > { %v4909_v45 = vadd.f32 %v4908_v23, %v14838_v27  ;;  %v5102_v21 = vadd.f32 %v5101_v9, %v14839_v2  ;;  %v5240_v47 = vmax.f32 %v4907_v14, 0.0  ;;  %v5242_v37 = vmax.f32 %v5100_v50, 0.0  ;;  %v14843_v14 = vld [vmem:[#allocation173_spill] sm:$0xff]  ;;  %v14845_v27 = vld [vmem:[#allocation175_spill] sm:$0xff] }
 0x5b6   : > { %v4912_v15 = vpop.f32.mrf.mxu0  ;;  %v5105_v42 = vpop.f32.mrf.mxu1  ;;  %v14847_v2 = vld [vmem:[#allocation171_spill] sm:$0xff] }
 0x5b7   : > { %v5241_v31 = vmax.f32 %v4909_v45, 0.0  ;;  %v5243_v57 = vmax.f32 %v5102_v21, 0.0  ;;  %v13244_v63 = vpack.c.bf16 %v5240_v47, %v5236_v6  ;;  %v13246_v59 = vpack.c.bf16 %v5242_v37, %v5238_v41  ;;  %v14848_v47 = vld [vmem:[#allocation172_spill] sm:$0xff]  ;;  %v14850_v6 = vld [vmem:[#allocation178_spill] sm:$0xff] }
 0x5b8   : > { %v4914_v40 = vpop.f32.mrf.mxu0  ;;  %v5107_v39 = vpop.f32.mrf.mxu1  ;;  %v4913_v21 = vadd.f32 %v4912_v15, %v14847_v2 }
 0x5b9   : > { %v13240_v32 = vpack.c.bf16 %v5241_v31, %v5237_v13  ;;  %v13242_v5 = vpack.c.bf16 %v5243_v57, %v5239_v4  ;;  %14841 = vst [vmem:[#allocation33_spill] sm:$0xff] %v13244_v63  ;;  %14842 = vst [vmem:[#allocation34_spill] sm:$0xff] %v13246_v59  ;;  %v4915_v50 = vadd.f32 %v4914_v40, %v14843_v14  ;;  %v14849_v31 = vld [vmem:[#allocation177_spill] sm:$0xff] }
 0x5ba   : > { %v4916_v23 = vpop.f32.mrf.mxu0  ;;  %v5109_v9 = vpop.f32.mrf.mxu1  ;;  %v5108_v62 = vadd.f32 %v5107_v39, %v14844_v0  ;;  %v5106_v13 = vadd.f32 %v5105_v42, %v14848_v47 }
 0x5bb   : > { %14840 = vst [vmem:[#allocation28_spill] sm:$0xff] %v13242_v5  ;;  %v4917_v45 = vadd.f32 %v4916_v23, %v14845_v27  ;;  %v5110_v36 = vadd.f32 %v5109_v9, %v14846_v54  ;;  %6246 = vmatprep.mubr.bf16.mxu0 %v13240_v32  ;;  %6439 = vmatprep.mubr.bf16.mxu1 %v13242_v5  ;;  %v5245_v9 = vmax.f32 %v4915_v50, 0.0  ;;  %v5244_v54 = vmax.f32 %v4913_v21, 0.0  ;;  %v14856_v50 = vld [vmem:[#allocation182_spill] sm:$0xff]  ;;  %v14858_v21 = vld [vmem:[#allocation184_spill] sm:$0xff] }
 0x5bc   : > { %v4918_v37 = vpop.f32.mrf.mxu0  ;;  %v5111_v4 = vpop.f32.mrf.mxu1  ;;  %6247 = vmatmul.mubr.bf16.gmra.mxu0 %v13244_v63  ;;  %6440 = vmatmul.mubr.bf16.gmra.mxu1 %v13246_v59  ;;  %v5247_v0 = vmax.f32 %v5108_v62, 0.0  ;;  %v5246_v42 = vmax.f32 %v5106_v13, 0.0 }
 0x5bd   : > { %v4919_v57 = vadd.f32 %v4918_v37, %v14849_v31  ;;  %v5112_v41 = vadd.f32 %v5111_v4, %v14850_v6  ;;  %v5248_v40 = vmax.f32 %v4917_v45, 0.0  ;;  %v5250_v39 = vmax.f32 %v5110_v36, 0.0  ;;  %v14855_v45 = vld [vmem:[#allocation181_spill] sm:$0xff] }
 0x5be   : > { %v4922_v14 = vpop.f32.mrf.mxu0  ;;  %v5115_v23 = vpop.f32.mrf.mxu1 }
 0x5bf   : > { %v5249_v27 = vmax.f32 %v4919_v57, 0.0  ;;  %v5251_v15 = vmax.f32 %v5112_v41, 0.0  ;;  %v13264_v59 = vpack.c.bf16 %v5248_v40, %v5244_v54  ;;  %v13266_v37 = vpack.c.bf16 %v5250_v39, %v5246_v42  ;;  %v14857_v57 = vld [vmem:[#allocation183_spill] sm:$0xff]  ;;  %v14860_v40 = vld [vmem:[#allocation180_spill] sm:$0xff]  ;;  %v14862_v42 = vld [vmem:[#allocation186_spill] sm:$0xff] }
 0x5c0   : > { %v4924_v2 = vpop.f32.mrf.mxu0  ;;  %v5117_v47 = vpop.f32.mrf.mxu1  ;;  %v14859_v41 = vld [vmem:[#allocation179_spill] sm:$0xff] }
 0x5c1   : > { %v13260_v5 = vpack.c.bf16 %v5249_v27, %v5245_v9  ;;  %v13262_v63 = vpack.c.bf16 %v5251_v15, %v5247_v0  ;;  %14853 = vst [vmem:[#allocation39_spill] sm:$0xff] %v13264_v59  ;;  %14854 = vst [vmem:[#allocation40_spill] sm:$0xff] %v13266_v37  ;;  %v4925_v36 = vadd.f32 %v4924_v2, %v14855_v45  ;;  %v14861_v15 = vld [vmem:[#allocation185_spill] sm:$0xff] }
 0x5c2   : > { %v4926_v4 = vpop.f32.mrf.mxu0  ;;  %v5119_v31 = vpop.f32.mrf.mxu1  ;;  %v5118_v62 = vadd.f32 %v5117_v47, %v14856_v50  ;;  %v4923_v9 = vadd.f32 %v4922_v14, %v14859_v41  ;;  %v5116_v0 = vadd.f32 %v5115_v23, %v14860_v40  ;;  %v9601_v47 = vld [vmem:[%s14364_s9 + $0x78] sm:$0xff]  }
 0x5c3   : > { %14851 = vst [vmem:[#allocation37_spill] sm:$0xff] %v13260_v5  ;;  %14852 = vst [vmem:[#allocation38_spill] sm:$0xff] %v13262_v63  ;;  %v4927_v6 = vadd.f32 %v4926_v4, %v14857_v57  ;;  %v5120_v13 = vadd.f32 %v5119_v31, %v14858_v21  ;;  %6256 = vmatprep.mubr.bf16.mxu0 %v13260_v5  ;;  %6449 = vmatprep.mubr.bf16.mxu1 %v13262_v63  ;;  %v9602_v14 = vld [vmem:[%s14364_s9 + $0xf8] sm:$0xff]   ;;  %v5253_v50 = vmax.f32 %v4925_v36, 0.0 }
 0x5c4   : > { %v4928_v39 = vpop.f32.mrf.mxu0  ;;  %v5121_v27 = vpop.f32.mrf.mxu1  ;;  %6257 = vmatmul.mubr.bf16.gmra.mxu0 %v13264_v59  ;;  %6450 = vmatmul.mubr.bf16.gmra.mxu1 %v13266_v37  ;;  %v5255_v57 = vmax.f32 %v5118_v62, 0.0  ;;  %v5252_v40 = vmax.f32 %v4923_v9, 0.0  ;;  %v14870_v9 = vld [vmem:[#allocation192_spill] sm:$0xff] }
 0x5c5   : > { %v4929_v54 = vadd.f32 %v4928_v39, %v14861_v15  ;;  %v5122_v2 = vadd.f32 %v5121_v27, %v14862_v42  ;;  %v5256_v45 = vmax.f32 %v4927_v6, 0.0  ;;  %v5258_v23 = vmax.f32 %v5120_v13, 0.0  ;;  %8881 = vmatprep.subr.bf16.mxu0 %v9601_v47  ;;  %8993 = vmatprep.subr.bf16.mxu1 %v9602_v14  ;;  %v14867_v13 = vld [vmem:[#allocation189_spill] sm:$0xff]  ;;  %v14869_v47 = vld [vmem:[#allocation191_spill] sm:$0xff] }
 0x5c6   : > { %v4932_v4 = vpop.f32.mrf.mxu0  ;;  %v5125_v31 = vpop.f32.mrf.mxu1  ;;  %v5254_v39 = vmax.f32 %v5116_v0, 0.0 }
 0x5c7   : > { %v5257_v21 = vmax.f32 %v4929_v54, 0.0  ;;  %v5259_v41 = vmax.f32 %v5122_v2, 0.0  ;;  %v13290_v59 = vpack.c.bf16 %v5256_v45, %v5252_v40  ;;  %v14868_v54 = vld [vmem:[#allocation190_spill] sm:$0xff]  ;;  %v14872_v45 = vld [vmem:[#allocation188_spill] sm:$0xff]  ;;  %v14873_v40 = vld [vmem:[#allocation193_spill] sm:$0xff] }
 0x5c8   : > { %v4934_v27 = vpop.f32.mrf.mxu0  ;;  %v5127_v15 = vpop.f32.mrf.mxu1  ;;  %v13292_v6 = vpack.c.bf16 %v5258_v23, %v5254_v39 }
 0x5c9   : > { %v13286_v42 = vpack.c.bf16 %v5257_v21, %v5253_v50  ;;  %v13288_v37 = vpack.c.bf16 %v5259_v41, %v5255_v57  ;;  %14865 = vst [vmem:[#allocation41_spill] sm:$0xff] %v13290_v59  ;;  %v4935_v63 = vadd.f32 %v4934_v27, %v14867_v13  ;;  %v5128_v2 = vadd.f32 %v5127_v15, %v14868_v54  ;;  %v14871_v50 = vld [vmem:[#allocation187_spill] sm:$0xff]  ;;  %v14874_v27 = vld [vmem:[#allocation194_spill] sm:$0xff] }
 0x5ca   : > { %14866 = vst [vmem:[#allocation42_spill] sm:$0xff] %v13292_v6  ;;  %v4936_v36 = vpop.f32.mrf.mxu0  ;;  %v5129_v62 = vpop.f32.mrf.mxu1  ;;  %v4933_v57 = vadd.f32 %v4932_v4, %v14871_v50  ;;  %v5126_v21 = vadd.f32 %v5125_v31, %v14872_v45 }
 0x5cb   : > { %14863 = vst [vmem:[#allocation35_spill] sm:$0xff] %v13286_v42  ;;  %14864 = vst [vmem:[#allocation36_spill] sm:$0xff] %v13288_v37  ;;  %v4937_v14 = vadd.f32 %v4936_v36, %v14869_v47  ;;  %v5130_v0 = vadd.f32 %v5129_v62, %v14870_v9  ;;  %6266 = vmatprep.mubr.bf16.mxu0 %v13286_v42  ;;  %6459 = vmatprep.mubr.bf16.mxu1 %v13288_v37  ;;  %v5261_v47 = vmax.f32 %v4935_v63, 0.0  ;;  %v14880_v63 = vld [vmem:[#allocation198_spill] sm:$0xff] }
 0x5cc   : > { %v4938_v23 = vpop.f32.mrf.mxu0  ;;  %v5131_v41 = vpop.f32.mrf.mxu1  ;;  %6267 = vmatmul.mubr.bf16.gmra.mxu0 %v13290_v59  ;;  %6460 = vmatmul.mubr.bf16.gmra.mxu1 %v13292_v6  ;;  %v5263_v9 = vmax.f32 %v5128_v2, 0.0  ;;  %v5260_v50 = vmax.f32 %v4933_v57, 0.0  ;;  %v5262_v31 = vmax.f32 %v5126_v21, 0.0  ;;  %v14882_v57 = vld [vmem:[#allocation200_spill] sm:$0xff] }
 0x5cd   : > { %v4939_v39 = vadd.f32 %v4938_v23, %v14873_v40  ;;  %v5132_v15 = vadd.f32 %v5131_v41, %v14874_v27  ;;  %v5264_v13 = vmax.f32 %v4937_v14, 0.0  ;;  %v5266_v36 = vmax.f32 %v5130_v0, 0.0  ;;  %v14879_v14 = vld [vmem:[#allocation197_spill] sm:$0xff] }
 0x5ce   : > { %v4942_v62 = vpop.f32.mrf.mxu0  ;;  %v5135_v54 = vpop.f32.mrf.mxu1 }
 0x5cf   : > { %v5265_v37 = vmax.f32 %v4939_v39, 0.0  ;;  %v5267_v4 = vmax.f32 %v5132_v15, 0.0  ;;  %v13310_v6 = vpack.c.bf16 %v5264_v13, %v5260_v50  ;;  %v13312_v23 = vpack.c.bf16 %v5266_v36, %v5262_v31  ;;  %v14881_v39 = vld [vmem:[#allocation199_spill] sm:$0xff]  ;;  %v14884_v13 = vld [vmem:[#allocation196_spill] sm:$0xff]  ;;  %v14886_v50 = vld [vmem:[#allocation202_spill] sm:$0xff] }
 0x5d0   : > { %v4944_v45 = vpop.f32.mrf.mxu0  ;;  %v5137_v42 = vpop.f32.mrf.mxu1 }
 0x5d1   : > { %v13306_v5 = vpack.c.bf16 %v5265_v37, %v5261_v47  ;;  %v13308_v59 = vpack.c.bf16 %v5267_v4, %v5263_v9  ;;  %14877 = vst [vmem:[#allocation47_spill] sm:$0xff] %v13310_v6  ;;  %14878 = vst [vmem:[#allocation48_spill] sm:$0xff] %v13312_v23  ;;  %v4945_v0 = vadd.f32 %v4944_v45, %v14879_v14  ;;  %v14883_v37 = vld [vmem:[#allocation195_spill] sm:$0xff]  ;;  %v14885_v4 = vld [vmem:[#allocation201_spill] sm:$0xff] }
 0x5d2   : > { %v4946_v41 = vpop.f32.mrf.mxu0  ;;  %v5139_v40 = vpop.f32.mrf.mxu1  ;;  %v5138_v2 = vadd.f32 %v5137_v42, %v14880_v63  ;;  %v4943_v15 = vadd.f32 %v4942_v62, %v14883_v37  ;;  %v5136_v47 = vadd.f32 %v5135_v54, %v14884_v13 }
 0x5d3   : > { %14875 = vst [vmem:[#allocation45_spill] sm:$0xff] %v13306_v5  ;;  %14876 = vst [vmem:[#allocation46_spill] sm:$0xff] %v13308_v59  ;;  %v4947_v27 = vadd.f32 %v4946_v41, %v14881_v39  ;;  %v5140_v21 = vadd.f32 %v5139_v40, %v14882_v57  ;;  %6276 = vmatprep.mubr.bf16.mxu0 %v13306_v5  ;;  %6469 = vmatprep.mubr.bf16.mxu1 %v13308_v59  ;;  %v5269_v63 = vmax.f32 %v4945_v0, 0.0  ;;  %v14892_v0 = vld [vmem:[#allocation206_spill] sm:$0xff] }
 0x5d4   : > { %v4948_v36 = vpop.f32.mrf.mxu0  ;;  %v5141_v9 = vpop.f32.mrf.mxu1  ;;  %6277 = vmatmul.mubr.bf16.gmra.mxu0 %v13310_v6  ;;  %6470 = vmatmul.mubr.bf16.gmra.mxu1 %v13312_v23  ;;  %v5271_v39 = vmax.f32 %v5138_v2, 0.0  ;;  %v5268_v37 = vmax.f32 %v4943_v15, 0.0  ;;  %v5270_v54 = vmax.f32 %v5136_v47, 0.0  ;;  %v14894_v15 = vld [vmem:[#allocation208_spill] sm:$0xff] }
 0x5d5   : > { %v4949_v42 = vadd.f32 %v4948_v36, %v14885_v4  ;;  %v5142_v31 = vadd.f32 %v5141_v9, %v14886_v50  ;;  %v5272_v45 = vmax.f32 %v4947_v27, 0.0  ;;  %v5274_v14 = vmax.f32 %v5140_v21, 0.0  ;;  %v14891_v27 = vld [vmem:[#allocation205_spill] sm:$0xff] }
 0x5d6   : > { %v4952_v41 = vpop.f32.mrf.mxu0  ;;  %v5145_v40 = vpop.f32.mrf.mxu1 }
 0x5d7   : > { %v5273_v57 = vmax.f32 %v4949_v42, 0.0  ;;  %v5275_v62 = vmax.f32 %v5142_v31, 0.0  ;;  %v13330_v23 = vpack.c.bf16 %v5272_v45, %v5268_v37  ;;  %v13332_v36 = vpack.c.bf16 %v5274_v14, %v5270_v54  ;;  %v14893_v42 = vld [vmem:[#allocation207_spill] sm:$0xff]  ;;  %v14896_v45 = vld [vmem:[#allocation204_spill] sm:$0xff]  ;;  %v14898_v37 = vld [vmem:[#allocation210_spill] sm:$0xff] }
 0x5d8   : > { %v4954_v13 = vpop.f32.mrf.mxu0  ;;  %v5147_v59 = vpop.f32.mrf.mxu1  ;;  %v14895_v31 = vld [vmem:[#allocation203_spill] sm:$0xff] }
 0x5d9   : > { %v13326_v5 = vpack.c.bf16 %v5273_v57, %v5269_v63  ;;  %v13328_v6 = vpack.c.bf16 %v5275_v62, %v5271_v39  ;;  %14889 = vst [vmem:[#allocation49_spill] sm:$0xff] %v13330_v23  ;;  %14890 = vst [vmem:[#allocation50_spill] sm:$0xff] %v13332_v36  ;;  %v4955_v21 = vadd.f32 %v4954_v13, %v14891_v27  ;;  %v14897_v62 = vld [vmem:[#allocation209_spill] sm:$0xff] }
 0x5da   : > { %v4956_v9 = vpop.f32.mrf.mxu0  ;;  %v5149_v4 = vpop.f32.mrf.mxu1  ;;  %v5148_v2 = vadd.f32 %v5147_v59, %v14892_v0  ;;  %v4953_v63 = vadd.f32 %v4952_v41, %v14895_v31  ;;  %v5146_v39 = vadd.f32 %v5145_v40, %v14896_v45 }
 0x5db   : > { %14887 = vst [vmem:[#allocation43_spill] sm:$0xff] %v13326_v5  ;;  %14888 = vst [vmem:[#allocation44_spill] sm:$0xff] %v13328_v6  ;;  %v4957_v50 = vadd.f32 %v4956_v9, %v14893_v42  ;;  %v5150_v47 = vadd.f32 %v5149_v4, %v14894_v15  ;;  %6286 = vmatprep.mubr.bf16.mxu0 %v13326_v5  ;;  %6479 = vmatprep.mubr.bf16.mxu1 %v13328_v6  ;;  %v5277_v0 = vmax.f32 %v4955_v21, 0.0  ;;  %v14901_v21 = vld [vmem:[#allocation214_spill] sm:$0xff] }
 0x5dc   : > { %v4958_v14 = vpop.f32.mrf.mxu0  ;;  %v5151_v57 = vpop.f32.mrf.mxu1  ;;  %6287 = vmatmul.mubr.bf16.gmra.mxu0 %v13330_v23  ;;  %6480 = vmatmul.mubr.bf16.gmra.mxu1 %v13332_v36  ;;  %v5279_v42 = vmax.f32 %v5148_v2, 0.0  ;;  %v5276_v31 = vmax.f32 %v4953_v63, 0.0  ;;  %v5278_v40 = vmax.f32 %v5146_v39, 0.0  ;;  %v14903_v63 = vld [vmem:[#allocation216_spill] sm:$0xff] }
 0x5dd   : > { %v4959_v59 = vadd.f32 %v4958_v14, %v14897_v62  ;;  %v5152_v54 = vadd.f32 %v5151_v57, %v14898_v37  ;;  %v5280_v13 = vmax.f32 %v4957_v50, 0.0  ;;  %v5282_v27 = vmax.f32 %v5150_v47, 0.0  ;;  %v14900_v50 = vld [vmem:[#allocation213_spill] sm:$0xff] }
 0x5de   : > { %v4962_v9 = vpop.f32.mrf.mxu0  ;;  %v5155_v4 = vpop.f32.mrf.mxu1 }
 0x5df   : > { %v5281_v15 = vmax.f32 %v4959_v59, 0.0  ;;  %v5283_v41 = vmax.f32 %v5152_v54, 0.0  ;;  %v13350_v36 = vpack.c.bf16 %v5280_v13, %v5276_v31  ;;  %v13352_v14 = vpack.c.bf16 %v5282_v27, %v5278_v40  ;;  %v14902_v59 = vld [vmem:[#allocation215_spill] sm:$0xff]  ;;  %v14905_v13 = vld [vmem:[#allocation212_spill] sm:$0xff]  ;;  %v14907_v31 = vld [vmem:[#allocation218_spill] sm:$0xff] }
 0x5e0   : > { %v4964_v45 = vpop.f32.mrf.mxu0  ;;  %v5157_v6 = vpop.f32.mrf.mxu1  ;;  %v14904_v54 = vld [vmem:[#allocation211_spill] sm:$0xff] }
 0x5e1   : > { %v13346_v5 = vpack.c.bf16 %v5281_v15, %v5277_v0  ;;  %v13348_v23 = vpack.c.bf16 %v5283_v41, %v5279_v42  ;;  %14899 = vst [vmem:[#allocation53_spill] sm:$0xff] %v13350_v36  ;;  %v4965_v47 = vadd.f32 %v4964_v45, %v14900_v50  ;;  %v5158_v2 = vadd.f32 %v5157_v6, %v14901_v21  ;;  %v14906_v41 = vld [vmem:[#allocation217_spill] sm:$0xff] }
 0x5e2   : > { %v4966_v57 = vpop.f32.mrf.mxu0  ;;  %v5159_v62 = vpop.f32.mrf.mxu1  ;;  %v4963_v0 = vadd.f32 %v4962_v9, %v14904_v54  ;;  %v5156_v42 = vadd.f32 %v5155_v4, %v14905_v13 }
 0x5e3   : > { %v4967_v37 = vadd.f32 %v4966_v57, %v14902_v59  ;;  %v5160_v39 = vadd.f32 %v5159_v62, %v14903_v63  ;;  %6296 = vmatprep.mubr.bf16.mxu0 %v13346_v5  ;;  %6489 = vmatprep.mubr.bf16.mxu1 %v13348_v23  ;;  %v5285_v57 = vmax.f32 %v4965_v47, 0.0  ;;  %v5287_v62 = vmax.f32 %v5158_v2, 0.0  ;;  %v9603_v47 = vld [vmem:[%s14364_s9 + $0x38] sm:$0xff]  }
 0x5e4   : > { %v4968_v27 = vpop.f32.mrf.mxu0  ;;  %v5161_v15 = vpop.f32.mrf.mxu1  ;;  %6297 = vmatmul.mubr.bf16.gmra.mxu0 %v13350_v36  ;;  %6490 = vmatmul.mubr.bf16.gmra.mxu1 %v13352_v14  ;;  %v5284_v63 = vmax.f32 %v4963_v0, 0.0  ;;  %v5286_v9 = vmax.f32 %v5156_v42, 0.0  ;;  %v9604_v2 = vld [vmem:[%s14364_s9 + $0xb8] sm:$0xff]   ;;  %v9611_v0 = vld [vmem:[%s14364_s9 + $0x60] sm:$0xff]  }
 0x5e5   : > { %v4969_v6 = vadd.f32 %v4968_v27, %v14906_v41  ;;  %v5162_v40 = vadd.f32 %v5161_v15, %v14907_v31  ;;  %v5288_v45 = vmax.f32 %v4967_v37, 0.0  ;;  %v5290_v50 = vmax.f32 %v5160_v39, 0.0  ;;  %v9605_v37 = vld [vmem:[%s14364_s9 + $0x70] sm:$0xff]   ;;  %v9623_v42 = vld [vmem:[%s14364_s9 + $0xe0] sm:$0xff]   ;;  %v9626_v41 = vld [vmem:[%s14364_s9 + $0x98] sm:$0xff]  }
 0x5e6   : > { %v9606_v39 = vld [vmem:[%s14364_s9 + $0xf0] sm:$0xff]   ;;  %v9612_v27 = vld [vmem:[%s14364_s9 + $0x20] sm:$0xff]  }
 0x5e7   : > { %v5289_v21 = vmax.f32 %v4969_v6, 0.0  ;;  %v5291_v59 = vmax.f32 %v5162_v40, 0.0  ;;  %v13370_v13 = vpack.c.bf16 %v5288_v45, %v5284_v63  ;;  %v13372_v36 = vpack.c.bf16 %v5290_v50, %v5286_v9  ;;  %v9624_v15 = vld [vmem:[%s14364_s9 + $0xa0] sm:$0xff]   ;;  %v9618_v6 = vld [vmem:[%s14364_s9 + $0x10] sm:$0xff]   ;;  %v14915_v63 = vld [vmem:[#allocation35_spill] sm:$0xff] }
 0x5e8   : > { %v14916_v9 = vld [vmem:[#allocation36_spill] sm:$0xff] }
 0x5e9   : > { %v13366_v54 = vpack.c.bf16 %v5289_v21, %v5285_v57  ;;  %v13368_v4 = vpack.c.bf16 %v5291_v59, %v5287_v62  ;;  %v14913_v21 = vld [vmem:[#allocation39_spill] sm:$0xff]  ;;  %v14914_v59 = vld [vmem:[#allocation40_spill] sm:$0xff] }
 0x5eb   : > { %6306 = vmatprep.mubr.bf16.mxu0 %v13366_v54  ;;  %6499 = vmatprep.mubr.bf16.mxu1 %v13368_v4 }
 0x5ec   : > { %6307 = vmatmul.mubr.bf16.gmra.mxu0 %v13370_v13  ;;  %6500 = vmatmul.mubr.bf16.gmra.mxu1 %v13372_v36 }
 0x5ed   : > { %6542 = vmatprep.mubr.bf16.mxu0 %v12874_v34  ;;  %6735 = vmatprep.mubr.bf16.mxu1 %v12876_v55  ;;  %v9607_v34 = vld [vmem:[%s14364_s9 + $0x30] sm:$0xff]  }
 0x5ee   : > { %v9608_v55 = vld [vmem:[%s14364_s9 + $0xb0] sm:$0xff]  }
 0x5f4   : > { %6543 = vmatmul.mubr.bf16.vlgmr.msra.gmra.mxu0 %v12884_v28  ;;  %6736 = vmatmul.mubr.bf16.vlgmr.msra.gmra.mxu1 %v12886_v43  ;;  %v9609_v28 = vld [vmem:[%s14364_s9 + $0x68] sm:$0xff]  }
 0x5f5   : > { %6552 = vmatprep.mubr.bf16.mxu0 %v12915_v56  ;;  %6745 = vmatprep.mubr.bf16.mxu1 %v12917_v30  ;;  %v9613_v43 = vld [vmem:[%s14364_s9 + $0xe8] sm:$0xff]  }
 0x5f6   : > { %8882 = vmatpush3.bf16.msra.mxu0 %v9603_v47  ;;  %8994 = vmatpush3.bf16.msra.mxu1 %v9604_v2  ;;  %v9610_v56 = vld [vmem:[%s14364_s9 + $0x28] sm:$0xff]  }
 0x5f7   : > { %8883 = vmatprep.subr.bf16.mxu0 %v9605_v37  ;;  %8995 = vmatprep.subr.bf16.mxu1 %v9606_v39  ;;  %v9614_v30 = vld [vmem:[%s14364_s9 + $0xa8] sm:$0xff]  }
 0x5fa   : > { %8884 = vmatpush3.bf16.msra.mxu0 %v9607_v34  ;;  %8996 = vmatpush3.bf16.msra.mxu1 %v9608_v55 }
 0x5fb   : > { %8885 = vmatprep.subr.bf16.mxu0 %v9609_v28  ;;  %8997 = vmatprep.subr.bf16.mxu1 %v9613_v43 }
 0x5fc   : > { %6553 = vmatmul.mubr.bf16.gmra.mxu0 %v12925_v46  ;;  %6746 = vmatmul.mubr.bf16.gmra.mxu1 %v12927_v25  ;;  %v9615_v46 = vld [vmem:[%s14364_s9 + $0x58] sm:$0xff]  }
 0x5fd   : > { %6562 = vmatprep.mubr.bf16.mxu0 %v12959_v33  ;;  %6755 = vmatprep.mubr.bf16.mxu1 %v12961_v19  ;;  %v9616_v25 = vld [vmem:[%s14364_s9 + $0x18] sm:$0xff]   ;;  %v9617_v33 = vld [vmem:[%s14364_s9 + $0x50] sm:$0xff]  }
 0x5fe   : > { %8886 = vmatpush3.bf16.msra.mxu0 %v9610_v56  ;;  %8998 = vmatpush3.bf16.msra.mxu1 %v9614_v30  ;;  %v9625_v19 = vld [vmem:[%s14364_s9 + $0xd8] sm:$0xff]   ;;  %v14918_v30 = vld [vmem:[#allocation42_spill] sm:$0xff] }
 0x5ff   : > { %8887 = vmatprep.subr.bf16.mxu0 %v9611_v0  ;;  %8999 = vmatprep.subr.bf16.mxu1 %v9623_v42  ;;  %v14917_v56 = vld [vmem:[#allocation41_spill] sm:$0xff]  ;;  %v14920_v42 = vld [vmem:[#allocation46_spill] sm:$0xff] }
 0x600   : > { %v14919_v0 = vld [vmem:[#allocation45_spill] sm:$0xff] }
 0x602   : > { %8888 = vmatpush3.bf16.msra.mxu0 %v9612_v27  ;;  %9000 = vmatpush3.bf16.msra.mxu1 %v9624_v15 }
 0x603   : > { %8889 = vmatprep.subr.bf16.mxu0 %v9615_v46  ;;  %9001 = vmatprep.subr.bf16.mxu1 %v9625_v19 }
 0x604   : > { %6563 = vmatmul.mubr.bf16.gmra.mxu0 %v12969_v16  ;;  %6756 = vmatmul.mubr.bf16.gmra.mxu1 %v12971_v48  ;;  %v9619_v16 = vld [vmem:[%s14364_s9 + $0x48] sm:$0xff]  }
 0x605   : > { %6572 = vmatprep.mubr.bf16.mxu0 %v13003_v8  ;;  %6765 = vmatprep.mubr.bf16.mxu1 %v13005_v26  ;;  %v9620_v48 = vld [vmem:[%s14364_s9 + $0x8] sm:$0xff]   ;;  %v9621_v8 = vld [vmem:[%s14364_s9 + $0x40] sm:$0xff]  }
 0x606   : > { %8890 = vmatpush3.bf16.msra.mxu0 %v9616_v25  ;;  %9002 = vmatpush3.bf16.msra.mxu1 %v9626_v41  ;;  %v9622_v26 = vld [vmem:[%s14364_s9] sm:$0xff]  }
 0x607   : > { %8891 = vmatprep.subr.bf16.mxu0 %v9617_v33 }
 0x60a   : > { %8892 = vmatpush3.bf16.msra.mxu0 %v9618_v6 }
 0x60b   : > { %8893 = vmatprep.subr.bf16.mxu0 %v9619_v16  ;;  %v14921_v16 = vld [vmem:[#allocation47_spill] sm:$0xff] }
 0x60c   : > { %6573 = vmatmul.mubr.bf16.gmra.mxu0 %v13013_v24  ;;  %6766 = vmatmul.mubr.bf16.gmra.mxu1 %v13015_v12  ;;  %v9627_v24 = vld [vmem:[%s14364_s9 + $0xd0] sm:$0xff]  }
 0x60d   : > { %6582 = vmatprep.mubr.bf16.mxu0 %v13047_v58  ;;  %6775 = vmatprep.mubr.bf16.mxu1 %v13049_v35  ;;  %v9628_v12 = vld [vmem:[%s14364_s9 + $0x90] sm:$0xff]   ;;  %v9629_v58 = vld [vmem:[%s14364_s9 + $0xc8] sm:$0xff]  }
 0x60e   : > { %8894 = vmatpush3.bf16.msra.mxu0 %v9620_v48  ;;  %9003 = vmatprep.subr.bf16.mxu1 %v9627_v24  ;;  %v9630_v35 = vld [vmem:[%s14364_s9 + $0x88] sm:$0xff]   ;;  %v14922_v48 = vld [vmem:[#allocation48_spill] sm:$0xff] }
 0x60f   : > { %8895 = vmatprep.subr.bf16.mxu0 %v9621_v8  ;;  %9004 = vmatpush3.bf16.msra.mxu1 %v9628_v12  ;;  %v14923_v8 = vld [vmem:[#allocation43_spill] sm:$0xff] }
 0x610   : > { %9005 = vmatprep.subr.bf16.mxu1 %v9629_v58 }
 0x612   : > { %8896 = vmatpush3.bf16.msra.mxu0 %v9622_v26  ;;  %v14924_v26 = vld [vmem:[#allocation44_spill] sm:$0xff] }
 0x613   : > { %9006 = vmatpush3.bf16.msra.mxu1 %v9630_v35 }
 0x614   : > { %6583 = vmatmul.mubr.bf16.gmra.mxu0 %v13057_v60  ;;  %6776 = vmatmul.mubr.bf16.gmra.mxu1 %v13059_v3 }
 0x615   : > { %6592 = vmatprep.mubr.bf16.mxu0 %v13091_v61  ;;  %6785 = vmatprep.mubr.bf16.mxu1 %v13093_v51  ;;  %v14908_v61 = vld [vmem:[#allocation28_spill] sm:$0xff]  ;;  %v9631_v51 = vld [vmem:[%s14364_s9 + $0xc0] sm:$0xff]  }
 0x616   : > { %9007 = vmatprep.subr.bf16.mxu1 %v9631_v51 }
 0x61c   : > { %6593 = vmatmul.mubr.bf16.gmra.mxu0 %v13101_v53  ;;  %6786 = vmatmul.mubr.bf16.gmra.mxu1 %v13103_v20  ;;  %v9632_v53 = vld [vmem:[%s14364_s9 + $0x80] sm:$0xff]  }
 0x61d   : > { %6602 = vmatprep.mubr.bf16.mxu0 %v13135_v1  ;;  %6795 = vmatprep.mubr.bf16.mxu1 %v13137_v49 }
 0x61e   : > { %9008 = vmatpush3.bf16.msra.mxu1 %v9632_v53 }
 0x624   : > { %6603 = vmatmul.mubr.bf16.gmra.mxu0 %v13145_v7  ;;  %6796 = vmatmul.mubr.bf16.gmra.mxu1 %v13147_v29 }
 0x625   : > { %6612 = vmatprep.mubr.bf16.mxu0 %v13179_v38  ;;  %6805 = vmatprep.mubr.bf16.mxu1 %v13181_v44 }
 0x62c   : > { %6613 = vmatmul.mubr.bf16.gmra.mxu0 %v13189_v18  ;;  %6806 = vmatmul.mubr.bf16.gmra.mxu1 %v13191_v22  ;;  %v14909_v22 = vld [vmem:[#allocation33_spill] sm:$0xff] }
 0x62d   : > { %6622 = vmatprep.mubr.bf16.mxu0 %v13220_v11  ;;  %6815 = vmatprep.mubr.bf16.mxu1 %v13222_v52  ;;  %v14910_v11 = vld [vmem:[#allocation34_spill] sm:$0xff]  ;;  %v14911_v52 = vld [vmem:[#allocation37_spill] sm:$0xff] }
 0x634   : > { %v13496_v60 = vpop.f32.mrf.mxu0  ;;  %v13498_v3 = vpop.f32.mrf.mxu1  ;;  %6623 = vmatmul.mubr.bf16.gmra.mxu0 %v13224_v10  ;;  %6816 = vmatmul.mubr.bf16.gmra.mxu1 %v13226_v17  ;;  %v14912_v10 = vld [vmem:[#allocation38_spill] sm:$0xff] }
 0x635   : > { %6632 = vmatprep.mubr.bf16.mxu0 %v13240_v32  ;;  %6825 = vmatprep.mubr.bf16.mxu1 %v14908_v61 }
 0x636   : > { %v13510_v20 = vpop.f32.mrf.mxu0  ;;  %v13512_v1 = vpop.f32.mrf.mxu1 }
 0x638   : > { %v13514_v49 = vpop.f32.mrf.mxu0  ;;  %v13516_v7 = vpop.f32.mrf.mxu1 }
 0x63a   : > { %v6164_v29 = vpop.f32.mrf.mxu0  ;;  %v6357_v38 = vpop.f32.mrf.mxu1 }
 0x63c   : > { %v13518_v44 = vpop.f32.mrf.mxu0  ;;  %v13520_v18 = vpop.f32.mrf.mxu1  ;;  %6633 = vmatmul.mubr.bf16.gmra.mxu0 %v14909_v22  ;;  %6826 = vmatmul.mubr.bf16.gmra.mxu1 %v14910_v11  ;;  %v14925_v11 = vld [vmem:[#allocation49_spill] sm:$0xff] }
 0x63d   : > { %6642 = vmatprep.mubr.bf16.mxu0 %v14911_v52  ;;  %6835 = vmatprep.mubr.bf16.mxu1 %v14912_v10  ;;  %v14926_v52 = vld [vmem:[#allocation50_spill] sm:$0xff] }
 0x63e   : > { %v13526_v17 = vpop.f32.mrf.mxu0  ;;  %v13528_v32 = vpop.f32.mrf.mxu1 }
 0x640   : > { %v13530_v31 = vpop.f32.mrf.mxu0  ;;  %v13532_v40 = vpop.f32.mrf.mxu1 }
 0x642   : > { %v13534_v45 = vpop.f32.mrf.mxu0  ;;  %v13536_v50 = vpop.f32.mrf.mxu1 }
 0x644   : > { %v13538_v57 = vpop.f32.mrf.mxu0  ;;  %v13540_v62 = vpop.f32.mrf.mxu1  ;;  %6643 = vmatmul.mubr.bf16.gmra.mxu0 %v14913_v21  ;;  %6836 = vmatmul.mubr.bf16.gmra.mxu1 %v14914_v59 }
 0x645   : > { %6652 = vmatprep.mubr.bf16.mxu0 %v14915_v63  ;;  %6845 = vmatprep.mubr.bf16.mxu1 %v14916_v9 }
 0x646   : > { %v13546_v47 = vpop.f32.mrf.mxu0  ;;  %v13548_v2 = vpop.f32.mrf.mxu1 }
 0x648   : > { %v13550_v37 = vpop.f32.mrf.mxu0  ;;  %v13552_v39 = vpop.f32.mrf.mxu1 }
 0x64a   : > { %v13554_v34 = vpop.f32.mrf.mxu0  ;;  %v13556_v55 = vpop.f32.mrf.mxu1 }
 0x64c   : > { %v13558_v28 = vpop.f32.mrf.mxu0  ;;  %v13560_v43 = vpop.f32.mrf.mxu1  ;;  %6653 = vmatmul.mubr.bf16.gmra.mxu0 %v14917_v56  ;;  %6846 = vmatmul.mubr.bf16.gmra.mxu1 %v14918_v30  ;;  %v6358_v30 = vadd.f32 %v6357_v38, %v6164_v29 }
 0x64d   : > { %6662 = vmatprep.mubr.bf16.mxu0 %v14919_v0  ;;  %6855 = vmatprep.mubr.bf16.mxu1 %v14920_v42 }
 0x64e   : > { %v13566_v27 = vpop.f32.mrf.mxu0  ;;  %v13568_v15 = vpop.f32.mrf.mxu1  ;;  %v6901_v29 = vmax.f32 %v6358_v30, 0.0 }
 0x650   : > { %v13570_v46 = vpop.f32.mrf.mxu0  ;;  %v13572_v25 = vpop.f32.mrf.mxu1 }
 0x652   : > { %v13574_v33 = vpop.f32.mrf.mxu0  ;;  %v13576_v19 = vpop.f32.mrf.mxu1 }
 0x654   : > { %v13578_v41 = vpop.f32.mrf.mxu0  ;;  %v13580_v6 = vpop.f32.mrf.mxu1  ;;  %6663 = vmatmul.mubr.bf16.gmra.mxu0 %v14921_v16  ;;  %6856 = vmatmul.mubr.bf16.gmra.mxu1 %v14922_v48 }
 0x655   : > { %6672 = vmatprep.mubr.bf16.mxu0 %v14923_v8  ;;  %6865 = vmatprep.mubr.bf16.mxu1 %v14924_v26 }
 0x656   : > { %v13586_v24 = vpop.f32.mrf.mxu0  ;;  %v13588_v12 = vpop.f32.mrf.mxu1 }
 0x658   : > { %v13590_v58 = vpop.f32.mrf.mxu0  ;;  %v13592_v35 = vpop.f32.mrf.mxu1 }
 0x65a   : > { %v13594_v61 = vpop.f32.mrf.mxu0  ;;  %v13596_v51 = vpop.f32.mrf.mxu1 }
 0x65c   : > { %v13598_v53 = vpop.f32.mrf.mxu0  ;;  %v13600_v22 = vpop.f32.mrf.mxu1  ;;  %6673 = vmatmul.mubr.bf16.gmra.mxu0 %v14925_v11  ;;  %6866 = vmatmul.mubr.bf16.gmra.mxu1 %v14926_v52 }
 0x65d   : > { %6682 = vmatprep.mubr.bf16.mxu0 %v13346_v5  ;;  %6875 = vmatprep.mubr.bf16.mxu1 %v13348_v23  ;;  %v14927_v5 = vld [vmem:[#allocation53_spill] sm:$0xff]  ;;  %v6354_v23 = vadd.f32 %v13512_v1, %v13510_v20  ;;  %v6352_v1 = vadd.f32 %v13498_v3, %v13496_v60 }
 0x65e   : > { %v13606_v10 = vpop.f32.mrf.mxu0  ;;  %v13608_v21 = vpop.f32.mrf.mxu1 }
 0x65f   : > { %v6897_v26 = vmax.f32 %v6354_v23, 0.0  ;;  %v6896_v23 = vmax.f32 %v6352_v1, 0.0 }
 0x660   : > { %v13610_v59 = vpop.f32.mrf.mxu0  ;;  %v13612_v63 = vpop.f32.mrf.mxu1 }
 0x662   : > { %v13614_v9 = vpop.f32.mrf.mxu0  ;;  %v13616_v56 = vpop.f32.mrf.mxu1 }
 0x664   : > { %v13618_v0 = vpop.f32.mrf.mxu0  ;;  %v13620_v42 = vpop.f32.mrf.mxu1  ;;  %6683 = vmatmul.mubr.bf16.gmra.mxu0 %v14927_v5  ;;  %6876 = vmatmul.mubr.bf16.gmra.mxu1 %v13352_v14  ;;  %v6356_v14 = vadd.f32 %v13516_v7, %v13514_v49  ;;  %v6364_v49 = vadd.f32 %v13528_v32, %v13526_v17  ;;  %v6378_v32 = vadd.f32 %v13556_v55, %v13554_v34 }
 0x665   : > { %6692 = vmatprep.mubr.bf16.mxu0 %v13366_v54  ;;  %6885 = vmatprep.mubr.bf16.mxu1 %v13368_v4  ;;  %v6368_v54 = vadd.f32 %v13536_v50, %v13534_v45  ;;  %v7025_v4 = vpack.c.bf16 %v6901_v29, %v6897_v26 }
 0x666   : > { %v13628_v16 = vpop.f32.mrf.mxu0  ;;  %v13630_v48 = vpop.f32.mrf.mxu1  ;;  %v6900_v7 = vmax.f32 %v6356_v14, 0.0  ;;  %v6905_v29 = vmax.f32 %v6364_v49, 0.0  ;;  %v6374_v49 = vadd.f32 %v13548_v2, %v13546_v47  ;;  %v6388_v2 = vadd.f32 %v13576_v19, %v13574_v33 }
 0x667   : > { %v6909_v50 = vmax.f32 %v6368_v54, 0.0  ;;  %v6362_v54 = vadd.f32 %v13520_v18, %v13518_v44 }
 0x668   : > { %v13632_v38 = vpop.f32.mrf.mxu0  ;;  %v13634_v8 = vpop.f32.mrf.mxu1  ;;  %v7024_v26 = vpack.c.bf16 %v6900_v7, %v6896_v23  ;;  %v6917_v23 = vmax.f32 %v6378_v32, 0.0  ;;  %v6913_v44 = vmax.f32 %v6374_v49, 0.0  ;;  %v6372_v32 = vadd.f32 %v13540_v62, %v13538_v57 }
 0x669   : > { %v7029_v14 = vpack.c.bf16 %v6909_v50, %v6905_v29  ;;  %v6904_v34 = vmax.f32 %v6362_v54, 0.0  ;;  %v6376_v29 = vadd.f32 %v13552_v39, %v13550_v37  ;;  %v6384_v49 = vadd.f32 %v13568_v15, %v13566_v27 }
 0x66a   : > { %v13638_v11 = vpop.f32.mrf.mxu0  ;;  %v13640_v20 = vpop.f32.mrf.mxu1  ;;  %v6912_v33 = vmax.f32 %v6372_v32, 0.0  ;;  %v6398_v15 = vadd.f32 %v13596_v51, %v13594_v61 }
 0x66b   : > { %v6916_v37 = vmax.f32 %v6376_v29, 0.0  ;;  %v6921_v57 = vmax.f32 %v6384_v49, 0.0  ;;  %v6394_v49 = vadd.f32 %v13588_v12, %v13586_v24  ;;  %v6408_v12 = vadd.f32 %v13616_v56, %v13614_v9 }
 0x66c   : > { %v13646_v52 = vpop.f32.mrf.mxu0  ;;  %v13648_v30 = vpop.f32.mrf.mxu1  ;;  %6693 = vmatmul.mubr.bf16.gmra.mxu0 %v13370_v13  ;;  %6886 = vmatmul.mubr.bf16.gmra.mxu1 %v13372_v36  ;;  %v6366_v36 = vadd.f32 %v13532_v40, %v13530_v31 }
 0x66d   : > { %7376 = vmatprep.mubr.bf16.mxu0 %v7025_v4  ;;  %v7032_v62 = vpack.c.bf16 %v6916_v37, %v6912_v33  ;;  %v6933_v33 = vmax.f32 %v6398_v15, 0.0  ;;  %v6392_v15 = vadd.f32 %v13580_v6, %v13578_v41 }
 0x66e   : > { %v13654_v5 = vpop.f32.mrf.mxu0  ;;  %v13656_v45 = vpop.f32.mrf.mxu1  ;;  %v6908_v31 = vmax.f32 %v6366_v36, 0.0  ;;  %v7033_v36 = vpack.c.bf16 %v6917_v23, %v6913_v44  ;;  %v6386_v44 = vadd.f32 %v13572_v25, %v13570_v46 }
 0x66f   : > { %v6928_v9 = vmax.f32 %v6392_v15, 0.0 }
 0x670   : > { %v13658_v60 = vpop.f32.mrf.mxu0  ;;  %v13660_v3 = vpop.f32.mrf.mxu1  ;;  %v7028_v18 = vpack.c.bf16 %v6908_v31, %v6904_v34  ;;  %v6925_v34 = vmax.f32 %v6388_v2, 0.0  ;;  %v6382_v2 = vadd.f32 %v13560_v43, %v13558_v28  ;;  %v6924_v46 = vmax.f32 %v6386_v44, 0.0 }
 0x671   : > { %v6929_v28 = vmax.f32 %v6394_v49, 0.0  ;;  %v6404_v49 = vadd.f32 %v13608_v21, %v13606_v10  ;;  %v6418_v21 = vadd.f32 %v13640_v20, %v13638_v11 }
 0x672   : > { %v13664_v13 = vpop.f32.mrf.mxu0  ;;  %v13666_v17 = vpop.f32.mrf.mxu1  ;;  %v7037_v29 = vpack.c.bf16 %v6925_v34, %v6921_v57  ;;  %v6920_v61 = vmax.f32 %v6382_v2, 0.0  ;;  %v6396_v57 = vadd.f32 %v13592_v35, %v13590_v58 }
 0x673   : > { %v7041_v44 = vpack.c.bf16 %v6933_v33, %v6929_v28  ;;  %v6937_v41 = vmax.f32 %v6404_v49, 0.0  ;;  %v6406_v28 = vadd.f32 %v13612_v63, %v13610_v59  ;;  %v6414_v49 = vadd.f32 %v13630_v48, %v13628_v16 }
 0x674   : > { %v13672_v4 = vpop.f32.mrf.mxu0  ;;  %v13674_v1 = vpop.f32.mrf.mxu1  ;;  %7377 = vmatmul.mubr.bf16.vlgmr.msra.gmra.mxu0 %v7024_v26  ;;  %v7036_v43 = vpack.c.bf16 %v6924_v46, %v6920_v61  ;;  %v6932_v58 = vmax.f32 %v6396_v57, 0.0  ;;  %v6941_v61 = vmax.f32 %v6408_v12, 0.0  ;;  %v6402_v12 = vadd.f32 %v13600_v22, %v13598_v53 }
 0x675   : > { %7384 = vmatprep.mubr.bf16.mxu0 %v7029_v14  ;;  %v6940_v59 = vmax.f32 %v6406_v28, 0.0  ;;  %v6945_v53 = vmax.f32 %v6414_v49, 0.0  ;;  %v6428_v48 = vadd.f32 %v13666_v17, %v13664_v13  ;;  %v6424_v49 = vadd.f32 %v13656_v45, %v13654_v5 }
 0x676   : > { %v13678_v40 = vpop.f32.mrf.mxu0  ;;  %v13680_v7 = vpop.f32.mrf.mxu1  ;;  %v7040_v6 = vpack.c.bf16 %v6932_v58, %v6928_v9  ;;  %v7045_v57 = vpack.c.bf16 %v6941_v61, %v6937_v41  ;;  %v6949_v9 = vmax.f32 %v6418_v21, 0.0  ;;  %v6936_v11 = vmax.f32 %v6402_v12, 0.0 }
 0x677   : > { %v6416_v41 = vadd.f32 %v13634_v8, %v13632_v38  ;;  %v6412_v21 = vadd.f32 %v13620_v42, %v13618_v0  ;;  %v6953_v0 = vmax.f32 %v6424_v49, 0.0  ;;  %v6434_v49 = vadd.f32 %v13680_v7, %v13678_v40 }
 0x678   : > { %v13682_v55 = vpop.f32.mrf.mxu0  ;;  %v13684_v50 = vpop.f32.mrf.mxu1  ;;  %v7044_v22 = vpack.c.bf16 %v6940_v59, %v6936_v11  ;;  %v7049_v28 = vpack.c.bf16 %v6949_v9, %v6945_v53  ;;  %v6957_v11 = vmax.f32 %v6428_v48, 0.0  ;;  %v6426_v53 = vadd.f32 %v13660_v3, %v13658_v60 }
 0x679   : > { %v6948_v38 = vmax.f32 %v6416_v41, 0.0  ;;  %v6944_v13 = vmax.f32 %v6412_v21, 0.0  ;;  %v6422_v48 = vadd.f32 %v13648_v30, %v13646_v52  ;;  %v6961_v52 = vmax.f32 %v6434_v49, 0.0 }
 0x67a   : > { %v13688_v26 = vpop.f32.mrf.mxu0  ;;  %v13690_v47 = vpop.f32.mrf.mxu1  ;;  %v7053_v41 = vpack.c.bf16 %v6957_v11, %v6953_v0  ;;  %v6956_v60 = vmax.f32 %v6426_v53, 0.0  ;;  %v6436_v0 = vadd.f32 %v13684_v50, %v13682_v55 }
 0x67b   : > { %v7048_v42 = vpack.c.bf16 %v6948_v38, %v6944_v13  ;;  %v6438_v45 = vadd.f32 %v13690_v47, %v13688_v26  ;;  %v6952_v26 = vmax.f32 %v6422_v48, 0.0 }
 0x67c   : > { %v13696_v14 = vpop.f32.mrf.mxu0  ;;  %v13698_v54 = vpop.f32.mrf.mxu1  ;;  %7385 = vmatmul.mubr.bf16.gmra.mxu0 %v7028_v18  ;;  %v6964_v55 = vmax.f32 %v6436_v0, 0.0 }
 0x67d   : > { %7392 = vmatprep.mubr.bf16.mxu0 %v7033_v36  ;;  %v6965_v13 = vmax.f32 %v6438_v45, 0.0  ;;  %v7052_v30 = vpack.c.bf16 %v6956_v60, %v6952_v26  ;;  %v6432_v45 = vadd.f32 %v13674_v1, %v13672_v4 }
 0x67e   : > { %v13702_v39 = vpop.f32.mrf.mxu0  ;;  %v13704_v31 = vpop.f32.mrf.mxu1 }
 0x67f   : > { %v7057_v53 = vpack.c.bf16 %v6965_v13, %v6961_v52  ;;  %v6444_v49 = vadd.f32 %v13704_v31, %v13702_v39 }
 0x680   : > { %v13706_v19 = vpop.f32.mrf.mxu0  ;;  %v13708_v23 = vpop.f32.mrf.mxu1 }
 0x681   : > { %v6969_v4 = vmax.f32 %v6444_v49, 0.0  ;;  %v6446_v52 = vadd.f32 %v13708_v23, %v13706_v19 }
 0x682   : > { %v13712_v18 = vpop.f32.mrf.mxu0  ;;  %v13714_v27 = vpop.f32.mrf.mxu1 }
 0x683   : > { %v6448_v7 = vadd.f32 %v13714_v27, %v13712_v18  ;;  %v6960_v18 = vmax.f32 %v6432_v45, 0.0 }
 0x684   : > { %v13720_v36 = vpop.f32.mrf.mxu0  ;;  %v13722_v32 = vpop.f32.mrf.mxu1  ;;  %7393 = vmatmul.mubr.bf16.gmra.mxu0 %v7032_v62 }
 0x685   : > { %7400 = vmatprep.mubr.bf16.mxu0 %v7037_v29  ;;  %v6973_v26 = vmax.f32 %v6448_v7, 0.0  ;;  %v7056_v1 = vpack.c.bf16 %v6964_v55, %v6960_v18  ;;  %v6442_v7 = vadd.f32 %v13698_v54, %v13696_v14  ;;  %v6972_v55 = vmax.f32 %v6446_v52, 0.0 }
 0x686   : > { %v13726_v25 = vpop.f32.mrf.mxu0  ;;  %v13728_v37 = vpop.f32.mrf.mxu1 }
 0x687   : > { %v7061_v0 = vpack.c.bf16 %v6973_v26, %v6969_v4  ;;  %v6454_v49 = vadd.f32 %v13728_v37, %v13726_v25 }
 0x688   : > { %v13730_v51 = vpop.f32.mrf.mxu0  ;;  %v13732_v34 = vpop.f32.mrf.mxu1 }
 0x689   : > { %v6456_v14 = vadd.f32 %v13732_v34, %v13730_v51 }
 0x68a   : > { %v13736_v62 = vpop.f32.mrf.mxu0  ;;  %v13738_v24 = vpop.f32.mrf.mxu1 }
 0x68b   : > { %v6458_v31 = vadd.f32 %v13738_v24, %v13736_v62  ;;  %v6980_v34 = vmax.f32 %v6456_v14, 0.0 }
 0x68c   : > { %v13744_v29 = vpop.f32.mrf.mxu0  ;;  %v13746_v2 = vpop.f32.mrf.mxu1  ;;  %7401 = vmatmul.mubr.bf16.gmra.mxu0 %v7036_v43 }
 0x68d   : > { %7408 = vmatprep.mubr.bf16.mxu0 %v7041_v44  ;;  %v6981_v18 = vmax.f32 %v6458_v31, 0.0  ;;  %v6452_v31 = vadd.f32 %v13722_v32, %v13720_v36 }
 0x68e   : > { %v13750_v35 = vpop.f32.mrf.mxu0  ;;  %v13752_v46 = vpop.f32.mrf.mxu1 }
 0x690   : > { %v13754_v56 = vpop.f32.mrf.mxu0  ;;  %v13756_v33 = vpop.f32.mrf.mxu1 }
 0x692   : > { %v13760_v43 = vpop.f32.mrf.mxu0  ;;  %v13762_v10 = vpop.f32.mrf.mxu1 }
 0x693   : > { %v6468_v25 = vadd.f32 %v13762_v10, %v13760_v43 }
 0x694   : > { %v13768_v44 = vpop.f32.mrf.mxu0  ;;  %v13770_v15 = vpop.f32.mrf.mxu1  ;;  %7409 = vmatmul.mubr.bf16.gmra.mxu0 %v7040_v6 }
 0x695   : > { %7416 = vmatprep.mubr.bf16.mxu0 %v7045_v57  ;;  %v6989_v43 = vmax.f32 %v6468_v25, 0.0 }
 0x696   : > { %v13774_v63 = vpop.f32.mrf.mxu0  ;;  %v13776_v58 = vpop.f32.mrf.mxu1 }
 0x698   : > { %v13778_v20 = vpop.f32.mrf.mxu0  ;;  %v13780_v61 = vpop.f32.mrf.mxu1 }
 0x69a   : > { %v13784_v6 = vpop.f32.mrf.mxu0  ;;  %v13786_v16 = vpop.f32.mrf.mxu1 }
 0x69b   : > { %v6478_v14 = vadd.f32 %v13786_v16, %v13784_v6 }
 0x69c   : > { %v13792_v57 = vpop.f32.mrf.mxu0  ;;  %v13794_v12 = vpop.f32.mrf.mxu1  ;;  %7417 = vmatmul.mubr.bf16.gmra.mxu0 %v7044_v22 }
 0x69d   : > { %7424 = vmatprep.mubr.bf16.mxu0 %v7049_v28  ;;  %v6997_v6 = vmax.f32 %v6478_v14, 0.0 }
 0x69e   : > { %v13798_v8 = vpop.f32.mrf.mxu0  ;;  %v13800_v59 = vpop.f32.mrf.mxu1 }
 0x6a0   : > { %v13802_v17 = vpop.f32.mrf.mxu0  ;;  %v13804_v9 = vpop.f32.mrf.mxu1 }
 0x6a2   : > { %v13808_v22 = vpop.f32.mrf.mxu0  ;;  %v13810_v5 = vpop.f32.mrf.mxu1 }
 0x6a4   : > { %v13816_v28 = vpop.f32.mrf.mxu0  ;;  %v13818_v21 = vpop.f32.mrf.mxu1  ;;  %7425 = vmatmul.mubr.bf16.gmra.mxu0 %v7048_v42 }
 0x6a5   : > { %7432 = vmatprep.mubr.bf16.mxu0 %v7053_v41 }
 0x6a6   : > { %v13822_v3 = vpop.f32.mrf.mxu0  ;;  %v13824_v38 = vpop.f32.mrf.mxu1 }
 0x6a8   : > { %v13826_v47 = vpop.f32.mrf.mxu0  ;;  %v13828_v11 = vpop.f32.mrf.mxu1 }
 0x6aa   : > { %v13832_v42 = vpop.f32.mrf.mxu0  ;;  %v13834_v40 = vpop.f32.mrf.mxu1 }
 0x6ac   : > { %v13840_v41 = vpop.f32.mrf.mxu0  ;;  %v13842_v48 = vpop.f32.mrf.mxu1  ;;  %7433 = vmatmul.mubr.bf16.gmra.mxu0 %v7052_v30 }
 0x6ad   : > { %14928 = vst [vmem:[#allocation54_spill] sm:$0xff] %v13840_v41  ;;  %14929 = vst [vmem:[#allocation55_spill] sm:$0xff] %v13842_v48  ;;  %7440 = vmatprep.mubr.bf16.mxu0 %v7057_v53  ;;  %v6968_v48 = vmax.f32 %v6442_v7, 0.0 }
 0x6ae   : > { %v13846_v50 = vpop.f32.mrf.mxu0  ;;  %v13848_v60 = vpop.f32.mrf.mxu1 }
 0x6af   : > { %v7060_v26 = vpack.c.bf16 %v6972_v55, %v6968_v48 }
 0x6b0   : > { %v13850_v27 = vpop.f32.mrf.mxu0  ;;  %v13852_v13 = vpop.f32.mrf.mxu1 }
 0x6b1   : > { %14930 = vst [vmem:[#allocation56_spill] sm:$0xff] %v13850_v27  ;;  %14931 = vst [vmem:[#allocation51_spill] sm:$0xff] %v13852_v13  ;;  %v6977_v27 = vmax.f32 %v6454_v49, 0.0 }
 0x6b2   : > { %v13856_v30 = vpop.f32.mrf.mxu0  ;;  %v13858_v39 = vpop.f32.mrf.mxu1 }
 0x6b3   : > { %v7065_v52 = vpack.c.bf16 %v6981_v18, %v6977_v27  ;;  %v6976_v27 = vmax.f32 %v6452_v31, 0.0  ;;  %v6474_v31 = vadd.f32 %v13776_v58, %v13774_v63  ;;  %v6476_v63 = vadd.f32 %v13780_v61, %v13778_v20 }
 0x6b4   : > { %v6544_v53 = vpop.f32.mrf.mxu0  ;;  %v6737_v45 = vpop.f32.mrf.mxu1  ;;  %7441 = vmatmul.mubr.bf16.gmra.mxu0 %v7056_v1 }
 0x6b5   : > { %7448 = vmatprep.mubr.bf16.mxu0 %v7061_v0  ;;  %v6738_v54 = vadd.f32 %v6737_v45, %v6544_v53 }
 0x6b6   : > { %v6546_v19 = vpop.f32.mrf.mxu0  ;;  %v6739_v23 = vpop.f32.mrf.mxu1 }
 0x6b7   : > { %v6740_v62 = vadd.f32 %v6739_v23, %v6546_v19 }
 0x6b8   : > { %v6548_v41 = vpop.f32.mrf.mxu0  ;;  %v6741_v13 = vpop.f32.mrf.mxu1 }
 0x6b9   : > { %v6742_v24 = vadd.f32 %v6741_v13, %v6548_v41  ;;  %v6464_v41 = vadd.f32 %v13752_v46, %v13750_v35  ;;  %v6899_v48 = vmax.f32 %v6740_v62, 0.0  ;;  %v6898_v13 = vmax.f32 %v6738_v54, 0.0 }
 0x6ba   : > { %v6550_v4 = vpop.f32.mrf.mxu0  ;;  %v6743_v1 = vpop.f32.mrf.mxu1  ;;  %v6466_v35 = vadd.f32 %v13756_v33, %v13754_v56 }
 0x6bb   : > { %v6744_v37 = vadd.f32 %v6743_v1, %v6550_v4  ;;  %v6902_v0 = vmax.f32 %v6742_v24, 0.0  ;;  %v6985_v32 = vmax.f32 %v6464_v41, 0.0  ;;  %v7064_v24 = vpack.c.bf16 %v6980_v34, %v6976_v27 }
 0x6bc   : > { %v6554_v7 = vpop.f32.mrf.mxu0  ;;  %v6747_v49 = vpop.f32.mrf.mxu1  ;;  %7449 = vmatmul.mubr.bf16.gmra.mxu0 %v7060_v26  ;;  %v6462_v1 = vadd.f32 %v13746_v2, %v13744_v29  ;;  %v6993_v2 = vmax.f32 %v6474_v31, 0.0  ;;  %v6488_v27 = vadd.f32 %v13810_v5, %v13808_v22 }
 0x6bd   : > { %v6903_v51 = vmax.f32 %v6744_v37, 0.0  ;;  %7456 = vmatprep.mubr.bf16.mxu0 %v7065_v52  ;;  %v7026_v55 = vpack.c.bf16 %v6902_v0, %v6898_v13  ;;  %v6748_v46 = vadd.f32 %v6747_v49, %v6554_v7  ;;  %v7069_v4 = vpack.c.bf16 %v6989_v43, %v6985_v32 }
 0x6be   : > { %v6556_v53 = vpop.f32.mrf.mxu0  ;;  %v6749_v45 = vpop.f32.mrf.mxu1  ;;  %v6988_v0 = vmax.f32 %v6466_v35, 0.0  ;;  %v6996_v35 = vmax.f32 %v6476_v63, 0.0  ;;  %v7005_v22 = vmax.f32 %v6488_v27, 0.0  ;;  %v6508_v27 = vadd.f32 %v13858_v39, %v13856_v30 }
 0x6bf   : > { %v7027_v10 = vpack.c.bf16 %v6903_v51, %v6899_v48  ;;  %v6750_v23 = vadd.f32 %v6749_v45, %v6556_v53  ;;  %v6906_v7 = vmax.f32 %v6748_v46, 0.0  ;;  %v6984_v48 = vmax.f32 %v6462_v1, 0.0 }
 0x6c0   : > { %v6558_v19 = vpop.f32.mrf.mxu0  ;;  %v6751_v36 = vpop.f32.mrf.mxu1  ;;  %v7021_v30 = vmax.f32 %v6508_v27, 0.0 }
 0x6c1   : > { %v6752_v18 = vadd.f32 %v6751_v36, %v6558_v19  ;;  %7537 = vmatprep.mubr.bf16.mxu1 %v7027_v10  ;;  %v6907_v56 = vmax.f32 %v6750_v23, 0.0  ;;  %v7068_v45 = vpack.c.bf16 %v6988_v0, %v6984_v48  ;;  %v7073_v19 = vpack.c.bf16 %v6997_v6, %v6993_v2 }
 0x6c2   : > { %v6560_v62 = vpop.f32.mrf.mxu0  ;;  %v6753_v26 = vpop.f32.mrf.mxu1  ;;  %7538 = vmatmul.mubr.bf16.vlgmr.msra.gmra.mxu1 %v7026_v55  ;;  %v6472_v36 = vadd.f32 %v13770_v15, %v13768_v44 }
 0x6c3   : > { %v6754_v54 = vadd.f32 %v6753_v26, %v6560_v62  ;;  %v6910_v25 = vmax.f32 %v6752_v18, 0.0 }
 0x6c4   : > { %v6564_v37 = vpop.f32.mrf.mxu0  ;;  %v6757_v52 = vpop.f32.mrf.mxu1  ;;  %7457 = vmatmul.mubr.bf16.gmra.mxu0 %v7064_v24  ;;  %v6484_v24 = vadd.f32 %v13800_v59, %v13798_v8  ;;  %v6992_v14 = vmax.f32 %v6472_v36, 0.0  ;;  %v6486_v8 = vadd.f32 %v13804_v9, %v13802_v17  ;;  %v6492_v36 = vadd.f32 %v13818_v21, %v13816_v28 }
 0x6c5   : > { %v6911_v33 = vmax.f32 %v6754_v54, 0.0  ;;  %7464 = vmatprep.mubr.bf16.mxu0 %v7069_v4  ;;  %v7030_v51 = vpack.c.bf16 %v6910_v25, %v6906_v7  ;;  %v6758_v58 = vadd.f32 %v6757_v52, %v6564_v37  ;;  %v6482_v7 = vadd.f32 %v13794_v12, %v13792_v57 }
 0x6c6   : > { %v6566_v49 = vpop.f32.mrf.mxu0  ;;  %v6759_v41 = vpop.f32.mrf.mxu1  ;;  %v7001_v15 = vmax.f32 %v6484_v24, 0.0  ;;  %v7072_v37 = vpack.c.bf16 %v6996_v35, %v6992_v14  ;;  %v7004_v48 = vmax.f32 %v6486_v8, 0.0  ;;  %v6504_v24 = vadd.f32 %v13848_v60, %v13846_v50  ;;  %v14933_v50 = vld [vmem:[#allocation51_spill] sm:$0xff]  ;;  %v14934_v8 = vld [vmem:[#allocation54_spill] sm:$0xff] }
 0x6c7   : > { %v7031_v16 = vpack.c.bf16 %v6911_v33, %v6907_v56  ;;  %v6760_v13 = vadd.f32 %v6759_v41, %v6566_v49  ;;  %v6914_v46 = vmax.f32 %v6758_v58, 0.0  ;;  %v6498_v56 = vadd.f32 %v13834_v40, %v13832_v42 }
 0x6c8   : > { %v6568_v34 = vpop.f32.mrf.mxu0  ;;  %v6761_v29 = vpop.f32.mrf.mxu1  ;;  %v7077_v0 = vpack.c.bf16 %v7005_v22, %v7001_v15  ;;  %v7000_v2 = vmax.f32 %v6482_v7, 0.0  ;;  %v7017_v21 = vmax.f32 %v6504_v24, 0.0 }
 0x6c9   : > { %v6762_v53 = vadd.f32 %v6761_v29, %v6568_v34  ;;  %7545 = vmatprep.mubr.bf16.mxu1 %v7031_v16  ;;  %v6915_v20 = vmax.f32 %v6760_v13, 0.0  ;;  %v6494_v16 = vadd.f32 %v13824_v38, %v13822_v3  ;;  %v7013_v42 = vmax.f32 %v6498_v56, 0.0 }
 0x6ca   : > { %v6570_v43 = vpop.f32.mrf.mxu0  ;;  %v6763_v10 = vpop.f32.mrf.mxu1  ;;  %7546 = vmatmul.mubr.bf16.gmra.mxu1 %v7030_v51  ;;  %v7076_v58 = vpack.c.bf16 %v7004_v48, %v7000_v2  ;;  %v6496_v3 = vadd.f32 %v13828_v11, %v13826_v47 }
 0x6cb   : > { %v6764_v55 = vadd.f32 %v6763_v10, %v6570_v43  ;;  %v6918_v32 = vmax.f32 %v6762_v53, 0.0  ;;  %v7009_v12 = vmax.f32 %v6494_v16, 0.0 }
 0x6cc   : > { %v6574_v23 = vpop.f32.mrf.mxu0  ;;  %v6767_v18 = vpop.f32.mrf.mxu1  ;;  %7465 = vmatmul.mubr.bf16.gmra.mxu0 %v7068_v45 }
 0x6cd   : > { %v6919_v61 = vmax.f32 %v6764_v55, 0.0  ;;  %7472 = vmatprep.mubr.bf16.mxu0 %v7073_v19  ;;  %v7034_v54 = vpack.c.bf16 %v6918_v32, %v6914_v46  ;;  %v6768_v59 = vadd.f32 %v6767_v18, %v6574_v23  ;;  %v7081_v19 = vpack.c.bf16 %v7013_v42, %v7009_v12 }
 0x6ce   : > { %v6576_v62 = vpop.f32.mrf.mxu0  ;;  %v6769_v26 = vpop.f32.mrf.mxu1 }
 0x6cf   : > { %v7035_v5 = vpack.c.bf16 %v6919_v61, %v6915_v20  ;;  %v6770_v1 = vadd.f32 %v6769_v26, %v6576_v62  ;;  %v6922_v51 = vmax.f32 %v6768_v59, 0.0  ;;  %v7012_v20 = vmax.f32 %v6496_v3, 0.0  ;;  %v14935_v59 = vld [vmem:[#allocation55_spill] sm:$0xff] }
 0x6d0   : > { %v6578_v4 = vpop.f32.mrf.mxu0  ;;  %v6771_v44 = vpop.f32.mrf.mxu1  ;;  %v7008_v62 = vmax.f32 %v6492_v36, 0.0 }
 0x6d1   : > { %v6772_v25 = vadd.f32 %v6771_v44, %v6578_v4  ;;  %7553 = vmatprep.mubr.bf16.mxu1 %v7035_v5  ;;  %v6923_v17 = vmax.f32 %v6770_v1, 0.0  ;;  %v14932_v4 = vld [vmem:[#allocation56_spill] sm:$0xff] }
 0x6d2   : > { %v6580_v52 = vpop.f32.mrf.mxu0  ;;  %v6773_v31 = vpop.f32.mrf.mxu1  ;;  %7554 = vmatmul.mubr.bf16.gmra.mxu1 %v7034_v54  ;;  %v7080_v54 = vpack.c.bf16 %v7012_v20, %v7008_v62  ;;  %v6506_v60 = vadd.f32 %v14933_v50, %v14932_v4 }
 0x6d3   : > { %v6774_v33 = vadd.f32 %v6773_v31, %v6580_v52  ;;  %v6926_v49 = vmax.f32 %v6772_v25, 0.0  ;;  %v6502_v52 = vadd.f32 %v14935_v59, %v14934_v8 }
 0x6d4   : > { %v6584_v41 = vpop.f32.mrf.mxu0  ;;  %v6777_v6 = vpop.f32.mrf.mxu1  ;;  %7473 = vmatmul.mubr.bf16.gmra.mxu0 %v7072_v37  ;;  %v7085_v37 = vpack.c.bf16 %v7021_v30, %v7017_v21 }
 0x6d5   : > { %v6927_v9 = vmax.f32 %v6774_v33, 0.0  ;;  %7480 = vmatprep.mubr.bf16.mxu0 %v7077_v0  ;;  %v7038_v13 = vpack.c.bf16 %v6926_v49, %v6922_v51  ;;  %v6778_v38 = vadd.f32 %v6777_v6, %v6584_v41  ;;  %v7020_v49 = vmax.f32 %v6506_v60, 0.0 }
 0x6d6   : > { %v6586_v34 = vpop.f32.mrf.mxu0  ;;  %v6779_v29 = vpop.f32.mrf.mxu1 }
 0x6d7   : > { %v7039_v40 = vpack.c.bf16 %v6927_v9, %v6923_v17  ;;  %v6780_v45 = vadd.f32 %v6779_v29, %v6586_v34  ;;  %v6930_v61 = vmax.f32 %v6778_v38, 0.0  ;;  %v7016_v9 = vmax.f32 %v6502_v52, 0.0 }
 0x6d8   : > { %v6588_v53 = vpop.f32.mrf.mxu0  ;;  %v6781_v57 = vpop.f32.mrf.mxu1 }
 0x6d9   : > { %v6782_v63 = vadd.f32 %v6781_v57, %v6588_v53  ;;  %7561 = vmatprep.mubr.bf16.mxu1 %v7039_v40  ;;  %v6931_v47 = vmax.f32 %v6780_v45, 0.0  ;;  %v7084_v40 = vpack.c.bf16 %v7020_v49, %v7016_v9 }
 0x6da   : > { %v6590_v43 = vpop.f32.mrf.mxu0  ;;  %v6783_v10 = vpop.f32.mrf.mxu1  ;;  %7562 = vmatmul.mubr.bf16.gmra.mxu1 %v7038_v13 }
 0x6db   : > { %v6784_v55 = vadd.f32 %v6783_v10, %v6590_v43  ;;  %v6934_v32 = vmax.f32 %v6782_v63, 0.0 }
 0x6dc   : > { %v6594_v23 = vpop.f32.mrf.mxu0  ;;  %v6787_v18 = vpop.f32.mrf.mxu1  ;;  %7481 = vmatmul.mubr.bf16.gmra.mxu0 %v7076_v58 }
 0x6dd   : > { %v6935_v11 = vmax.f32 %v6784_v55, 0.0  ;;  %7488 = vmatprep.mubr.bf16.mxu0 %v7081_v19  ;;  %v7042_v26 = vpack.c.bf16 %v6934_v32, %v6930_v61  ;;  %v6788_v44 = vadd.f32 %v6787_v18, %v6594_v23 }
 0x6de   : > { %v6596_v35 = vpop.f32.mrf.mxu0  ;;  %v6789_v46 = vpop.f32.mrf.mxu1 }
 0x6df   : > { %v7043_v39 = vpack.c.bf16 %v6935_v11, %v6931_v47  ;;  %v6790_v5 = vadd.f32 %v6789_v46, %v6596_v35  ;;  %v6938_v41 = vmax.f32 %v6788_v44, 0.0 }
 0x6e0   : > { %v6598_v22 = vpop.f32.mrf.mxu0  ;;  %v6791_v28 = vpop.f32.mrf.mxu1 }
 0x6e1   : > { %v6792_v14 = vadd.f32 %v6791_v28, %v6598_v22  ;;  %7569 = vmatprep.mubr.bf16.mxu1 %v7043_v39  ;;  %v6939_v0 = vmax.f32 %v6790_v5, 0.0 }
 0x6e2   : > { %v6600_v15 = vpop.f32.mrf.mxu0  ;;  %v6793_v1 = vpop.f32.mrf.mxu1  ;;  %7570 = vmatmul.mubr.bf16.gmra.mxu1 %v7042_v26 }
 0x6e3   : > { %v6794_v25 = vadd.f32 %v6793_v1, %v6600_v15  ;;  %v6942_v31 = vmax.f32 %v6792_v14, 0.0 }
 0x6e4   : > { %v6604_v56 = vpop.f32.mrf.mxu0  ;;  %v6797_v33 = vpop.f32.mrf.mxu1  ;;  %7489 = vmatmul.mubr.bf16.gmra.mxu0 %v7080_v54 }
 0x6e5   : > { %v6943_v7 = vmax.f32 %v6794_v25, 0.0  ;;  %7496 = vmatprep.mubr.bf16.mxu0 %v7085_v37  ;;  %v7046_v48 = vpack.c.bf16 %v6942_v31, %v6938_v41  ;;  %v6798_v2 = vadd.f32 %v6797_v33, %v6604_v56 }
 0x6e6   : > { %v6606_v6 = vpop.f32.mrf.mxu0  ;;  %v6799_v16 = vpop.f32.mrf.mxu1 }
 0x6e7   : > { %v7047_v17 = vpack.c.bf16 %v6943_v7, %v6939_v0  ;;  %v6800_v29 = vadd.f32 %v6799_v16, %v6606_v6  ;;  %v6946_v38 = vmax.f32 %v6798_v2, 0.0 }
 0x6e8   : > { %v6608_v51 = vpop.f32.mrf.mxu0  ;;  %v6801_v34 = vpop.f32.mrf.mxu1 }
 0x6e9   : > { %v6802_v42 = vadd.f32 %v6801_v34, %v6608_v51  ;;  %7577 = vmatprep.mubr.bf16.mxu1 %v7047_v17  ;;  %v6947_v58 = vmax.f32 %v6800_v29, 0.0 }
 0x6ea   : > { %v6610_v13 = vpop.f32.mrf.mxu0  ;;  %v6803_v53 = vpop.f32.mrf.mxu1  ;;  %7578 = vmatmul.mubr.bf16.gmra.mxu1 %v7046_v48 }
 0x6eb   : > { %v6804_v57 = vadd.f32 %v6803_v53, %v6610_v13  ;;  %v6950_v12 = vmax.f32 %v6802_v42, 0.0 }
 0x6ec   : > { %v6614_v45 = vpop.f32.mrf.mxu0  ;;  %v6807_v63 = vpop.f32.mrf.mxu1  ;;  %7497 = vmatmul.mubr.bf16.gmra.mxu0 %v7084_v40 }
 0x6ed   : > { %v6951_v3 = vmax.f32 %v6804_v57, 0.0  ;;  %v7050_v55 = vpack.c.bf16 %v6950_v12, %v6946_v38  ;;  %v6808_v18 = vadd.f32 %v6807_v63, %v6614_v45 }
 0x6ee   : > { %v6616_v43 = vpop.f32.mrf.mxu0  ;;  %v6809_v10 = vpop.f32.mrf.mxu1 }
 0x6ef   : > { %v7051_v27 = vpack.c.bf16 %v6951_v3, %v6947_v58  ;;  %v6810_v32 = vadd.f32 %v6809_v10, %v6616_v43  ;;  %v6954_v39 = vmax.f32 %v6808_v18, 0.0 }
 0x6f0   : > { %v6618_v19 = vpop.f32.mrf.mxu0  ;;  %v6811_v36 = vpop.f32.mrf.mxu1 }
 0x6f1   : > { %v6812_v23 = vadd.f32 %v6811_v36, %v6618_v19  ;;  %7585 = vmatprep.mubr.bf16.mxu1 %v7051_v27  ;;  %v6955_v46 = vmax.f32 %v6810_v32, 0.0 }
 0x6f2   : > { %v6620_v24 = vpop.f32.mrf.mxu0  ;;  %v6813_v47 = vpop.f32.mrf.mxu1  ;;  %7586 = vmatmul.mubr.bf16.gmra.mxu1 %v7050_v55 }
 0x6f3   : > { %v6814_v11 = vadd.f32 %v6813_v47, %v6620_v24  ;;  %v6958_v20 = vmax.f32 %v6812_v23, 0.0 }
 0x6f4   : > { %v6624_v61 = vpop.f32.mrf.mxu0  ;;  %v6817_v35 = vpop.f32.mrf.mxu1 }
 0x6f5   : > { %v6959_v30 = vmax.f32 %v6814_v11, 0.0  ;;  %v7054_v28 = vpack.c.bf16 %v6958_v20, %v6954_v39  ;;  %v6818_v4 = vadd.f32 %v6817_v35, %v6624_v61 }
 0x6f6   : > { %v6626_v62 = vpop.f32.mrf.mxu0  ;;  %v6819_v26 = vpop.f32.mrf.mxu1 }
 0x6f7   : > { %v7055_v22 = vpack.c.bf16 %v6959_v30, %v6955_v46  ;;  %v6820_v14 = vadd.f32 %v6819_v26, %v6626_v62  ;;  %v6962_v59 = vmax.f32 %v6818_v4, 0.0 }
 0x6f8   : > { %v6628_v21 = vpop.f32.mrf.mxu0  ;;  %v6821_v5 = vpop.f32.mrf.mxu1 }
 0x6f9   : > { %v6822_v54 = vadd.f32 %v6821_v5, %v6628_v21  ;;  %7593 = vmatprep.mubr.bf16.mxu1 %v7055_v22  ;;  %v6963_v37 = vmax.f32 %v6820_v14, 0.0 }
 0x6fa   : > { %v6630_v50 = vpop.f32.mrf.mxu0  ;;  %v6823_v60 = vpop.f32.mrf.mxu1  ;;  %7594 = vmatmul.mubr.bf16.gmra.mxu1 %v7054_v28 }
 0x6fb   : > { %v6824_v44 = vadd.f32 %v6823_v60, %v6630_v50  ;;  %v6966_v15 = vmax.f32 %v6822_v54, 0.0 }
 0x6fc   : > { %v6634_v1 = vpop.f32.mrf.mxu0  ;;  %v6827_v25 = vpop.f32.mrf.mxu1 }
 0x6fd   : > { %v6967_v8 = vmax.f32 %v6824_v44, 0.0  ;;  %v7058_v33 = vpack.c.bf16 %v6966_v15, %v6962_v59  ;;  %v6828_v6 = vadd.f32 %v6827_v25, %v6634_v1 }
 0x6fe   : > { %v6636_v52 = vpop.f32.mrf.mxu0  ;;  %v6829_v31 = vpop.f32.mrf.mxu1 }
 0x6ff   : > { %v7059_v56 = vpack.c.bf16 %v6967_v8, %v6963_v37  ;;  %v6830_v49 = vadd.f32 %v6829_v31, %v6636_v52  ;;  %v6970_v40 = vmax.f32 %v6828_v6, 0.0 }
 0x700   : > { %v6638_v0 = vpop.f32.mrf.mxu0  ;;  %v6831_v7 = vpop.f32.mrf.mxu1 }
 0x701   : > { %v6832_v41 = vadd.f32 %v6831_v7, %v6638_v0  ;;  %7601 = vmatprep.mubr.bf16.mxu1 %v7059_v56  ;;  %v6971_v29 = vmax.f32 %v6830_v49, 0.0 }
 0x702   : > { %v6640_v16 = vpop.f32.mrf.mxu0  ;;  %v6833_v17 = vpop.f32.mrf.mxu1  ;;  %7602 = vmatmul.mubr.bf16.gmra.mxu1 %v7058_v33 }
 0x703   : > { %v6834_v9 = vadd.f32 %v6833_v17, %v6640_v16  ;;  %v6974_v48 = vmax.f32 %v6832_v41, 0.0 }
 0x704   : > { %v6644_v51 = vpop.f32.mrf.mxu0  ;;  %v6837_v34 = vpop.f32.mrf.mxu1 }
 0x705   : > { %v6975_v42 = vmax.f32 %v6834_v9, 0.0  ;;  %v7062_v57 = vpack.c.bf16 %v6974_v48, %v6970_v40  ;;  %v6838_v3 = vadd.f32 %v6837_v34, %v6644_v51 }
 0x706   : > { %v6646_v2 = vpop.f32.mrf.mxu0  ;;  %v6839_v13 = vpop.f32.mrf.mxu1 }
 0x707   : > { %v7063_v53 = vpack.c.bf16 %v6975_v42, %v6971_v29  ;;  %v6840_v63 = vadd.f32 %v6839_v13, %v6646_v2  ;;  %v6978_v23 = vmax.f32 %v6838_v3, 0.0 }
 0x708   : > { %v6648_v12 = vpop.f32.mrf.mxu0  ;;  %v6841_v45 = vpop.f32.mrf.mxu1 }
 0x709   : > { %v6842_v58 = vadd.f32 %v6841_v45, %v6648_v12  ;;  %7609 = vmatprep.mubr.bf16.mxu1 %v7063_v53  ;;  %v6979_v36 = vmax.f32 %v6840_v63, 0.0 }
 0x70a   : > { %v6650_v38 = vpop.f32.mrf.mxu0  ;;  %v6843_v43 = vpop.f32.mrf.mxu1  ;;  %7610 = vmatmul.mubr.bf16.gmra.mxu1 %v7062_v57 }
 0x70b   : > { %v6844_v10 = vadd.f32 %v6843_v43, %v6650_v38  ;;  %v6982_v27 = vmax.f32 %v6842_v58, 0.0 }
 0x70c   : > { %v6654_v55 = vpop.f32.mrf.mxu0  ;;  %v6847_v19 = vpop.f32.mrf.mxu1 }
 0x70d   : > { %v6983_v32 = vmax.f32 %v6844_v10, 0.0  ;;  %v7066_v11 = vpack.c.bf16 %v6982_v27, %v6978_v23  ;;  %v6848_v30 = vadd.f32 %v6847_v19, %v6654_v55  ;;  %v13910_v19 = vpop.permute.xlu0 %7698 }
 0x70e   : > { %v6656_v18 = vpop.f32.mrf.mxu0  ;;  %v6849_v24 = vpop.f32.mrf.mxu1 }
 0x70f   : > { %v7067_v47 = vpack.c.bf16 %v6983_v32, %v6979_v36  ;;  %v6850_v35 = vadd.f32 %v6849_v24, %v6656_v18  ;;  %v6986_v54 = vmax.f32 %v6848_v30, 0.0 }
 0x710   : > { %v6658_v20 = vpop.f32.mrf.mxu0  ;;  %v6851_v61 = vpop.f32.mrf.mxu1 }
 0x711   : > { %v6852_v46 = vadd.f32 %v6851_v61, %v6658_v20  ;;  %7617 = vmatprep.mubr.bf16.mxu1 %v7067_v47  ;;  %v6987_v5 = vmax.f32 %v6850_v35, 0.0  ;;  %v13912_v35 = vpop.permute.xlu1 %7700 }
 0x712   : > { %v6660_v39 = vpop.f32.mrf.mxu0  ;;  %v6853_v62 = vpop.f32.mrf.mxu1  ;;  %7618 = vmatmul.mubr.bf16.gmra.mxu1 %v7066_v11 }
 0x713   : > { %v6854_v26 = vadd.f32 %v6853_v62, %v6660_v39  ;;  %v6990_v22 = vmax.f32 %v6852_v46, 0.0 }
 0x714   : > { %v6664_v28 = vpop.f32.mrf.mxu0  ;;  %v6857_v21 = vpop.f32.mrf.mxu1 }
 0x715   : > { %v6991_v14 = vmax.f32 %v6854_v26, 0.0  ;;  %v7070_v44 = vpack.c.bf16 %v6990_v22, %v6986_v54  ;;  %v6858_v8 = vadd.f32 %v6857_v21, %v6664_v28  ;;  %v13914_v22 = vpop.permute.xlu0 %7702 }
 0x716   : > { %v6666_v4 = vpop.f32.mrf.mxu0  ;;  %v6859_v50 = vpop.f32.mrf.mxu1 }
 0x717   : > { %v7071_v60 = vpack.c.bf16 %v6991_v14, %v6987_v5  ;;  %v6860_v25 = vadd.f32 %v6859_v50, %v6666_v4  ;;  %v6994_v41 = vmax.f32 %v6858_v8, 0.0 }
 0x718   : > { %v6668_v15 = vpop.f32.mrf.mxu0  ;;  %v6861_v1 = vpop.f32.mrf.mxu1 }
 0x719   : > { %v6862_v37 = vadd.f32 %v6861_v1, %v6668_v15  ;;  %7625 = vmatprep.mubr.bf16.mxu1 %v7071_v60  ;;  %v6995_v7 = vmax.f32 %v6860_v25, 0.0  ;;  %v13916_v15 = vpop.permute.xlu1 %7704  ;;  %v13920_v8 = vpop.permute.xlu0 %7706 }
 0x71a   : > { %v6670_v59 = vpop.f32.mrf.mxu0  ;;  %v6863_v52 = vpop.f32.mrf.mxu1  ;;  %7626 = vmatmul.mubr.bf16.gmra.mxu1 %v7070_v44 }
 0x71b   : > { %v6864_v31 = vadd.f32 %v6863_v52, %v6670_v59  ;;  %v6998_v56 = vmax.f32 %v6862_v37, 0.0 }
 0x71c   : > { %v6674_v33 = vpop.f32.mrf.mxu0  ;;  %v6867_v0 = vpop.f32.mrf.mxu1 }
 0x71d   : > { %v6999_v49 = vmax.f32 %v6864_v31, 0.0  ;;  %v7074_v9 = vpack.c.bf16 %v6998_v56, %v6994_v41  ;;  %v6868_v42 = vadd.f32 %v6867_v0, %v6674_v33 }
 0x71e   : > { %v6676_v6 = vpop.f32.mrf.mxu0  ;;  %v6869_v16 = vpop.f32.mrf.mxu1 }
 0x71f   : > { %v7075_v17 = vpack.c.bf16 %v6999_v49, %v6995_v7  ;;  %v6870_v34 = vadd.f32 %v6869_v16, %v6676_v6  ;;  %v7002_v58 = vmax.f32 %v6868_v42, 0.0  ;;  %v13926_v49 = vpop.permute.xlu1 %7708  ;;  %v13930_v6 = vpop.permute.xlu0 %7710 }
 0x720   : > { %v6678_v48 = vpop.f32.mrf.mxu0  ;;  %v6871_v51 = vpop.f32.mrf.mxu1 }
 0x721   : > { %v6872_v29 = vadd.f32 %v6871_v51, %v6678_v48  ;;  %7633 = vmatprep.mubr.bf16.mxu1 %v7075_v17  ;;  %v7003_v45 = vmax.f32 %v6870_v34, 0.0 }
 0x722   : > { %v6680_v40 = vpop.f32.mrf.mxu0  ;;  %v6873_v2 = vpop.f32.mrf.mxu1  ;;  %7634 = vmatmul.mubr.bf16.gmra.mxu1 %v7074_v9 }
 0x723   : > { %v6874_v13 = vadd.f32 %v6873_v2, %v6680_v40  ;;  %v7006_v53 = vmax.f32 %v6872_v29, 0.0  ;;  %v13936_v9 = vpop.permute.xlu1 %7712  ;;  %v13940_v51 = vpop.permute.xlu0 %7714 }
 0x724   : > { %v6684_v57 = vpop.f32.mrf.mxu0  ;;  %v6877_v12 = vpop.f32.mrf.mxu1 }
 0x725   : > { %v7007_v63 = vmax.f32 %v6874_v13, 0.0  ;;  %v7078_v10 = vpack.c.bf16 %v7006_v53, %v7002_v58  ;;  %v6878_v23 = vadd.f32 %v6877_v12, %v6684_v57 }
 0x726   : > { %v6686_v3 = vpop.f32.mrf.mxu0  ;;  %v6879_v38 = vpop.f32.mrf.mxu1 }
 0x727   : > { %v7079_v43 = vpack.c.bf16 %v7007_v63, %v7003_v45  ;;  %v6880_v36 = vadd.f32 %v6879_v38, %v6686_v3  ;;  %v7010_v39 = vmax.f32 %v6878_v23, 0.0  ;;  %v13946_v42 = vpop.permute.xlu1 %7716  ;;  %v13950_v2 = vpop.permute.xlu0 %7718 }
 0x728   : > { %v6688_v27 = vpop.f32.mrf.mxu0  ;;  %v6881_v55 = vpop.f32.mrf.mxu1 }
 0x729   : > { %v6882_v32 = vadd.f32 %v6881_v55, %v6688_v27  ;;  %7641 = vmatprep.mubr.bf16.mxu1 %v7079_v43  ;;  %v7011_v46 = vmax.f32 %v6880_v36, 0.0 }
 0x72a   : > { %v6690_v18 = vpop.f32.mrf.mxu0  ;;  %v6883_v24 = vpop.f32.mrf.mxu1  ;;  %7642 = vmatmul.mubr.bf16.gmra.mxu1 %v7078_v10 }
 0x72b   : > { %v6884_v47 = vadd.f32 %v6883_v24, %v6690_v18  ;;  %v7014_v11 = vmax.f32 %v6882_v32, 0.0  ;;  %v13956_v57 = vpop.permute.xlu1 %7720  ;;  %v13960_v45 = vpop.permute.xlu0 %7722 }
 0x72c   : > { %v6694_v20 = vpop.f32.mrf.mxu0  ;;  %v6887_v61 = vpop.f32.mrf.mxu1 }
 0x72d   : > { %v7015_v30 = vmax.f32 %v6884_v47, 0.0  ;;  %v7082_v21 = vpack.c.bf16 %v7014_v11, %v7010_v39  ;;  %v6888_v50 = vadd.f32 %v6887_v61, %v6694_v20 }
 0x72e   : > { %v6696_v62 = vpop.f32.mrf.mxu0  ;;  %v6889_v26 = vpop.f32.mrf.mxu1 }
 0x72f   : > { %v7083_v28 = vpack.c.bf16 %v7015_v30, %v7011_v46  ;;  %v6890_v54 = vadd.f32 %v6889_v26, %v6696_v62  ;;  %v7018_v31 = vmax.f32 %v6888_v50, 0.0  ;;  %v13966_v3 = vpop.permute.xlu1 %7724  ;;  %v13970_v43 = vpop.permute.xlu0 %7726 }
 0x730   : > { %v6698_v5 = vpop.f32.mrf.mxu0  ;;  %v6891_v14 = vpop.f32.mrf.mxu1 }
 0x731   : > { %v6892_v4 = vadd.f32 %v6891_v14, %v6698_v5  ;;  %7649 = vmatprep.mubr.bf16.mxu1 %v7083_v28  ;;  %v7019_v59 = vmax.f32 %v6890_v54, 0.0 }
 0x732   : > { %v6700_v60 = vpop.f32.mrf.mxu0  ;;  %v6893_v44 = vpop.f32.mrf.mxu1  ;;  %7650 = vmatmul.mubr.bf16.gmra.mxu1 %v7082_v21 }
 0x733   : > { %v6894_v1 = vadd.f32 %v6893_v44, %v6700_v60  ;;  %v7022_v25 = vmax.f32 %v6892_v4, 0.0  ;;  %v13976_v55 = vpop.permute.xlu1 %7728  ;;  %v13980_v32 = vpop.permute.xlu0 %7730 }
 0x734   : > { %v13918_v37 = vpop.f32.mrf.mxu0 }
 0x735   : > { %v7023_v52 = vmax.f32 %v6894_v1, 0.0  ;;  %v7086_v0 = vpack.c.bf16 %v7022_v25, %v7018_v31 }
 0x736   : > { %v13922_v56 = vpop.f32.mrf.mxu0 }
 0x737   : > { %v7087_v33 = vpack.c.bf16 %v7023_v52, %v7019_v59  ;;  %v13986_v24 = vpop.permute.xlu1 %7732  ;;  %v13990_v11 = vpop.permute.xlu0 %7734 }
 0x738   : > { %v13924_v7 = vpop.f32.mrf.mxu0  ;;  %14936 = vst [vmem:[#allocation52_spill] sm:$0xff] %v13990_v11 }
 0x739   : > { %7657 = vmatprep.mubr.bf16.mxu1 %v7087_v33 }
 0x73a   : > { %v13928_v41 = vpop.f32.mrf.mxu0  ;;  %7658 = vmatmul.mubr.bf16.gmra.mxu1 %v7086_v0 }
 0x73b   : > { %v13996_v46 = vpop.permute.xlu1 %7736  ;;  %v14000_v39 = vpop.permute.xlu0 %7738 }
 0x73c   : > { %v13932_v16 = vpop.f32.mrf.mxu0  ;;  %14937 = vst [vmem:[#allocation57_spill] sm:$0xff] %v13996_v46  ;;  %14938 = vst [vmem:[#allocation58_spill] sm:$0xff] %v14000_v39 }
 0x73e   : > { %v13934_v17 = vpop.f32.mrf.mxu0 }
 0x73f   : > { %v14004_v26 = vpop.permute.xlu1 %7740  ;;  %v14008_v21 = vpop.permute.xlu0 %7742 }
 0x740   : > { %v13938_v48 = vpop.f32.mrf.mxu0  ;;  %14939 = vst [vmem:[#allocation61_spill] sm:$0xff] %v14004_v26  ;;  %14940 = vst [vmem:[#allocation62_spill] sm:$0xff] %v14008_v21 }
 0x742   : > { %v13942_v34 = vpop.f32.mrf.mxu0 }
 0x743   : > { %v14012_v14 = vpop.permute.xlu1 %7744  ;;  %v14014_v54 = vpop.permute.xlu0 %7746 }
 0x744   : > { %v13944_v29 = vpop.f32.mrf.mxu0  ;;  %14941 = vst [vmem:[#allocation63_spill] sm:$0xff] %v14012_v14  ;;  %14942 = vst [vmem:[#allocation64_spill] sm:$0xff] %v14014_v54 }
 0x746   : > { %v13948_v40 = vpop.f32.mrf.mxu0 }
 0x747   : > { %v14018_v50 = vpop.permute.xlu1 %7748  ;;  %v14022_v44 = vpop.permute.xlu0 %7750 }
 0x748   : > { %v13952_v13 = vpop.f32.mrf.mxu0  ;;  %14943 = vst [vmem:[#allocation59_spill] sm:$0xff] %v14018_v50  ;;  %14944 = vst [vmem:[#allocation60_spill] sm:$0xff] %v14022_v44  ;;  %v8899_v44 = vadd.f32 %v13922_v56, %v13918_v37 }
 0x74a   : > { %v13954_v53 = vpop.f32.mrf.mxu0 }
 0x74b   : > { %v14026_v25 = vpop.permute.xlu1 %7752  ;;  %v14028_v59 = vpop.permute.xlu0 %7754 }
 0x74c   : > { %v13958_v12 = vpop.f32.mrf.mxu0  ;;  %14945 = vst [vmem:[#allocation65_spill] sm:$0xff] %v14026_v25  ;;  %14946 = vst [vmem:[#allocation66_spill] sm:$0xff] %v14028_v59 }
 0x74e   : > { %v13962_v63 = vpop.f32.mrf.mxu0 }
 0x74f   : > { %v14032_v31 = vpop.permute.xlu1 %7756  ;;  %v14036_v54 = vpop.permute.xlu0 %7758 }
 0x750   : > { %v13964_v58 = vpop.f32.mrf.mxu0  ;;  %14947 = vst [vmem:[#allocation69_spill] sm:$0xff] %v14032_v31  ;;  %14948 = vst [vmem:[#allocation70_spill] sm:$0xff] %v14036_v54  ;;  %v8902_v54 = vadd.f32 %v13928_v41, %v13924_v7  ;;  %v8905_v7 = vadd.f32 %v13934_v17, %v13932_v16 }
 0x752   : > { %v13968_v38 = vpop.f32.mrf.mxu0 }
 0x753   : > { %v14045_v25 = vpop.permute.xlu1 %7760  ;;  %v7827_v39 = vpop.permute.xlu0 %7826 }
 0x754   : > { %v13972_v10 = vpop.f32.mrf.mxu0  ;;  %14949 = vst [vmem:[#allocation71_spill] sm:$0xff] %v14045_v25 }
 0x756   : > { %v13974_v27 = vpop.f32.mrf.mxu0 }
 0x758   : > { %v13978_v36 = vpop.f32.mrf.mxu0 }
 0x75a   : > { %v13982_v23 = vpop.f32.mrf.mxu0 }
 0x75c   : > { %v13984_v18 = vpop.f32.mrf.mxu0 }
 0x75e   : > { %v13988_v47 = vpop.f32.mrf.mxu0 }
 0x760   : > { %v13992_v20 = vpop.f32.mrf.mxu0 }
 0x762   : > { %v13994_v61 = vpop.f32.mrf.mxu0 }
 0x764   : > { %v13998_v30 = vpop.f32.mrf.mxu0 }
 0x766   : > { %v14002_v62 = vpop.f32.mrf.mxu0 }
 0x768   : > { %v14006_v28 = vpop.f32.mrf.mxu0 }
 0x76a   : > { %v14010_v5 = vpop.f32.mrf.mxu0 }
 0x76c   : > { %v14016_v4 = vpop.f32.mrf.mxu0 }
 0x76e   : > { %v14020_v60 = vpop.f32.mrf.mxu0 }
 0x770   : > { %v14024_v1 = vpop.f32.mrf.mxu0 }
 0x772   : > { %v14030_v52 = vpop.f32.mrf.mxu0 }
 0x774   : > { %v14034_v33 = vpop.f32.mrf.mxu0 }
 0x776   : > { %v14041_v21 = vpop.f32.mrf.mxu0 }
 0x778   : > { %v14051_v56 = vpop.f32.mrf.mxu0 }
 0x782   : > { %v9009_v0 = vpop.f32.mrf.mxu1 }
 0x784   : > { %v9010_v50 = vpop.f32.mrf.mxu1 }
 0x785   : > { %v9011_v14 = vadd.f32 %v9010_v50, %v9009_v0 }
 0x786   : > { %v9012_v59 = vpop.f32.mrf.mxu1 }
 0x787   : > { %v7540_v26 = vadd.f32 %v9011_v14, %v8899_v44  ;;  %v7829_v44 = vpop.permute.xlu1 %7828 }
 0x788   : > { %v9013_v31 = vpop.f32.mrf.mxu1 }
 0x789   : > { %v7922_v46 = vsel %vm1433_vm2, %v7540_v26, %v13910_v19  ;;  %v9014_v37 = vadd.f32 %v9013_v31, %v9012_v59  ;;  %v14062_v26 = vpop.f32.mrf.mxu0  ;;  %v7831_v31 = vpop.permute.xlu0 %7830 }
 0x78a   : > { %v7955_v50 = vsel %vm7954_vm3, %v7922_v46, %v7827_v39  ;;  %v9015_v0 = vpop.f32.mrf.mxu1 }
 0x78b   : > { %v7988_v11 = vsel %vm7987_vm4, %v7955_v50, 0.0  ;;  %v7543_v25 = vadd.f32 %v9014_v37, %v8902_v54  ;;  %v8908_v37 = vadd.f32 %v13942_v34, %v13938_v48  ;;  %v14071_v17 = vpop.f32.mrf.mxu0 }
 0x78c   : > { %8020 = vst [vmem:[%s14055_s20] sm:$0xff] %v7988_v11  ;;  %v9016_v14 = vpop.f32.mrf.mxu1 }
 0x78d   : > { %v7923_v19 = vsel %vm1433_vm2, %v7543_v25, %v13912_v35  ;;  %v9017_v41 = vadd.f32 %v9016_v14, %v9015_v0  ;;  %v14080_v34 = vpop.f32.mrf.mxu0 }
 0x78e   : > { %v7956_v46 = vsel %vm7954_vm3, %v7923_v19, %v7829_v44  ;;  %v9018_v39 = vpop.f32.mrf.mxu1  ;;  %v8911_v19 = vadd.f32 %v13948_v40, %v13944_v29 }
 0x78f   : > { %v7989_v54 = vsel %vm7987_vm4, %v7956_v46, 0.0  ;;  %v7548_v59 = vadd.f32 %v9017_v41, %v8905_v7  ;;  %v7833_v7 = vpop.permute.xlu1 %7832  ;;  %v14089_v40 = vpop.f32.mrf.mxu0 }
 0x790   : > { %8021 = vst [vmem:[%s14055_s20 + $0x8] sm:$0xff] %v7989_v54  ;;  %v9019_v11 = vpop.f32.mrf.mxu1 }
 0x791   : > { %v7924_v16 = vsel %vm1433_vm2, %v7548_v59, %v13914_v22  ;;  %v9020_v35 = vadd.f32 %v9019_v11, %v9018_v39  ;;  %v7835_v11 = vpop.permute.xlu0 %7834 }
 0x792   : > { %v7957_v25 = vsel %vm7954_vm3, %v7924_v16, %v7831_v31  ;;  %v9021_v50 = vpop.f32.mrf.mxu1  ;;  %v8914_v31 = vadd.f32 %v13954_v53, %v13952_v13  ;;  %v14098_v53 = vpop.f32.mrf.mxu0 }
 0x793   : > { %v7990_v0 = vsel %vm7987_vm4, %v7957_v25, 0.0  ;;  %v7551_v14 = vadd.f32 %v9020_v35, %v8908_v37 }
 0x794   : > { %8022 = vst [vmem:[%s14055_s20 + $0x10] sm:$0xff] %v7990_v0  ;;  %v9022_v44 = vpop.f32.mrf.mxu1  ;;  %v7837_v0 = vpop.permute.xlu1 %7836 }
 0x795   : > { %v7925_v48 = vsel %vm1433_vm2, %v7551_v14, %v13916_v15  ;;  %v9023_v22 = vadd.f32 %v9022_v44, %v9021_v50  ;;  %v8917_v14 = vadd.f32 %v13962_v63, %v13958_v12  ;;  %v14107_v63 = vpop.f32.mrf.mxu0 }
 0x796   : > { %v7958_v41 = vsel %vm7954_vm3, %v7925_v48, %v7833_v7  ;;  %v9024_v46 = vpop.f32.mrf.mxu1 }
 0x797   : > { %v7991_v39 = vsel %vm7987_vm4, %v7958_v41, 0.0  ;;  %v7556_v54 = vadd.f32 %v9023_v22, %v8911_v19  ;;  %v7839_v41 = vpop.permute.xlu0 %7838 }
 0x798   : > { %8023 = vst [vmem:[%s14055_s20 + $0x18] sm:$0xff] %v7991_v39  ;;  %v9025_v59 = vpop.f32.mrf.mxu1 }
 0x799   : > { %v7926_v29 = vsel %vm1433_vm2, %v7556_v54, %v13920_v8  ;;  %v9026_v15 = vadd.f32 %v9025_v59, %v9024_v46  ;;  %v8920_v46 = vadd.f32 %v13968_v38, %v13964_v58  ;;  %v14116_v38 = vpop.f32.mrf.mxu0 }
 0x79a   : > { %v7959_v37 = vsel %vm7954_vm3, %v7926_v29, %v7835_v11  ;;  %v9027_v16 = vpop.f32.mrf.mxu1  ;;  %v7841_v29 = vpop.permute.xlu1 %7840 }
 0x79b   : > { %v7992_v35 = vsel %vm7987_vm4, %v7959_v37, 0.0  ;;  %v7559_v25 = vadd.f32 %v9026_v15, %v8914_v31  ;;  %v8923_v15 = vadd.f32 %v13974_v27, %v13972_v10  ;;  %v14125_v27 = vpop.f32.mrf.mxu0 }
 0x79c   : > { %8024 = vst [vmem:[%s14055_s20 + $0x20] sm:$0xff] %v7992_v35  ;;  %v9028_v50 = vpop.f32.mrf.mxu1 }
 0x79d   : > { %v7927_v13 = vsel %vm1433_vm2, %v7559_v25, %v13926_v49  ;;  %v9029_v8 = vadd.f32 %v9028_v50, %v9027_v16 }
 0x79e   : > { %v7960_v44 = vsel %vm7954_vm3, %v7927_v13, %v7837_v0  ;;  %v9030_v7 = vpop.f32.mrf.mxu1  ;;  %v7843_v0 = vpop.permute.xlu0 %7842 }
 0x79f   : > { %v7993_v19 = vsel %vm7987_vm4, %v7960_v44, 0.0  ;;  %v7564_v48 = vadd.f32 %v9029_v8, %v8917_v14  ;;  %v8926_v14 = vadd.f32 %v13982_v23, %v13978_v36  ;;  %v14134_v23 = vpop.f32.mrf.mxu0 }
 0x7a0   : > { %8025 = vst [vmem:[%s14055_s20 + $0x28] sm:$0xff] %v7993_v19  ;;  %v9031_v22 = vpop.f32.mrf.mxu1 }
 0x7a1   : > { %v7928_v12 = vsel %vm1433_vm2, %v7564_v48, %v13930_v6  ;;  %v9032_v49 = vadd.f32 %v9031_v22, %v9030_v7  ;;  %v7845_v48 = vpop.permute.xlu1 %7844  ;;  %v8929_v22 = vadd.f32 %v13988_v47, %v13984_v18  ;;  %v14143_v47 = vpop.f32.mrf.mxu0 }
 0x7a2   : > { %v7961_v39 = vsel %vm7954_vm3, %v7928_v12, %v7839_v41  ;;  %v9033_v54 = vpop.f32.mrf.mxu1 }
 0x7a3   : > { %v7994_v59 = vsel %vm7987_vm4, %v7961_v39, 0.0  ;;  %v7567_v11 = vadd.f32 %v9032_v49, %v8920_v46 }
 0x7a4   : > { %8026 = vst [vmem:[%s14055_s20 + $0x30] sm:$0xff] %v7994_v59  ;;  %v9034_v31 = vpop.f32.mrf.mxu1  ;;  %v8932_v59 = vadd.f32 %v13994_v61, %v13992_v20  ;;  %v14152_v61 = vpop.f32.mrf.mxu0 }
 0x7a5   : > { %v7929_v58 = vsel %vm1433_vm2, %v7567_v11, %v13936_v9  ;;  %v9035_v6 = vadd.f32 %v9034_v31, %v9033_v54  ;;  %v7847_v54 = vpop.permute.xlu0 %7846 }
 0x7a6   : > { %v7962_v37 = vsel %vm7954_vm3, %v7929_v58, %v7841_v29  ;;  %v9036_v16 = vpop.f32.mrf.mxu1 }
 0x7a7   : > { %v7995_v35 = vsel %vm7987_vm4, %v7962_v37, 0.0  ;;  %v7572_v25 = vadd.f32 %v9035_v6, %v8923_v15  ;;  %v7849_v6 = vpop.permute.xlu1 %7848  ;;  %v8935_v37 = vadd.f32 %v14002_v62, %v13998_v30  ;;  %v14161_v62 = vpop.f32.mrf.mxu0 }
 0x7a8   : > { %8027 = vst [vmem:[%s14055_s20 + $0x38] sm:$0xff] %v7995_v35  ;;  %v9037_v50 = vpop.f32.mrf.mxu1 }
 0x7a9   : > { %v7930_v10 = vsel %vm1433_vm2, %v7572_v25, %v13940_v51  ;;  %v9038_v9 = vadd.f32 %v9037_v50, %v9036_v16 }
 0x7aa   : > { %v7963_v13 = vsel %vm7954_vm3, %v7930_v10, %v7843_v0  ;;  %v9039_v8 = vpop.f32.mrf.mxu1  ;;  %v8938_v10 = vadd.f32 %v14010_v5, %v14006_v28  ;;  %v14170_v5 = vpop.f32.mrf.mxu0 }
 0x7ab   : > { %v7996_v44 = vsel %vm7987_vm4, %v7963_v13, 0.0  ;;  %v7575_v7 = vadd.f32 %v9038_v9, %v8926_v14  ;;  %v7851_v14 = vpop.permute.xlu0 %7850 }
 0x7ac   : > { %8028 = vst [vmem:[%s14055_s20 + $0x40] sm:$0xff] %v7996_v44  ;;  %v9040_v19 = vpop.f32.mrf.mxu1 }
 0x7ad   : > { %v7931_v36 = vsel %vm1433_vm2, %v7575_v7, %v13946_v42  ;;  %v9041_v51 = vadd.f32 %v9040_v19, %v9039_v8  ;;  %v7853_v19 = vpop.permute.xlu1 %7852 }
 0x7ae   : > { %v7964_v41 = vsel %vm7954_vm3, %v7931_v36, %v7845_v48  ;;  %v9042_v46 = vpop.f32.mrf.mxu1  ;;  %v8941_v48 = vadd.f32 %v14020_v60, %v14016_v4  ;;  %v14179_v60 = vpop.f32.mrf.mxu0 }
 0x7af   : > { %v7997_v12 = vsel %vm7987_vm4, %v7964_v41, 0.0  ;;  %v7580_v49 = vadd.f32 %v9041_v51, %v8929_v22 }
 0x7b0   : > { %8029 = vst [vmem:[%s14055_s20 + $0x48] sm:$0xff] %v7997_v12  ;;  %v9043_v39 = vpop.f32.mrf.mxu1  ;;  %v7855_v12 = vpop.permute.xlu0 %7854 }
 0x7b1   : > { %v7932_v18 = vsel %vm1433_vm2, %v7580_v49, %v13950_v2  ;;  %v9044_v42 = vadd.f32 %v9043_v39, %v9042_v46  ;;  %v8944_v49 = vadd.f32 %v14030_v52, %v14024_v1  ;;  %v14188_v52 = vpop.f32.mrf.mxu0 }
 0x7b2   : > { %v7965_v11 = vsel %vm7954_vm3, %v7932_v18, %v7847_v54  ;;  %v9045_v31 = vpop.f32.mrf.mxu1 }
 0x7b3   : > { %v7998_v29 = vsel %vm7987_vm4, %v7965_v11, 0.0  ;;  %v7583_v15 = vadd.f32 %v9044_v42, %v8932_v59  ;;  %v7857_v11 = vpop.permute.xlu1 %7856 }
 0x7b4   : > { %8030 = vst [vmem:[%s14055_s20 + $0x50] sm:$0xff] %v7998_v29  ;;  %v9046_v58 = vpop.f32.mrf.mxu1 }
 0x7b5   : > { %v7933_v20 = vsel %vm1433_vm2, %v7583_v15, %v13956_v57  ;;  %v9047_v2 = vadd.f32 %v9046_v58, %v9045_v31  ;;  %v8947_v31 = vadd.f32 %v14041_v21, %v14034_v33  ;;  %v14197_v33 = vpop.f32.mrf.mxu0 }
 0x7b6   : > { %v7966_v16 = vsel %vm7954_vm3, %v7933_v20, %v7849_v6  ;;  %v9048_v35 = vpop.f32.mrf.mxu1  ;;  %v7859_v20 = vpop.permute.xlu0 %7858 }
 0x7b7   : > { %v7999_v25 = vsel %vm7987_vm4, %v7966_v16, 0.0  ;;  %v7588_v50 = vadd.f32 %v9047_v2, %v8935_v37  ;;  %v8950_v2 = vadd.f32 %v14062_v26, %v14051_v56  ;;  %v14206_v26 = vpop.f32.mrf.mxu0 }
 0x7b8   : > { %8031 = vst [vmem:[%s14055_s20 + $0x58] sm:$0xff] %v7999_v25  ;;  %v9049_v0 = vpop.f32.mrf.mxu1 }
 0x7b9   : > { %v7934_v30 = vsel %vm1433_vm2, %v7588_v50, %v13960_v45  ;;  %v9050_v57 = vadd.f32 %v9049_v0, %v9048_v35 }
 0x7ba   : > { %v7967_v9 = vsel %vm7954_vm3, %v7934_v30, %v7851_v14  ;;  %v9051_v13 = vpop.f32.mrf.mxu1  ;;  %v7861_v14 = vpop.permute.xlu1 %7860 }
 0x7bb   : > { %v8000_v8 = vsel %vm7987_vm4, %v7967_v9, 0.0  ;;  %v7591_v44 = vadd.f32 %v9050_v57, %v8938_v10  ;;  %v8953_v10 = vadd.f32 %v14080_v34, %v14071_v17  ;;  %v14950_v17 = vld [vmem:[#allocation52_spill] sm:$0xff] }
 0x7bc   : > { %8032 = vst [vmem:[%s14055_s20 + $0x60] sm:$0xff] %v8000_v8  ;;  %v9052_v7 = vpop.f32.mrf.mxu1 }
 0x7bd   : > { %v7935_v28 = vsel %vm1433_vm2, %v7591_v44, %v13966_v3  ;;  %v9053_v45 = vadd.f32 %v9052_v7, %v9051_v13  ;;  %v7863_v44 = vpop.permute.xlu0 %7862  ;;  %v8956_v7 = vadd.f32 %v14098_v53, %v14089_v40  ;;  %v14951_v40 = vld [vmem:[#allocation57_spill] sm:$0xff] }
 0x7be   : > { %v7968_v22 = vsel %vm7954_vm3, %v7935_v28, %v7853_v19  ;;  %v9054_v36 = vpop.f32.mrf.mxu1  ;;  %v14215_v19 = vpop.f32.mrf.mxu0 }
 0x7bf   : > { %v8001_v51 = vsel %vm7987_vm4, %v7968_v22, 0.0  ;;  %v7596_v41 = vadd.f32 %v9053_v45, %v8941_v48 }
 0x7c0   : > { %8033 = vst [vmem:[%s14055_s20 + $0x68] sm:$0xff] %v8001_v51  ;;  %v9055_v46 = vpop.f32.mrf.mxu1  ;;  %v7865_v51 = vpop.permute.xlu1 %7864 }
 0x7c1   : > { %v7936_v4 = vsel %vm1433_vm2, %v7596_v41, %v13970_v43  ;;  %v9056_v3 = vadd.f32 %v9055_v46, %v9054_v36  ;;  %v8959_v41 = vadd.f32 %v14116_v38, %v14107_v63  ;;  %v14952_v63 = vld [vmem:[#allocation58_spill] sm:$0xff] }
 0x7c2   : > { %v7969_v39 = vsel %vm7954_vm3, %v7936_v4, %v7855_v12  ;;  %v9057_v54 = vpop.f32.mrf.mxu1  ;;  %v14224_v12 = vpop.f32.mrf.mxu0 }
 0x7c3   : > { %v8002_v59 = vsel %vm7987_vm4, %v7969_v39, 0.0  ;;  %v7599_v18 = vadd.f32 %v9056_v3, %v8944_v49 }
 0x7c4   : > { %8034 = vst [vmem:[%s14055_s20 + $0x70] sm:$0xff] %v8002_v59  ;;  %v9058_v42 = vpop.f32.mrf.mxu1  ;;  %v7867_v59 = vpop.permute.xlu0 %7866 }
 0x7c5   : > { %v7937_v1 = vsel %vm1433_vm2, %v7599_v18, %v13976_v55  ;;  %v9059_v43 = vadd.f32 %v9058_v42, %v9057_v54  ;;  %v8962_v18 = vadd.f32 %v14134_v23, %v14125_v27  ;;  %v14953_v27 = vld [vmem:[#allocation61_spill] sm:$0xff] }
 0x7c6   : > { %v7970_v29 = vsel %vm7954_vm3, %v7937_v1, %v7857_v11  ;;  %v9060_v15 = vpop.f32.mrf.mxu1  ;;  %v14233_v11 = vpop.f32.mrf.mxu0 }
 0x7c7   : > { %v8003_v58 = vsel %vm7987_vm4, %v7970_v29, 0.0  ;;  %v7604_v6 = vadd.f32 %v9059_v43, %v8947_v31 }
 0x7c8   : > { %8035 = vst [vmem:[%s14055_s20 + $0x78] sm:$0xff] %v8003_v58  ;;  %v9061_v37 = vpop.f32.mrf.mxu1  ;;  %v7869_v58 = vpop.permute.xlu1 %7868 }
 0x7c9   : > { %v7938_v21 = vsel %vm1433_vm2, %v7604_v6, %v13980_v32  ;;  %v9062_v55 = vadd.f32 %v9061_v37, %v9060_v15  ;;  %v8965_v6 = vadd.f32 %v14152_v61, %v14143_v47 }
 0x7ca   : > { %v7971_v16 = vsel %vm7954_vm3, %v7938_v21, %v7859_v20  ;;  %v9063_v35 = vpop.f32.mrf.mxu1  ;;  %v8979_v20 = vpop.f32.mrf.mxu0 }
 0x7cb   : > { %v8004_v25 = vsel %vm7987_vm4, %v7971_v16, 0.0  ;;  %v7607_v50 = vadd.f32 %v9062_v55, %v8950_v2 }
 0x7cc   : > { %8036 = vst [vmem:[%s14055_s20 + $0x80] sm:$0xff] %v8004_v25  ;;  %v9064_v0 = vpop.f32.mrf.mxu1  ;;  %v7871_v25 = vpop.permute.xlu0 %7870 }
 0x7cd   : > { %v7939_v56 = vsel %vm1433_vm2, %v7607_v50, %v13986_v24  ;;  %v9065_v32 = vadd.f32 %v9064_v0, %v9063_v35  ;;  %v8968_v50 = vadd.f32 %v14170_v5, %v14161_v62  ;;  %v14954_v0 = vld [vmem:[#allocation62_spill] sm:$0xff] }
 0x7ce   : > { %v7972_v30 = vsel %vm7954_vm3, %v7939_v56, %v7861_v14  ;;  %v9066_v57 = vpop.f32.mrf.mxu1  ;;  %v8981_v14 = vpop.f32.mrf.mxu0 }
 0x7cf   : > { %v8005_v9 = vsel %vm7987_vm4, %v7972_v30, 0.0  ;;  %v7612_v13 = vadd.f32 %v9065_v32, %v8953_v10 }
 0x7d0   : > { %8037 = vst [vmem:[%s14055_s20 + $0x88] sm:$0xff] %v8005_v9  ;;  %v9067_v8 = vpop.f32.mrf.mxu1  ;;  %v7873_v9 = vpop.permute.xlu1 %7872 }
 0x7d1   : > { %v7940_v34 = vsel %vm1433_vm2, %v7612_v13, %v14950_v17  ;;  %v9068_v24 = vadd.f32 %v9067_v8, %v9066_v57  ;;  %v8971_v13 = vadd.f32 %v14188_v52, %v14179_v60  ;;  %v14955_v8 = vld [vmem:[#allocation63_spill] sm:$0xff] }
 0x7d2   : > { %v7973_v48 = vsel %vm7954_vm3, %v7940_v34, %v7863_v44  ;;  %v9069_v28 = vpop.f32.mrf.mxu1  ;;  %v8982_v44 = vpop.f32.mrf.mxu0 }
 0x7d3   : > { %v8006_v45 = vsel %vm7987_vm4, %v7973_v48, 0.0  ;;  %v7615_v22 = vadd.f32 %v9068_v24, %v8956_v7 }
 0x7d4   : > { %8038 = vst [vmem:[%s14055_s20 + $0x90] sm:$0xff] %v8006_v45  ;;  %v9070_v36 = vpop.f32.mrf.mxu1  ;;  %v8974_v45 = vadd.f32 %v14206_v26, %v14197_v33 }
 0x7d5   : > { %v7941_v53 = vsel %vm1433_vm2, %v7615_v22, %v14951_v40  ;;  %v9071_v46 = vadd.f32 %v9070_v36, %v9069_v28  ;;  %v7875_v28 = vpop.permute.xlu0 %7874  ;;  %v14956_v22 = vld [vmem:[#allocation64_spill] sm:$0xff]  ;;  %v8984_v36 = vpop.f32.mrf.mxu0 }
 0x7d6   : > { %v7974_v49 = vsel %vm7954_vm3, %v7941_v53, %v7865_v51  ;;  %v9072_v4 = vpop.f32.mrf.mxu1 }
 0x7d7   : > { %v8007_v3 = vsel %vm7987_vm4, %v7974_v49, 0.0  ;;  %v7620_v39 = vadd.f32 %v9071_v46, %v8959_v41  ;;  %v7877_v49 = vpop.permute.xlu1 %7876 }
 0x7d8   : > { %8039 = vst [vmem:[%s14055_s20 + $0x98] sm:$0xff] %v8007_v3  ;;  %v9073_v54 = vpop.f32.mrf.mxu1  ;;  %v14957_v3 = vld [vmem:[#allocation59_spill] sm:$0xff] }
 0x7d9   : > { %v7942_v38 = vsel %vm1433_vm2, %v7620_v39, %v14952_v63  ;;  %v9074_v42 = vadd.f32 %v9073_v54, %v9072_v4  ;;  %v8977_v4 = vadd.f32 %v14224_v12, %v14215_v19  ;;  %v8985_v39 = vpop.f32.mrf.mxu0 }
 0x7da   : > { %v7975_v31 = vsel %vm7954_vm3, %v7942_v38, %v7867_v59  ;;  %v9075_v1 = vpop.f32.mrf.mxu1 }
 0x7db   : > { %v8008_v43 = vsel %vm7987_vm4, %v7975_v31, 0.0  ;;  %v7623_v29 = vadd.f32 %v9074_v42, %v8962_v18  ;;  %v7879_v42 = vpop.permute.xlu0 %7878  ;;  %v8980_v31 = vadd.f32 %v8979_v20, %v14233_v11 }
 0x7dc   : > { %8040 = vst [vmem:[%s14055_s20 + $0xa0] sm:$0xff] %v8008_v43  ;;  %v9076_v15 = vpop.f32.mrf.mxu1  ;;  %v8987_v43 = vpop.f32.mrf.mxu0 }
 0x7dd   : > { %v7943_v23 = vsel %vm1433_vm2, %v7623_v29, %v14953_v27  ;;  %v9077_v37 = vadd.f32 %v9076_v15, %v9075_v1  ;;  %v14958_v1 = vld [vmem:[#allocation60_spill] sm:$0xff] }
 0x7de   : > { %v7976_v2 = vsel %vm7954_vm3, %v7943_v23, %v7869_v58  ;;  %v9078_v21 = vpop.f32.mrf.mxu1  ;;  %v7881_v23 = vpop.permute.xlu1 %7880 }
 0x7df   : > { %v8009_v55 = vsel %vm7987_vm4, %v7976_v2, 0.0  ;;  %v7628_v16 = vadd.f32 %v9077_v37, %v8965_v6  ;;  %v8983_v37 = vadd.f32 %v8982_v44, %v8981_v14  ;;  %v14959_v2 = vld [vmem:[#allocation65_spill] sm:$0xff]  ;;  %v8988_v20 = vpop.f32.mrf.mxu0 }
 0x7e0   : > { %8041 = vst [vmem:[%s14055_s20 + $0xa8] sm:$0xff] %v8009_v55  ;;  %v9079_v35 = vpop.f32.mrf.mxu1 }
 0x7e1   : > { %v7944_v47 = vsel %vm1433_vm2, %v7628_v16, %v14954_v0  ;;  %v9080_v61 = vadd.f32 %v9079_v35, %v9078_v21  ;;  %v7883_v0 = vpop.permute.xlu0 %7882 }
 0x7e2   : > { %v7977_v10 = vsel %vm7954_vm3, %v7944_v47, %v7871_v25  ;;  %v9081_v56 = vpop.f32.mrf.mxu1  ;;  %v8986_v47 = vadd.f32 %v8985_v39, %v8984_v36 }
 0x7e3   : > { %v8010_v32 = vsel %vm7987_vm4, %v7977_v10, 0.0  ;;  %v7631_v30 = vadd.f32 %v9080_v61, %v8968_v50  ;;  %v14960_v61 = vld [vmem:[#allocation66_spill] sm:$0xff] }
 0x7e4   : > { %8042 = vst [vmem:[%s14055_s20 + $0xb0] sm:$0xff] %v8010_v32  ;;  %v9082_v57 = vpop.f32.mrf.mxu1 }
 0x7e5   : > { %v7945_v62 = vsel %vm1433_vm2, %v7631_v30, %v14955_v8  ;;  %v9083_v5 = vadd.f32 %v9082_v57, %v9081_v56  ;;  %v8990_v56 = vpop.f32.mrf.mxu0  ;;  %v7885_v8 = vpop.permute.xlu1 %7884 }
 0x7e6   : > { %v7978_v7 = vsel %vm7954_vm3, %v7945_v62, %v7873_v9  ;;  %v9084_v17 = vpop.f32.mrf.mxu1  ;;  %v8989_v62 = vadd.f32 %v8988_v20, %v8987_v43 }
 0x7e7   : > { %v8011_v34 = vsel %vm7987_vm4, %v7978_v7, 0.0  ;;  %v7636_v24 = vadd.f32 %v9083_v5, %v8971_v13  ;;  %v14961_v5 = vld [vmem:[#allocation69_spill] sm:$0xff] }
 0x7e8   : > { %8043 = vst [vmem:[%s14055_s20 + $0xb8] sm:$0xff] %v8011_v34  ;;  %v9085_v48 = vpop.f32.mrf.mxu1 }
 0x7e9   : > { %v7946_v60 = vsel %vm1433_vm2, %v7636_v24, %v14956_v22  ;;  %v9086_v52 = vadd.f32 %v9085_v48, %v9084_v17  ;;  %v8991_v17 = vpop.f32.mrf.mxu0  ;;  %v7887_v22 = vpop.permute.xlu0 %7886 }
 0x7ea   : > { %v7979_v51 = vsel %vm7954_vm3, %v7946_v60, %v7875_v28  ;;  %v9087_v41 = vpop.f32.mrf.mxu1  ;;  %v8992_v60 = vadd.f32 %v8991_v17, %v8990_v56 }
 0x7eb   : > { %v8012_v40 = vsel %vm7987_vm4, %v7979_v51, 0.0  ;;  %v7639_v53 = vadd.f32 %v9086_v52, %v8974_v45  ;;  %v14962_v52 = vld [vmem:[#allocation70_spill] sm:$0xff] }
 0x7ec   : > { %8044 = vst [vmem:[%s14055_s20 + $0xc0] sm:$0xff] %v8012_v40  ;;  %v9088_v46 = vpop.f32.mrf.mxu1 }
 0x7ed   : > { %v7947_v33 = vsel %vm1433_vm2, %v7639_v53, %v14957_v3  ;;  %v9089_v26 = vadd.f32 %v9088_v46, %v9087_v41  ;;  %v7889_v46 = vpop.permute.xlu1 %7888 }
 0x7ee   : > { %v7980_v54 = vsel %vm7954_vm3, %v7947_v33, %v7877_v49  ;;  %v9090_v59 = vpop.f32.mrf.mxu1  ;;  %v14963_v49 = vld [vmem:[#allocation71_spill] sm:$0xff] }
 0x7ef   : > { %v8013_v18 = vsel %vm7987_vm4, %v7980_v54, 0.0  ;;  %v7644_v63 = vadd.f32 %v9089_v26, %v8977_v4 }
 0x7f0   : > { %8045 = vst [vmem:[%s14055_s20 + $0xc8] sm:$0xff] %v8013_v18  ;;  %v9091_v38 = vpop.f32.mrf.mxu1 }
 0x7f1   : > { %v7948_v19 = vsel %vm1433_vm2, %v7644_v63, %v14958_v1  ;;  %v9092_v12 = vadd.f32 %v9091_v38, %v9090_v59 }
 0x7f2   : > { %v7981_v29 = vsel %vm7954_vm3, %v7948_v19, %v7879_v42  ;;  %v9093_v15 = vpop.f32.mrf.mxu1 }
 0x7f3   : > { %v8014_v58 = vsel %vm7987_vm4, %v7981_v29, 0.0  ;;  %v7647_v6 = vadd.f32 %v9092_v12, %v8980_v31 }
 0x7f4   : > { %8046 = vst [vmem:[%s14055_s20 + $0xd0] sm:$0xff] %v8014_v58  ;;  %v9094_v27 = vpop.f32.mrf.mxu1 }
 0x7f5   : > { %v7949_v21 = vsel %vm1433_vm2, %v7647_v6, %v14959_v2  ;;  %v9095_v11 = vadd.f32 %v9094_v27, %v9093_v15 }
 0x7f6   : > { %v7982_v55 = vsel %vm7954_vm3, %v7949_v21, %v7881_v23  ;;  %v9096_v16 = vpop.f32.mrf.mxu1 }
 0x7f7   : > { %v8015_v35 = vsel %vm7987_vm4, %v7982_v55, 0.0  ;;  %v7652_v25 = vadd.f32 %v9095_v11, %v8983_v37 }
 0x7f8   : > { %8047 = vst [vmem:[%s14055_s20 + $0xd8] sm:$0xff] %v8015_v35  ;;  %v9097_v50 = vpop.f32.mrf.mxu1 }
 0x7f9   : > { %v7950_v10 = vsel %vm1433_vm2, %v7652_v25, %v14960_v61  ;;  %v9098_v14 = vadd.f32 %v9097_v50, %v9096_v16 }
 0x7fa   : > { %v7983_v32 = vsel %vm7954_vm3, %v7950_v10, %v7883_v0  ;;  %v9099_v30 = vpop.f32.mrf.mxu1 }
 0x7fb   : > { %v8016_v57 = vsel %vm7987_vm4, %v7983_v32, 0.0  ;;  %v7655_v9 = vadd.f32 %v9098_v14, %v8986_v47 }
 0x7fc   : > { %8048 = vst [vmem:[%s14055_s20 + $0xe0] sm:$0xff] %v8016_v57  ;;  %v9100_v13 = vpop.f32.mrf.mxu1 }
 0x7fd   : > { %v7951_v44 = vsel %vm1433_vm2, %v7655_v9, %v14961_v5  ;;  %v9101_v7 = vadd.f32 %v9100_v13, %v9099_v30 }
 0x7fe   : > { %v7984_v34 = vsel %vm7954_vm3, %v7951_v44, %v7885_v8  ;;  %v9102_v24 = vpop.f32.mrf.mxu1 }
 0x7ff   : > { %v8017_v48 = vsel %vm7987_vm4, %v7984_v34, 0.0  ;;  %v7660_v28 = vadd.f32 %v9101_v7, %v8989_v62 }
 0x800   : > { %8049 = vst [vmem:[%s14055_s20 + $0xe8] sm:$0xff] %v8017_v48  ;;  %v9103_v45 = vpop.f32.mrf.mxu1 }
 0x801   : > { %v7952_v36 = vsel %vm1433_vm2, %v7660_v28, %v14962_v52  ;;  %v9104_v51 = vadd.f32 %v9103_v45, %v9102_v24 }
 0x802   : > { %v7985_v41 = vsel %vm7954_vm3, %v7952_v36, %v7887_v22 }
 0x803   : > { %v8018_v40 = vsel %vm7987_vm4, %v7985_v41, 0.0  ;;  %v7663_v53 = vadd.f32 %v9104_v51, %v8992_v60 }
 0x804   : > { %8050 = vst [vmem:[%s14055_s20 + $0xf0] sm:$0xff] %v8018_v40 }
 0x805   : > { %v7953_v4 = vsel %vm1433_vm2, %v7663_v53, %v14963_v49 }
 0x806   : > { %v7986_v3 = vsel %vm7954_vm3, %v7953_v4, %v7889_v46 }
 0x807   : > { %v8019_v33 = vsel %vm7987_vm4, %v7986_v3, 0.0 }
 0x808   : > { %8051 = vst [vmem:[%s14055_s20 + $0xf8] sm:$0xff] %v8019_v33 }
 0x809   : > { %9736 = shalt.err (!%p9733_p0)
}
 0x80a   : > { %s9737_s28 = scalar_lea.hbm %s14306_s29, 4096  ;;  %s9741_s20 = scalar_lea.hbm %s14365_s10, 8192 }
 0x80b   : > { %p9738_p1 = scmp.ne.s32.totalorder %s14306_s29, %s9737_s28  ;;  %p9742_p4 = scmp.lt.s32.totalorder %s14306_s29, %s14365_s10 }
 0x80c   : > { %p9743_p7 = scmp.lt.s32.totalorder %s9741_s20, %s9737_s28 }
 0x80d   : > { %p9739_p2 = pnand %p9738_p1, %p9890_p5 }
 0x80e   : > { %p9744_p6 = por %p9743_p7, %p9742_p4 }
 0x80f   : > { %p9740_p3 = pneg %p9739_p2 }
 0x811   : > { %p9745_p8 = pnand %p9744_p6, %p9740_p3 }
 0x813   : > { %9748 = shalt.err (!%p9745_p8)
}
 0x814   : > { %s9795_s4 = smov 128   ;;  %s9796_s30 = smov 8  }
 0x815   : > { %9109 = dma.vmem_to_hbm [thread:$0]  (%p9890_p5), %s14308_s1, 4096, %s14306_s29, %s14315_s17, %s9795_s4, %s9795_s4, %s9796_s30  }
 0x816 PF: > { %p9121_p9 = scmp.ge.s32.totalorder %s9787_s16, 2  ;;  %s8081_s11 = sand.u32 1, %s9775_s13  }
 0x817   : > { %p14964_p10 = scmp.ne.s32.totalorder %s14412_s24, 0  ;;  %s8082_s26 = scalar_lea.sflag [#allocation4], %s8081_s11 }
 0x819   : > { %p9116_p11 = pnand %p9121_p9, %p14964_p10 }
 0x81b   : > { %p9117_p12 = pneg %p9116_p11 }
 0x81d   : > { %9770 = dma.done.wait (%p9117_p12), %s8082_s26, 4096  }
 0x81e   : > { %9772 = vsyncadd (%p9117_p12), %s8082_s26, 4294963200  ;;  %p21_p13 = scmp.ge.s32.totalorder %s9877_s19, 4   ;;  %s14965_s13 = smov %s9779_s14 }
 0x81f   : > { %s14966_s14 = smov %s9783_s15  ;;  %s14967_s15 = smov %s9888_s22 }
 0x820   : > { %s14968_s16 = smov %s9877_s19  ;;  %23 = sbr.rel (!%p21_p13) target bundleno = 7 (0x7), region = 106 }
 0x825   :  { %8087 = vsyncpa [#allocation3], 1 }
 0x826   :  { %8089 = vsyncpa [#allocation3 + $0x1], 1 }
 0x827   :  { %8090 = vsyncpa [#allocation4], 1 }
 0x828   :  { %8092 = vsyncpa [#allocation4 + $0x1], 1 }

</bundles_post_ra>
